<compile_context>
chip_gen: v7x
topology: tpu7x:2x2x1
jax: 0.10.0
libtpu: 0.0.40
codegen_flags: <defaults>
</compile_context>

<pallas_src>
import functools

import jax
import jax.numpy as jnp
import numpy as np
from jax.experimental import pallas as pl
from jax.experimental.pallas import tpu as pltpu


# ---------------------------------------------------------------------------
# Kernel 1: tiled pairwise (negative squared) distance for kNN
#   d[b, i, j] = 2 x_i.x_j - ||x_i||^2 - ||x_j||^2   (matches the torch knn())
# grid = (B, N//TI, N//TJ); each step produces one (TI, TJ) output tile.
# ---------------------------------------------------------------------------
def _pairwise_kernel(xt_ref, x_ref, d_ref):
    xi = xt_ref[0]                                                 # (TI, C)
    xj = x_ref[0]                                                  # (C, TJ)
    gram = jnp.dot(xi, xj, preferred_element_type=jnp.float32)     # (TI, TJ)
    xx_i = jnp.sum(xi * xi, axis=1, keepdims=True)                 # (TI, 1)
    xx_j = jnp.sum(xj * xj, axis=0, keepdims=True)                 # (1, TJ)
    d_ref[0] = 2.0 * gram - xx_i - xx_j


# ---------------------------------------------------------------------------
# Kernel 2: fused DGCNN hot path for one point tile:
#   chained 1x1 convs (channel matmuls, bf16 in / f32 acc) + folded-BN bias +
#   leaky ReLU + max-over-neighbors + fused conv5.
# Feature block layout: (1, k, TILE_N, 2C), rows neighbor-major (row = j*TILE_N + n).
# ---------------------------------------------------------------------------
def _dgcnn_kernel(feat_ref,
                  w1_ref, t1_ref, w2_ref, t2_ref, w3_ref, t3_ref,
                  w4_ref, t4_ref, w5_ref, t5_ref,
                  out_ref, x4_ref, x3_ref,
                  *, tile_n, k):
    compute_dtype = w1_ref.dtype

    def leaky(x, slope):
        # max(x, slope*x): 2 VPU ops, equivalent to leaky ReLU for 0 < slope < 1.
        return jnp.maximum(x, slope * x)

    def max_over_neighbors(h):
        # h: (k*tile_n, C) f32, rows neighbor-major.  Splitting the leading
        # (major) dim is layout-free (tile_n % 8 == 0 in the tiled path), and the
        # reduction is a pure elementwise max across aligned (tile_n, C) slabs.
        h3 = h.reshape(k, tile_n, h.shape[-1])
        m = h3[0]
        for j in range(1, k):
            m = jnp.maximum(m, h3[j])
        return m

    feat = feat_ref[0].reshape(k * tile_n, feat_ref.shape[-1])     # (k*TN, 2C) bf16

    h = jnp.dot(feat, w1_ref[...], preferred_element_type=jnp.float32)
    h = leaky(h + t1_ref[...], 0.2)                                # (k*TN, 64) f32
    x1 = max_over_neighbors(h)                                     # (TN, 64)

    h = jnp.dot(h.astype(compute_dtype), w2_ref[...],
                preferred_element_type=jnp.float32)
    h = leaky(h + t2_ref[...], 0.2)                                # (k*TN, 64)
    x2 = max_over_neighbors(h)                                     # (TN, 64)

    h = jnp.dot(h.astype(compute_dtype), w3_ref[...],
                preferred_element_type=jnp.float32)
    h = leaky(h + t3_ref[...], 0.2)                                # (k*TN, 128)
    x3 = max_over_neighbors(h)                                     # (TN, 128)

    h = jnp.dot(h.astype(compute_dtype), w4_ref[...],
                preferred_element_type=jnp.float32)
    h = leaky(h + t4_ref[...], 0.2)                                # (k*TN, 256)
    x4 = max_over_neighbors(h)                                     # (TN, 256)

    # conv5 as one fused K=512 matmul on the channel concat (cheap lane copy).
    cat = jnp.concatenate([x1, x2, x3, x4], axis=-1).astype(compute_dtype)  # (TN, 512)
    z = jnp.dot(cat, w5_ref[...], preferred_element_type=jnp.float32)
    out = leaky(z + t5_ref[...], 0.01)             # F.leaky_relu_ default slope

    out_ref[0] = out.astype(out_ref.dtype)
    x4_ref[0] = x4.astype(x4_ref.dtype)
    x3_ref[0] = x3.astype(x3_ref.dtype)


# ---------------------------------------------------------------------------
# Parameters (deterministic, synthetic): 1x1-conv weights + eval-mode BatchNorm.
# ---------------------------------------------------------------------------
def init_params(key, emb_dims=512):
    layer_shapes = [(6, 64), (64, 64), (64, 128), (128, 256), (512, emb_dims)]
    eps = 1e-5
    keys = jax.random.split(key, 5 * len(layer_shapes))
    params = {}
    for i, (cin, cout) in enumerate(layer_shapes):
        kw, kg, kb, km, kv = keys[5 * i:5 * i + 5]
        w = jax.random.normal(kw, (cin, cout), jnp.float32) / jnp.sqrt(float(cin))
        gamma = 1.0 + 0.1 * jax.random.normal(kg, (cout,), jnp.float32)
        beta = 0.1 * jax.random.normal(kb, (cout,), jnp.float32)
        mean = 0.1 * jax.random.normal(km, (cout,), jnp.float32)
        var = 1.0 + 0.5 * jax.random.uniform(kv, (cout,), jnp.float32)
        s = gamma / jnp.sqrt(var + eps)
        t = beta - mean * s
        params[f'w{i + 1}'] = w
        params[f's{i + 1}'] = s.reshape(1, cout)
        params[f't{i + 1}'] = t.reshape(1, cout)
    return params


def fold_bn_params(params, compute_dtype=jnp.bfloat16):
    """Fold the BN scale into the conv weight; keep the bias in f32."""
    folded = {}
    for i in range(1, 6):
        w = params[f'w{i}'] * params[f's{i}']              # (Cin,Cout) * (1,Cout)
        folded[f'w{i}'] = w.astype(compute_dtype)
        folded[f't{i}'] = params[f't{i}'].astype(jnp.float32)
    return folded


def _pick_tile(n, preferred=128):
    if n % preferred == 0:
        return preferred
    for t in (64, 32, 16, 8):
        if n % t == 0:
            return t
    # TODO(synk): pad N to a multiple of 8 for ragged point counts.
    return n


# ---------------------------------------------------------------------------
# Wrapper: tiled pairwise kernel + top_k + neighbor gather (XLA glue), then the
# point-tiled fused DGCNN kernel, then transpose back to PyTorch layouts.
# ---------------------------------------------------------------------------
def dgcnn_leaky_forward(x, params, k=10, compute_dtype=jnp.bfloat16):
    # x: (B, num_dims, N) float32  (num_dims must be 3 so that 2*num_dims == 6)
    B, C, N = x.shape
    k = min(k, N)
    folded = fold_bn_params(params, compute_dtype)
    emb = folded['w5'].shape[1]

    xt = jnp.transpose(x, (0, 2, 1))                               # (B, N, C)

    # --- pairwise distances via tiled Pallas kernel ---
    TI = _pick_tile(N)
    d = pl.pallas_call(
        _pairwise_kernel,
        out_shape=jax.ShapeDtypeStruct((B, N, N), jnp.float32),
        grid=(B, N // TI, N // TI),
        in_specs=[pl.BlockSpec((1, TI, C), lambda b, i, j: (b, i, 0)),
                  pl.BlockSpec((1, C, TI), lambda b, i, j: (b, 0, j))],
        out_specs=pl.BlockSpec((1, TI, TI), lambda b, i, j: (b, i, j)),
        compiler_params=pltpu.CompilerParams(
            dimension_semantics=("parallel", "parallel", "parallel"),
            vmem_limit_bytes=32 * 1024 * 1024),
    )(xt, x)

    # --- kNN indices + neighbor gather (data-dependent gather: XLA glue) ---
    _, idx = jax.lax.top_k(d, k)                                   # (B, N, k)
    batch_idx = jnp.arange(B)[:, None, None]
    neigh = xt[batch_idx, idx, :]                                  # (B, N, k, C)
    center = jnp.broadcast_to(xt[:, :, None, :], (B, N, k, C))     # (B, N, k, C)
    feat_bnkc = jnp.concatenate([neigh, center], axis=-1)          # (B, N, k, 2C) f32
    # Neighbor-major (B, k, N, 2C): a point tile carries all k neighbors; bf16
    # halves the feature DMA bytes (f32 accumulation keeps accuracy).
    feat = jnp.transpose(feat_bnkc, (0, 2, 1, 3)).astype(compute_dtype)

    # --- main fused DGCNN kernel, tiled over points ---
    TN = _pick_tile(N)
    kernel = functools.partial(_dgcnn_kernel, tile_n=TN, k=k)
    param_names = ['w1', 't1', 'w2', 't2', 'w3', 't3', 'w4', 't4', 'w5', 't5']
    in_specs = [pl.BlockSpec((1, k, TN, 2 * C), lambda b, t: (b, 0, t, 0))]
    for name in param_names:
        in_specs.append(pl.BlockSpec(folded[name].shape, lambda b, t: (0, 0)))

    out, x4, x3 = pl.pallas_call(
        kernel,
        out_shape=(jax.ShapeDtypeStruct((B, N, emb), jnp.float32),
                   jax.ShapeDtypeStruct((B, N, 256), jnp.float32),
                   jax.ShapeDtypeStruct((B, N, 128), jnp.float32)),
        grid=(B, N // TN),
        in_specs=in_specs,
        out_specs=(pl.BlockSpec((1, TN, emb), lambda b, t: (b, t, 0)),
                   pl.BlockSpec((1, TN, 256), lambda b, t: (b, t, 0)),
                   pl.BlockSpec((1, TN, 128), lambda b, t: (b, t, 0))),
        compiler_params=pltpu.CompilerParams(
            dimension_semantics=("parallel", "parallel"),
            vmem_limit_bytes=32 * 1024 * 1024),
    )(feat, *[folded[n] for n in param_names])

    # --- back to PyTorch conventions ---
    x_out = jnp.transpose(out, (0, 2, 1))                          # (B, emb, N)
    x4_out = jnp.transpose(x4, (0, 2, 1))[..., None]               # (B, 256, N, 1)
    x3_out = jnp.transpose(x3, (0, 2, 1))[..., None]               # (B, 128, N, 1)
    return x_out, x4_out, x3_out, feat_bnkc, folded


# Pure-JAX reference (same folded-BN bf16 weights / casts) for a sanity check.
def _reference_from_feat(feat_bnkc, folded, compute_dtype=jnp.bfloat16):
    def leaky(v, s):
        return jnp.maximum(v, s * v)

    h = jnp.einsum('bnkc,cd->bnkd', feat_bnkc.astype(compute_dtype), folded['w1'],
                   preferred_element_type=jnp.float32)
    h = leaky(h + folded['t1'], 0.2)
    x1 = h.max(axis=2)
    h = jnp.einsum('bnkc,cd->bnkd', h.astype(compute_dtype), folded['w2'],
                   preferred_element_type=jnp.float32)
    h = leaky(h + folded['t2'], 0.2)
    x2 = h.max(axis=2)
    h = jnp.einsum('bnkc,cd->bnkd', h.astype(compute_dtype), folded['w3'],
                   preferred_element_type=jnp.float32)
    h = leaky(h + folded['t3'], 0.2)
    x3 = h.max(axis=2)
    h = jnp.einsum('bnkc,cd->bnkd', h.astype(compute_dtype), folded['w4'],
                   preferred_element_type=jnp.float32)
    h = leaky(h + folded['t4'], 0.2)
    x4 = h.max(axis=2)
    cat = jnp.concatenate([x1, x2, x3, x4], axis=-1).astype(compute_dtype)
    out = jnp.einsum('bnc,cd->bnd', cat, folded['w5'],
                     preferred_element_type=jnp.float32)
    out = leaky(out + folded['t5'], 0.01)
    return (jnp.transpose(out, (0, 2, 1)),
            jnp.transpose(x4, (0, 2, 1))[..., None],
            jnp.transpose(x3, (0, 2, 1))[..., None])


if __name__ == "__main__":
    key = jax.random.PRNGKey(0)
    k_params, k_x = jax.random.split(key)

    # N=256 exercises real tiling: pairwise grid (B, 2, 2), main grid (B, 2).
    B, NUM_DIMS, N = 2, 3, 256           # conv1 expects 2*num_dims == 6 channels
    EMB_DIMS, K = 512, 10

    params = init_params(k_params, emb_dims=EMB_DIMS)
    x = jax.random.normal(k_x, (B, NUM_DIMS, N), jnp.float32)

    fwd = jax.jit(functools.partial(dgcnn_leaky_forward, k=K))
    x_out, x4_out, x3_out, feat_bnkc, folded = fwd(x, params)
    jax.block_until_ready((x_out, x4_out, x3_out))

    assert x_out.shape == (B, EMB_DIMS, N)
    assert x4_out.shape == (B, 256, N, 1)
    assert x3_out.shape == (B, 128, N, 1)

    # sanity check against a pure-JAX reference built from the same graph
    # features and the same folded bf16 weights (f32 accumulation both sides).
    ref_x, ref_x4, ref_x3 = _reference_from_feat(feat_bnkc, folded)
    np.testing.assert_allclose(np.asarray(x_out), np.asarray(ref_x),
                               rtol=5e-3, atol=5e-3)
    np.testing.assert_allclose(np.asarray(x4_out), np.asarray(ref_x4),
                               rtol=5e-3, atol=5e-3)
    np.testing.assert_allclose(np.asarray(x3_out), np.asarray(ref_x3),
                               rtol=5e-3, atol=5e-3)

    print("KERNEL_OK")
</pallas_src>

<mosaic_0001>
module attributes {stable_mosaic.version = 11 : i64} {
  func.func @_pairwise_kernel(%arg0: i32, %arg1: i32, %arg2: i32, %arg3: memref<1x128x3xf32, #tpu.memory_space<vmem>>, %arg4: memref<1x3x128xf32, #tpu.memory_space<vmem>>, %arg5: memref<1x128x128xf32, #tpu.memory_space<vmem>>) attributes {dimension_semantics = [#tpu.dimension_semantics<parallel>, #tpu.dimension_semantics<parallel>, #tpu.dimension_semantics<parallel>], iteration_bounds = array<i64: 2, 2, 2>, scalar_prefetch = 0 : i64, scratch_operands = 0 : i64, tpu.core_type = #tpu.core_type<tc>, window_params = [{transform_indices = @transform_0, window_bounds = array<i64: 1, 128, 3>}, {transform_indices = @transform_1, window_bounds = array<i64: 1, 3, 128>}, {transform_indices = @transform_2, window_bounds = array<i64: 1, 128, 128>}]} {
    %c0 = arith.constant 0 : index
    %c0_0 = arith.constant 0 : index
    %c0_1 = arith.constant 0 : index
    %0 = vector.load %arg3[%c0, %c0_0, %c0_1] : memref<1x128x3xf32, #tpu.memory_space<vmem>>, vector<1x128x3xf32>
    %1 = vector.shape_cast %0 : vector<1x128x3xf32> to vector<128x3xf32>
    %c0_2 = arith.constant 0 : index
    %c0_3 = arith.constant 0 : index
    %c0_4 = arith.constant 0 : index
    %2 = vector.load %arg4[%c0_2, %c0_3, %c0_4] : memref<1x3x128xf32, #tpu.memory_space<vmem>>, vector<1x3x128xf32>
    %3 = vector.shape_cast %2 : vector<1x3x128xf32> to vector<3x128xf32>
    %cst = arith.constant dense<0.000000e+00> : vector<128x128xf32>
    %4 = tpu.matmul %1, %3, %cst {dimension_numbers = #tpu.dot_dimension_numbers<[1], [0], [0], [1], [0, 0, 1, 1], [], []>} : vector<128x3xf32>, vector<3x128xf32>, vector<128x128xf32> -> vector<128x128xf32>
    %5 = arith.mulf %1, %1 : vector<128x3xf32>
    %cst_5 = arith.constant dense<0.000000e+00> : vector<128xf32>
    %6 = vector.multi_reduction <add>, %5, %cst_5 [1] : vector<128x3xf32> to vector<128xf32>
    %7 = vector.shape_cast %6 : vector<128xf32> to vector<128x1xf32>
    %8 = arith.mulf %3, %3 : vector<3x128xf32>
    %cst_6 = arith.constant dense<0.000000e+00> : vector<128xf32>
    %9 = vector.multi_reduction <add>, %8, %cst_6 [0] : vector<3x128xf32> to vector<128xf32>
    %10 = vector.shape_cast %9 : vector<128xf32> to vector<1x128xf32>
    %cst_7 = arith.constant 2.000000e+00 : f32
    %11 = vector.broadcast %cst_7 : f32 to vector<128x128xf32>
    %12 = arith.mulf %11, %4 : vector<128x128xf32>
    %13 = vector.broadcast %7 : vector<128x1xf32> to vector<128x128xf32>
    %14 = arith.subf %12, %13 : vector<128x128xf32>
    %15 = vector.broadcast %10 : vector<1x128xf32> to vector<128x128xf32>
    %16 = arith.subf %14, %15 : vector<128x128xf32>
    %c0_8 = arith.constant 0 : index
    %c0_9 = arith.constant 0 : index
    %c0_10 = arith.constant 0 : index
    %17 = vector.load %arg5[%c0_8, %c0_9, %c0_10] : memref<1x128x128xf32, #tpu.memory_space<vmem>>, vector<1x128x128xf32>
    %18 = vector.shape_cast %17 : vector<1x128x128xf32> to vector<128x128xf32>
    %19 = vector.shape_cast %16 : vector<128x128xf32> to vector<1x128x128xf32>
    tpu.vector_store %arg5[%c0_8, %c0_9, %c0_10], %19 {strides = array<i32>} : memref<1x128x128xf32, #tpu.memory_space<vmem>>, vector<1x128x128xf32>,
    return
  }
  func.func @transform_0(%arg0: i32, %arg1: i32, %arg2: i32) -> (i32, i32, i32) {
    %c0_i32 = arith.constant 0 : i32
    %c0_i32_0 = arith.constant 0 : i32
    return %arg0, %arg1, %c0_i32 : i32, i32, i32
  }
  func.func @transform_1(%arg0: i32, %arg1: i32, %arg2: i32) -> (i32, i32, i32) {
    %c0_i32 = arith.constant 0 : i32
    %c0_i32_0 = arith.constant 0 : i32
    return %arg0, %c0_i32, %arg2 : i32, i32, i32
  }
  func.func @transform_2(%arg0: i32, %arg1: i32, %arg2: i32) -> (i32, i32, i32) {
    %c0_i32 = arith.constant 0 : i32
    return %arg0, %arg1, %arg2 : i32, i32, i32
  }
}

module attributes {stable_mosaic.version = 11 : i64} {
  func.func @_dgcnn_kernel(%arg0: i32, %arg1: i32, %arg2: memref<1x10x128x6xbf16, #tpu.memory_space<vmem>>, %arg3: memref<6x64xbf16, #tpu.memory_space<vmem>>, %arg4: memref<1x64xf32, #tpu.memory_space<vmem>>, %arg5: memref<64x64xbf16, #tpu.memory_space<vmem>>, %arg6: memref<1x64xf32, #tpu.memory_space<vmem>>, %arg7: memref<64x128xbf16, #tpu.memory_space<vmem>>, %arg8: memref<1x128xf32, #tpu.memory_space<vmem>>, %arg9: memref<128x256xbf16, #tpu.memory_space<vmem>>, %arg10: memref<1x256xf32, #tpu.memory_space<vmem>>, %arg11: memref<512x512xbf16, #tpu.memory_space<vmem>>, %arg12: memref<1x512xf32, #tpu.memory_space<vmem>>, %arg13: memref<1x128x512xf32, #tpu.memory_space<vmem>>, %arg14: memref<1x128x256xf32, #tpu.memory_space<vmem>>, %arg15: memref<1x128x128xf32, #tpu.memory_space<vmem>>) attributes {dimension_semantics = [#tpu.dimension_semantics<parallel>, #tpu.dimension_semantics<parallel>], iteration_bounds = array<i64: 2, 2>, scalar_prefetch = 0 : i64, scratch_operands = 0 : i64, tpu.core_type = #tpu.core_type<tc>, window_params = [{transform_indices = @transform_0, window_bounds = array<i64: 1, 10, 128, 6>}, {pipeline_mode = #tpu.pipeline_mode<synchronous>, transform_indices = @transform_1, window_bounds = array<i64: 6, 64>}, {pipeline_mode = #tpu.pipeline_mode<synchronous>, transform_indices = @transform_2, window_bounds = array<i64: 1, 64>}, {pipeline_mode = #tpu.pipeline_mode<synchronous>, transform_indices = @transform_3, window_bounds = array<i64: 64, 64>}, {pipeline_mode = #tpu.pipeline_mode<synchronous>, transform_indices = @transform_4, window_bounds = array<i64: 1, 64>}, {pipeline_mode = #tpu.pipeline_mode<synchronous>, transform_indices = @transform_5, window_bounds = array<i64: 64, 128>}, {pipeline_mode = #tpu.pipeline_mode<synchronous>, transform_indices = @transform_6, window_bounds = array<i64: 1, 128>}, {pipeline_mode = #tpu.pipeline_mode<synchronous>, transform_indices = @transform_7, window_bounds = array<i64: 128, 256>}, {pipeline_mode = #tpu.pipeline_mode<synchronous>, transform_indices = @transform_8, window_bounds = array<i64: 1, 256>}, {pipeline_mode = #tpu.pipeline_mode<synchronous>, transform_indices = @transform_9, window_bounds = array<i64: 512, 512>}, {pipeline_mode = #tpu.pipeline_mode<synchronous>, transform_indices = @transform_10, window_bounds = array<i64: 1, 512>}, {transform_indices = @transform_11, window_bounds = array<i64: 1, 128, 512>}, {transform_indices = @transform_12, window_bounds = array<i64: 1, 128, 256>}, {transform_indices = @transform_13, window_bounds = array<i64: 1, 128, 128>}]} {
    %c0 = arith.constant 0 : index
    %c0_0 = arith.constant 0 : index
    %c0_1 = arith.constant 0 : index
    %c0_2 = arith.constant 0 : index
    %0 = vector.load %arg2[%c0, %c0_0, %c0_1, %c0_2] : memref<1x10x128x6xbf16, #tpu.memory_space<vmem>>, vector<1x10x128x6xbf16>
    %1 = vector.shape_cast %0 : vector<1x10x128x6xbf16> to vector<10x128x6xbf16>
    %2 = vector.shape_cast %1 : vector<10x128x6xbf16> to vector<1280x6xbf16>
    %c0_3 = arith.constant 0 : index
    %c0_4 = arith.constant 0 : index
    %3 = vector.load %arg3[%c0_3, %c0_4] : memref<6x64xbf16, #tpu.memory_space<vmem>>, vector<6x64xbf16>
    %cst = arith.constant dense<0.000000e+00> : vector<1280x64xf32>
    %4 = tpu.matmul %2, %3, %cst {dimension_numbers = #tpu.dot_dimension_numbers<[1], [0], [0], [1], [0, 0, 1, 1], [], []>} : vector<1280x6xbf16>, vector<6x64xbf16>, vector<1280x64xf32> -> vector<1280x64xf32>
    %c0_5 = arith.constant 0 : index
    %c0_6 = arith.constant 0 : index
    %5 = vector.load %arg4[%c0_5, %c0_6] : memref<1x64xf32, #tpu.memory_space<vmem>>, vector<1x64xf32>
    %6 = vector.broadcast %5 : vector<1x64xf32> to vector<1280x64xf32>
    %7 = arith.addf %4, %6 : vector<1280x64xf32>
    %cst_7 = arith.constant 2.000000e-01 : f32
    %8 = vector.broadcast %cst_7 : f32 to vector<1280x64xf32>
    %9 = arith.mulf %8, %7 : vector<1280x64xf32>
    %10 = arith.maximumf %7, %9 : vector<1280x64xf32>
    %11 = vector.shape_cast %10 : vector<1280x64xf32> to vector<10x128x64xf32>
    %12 = vector.extract_strided_slice %11 {offsets = [0, 0, 0], sizes = [1, 128, 64], strides = [1, 1, 1]} : vector<10x128x64xf32> to vector<1x128x64xf32>
    %13 = vector.shape_cast %12 : vector<1x128x64xf32> to vector<128x64xf32>
    %14 = vector.extract_strided_slice %11 {offsets = [1, 0, 0], sizes = [1, 128, 64], strides = [1, 1, 1]} : vector<10x128x64xf32> to vector<1x128x64xf32>
    %15 = vector.shape_cast %14 : vector<1x128x64xf32> to vector<128x64xf32>
    %16 = arith.maximumf %13, %15 : vector<128x64xf32>
    %17 = vector.extract_strided_slice %11 {offsets = [2, 0, 0], sizes = [1, 128, 64], strides = [1, 1, 1]} : vector<10x128x64xf32> to vector<1x128x64xf32>
    %18 = vector.shape_cast %17 : vector<1x128x64xf32> to vector<128x64xf32>
    %19 = arith.maximumf %16, %18 : vector<128x64xf32>
    %20 = vector.extract_strided_slice %11 {offsets = [3, 0, 0], sizes = [1, 128, 64], strides = [1, 1, 1]} : vector<10x128x64xf32> to vector<1x128x64xf32>
    %21 = vector.shape_cast %20 : vector<1x128x64xf32> to vector<128x64xf32>
    %22 = arith.maximumf %19, %21 : vector<128x64xf32>
    %23 = vector.extract_strided_slice %11 {offsets = [4, 0, 0], sizes = [1, 128, 64], strides = [1, 1, 1]} : vector<10x128x64xf32> to vector<1x128x64xf32>
    %24 = vector.shape_cast %23 : vector<1x128x64xf32> to vector<128x64xf32>
    %25 = arith.maximumf %22, %24 : vector<128x64xf32>
    %26 = vector.extract_strided_slice %11 {offsets = [5, 0, 0], sizes = [1, 128, 64], strides = [1, 1, 1]} : vector<10x128x64xf32> to vector<1x128x64xf32>
    %27 = vector.shape_cast %26 : vector<1x128x64xf32> to vector<128x64xf32>
    %28 = arith.maximumf %25, %27 : vector<128x64xf32>
    %29 = vector.extract_strided_slice %11 {offsets = [6, 0, 0], sizes = [1, 128, 64], strides = [1, 1, 1]} : vector<10x128x64xf32> to vector<1x128x64xf32>
    %30 = vector.shape_cast %29 : vector<1x128x64xf32> to vector<128x64xf32>
    %31 = arith.maximumf %28, %30 : vector<128x64xf32>
    %32 = vector.extract_strided_slice %11 {offsets = [7, 0, 0], sizes = [1, 128, 64], strides = [1, 1, 1]} : vector<10x128x64xf32> to vector<1x128x64xf32>
    %33 = vector.shape_cast %32 : vector<1x128x64xf32> to vector<128x64xf32>
    %34 = arith.maximumf %31, %33 : vector<128x64xf32>
    %35 = vector.extract_strided_slice %11 {offsets = [8, 0, 0], sizes = [1, 128, 64], strides = [1, 1, 1]} : vector<10x128x64xf32> to vector<1x128x64xf32>
    %36 = vector.shape_cast %35 : vector<1x128x64xf32> to vector<128x64xf32>
    %37 = arith.maximumf %34, %36 : vector<128x64xf32>
    %38 = vector.extract_strided_slice %11 {offsets = [9, 0, 0], sizes = [1, 128, 64], strides = [1, 1, 1]} : vector<10x128x64xf32> to vector<1x128x64xf32>
    %39 = vector.shape_cast %38 : vector<1x128x64xf32> to vector<128x64xf32>
    %40 = arith.maximumf %37, %39 : vector<128x64xf32>
    %41 = arith.truncf %10 : vector<1280x64xf32> to vector<1280x64xbf16>
    %c0_8 = arith.constant 0 : index
    %c0_9 = arith.constant 0 : index
    %42 = vector.load %arg5[%c0_8, %c0_9] : memref<64x64xbf16, #tpu.memory_space<vmem>>, vector<64x64xbf16>
    %cst_10 = arith.constant dense<0.000000e+00> : vector<1280x64xf32>
    %43 = tpu.matmul %41, %42, %cst_10 {dimension_numbers = #tpu.dot_dimension_numbers<[1], [0], [0], [1], [0, 0, 1, 1], [], []>} : vector<1280x64xbf16>, vector<64x64xbf16>, vector<1280x64xf32> -> vector<1280x64xf32>
    %c0_11 = arith.constant 0 : index
    %c0_12 = arith.constant 0 : index
    %44 = vector.load %arg6[%c0_11, %c0_12] : memref<1x64xf32, #tpu.memory_space<vmem>>, vector<1x64xf32>
    %45 = vector.broadcast %44 : vector<1x64xf32> to vector<1280x64xf32>
    %46 = arith.addf %43, %45 : vector<1280x64xf32>
    %cst_13 = arith.constant 2.000000e-01 : f32
    %47 = vector.broadcast %cst_13 : f32 to vector<1280x64xf32>
    %48 = arith.mulf %47, %46 : vector<1280x64xf32>
    %49 = arith.maximumf %46, %48 : vector<1280x64xf32>
    %50 = vector.shape_cast %49 : vector<1280x64xf32> to vector<10x128x64xf32>
    %51 = vector.extract_strided_slice %50 {offsets = [0, 0, 0], sizes = [1, 128, 64], strides = [1, 1, 1]} : vector<10x128x64xf32> to vector<1x128x64xf32>
    %52 = vector.shape_cast %51 : vector<1x128x64xf32> to vector<128x64xf32>
    %53 = vector.extract_strided_slice %50 {offsets = [1, 0, 0], sizes = [1, 128, 64], strides = [1, 1, 1]} : vector<10x128x64xf32> to vector<1x128x64xf32>
    %54 = vector.shape_cast %53 : vector<1x128x64xf32> to vector<128x64xf32>
    %55 = arith.maximumf %52, %54 : vector<128x64xf32>
    %56 = vector.extract_strided_slice %50 {offsets = [2, 0, 0], sizes = [1, 128, 64], strides = [1, 1, 1]} : vector<10x128x64xf32> to vector<1x128x64xf32>
    %57 = vector.shape_cast %56 : vector<1x128x64xf32> to vector<128x64xf32>
    %58 = arith.maximumf %55, %57 : vector<128x64xf32>
    %59 = vector.extract_strided_slice %50 {offsets = [3, 0, 0], sizes = [1, 128, 64], strides = [1, 1, 1]} : vector<10x128x64xf32> to vector<1x128x64xf32>
    %60 = vector.shape_cast %59 : vector<1x128x64xf32> to vector<128x64xf32>
    %61 = arith.maximumf %58, %60 : vector<128x64xf32>
    %62 = vector.extract_strided_slice %50 {offsets = [4, 0, 0], sizes = [1, 128, 64], strides = [1, 1, 1]} : vector<10x128x64xf32> to vector<1x128x64xf32>
    %63 = vector.shape_cast %62 : vector<1x128x64xf32> to vector<128x64xf32>
    %64 = arith.maximumf %61, %63 : vector<128x64xf32>
    %65 = vector.extract_strided_slice %50 {offsets = [5, 0, 0], sizes = [1, 128, 64], strides = [1, 1, 1]} : vector<10x128x64xf32> to vector<1x128x64xf32>
    %66 = vector.shape_cast %65 : vector<1x128x64xf32> to vector<128x64xf32>
    %67 = arith.maximumf %64, %66 : vector<128x64xf32>
    %68 = vector.extract_strided_slice %50 {offsets = [6, 0, 0], sizes = [1, 128, 64], strides = [1, 1, 1]} : vector<10x128x64xf32> to vector<1x128x64xf32>
    %69 = vector.shape_cast %68 : vector<1x128x64xf32> to vector<128x64xf32>
    %70 = arith.maximumf %67, %69 : vector<128x64xf32>
    %71 = vector.extract_strided_slice %50 {offsets = [7, 0, 0], sizes = [1, 128, 64], strides = [1, 1, 1]} : vector<10x128x64xf32> to vector<1x128x64xf32>
    %72 = vector.shape_cast %71 : vector<1x128x64xf32> to vector<128x64xf32>
    %73 = arith.maximumf %70, %72 : vector<128x64xf32>
    %74 = vector.extract_strided_slice %50 {offsets = [8, 0, 0], sizes = [1, 128, 64], strides = [1, 1, 1]} : vector<10x128x64xf32> to vector<1x128x64xf32>
    %75 = vector.shape_cast %74 : vector<1x128x64xf32> to vector<128x64xf32>
    %76 = arith.maximumf %73, %75 : vector<128x64xf32>
    %77 = vector.extract_strided_slice %50 {offsets = [9, 0, 0], sizes = [1, 128, 64], strides = [1, 1, 1]} : vector<10x128x64xf32> to vector<1x128x64xf32>
    %78 = vector.shape_cast %77 : vector<1x128x64xf32> to vector<128x64xf32>
    %79 = arith.maximumf %76, %78 : vector<128x64xf32>
    %80 = arith.truncf %49 : vector<1280x64xf32> to vector<1280x64xbf16>
    %c0_14 = arith.constant 0 : index
    %c0_15 = arith.constant 0 : index
    %81 = vector.load %arg7[%c0_14, %c0_15] : memref<64x128xbf16, #tpu.memory_space<vmem>>, vector<64x128xbf16>
    %cst_16 = arith.constant dense<0.000000e+00> : vector<1280x128xf32>
    %82 = tpu.matmul %80, %81, %cst_16 {dimension_numbers = #tpu.dot_dimension_numbers<[1], [0], [0], [1], [0, 0, 1, 1], [], []>} : vector<1280x64xbf16>, vector<64x128xbf16>, vector<1280x128xf32> -> vector<1280x128xf32>
    %c0_17 = arith.constant 0 : index
    %c0_18 = arith.constant 0 : index
    %83 = vector.load %arg8[%c0_17, %c0_18] : memref<1x128xf32, #tpu.memory_space<vmem>>, vector<1x128xf32>
    %84 = vector.broadcast %83 : vector<1x128xf32> to vector<1280x128xf32>
    %85 = arith.addf %82, %84 : vector<1280x128xf32>
    %cst_19 = arith.constant 2.000000e-01 : f32
    %86 = vector.broadcast %cst_19 : f32 to vector<1280x128xf32>
    %87 = arith.mulf %86, %85 : vector<1280x128xf32>
    %88 = arith.maximumf %85, %87 : vector<1280x128xf32>
    %89 = vector.shape_cast %88 : vector<1280x128xf32> to vector<10x128x128xf32>
    %90 = vector.extract_strided_slice %89 {offsets = [0, 0, 0], sizes = [1, 128, 128], strides = [1, 1, 1]} : vector<10x128x128xf32> to vector<1x128x128xf32>
    %91 = vector.shape_cast %90 : vector<1x128x128xf32> to vector<128x128xf32>
    %92 = vector.extract_strided_slice %89 {offsets = [1, 0, 0], sizes = [1, 128, 128], strides = [1, 1, 1]} : vector<10x128x128xf32> to vector<1x128x128xf32>
    %93 = vector.shape_cast %92 : vector<1x128x128xf32> to vector<128x128xf32>
    %94 = arith.maximumf %91, %93 : vector<128x128xf32>
    %95 = vector.extract_strided_slice %89 {offsets = [2, 0, 0], sizes = [1, 128, 128], strides = [1, 1, 1]} : vector<10x128x128xf32> to vector<1x128x128xf32>
    %96 = vector.shape_cast %95 : vector<1x128x128xf32> to vector<128x128xf32>
    %97 = arith.maximumf %94, %96 : vector<128x128xf32>
    %98 = vector.extract_strided_slice %89 {offsets = [3, 0, 0], sizes = [1, 128, 128], strides = [1, 1, 1]} : vector<10x128x128xf32> to vector<1x128x128xf32>
    %99 = vector.shape_cast %98 : vector<1x128x128xf32> to vector<128x128xf32>
    %100 = arith.maximumf %97, %99 : vector<128x128xf32>
    %101 = vector.extract_strided_slice %89 {offsets = [4, 0, 0], sizes = [1, 128, 128], strides = [1, 1, 1]} : vector<10x128x128xf32> to vector<1x128x128xf32>
    %102 = vector.shape_cast %101 : vector<1x128x128xf32> to vector<128x128xf32>
    %103 = arith.maximumf %100, %102 : vector<128x128xf32>
    %104 = vector.extract_strided_slice %89 {offsets = [5, 0, 0], sizes = [1, 128, 128], strides = [1, 1, 1]} : vector<10x128x128xf32> to vector<1x128x128xf32>
    %105 = vector.shape_cast %104 : vector<1x128x128xf32> to vector<128x128xf32>
    %106 = arith.maximumf %103, %105 : vector<128x128xf32>
    %107 = vector.extract_strided_slice %89 {offsets = [6, 0, 0], sizes = [1, 128, 128], strides = [1, 1, 1]} : vector<10x128x128xf32> to vector<1x128x128xf32>
    %108 = vector.shape_cast %107 : vector<1x128x128xf32> to vector<128x128xf32>
    %109 = arith.maximumf %106, %108 : vector<128x128xf32>
    %110 = vector.extract_strided_slice %89 {offsets = [7, 0, 0], sizes = [1, 128, 128], strides = [1, 1, 1]} : vector<10x128x128xf32> to vector<1x128x128xf32>
    %111 = vector.shape_cast %110 : vector<1x128x128xf32> to vector<128x128xf32>
    %112 = arith.maximumf %109, %111 : vector<128x128xf32>
    %113 = vector.extract_strided_slice %89 {offsets = [8, 0, 0], sizes = [1, 128, 128], strides = [1, 1, 1]} : vector<10x128x128xf32> to vector<1x128x128xf32>
    %114 = vector.shape_cast %113 : vector<1x128x128xf32> to vector<128x128xf32>
    %115 = arith.maximumf %112, %114 : vector<128x128xf32>
    %116 = vector.extract_strided_slice %89 {offsets = [9, 0, 0], sizes = [1, 128, 128], strides = [1, 1, 1]} : vector<10x128x128xf32> to vector<1x128x128xf32>
    %117 = vector.shape_cast %116 : vector<1x128x128xf32> to vector<128x128xf32>
    %118 = arith.maximumf %115, %117 : vector<128x128xf32>
    %119 = arith.truncf %88 : vector<1280x128xf32> to vector<1280x128xbf16>
    %c0_20 = arith.constant 0 : index
    %c0_21 = arith.constant 0 : index
    %120 = vector.load %arg9[%c0_20, %c0_21] : memref<128x256xbf16, #tpu.memory_space<vmem>>, vector<128x256xbf16>
    %cst_22 = arith.constant dense<0.000000e+00> : vector<1280x256xf32>
    %121 = tpu.matmul %119, %120, %cst_22 {dimension_numbers = #tpu.dot_dimension_numbers<[1], [0], [0], [1], [0, 0, 1, 1], [], []>} : vector<1280x128xbf16>, vector<128x256xbf16>, vector<1280x256xf32> -> vector<1280x256xf32>
    %c0_23 = arith.constant 0 : index
    %c0_24 = arith.constant 0 : index
    %122 = vector.load %arg10[%c0_23, %c0_24] : memref<1x256xf32, #tpu.memory_space<vmem>>, vector<1x256xf32>
    %123 = vector.broadcast %122 : vector<1x256xf32> to vector<1280x256xf32>
    %124 = arith.addf %121, %123 : vector<1280x256xf32>
    %cst_25 = arith.constant 2.000000e-01 : f32
    %125 = vector.broadcast %cst_25 : f32 to vector<1280x256xf32>
    %126 = arith.mulf %125, %124 : vector<1280x256xf32>
    %127 = arith.maximumf %124, %126 : vector<1280x256xf32>
    %128 = vector.shape_cast %127 : vector<1280x256xf32> to vector<10x128x256xf32>
    %129 = vector.extract_strided_slice %128 {offsets = [0, 0, 0], sizes = [1, 128, 256], strides = [1, 1, 1]} : vector<10x128x256xf32> to vector<1x128x256xf32>
    %130 = vector.shape_cast %129 : vector<1x128x256xf32> to vector<128x256xf32>
    %131 = vector.extract_strided_slice %128 {offsets = [1, 0, 0], sizes = [1, 128, 256], strides = [1, 1, 1]} : vector<10x128x256xf32> to vector<1x128x256xf32>
    %132 = vector.shape_cast %131 : vector<1x128x256xf32> to vector<128x256xf32>
    %133 = arith.maximumf %130, %132 : vector<128x256xf32>
    %134 = vector.extract_strided_slice %128 {offsets = [2, 0, 0], sizes = [1, 128, 256], strides = [1, 1, 1]} : vector<10x128x256xf32> to vector<1x128x256xf32>
    %135 = vector.shape_cast %134 : vector<1x128x256xf32> to vector<128x256xf32>
    %136 = arith.maximumf %133, %135 : vector<128x256xf32>
    %137 = vector.extract_strided_slice %128 {offsets = [3, 0, 0], sizes = [1, 128, 256], strides = [1, 1, 1]} : vector<10x128x256xf32> to vector<1x128x256xf32>
    %138 = vector.shape_cast %137 : vector<1x128x256xf32> to vector<128x256xf32>
    %139 = arith.maximumf %136, %138 : vector<128x256xf32>
    %140 = vector.extract_strided_slice %128 {offsets = [4, 0, 0], sizes = [1, 128, 256], strides = [1, 1, 1]} : vector<10x128x256xf32> to vector<1x128x256xf32>
    %141 = vector.shape_cast %140 : vector<1x128x256xf32> to vector<128x256xf32>
    %142 = arith.maximumf %139, %141 : vector<128x256xf32>
    %143 = vector.extract_strided_slice %128 {offsets = [5, 0, 0], sizes = [1, 128, 256], strides = [1, 1, 1]} : vector<10x128x256xf32> to vector<1x128x256xf32>
    %144 = vector.shape_cast %143 : vector<1x128x256xf32> to vector<128x256xf32>
    %145 = arith.maximumf %142, %144 : vector<128x256xf32>
    %146 = vector.extract_strided_slice %128 {offsets = [6, 0, 0], sizes = [1, 128, 256], strides = [1, 1, 1]} : vector<10x128x256xf32> to vector<1x128x256xf32>
    %147 = vector.shape_cast %146 : vector<1x128x256xf32> to vector<128x256xf32>
    %148 = arith.maximumf %145, %147 : vector<128x256xf32>
    %149 = vector.extract_strided_slice %128 {offsets = [7, 0, 0], sizes = [1, 128, 256], strides = [1, 1, 1]} : vector<10x128x256xf32> to vector<1x128x256xf32>
    %150 = vector.shape_cast %149 : vector<1x128x256xf32> to vector<128x256xf32>
    %151 = arith.maximumf %148, %150 : vector<128x256xf32>
    %152 = vector.extract_strided_slice %128 {offsets = [8, 0, 0], sizes = [1, 128, 256], strides = [1, 1, 1]} : vector<10x128x256xf32> to vector<1x128x256xf32>
    %153 = vector.shape_cast %152 : vector<1x128x256xf32> to vector<128x256xf32>
    %154 = arith.maximumf %151, %153 : vector<128x256xf32>
    %155 = vector.extract_strided_slice %128 {offsets = [9, 0, 0], sizes = [1, 128, 256], strides = [1, 1, 1]} : vector<10x128x256xf32> to vector<1x128x256xf32>
    %156 = vector.shape_cast %155 : vector<1x128x256xf32> to vector<128x256xf32>
    %157 = arith.maximumf %154, %156 : vector<128x256xf32>
    %158 = tpu.concatenate %40, %79, %118, %157 in 1 : vector<128x64xf32>, vector<128x64xf32>, vector<128x128xf32>, vector<128x256xf32> -> vector<128x512xf32>
    %159 = arith.truncf %158 : vector<128x512xf32> to vector<128x512xbf16>
    %c0_26 = arith.constant 0 : index
    %c0_27 = arith.constant 0 : index
    %160 = vector.load %arg11[%c0_26, %c0_27] : memref<512x512xbf16, #tpu.memory_space<vmem>>, vector<512x512xbf16>
    %cst_28 = arith.constant dense<0.000000e+00> : vector<128x512xf32>
    %161 = tpu.matmul %159, %160, %cst_28 {dimension_numbers = #tpu.dot_dimension_numbers<[1], [0], [0], [1], [0, 0, 1, 1], [], []>} : vector<128x512xbf16>, vector<512x512xbf16>, vector<128x512xf32> -> vector<128x512xf32>
    %c0_29 = arith.constant 0 : index
    %c0_30 = arith.constant 0 : index
    %162 = vector.load %arg12[%c0_29, %c0_30] : memref<1x512xf32, #tpu.memory_space<vmem>>, vector<1x512xf32>
    %163 = vector.broadcast %162 : vector<1x512xf32> to vector<128x512xf32>
    %164 = arith.addf %161, %163 : vector<128x512xf32>
    %cst_31 = arith.constant 0.00999999977 : f32
    %165 = vector.broadcast %cst_31 : f32 to vector<128x512xf32>
    %166 = arith.mulf %165, %164 : vector<128x512xf32>
    %167 = arith.maximumf %164, %166 : vector<128x512xf32>
    %c0_32 = arith.constant 0 : index
    %c0_33 = arith.constant 0 : index
    %c0_34 = arith.constant 0 : index
    %168 = vector.load %arg13[%c0_32, %c0_33, %c0_34] : memref<1x128x512xf32, #tpu.memory_space<vmem>>, vector<1x128x512xf32>
    %169 = vector.shape_cast %168 : vector<1x128x512xf32> to vector<128x512xf32>
    %170 = vector.shape_cast %167 : vector<128x512xf32> to vector<1x128x512xf32>
    tpu.vector_store %arg13[%c0_32, %c0_33, %c0_34], %170 {strides = array<i32>} : memref<1x128x512xf32, #tpu.memory_space<vmem>>, vector<1x128x512xf32>,
    %c0_35 = arith.constant 0 : index
    %c0_36 = arith.constant 0 : index
    %c0_37 = arith.constant 0 : index
    %171 = vector.load %arg14[%c0_35, %c0_36, %c0_37] : memref<1x128x256xf32, #tpu.memory_space<vmem>>, vector<1x128x256xf32>
    %172 = vector.shape_cast %171 : vector<1x128x256xf32> to vector<128x256xf32>
    %173 = vector.shape_cast %157 : vector<128x256xf32> to vector<1x128x256xf32>
    tpu.vector_store %arg14[%c0_35, %c0_36, %c0_37], %173 {strides = array<i32>} : memref<1x128x256xf32, #tpu.memory_space<vmem>>, vector<1x128x256xf32>,
    %c0_38 = arith.constant 0 : index
    %c0_39 = arith.constant 0 : index
    %c0_40 = arith.constant 0 : index
    %174 = vector.load %arg15[%c0_38, %c0_39, %c0_40] : memref<1x128x128xf32, #tpu.memory_space<vmem>>, vector<1x128x128xf32>
    %175 = vector.shape_cast %174 : vector<1x128x128xf32> to vector<128x128xf32>
    %176 = vector.shape_cast %118 : vector<128x128xf32> to vector<1x128x128xf32>
    tpu.vector_store %arg15[%c0_38, %c0_39, %c0_40], %176 {strides = array<i32>} : memref<1x128x128xf32, #tpu.memory_space<vmem>>, vector<1x128x128xf32>,
    return
  }
  func.func @transform_0(%arg0: i32, %arg1: i32) -> (i32, i32, i32, i32) {
    %c0_i32 = arith.constant 0 : i32
    %c0_i32_0 = arith.constant 0 : i32
    %c0_i32_1 = arith.constant 0 : i32
    return %arg0, %c0_i32, %arg1, %c0_i32_0 : i32, i32, i32, i32
  }
  func.func @transform_1(%arg0: i32, %arg1: i32) -> (i32, i32) {
    %c0_i32 = arith.constant 0 : i32
    %c0_i32_0 = arith.constant 0 : i32
    %c0_i32_1 = arith.constant 0 : i32
    return %c0_i32, %c0_i32_0 : i32, i32
  }
  func.func @transform_2(%arg0: i32, %arg1: i32) -> (i32, i32) {
    %c0_i32 = arith.constant 0 : i32
    %c0_i32_0 = arith.constant 0 : i32
    %c0_i32_1 = arith.constant 0 : i32
    return %c0_i32, %c0_i32_0 : i32, i32
  }
  func.func @transform_3(%arg0: i32, %arg1: i32) -> (i32, i32) {
    %c0_i32 = arith.constant 0 : i32
    %c0_i32_0 = arith.constant 0 : i32
    %c0_i32_1 = arith.constant 0 : i32
    return %c0_i32, %c0_i32_0 : i32, i32
  }
  func.func @transform_4(%arg0: i32, %arg1: i32) -> (i32, i32) {
    %c0_i32 = arith.constant 0 : i32
    %c0_i32_0 = arith.constant 0 : i32
    %c0_i32_1 = arith.constant 0 : i32
    return %c0_i32, %c0_i32_0 : i32, i32
  }
  func.func @transform_5(%arg0: i32, %arg1: i32) -> (i32, i32) {
    %c0_i32 = arith.constant 0 : i32
    %c0_i32_0 = arith.constant 0 : i32
    %c0_i32_1 = arith.constant 0 : i32
    return %c0_i32, %c0_i32_0 : i32, i32
  }
  func.func @transform_6(%arg0: i32, %arg1: i32) -> (i32, i32) {
    %c0_i32 = arith.constant 0 : i32
    %c0_i32_0 = arith.constant 0 : i32
    %c0_i32_1 = arith.constant 0 : i32
    return %c0_i32, %c0_i32_0 : i32, i32
  }
  func.func @transform_7(%arg0: i32, %arg1: i32) -> (i32, i32) {
    %c0_i32 = arith.constant 0 : i32
    %c0_i32_0 = arith.constant 0 : i32
    %c0_i32_1 = arith.constant 0 : i32
    return %c0_i32, %c0_i32_0 : i32, i32
  }
  func.func @transform_8(%arg0: i32, %arg1: i32) -> (i32, i32) {
    %c0_i32 = arith.constant 0 : i32
    %c0_i32_0 = arith.constant 0 : i32
    %c0_i32_1 = arith.constant 0 : i32
    return %c0_i32, %c0_i32_0 : i32, i32
  }
  func.func @transform_9(%arg0: i32, %arg1: i32) -> (i32, i32) {
    %c0_i32 = arith.constant 0 : i32
    %c0_i32_0 = arith.constant 0 : i32
    %c0_i32_1 = arith.constant 0 : i32
    return %c0_i32, %c0_i32_0 : i32, i32
  }
  func.func @transform_10(%arg0: i32, %arg1: i32) -> (i32, i32) {
    %c0_i32 = arith.constant 0 : i32
    %c0_i32_0 = arith.constant 0 : i32
    %c0_i32_1 = arith.constant 0 : i32
    return %c0_i32, %c0_i32_0 : i32, i32
  }
  func.func @transform_11(%arg0: i32, %arg1: i32) -> (i32, i32, i32) {
    %c0_i32 = arith.constant 0 : i32
    %c0_i32_0 = arith.constant 0 : i32
    return %arg0, %arg1, %c0_i32 : i32, i32, i32
  }
  func.func @transform_12(%arg0: i32, %arg1: i32) -> (i32, i32, i32) {
    %c0_i32 = arith.constant 0 : i32
    %c0_i32_0 = arith.constant 0 : i32
    return %arg0, %arg1, %c0_i32 : i32, i32, i32
  }
  func.func @transform_13(%arg0: i32, %arg1: i32) -> (i32, i32, i32) {
    %c0_i32 = arith.constant 0 : i32
    %c0_i32_0 = arith.constant 0 : i32
    return %arg0, %arg1, %c0_i32 : i32, i32, i32
  }
}

</mosaic_0001>

<bundles_post_ra>
// kernel: dgcnn_leaky_forward.2
= control target key start
LH: loop header
LB: loop body
LE: loop exit
PB: predicated region body
PF: predicated region fallthrough
CT: control target
= control target key end

     0   :  { %s1002_s9 = smov 0   ;;  %s1004_s10 = smov 0   ;;  %s1250_s0 = inlined_call_operand.vmem [shape: f32[2,256,3], index: 0, kind: input, shape index: {}]   ;;  %s1251_s1 = inlined_call_operand.vmem [shape: f32[2,3,256], index: 1, kind: input, shape index: {}]   ;;  %s1252_s2 = inlined_call_operand.vmem [shape: f32[2,256,256], index: 2, kind: output, shape index: {}]  }
   0x1   :  { %s1006_s11 = smov 0   ;;  %s1008_s12 = smov 0  }
   0x2   :  { %s1010_s13 = smov 0   ;;  %s1012_s14 = smov 0  }
   0x3   :  { %s1014_s15 = smov 0   ;;  %s1016_s16 = smov 0  }
   0x4   :  { %s1018_s17 = smov 0  }
   0x5 LB: > { %s24_s18 = sadd.s32 1, %s973_s14  ;;  %s27_s19 = sadd.s32 1, %s977_s15  ;;  %s985_s17 = sphi %s1018_s17, %s12_s17   ;;  %s981_s16 = sphi %s1016_s16, %s1261_s16   ;;  %s977_s15 = sphi %s1014_s15, %s1260_s15   ;;  %s973_s14 = sphi %s1012_s14, %s1259_s14   ;;  %s969_s13 = sphi %s1010_s13, %s1258_s13   ;;  %s965_s12 = sphi %s1008_s12, %s1257_s12   ;;  %s961_s11 = sphi %s1006_s11, %s1256_s11   ;;  %s957_s10 = sphi %s1004_s10, %s1255_s10   ;;  %s953_s9 = sphi %s1002_s9, %s1254_s9  }
   0x6   : > { %p25_p0 = scmp.ge.s32.totalorder %s24_s18, 2  ;;  %s762_s20 = sadd.s32 4294967295, %s985_s17  }
   0x7   : > { %s31_s21 = sadd.s32 1, %s981_s16  ;;  %p108_p1 = scmp.ne.s32.totalorder %s957_s10, %s953_s9 }
   0x8   : > { %s1263_s18 = smov (%p25_p0, %s24_s18), 0  ;;  %s1265_s19 = smov (!%p25_p0, %s27_s19), %s977_s15 }
   0x9   : > { %p29_p2 = scmp.ge.s32.totalorder %s1265_s19, 2  ;;  %p109_p3 = scmp.eq.s32.totalorder %s762_s20, 7 }
   0xa   : > { %p766_p4 = scmp.ge.s32.totalorder %s985_s17, 1  ;;  %p157_p5 = scmp.lt.s32.totalorder %s985_s17, 9 }
   0xb   : > { %s1267_s19 = smov (%p29_p2, %s1265_s19), 0  ;;  %s1269_s21 = smov (!%p29_p2, %s31_s21), %s981_s16 }
   0xc   : > { %p1061_p6 = por %p109_p3, %p108_p1  ;;  %p33_p7 = scmp.ge.s32.totalorder %s1269_s21, 2 }
   0xd   : > { %p158_p8 = pnand %p766_p4, %p157_p5  ;;  %s92_s23 = ssub.s32 %s977_s15, %s1267_s19 }
   0xe   : > { %s1271_s21 = smov (%p33_p7, %s1269_s21), 0  ;;  %s94_s24 = ssub.s32 %s973_s14, %s1263_s18  ;;  %vm226_vm0 = vcmask (!%p158_p8), 23552   ;;  %vm275_vm1 = vcmask (!%p158_p8), 1042432  }
   0xf   : > { %s91_s25 = ssub.s32 %s981_s16, %s1271_s21  ;;  %s98_s28 = sadd.s32 1, %s957_s10 }
  0x10   : > { %s93_s26 = sor.u32 %s92_s23, %s91_s25  ;;  %161 = sbr.rel (%p158_p8) target bundleno = 278 (0x116), region = 28 }
  0x11   : > { %s95_s27 = sor.u32 %s94_s24, %s93_s26  ;;  %s768_s30 = sshll.u32 (!%p158_p8), %s965_s12, 4 }
  0x12   : > { %p96_p9 = scmp.eq.s32.totalorder %s95_s27, 0  ;;  %p191_p10 = scmp.lt.s32.totalorder (!%p158_p8), %s969_s13, 1 }
  0x13   : > { %p193_p11 = scmp.lt.s32.totalorder (!%p158_p8), %s768_s30, 31  ;;  %p202_p12 = scmp.lt.s32.totalorder (!%p158_p8), %s961_s11, 1 }
  0x14   : > { %s1075_s29 = scalar_select %p96_p9, %s957_s10, %s98_s28  }
  0x17   : > { %s192_s3 = scalar_select %p191_p10, %s969_s13, 1 }
  0x18   : > { %s1273_s30 = smov (!%p193_p11, %s768_s30), 31 }
  0x19   : > { %s769_s4 = sshll.u32 %s192_s3, 5  ;;  %s771_s23 = sshll.u32 %s192_s3, 1 }
  0x1a   : > { %s196_s5 = sadd.s32 %s769_s4, %s1273_s30  ;;  %s187_s3 = sand.u32 1, %s953_s9  }
  0x1b   : > { %s770_s6 = sshll.u32 %s196_s5, 3  ;;  %s767_s4 = sshll.u32 %s187_s3, 7 }
  0x1c   : > { %s1084_s20 = scalar_lea.vmem %s1250_s0, %s770_s6  ;;  %s1164_s9 = scalar_lea.vmem [#allocation2], %s767_s4 }
  0x1d   : > { %s203_s24 = scalar_select %p202_p12, %s961_s11, 1  ;;  %v209_v0 = vld [vmem:[%s1084_s20] sm:$0xff]  ;;  %v211_v3 = vld [vmem:[%s1084_s20 + $0x10] sm:$0xff]  ;;  %v210_v4 = vld [vmem:[%s1084_s20 + $0x8] sm:$0xff] }
  0x1e   : > { %v217_v1 = vld [vmem:[%s1084_s20 + $0x40] sm:$0xff]  ;;  %817 = vmatprep.mubr.msk.f32.mxu0 %vm226_vm0, %v209_v0  ;;  %v424_v2 = vmul.f32 %v209_v0, %v209_v0  ;;  %v212_v5 = vld [vmem:[%s1084_s20 + $0x18] sm:$0xff]  ;;  %v426_v6 = vmul.f32 %v211_v3, %v211_v3  ;;  %v425_v9 = vmul.f32 %v210_v4, %v210_v4  ;;  %v218_v12 = vld [vmem:[%s1084_s20 + $0x48] sm:$0xff]  ;;  %s797_s5 = sshll.u32 (%p1061_p6), %s965_s12, 5  ;;  %s793_s6 = sshll.u32 (%p1061_p6), %s969_s13, 6 }
  0x1f   : > { %829 = vmatprep.mubr.msk.f32.mxu1 %vm226_vm0, %v217_v1  ;;  %s205_s25 = sadd.s32 %s771_s23, %s203_s24  ;;  %v427_v8 = vmul.f32 %v212_v5, %v212_v5  ;;  %v219_v14 = vld [vmem:[%s1084_s20 + $0x50] sm:$0xff]  ;;  %v213_v15 = vld [vmem:[%s1084_s20 + $0x20] sm:$0xff]  ;;  %v214_v16 = vld [vmem:[%s1084_s20 + $0x28] sm:$0xff]  ;;  %v432_v32 = vmul.f32 %v217_v1, %v217_v1  ;;  %v433_v35 = vmul.f32 %v218_v12, %v218_v12  ;;  %s569_s22 = sadd.s32 (%p1061_p6), %s961_s11, %s797_s5 }
  0x20   : > { %s772_s26 = sshll.u32 %s205_s25, 2  ;;  %v440_v7 = vsel %vm226_vm0, %v424_v2, 0.0  ;;  %v446_v10 = vsel %vm226_vm0, %v426_v6, 0.0  ;;  %v443_v18 = vsel %vm226_vm0, %v425_v9, 0.0  ;;  %v429_v19 = vmul.f32 %v214_v16, %v214_v16  ;;  %v220_v22 = vld [vmem:[%s1084_s20 + $0x58] sm:$0xff]  ;;  %v221_v23 = vld [vmem:[%s1084_s20 + $0x60] sm:$0xff]  ;;  %s571_s7 = sadd.s32 (%p1061_p6), %s793_s6, %s569_s22 }
  0x21   : > { %s207_s30 = scalar_lea.vmem %s1251_s1, %s772_s26  ;;  %441 = vadd.xlane.f32.xlu0 %v440_v7  ;;  %447 = vadd.xlane.f32.xlu1 %v446_v10  ;;  %v449_v17 = vsel %vm226_vm0, %v427_v8, 0.0  ;;  %v428_v20 = vmul.f32 %v213_v15, %v213_v15  ;;  %v215_v24 = vld [vmem:[%s1084_s20 + $0x30] sm:$0xff]  ;;  %v216_v25 = vld [vmem:[%s1084_s20 + $0x38] sm:$0xff]  ;;  %v222_v30 = vld [vmem:[%s1084_s20 + $0x68] sm:$0xff]  ;;  %v467_v37 = vsel %vm226_vm0, %v433_v35, 0.0  ;;  %v464_v38 = vsel %vm226_vm0, %v432_v32, 0.0 }
  0x22   : > { %v225_v11 = vld [vmem:[%s207_s30] sm:$0x7]  ;;  %v455_v26 = vsel %vm226_vm0, %v429_v19, 0.0  ;;  %v431_v28 = vmul.f32 %v216_v25, %v216_v25  ;;  %v430_v29 = vmul.f32 %v215_v24, %v215_v24  ;;  %v223_v31 = vld [vmem:[%s1084_s20 + $0x70] sm:$0xff]  ;;  %v224_v36 = vld [vmem:[%s1084_s20 + $0x78] sm:$0xff]  ;;  %v435_v39 = vmul.f32 %v220_v22, %v220_v22  ;;  %s794_s8 = sshll.u32 (%p1061_p6), %s571_s7, 3 }
  0x23   : > { %815 = vmatprep.subr.msk.mxu0 %vm275_vm1, %v225_v11  ;;  %v488_v13 = vmul.f32 %v225_v11, %v225_v11  ;;  %841 = vmatprep.subr.msk.mxu1 %vm275_vm1, %v225_v11  ;;  %v452_v27 = vsel %vm226_vm0, %v428_v20, 0.0  ;;  %v434_v40 = vmul.f32 %v219_v14, %v219_v14  ;;  %v437_v43 = vmul.f32 %v222_v30, %v222_v30  ;;  %s573_s20 = scalar_lea.vmem (%p1061_p6), %s1252_s2, %s794_s8 }
  0x24   : > { %816 = vmatpush3.msk.msra.mxu0 %vm275_vm1, %v225_v11  ;;  %842 = vmatpush3.msk.msra.mxu1 %vm275_vm1, %v225_v11  ;;  %v461_v33 = vsel %vm226_vm0, %v431_v28, 0.0  ;;  %v458_v34 = vsel %vm226_vm0, %v430_v29, 0.0  ;;  %v473_v41 = vsel %vm226_vm0, %v435_v39, 0.0  ;;  %v436_v44 = vmul.f32 %v221_v23, %v221_v23 }
  0x25   : > { %v1110_v21 = vsel %vm275_vm1, %v488_v13, 0.0  ;;  %818 = vmatmul.mubr.msk.f32.vlgmr.msra.gmra.mrb[0].mxu0 %vm226_vm0, %v210_v4  ;;  %830 = vmatmul.mubr.msk.f32.vlgmr.msra.gmra.mrb[0].mxu1 %vm226_vm0, %v218_v12  ;;  %v470_v42 = vsel %vm226_vm0, %v434_v40, 0.0  ;;  %v479_v45 = vsel %vm226_vm0, %v437_v43, 0.0  ;;  %v439_v47 = vmul.f32 %v224_v36, %v224_v36 }
  0x26   : > { %820 = vmatprep.mubr.msk.f32.mxu0 %vm226_vm0, %v211_v3  ;;  %832 = vmatprep.mubr.msk.f32.mxu1 %vm226_vm0, %v219_v14  ;;  %v476_v46 = vsel %vm226_vm0, %v436_v44, 0.0  ;;  %v438_v48 = vmul.f32 %v223_v31, %v223_v31  ;;  %v490_v57 = vrot.slane %v1110_v21, 4 }
  0x27   : > { %450 = vadd.xlane.f32.xlu1 %v449_v17  ;;  %444 = vadd.xlane.f32.xlu0 %v443_v18  ;;  %v485_v49 = vsel %vm226_vm0, %v439_v47, 0.0 }
  0x28   : > { %v482_v50 = vsel %vm226_vm0, %v438_v48, 0.0  ;;  %v491_v58 = vadd.f32 %v490_v57, %v1110_v21 }
  0x29   : > { %821 = vmatmul.mubr.msk.f32.gmra.mrb[2].mxu0 %vm226_vm0, %v212_v5  ;;  %833 = vmatmul.mubr.msk.f32.gmra.mrb[2].mxu1 %vm226_vm0, %v220_v22 }
  0x2a   : > { %823 = vmatprep.mubr.msk.f32.mxu0 %vm226_vm0, %v213_v15  ;;  %835 = vmatprep.mubr.msk.f32.mxu1 %vm226_vm0, %v221_v23  ;;  %v492_v61 = vrot.slane %v491_v58, 2 }
  0x2b   : > { %456 = vadd.xlane.f32.xlu1 %v455_v26  ;;  %453 = vadd.xlane.f32.xlu0 %v452_v27 }
  0x2c   : > { %v493_v0 = vadd.f32 %v492_v61, %v491_v58 }
  0x2d   : > { %824 = vmatmul.mubr.msk.f32.gmra.mrb[4].mxu0 %vm226_vm0, %v214_v16  ;;  %836 = vmatmul.mubr.msk.f32.gmra.mrb[4].mxu1 %vm226_vm0, %v222_v30 }
  0x2e   : > { %826 = vmatprep.mubr.msk.f32.mxu0 %vm226_vm0, %v215_v24  ;;  %838 = vmatprep.mubr.msk.f32.mxu1 %vm226_vm0, %v223_v31  ;;  %v494_v1 = vrot.slane %v493_v0, 1 }
  0x2f   : > { %462 = vadd.xlane.f32.xlu1 %v461_v33  ;;  %459 = vadd.xlane.f32.xlu0 %v458_v34 }
  0x30   : > { %v1158_v6 = vadd.f32 %v494_v1, %v493_v0 }
  0x31   : > { %827 = vmatmul.mubr.msk.f32.gmra.mrb[6].mxu0 %vm226_vm0, %v216_v25  ;;  %839 = vmatmul.mubr.msk.f32.gmra.mrb[6].mxu1 %vm226_vm0, %v224_v36 }
  0x33   : > { %468 = vadd.xlane.f32.xlu1 %v467_v37  ;;  %465 = vadd.xlane.f32.xlu0 %v464_v38 }
  0x37   : > { %474 = vadd.xlane.f32.xlu1 %v473_v41  ;;  %471 = vadd.xlane.f32.xlu0 %v470_v42 }
  0x3b   : > { %480 = vadd.xlane.f32.xlu1 %v479_v45  ;;  %477 = vadd.xlane.f32.xlu0 %v476_v46 }
  0x3f   : > { %486 = vadd.xlane.f32.xlu1 %v485_v49  ;;  %483 = vadd.xlane.f32.xlu0 %v482_v50 }
  0xae   : > { %v1145_v51 = vpop.xlane.xlu1 %447  ;;  %v442_v52 = vpop.xlane.xlu0 %441 }
  0xb4   : > { %v451_v53 = vpop.xlane.xlu1 %450  ;;  %v445_v54 = vpop.xlane.xlu0 %444 }
  0xb8   : > { %v1147_v55 = vpop.xlane.xlu1 %456  ;;  %v1149_v56 = vpop.xlane.xlu0 %453 }
  0xbc   : > { %v1153_v59 = vpop.xlane.xlu1 %462  ;;  %v1155_v60 = vpop.xlane.xlu0 %459 }
  0xc0   : > { %v469_v62 = vpop.xlane.xlu1 %468  ;;  %v466_v63 = vpop.xlane.xlu0 %465 }
  0xc4   : > { %v475_v2 = vpop.xlane.xlu1 %474  ;;  %v472_v3 = vpop.xlane.xlu0 %471 }
  0xc8   : > { %v481_v15 = vpop.xlane.xlu1 %480  ;;  %v478_v16 = vpop.xlane.xlu0 %477 }
  0xcc   : > { %v487_v49 = vpop.xlane.xlu1 %486  ;;  %v484_v50 = vpop.xlane.xlu0 %483 }
  0xf8   : > { %v819_v4 = vpop.f32.mrb[0].mxu0  ;;  %v831_v5 = vpop.f32.mrb[0].mxu1 }
  0xf9   : > { %v497_v7 = vmul.f32 2.0, %v819_v4  ;;  %v505_v8 = vmul.f32 2.0, %v831_v5  ;;  %v345_v9 = vpop.f32.mrb[1].mxu0  ;;  %v385_v10 = vpop.f32.mrb[1].mxu1 }
  0xfa   : > { %v496_v11 = vmul.f32 2.0, %v345_v9  ;;  %v504_v12 = vmul.f32 2.0, %v385_v10 }
  0xfb   : > { %v513_v13 = vsub.f32 %v497_v7, %v445_v54  ;;  %v521_v14 = vsub.f32 %v505_v8, %v469_v62 }
  0xfc   : > { %v512_v17 = vsub.f32 %v496_v11, %v442_v52  ;;  %v520_v18 = vsub.f32 %v504_v12, %v466_v63  ;;  %v822_v19 = vpop.f32.mrb[2].mxu0  ;;  %v834_v20 = vpop.f32.mrb[2].mxu1 }
  0xfd   : > { %v529_v21 = vsub.f32 %v513_v13, %v1158_v6  ;;  %v537_v22 = vsub.f32 %v521_v14, %v1158_v6  ;;  %v499_v23 = vmul.f32 2.0, %v822_v19  ;;  %v507_v24 = vmul.f32 2.0, %v834_v20  ;;  %v355_v25 = vpop.f32.mrb[3].mxu0  ;;  %v395_v26 = vpop.f32.mrb[3].mxu1 }
  0xfe   : > { %v528_v27 = vsub.f32 %v512_v17, %v1158_v6  ;;  %v536_v28 = vsub.f32 %v520_v18, %v1158_v6  ;;  %v498_v29 = vmul.f32 2.0, %v355_v25  ;;  %v506_v30 = vmul.f32 2.0, %v395_v26 }
  0xff   : > { %545 = vst [vmem:[%s1164_s9 + $0x8] sm:$0xff] %v529_v21  ;;  %553 = vst [vmem:[%s1164_s9 + $0x48] sm:$0xff] %v537_v22  ;;  %v515_v31 = vsub.f32 %v499_v23, %v451_v53  ;;  %v523_v32 = vsub.f32 %v507_v24, %v475_v2 }
 0x100   : > { %544 = vst [vmem:[%s1164_s9] sm:$0xff] %v528_v27  ;;  %552 = vst [vmem:[%s1164_s9 + $0x40] sm:$0xff] %v536_v28  ;;  %v514_v33 = vsub.f32 %v498_v29, %v1145_v51  ;;  %v522_v34 = vsub.f32 %v506_v30, %v472_v3  ;;  %v825_v35 = vpop.f32.mrb[4].mxu0  ;;  %v837_v36 = vpop.f32.mrb[4].mxu1 }
 0x101   : > { %v531_v37 = vsub.f32 %v515_v31, %v1158_v6  ;;  %v539_v38 = vsub.f32 %v523_v32, %v1158_v6  ;;  %v501_v39 = vmul.f32 2.0, %v825_v35  ;;  %v509_v40 = vmul.f32 2.0, %v837_v36  ;;  %v365_v41 = vpop.f32.mrb[5].mxu0  ;;  %v405_v42 = vpop.f32.mrb[5].mxu1 }
 0x102   : > { %v530_v43 = vsub.f32 %v514_v33, %v1158_v6  ;;  %v538_v44 = vsub.f32 %v522_v34, %v1158_v6  ;;  %v500_v45 = vmul.f32 2.0, %v365_v41  ;;  %v508_v46 = vmul.f32 2.0, %v405_v42 }
 0x103   : > { %547 = vst [vmem:[%s1164_s9 + $0x18] sm:$0xff] %v531_v37  ;;  %555 = vst [vmem:[%s1164_s9 + $0x58] sm:$0xff] %v539_v38  ;;  %v517_v47 = vsub.f32 %v501_v39, %v1147_v55  ;;  %v525_v48 = vsub.f32 %v509_v40, %v481_v15 }
 0x104   : > { %546 = vst [vmem:[%s1164_s9 + $0x10] sm:$0xff] %v530_v43  ;;  %554 = vst [vmem:[%s1164_s9 + $0x50] sm:$0xff] %v538_v44  ;;  %v516_v51 = vsub.f32 %v500_v45, %v1149_v56  ;;  %v524_v52 = vsub.f32 %v508_v46, %v478_v16  ;;  %v828_v53 = vpop.f32.mrb[6].mxu0  ;;  %v840_v54 = vpop.f32.mrb[6].mxu1 }
 0x105   : > { %v533_v57 = vsub.f32 %v517_v47, %v1158_v6  ;;  %v541_v58 = vsub.f32 %v525_v48, %v1158_v6  ;;  %v503_v61 = vmul.f32 2.0, %v828_v53  ;;  %v511_v55 = vmul.f32 2.0, %v840_v54  ;;  %v375_v62 = vpop.f32.mrb[7].mxu0  ;;  %v415_v63 = vpop.f32.mrb[7].mxu1 }
 0x106   : > { %v532_v0 = vsub.f32 %v516_v51, %v1158_v6  ;;  %v540_v1 = vsub.f32 %v524_v52, %v1158_v6  ;;  %v502_v56 = vmul.f32 2.0, %v375_v62  ;;  %v510_v2 = vmul.f32 2.0, %v415_v63  ;;  %566 = sbr.rel (!%p1061_p6) target bundleno = 278 (0x116), region = 32  ;;  %v649_v18 = vld [vmem:[%s1164_s9 + $0x48] sm:$0xff] (%p1061_p6) }
 0x107   : > { %549 = vst [vmem:[%s1164_s9 + $0x28] sm:$0xff] %v533_v57  ;;  %557 = vst [vmem:[%s1164_s9 + $0x68] sm:$0xff] %v541_v58  ;;  %v519_v3 = vsub.f32 %v503_v61, %v1153_v59  ;;  %v527_v4 = vsub.f32 %v511_v55, %v487_v49  ;;  %v631_v59 = vld [vmem:[%s1164_s9] sm:$0xff] (%p1061_p6) }
 0x108   : > { %548 = vst [vmem:[%s1164_s9 + $0x20] sm:$0xff] %v532_v0  ;;  %556 = vst [vmem:[%s1164_s9 + $0x60] sm:$0xff] %v540_v1  ;;  %v518_v5 = vsub.f32 %v502_v56, %v1155_v60  ;;  %v526_v7 = vsub.f32 %v510_v2, %v484_v50  ;;  %v633_v60 = vld [vmem:[%s1164_s9 + $0x8] sm:$0xff] (%p1061_p6)  ;;  %v647_v17 = vld [vmem:[%s1164_s9 + $0x40] sm:$0xff] (%p1061_p6) }
 0x109   : > { %v535_v8 = vsub.f32 %v519_v3, %v1158_v6  ;;  %v543_v9 = vsub.f32 %v527_v4, %v1158_v6  ;;  %632 = vst [vmem:[%s573_s20] sm:$0xff] (%p1061_p6), %v631_v59  ;;  %634 = vst [vmem:[%s573_s20 + $0x10] sm:$0xff] (%p1061_p6), %v633_v60 }
 0x10a   : > { %v534_v10 = vsub.f32 %v518_v5, %v1158_v6  ;;  %v542_v11 = vsub.f32 %v526_v7, %v1158_v6  ;;  %v637_v12 = vld [vmem:[%s1164_s9 + $0x18] sm:$0xff] (%p1061_p6)  ;;  %648 = vst [vmem:[%s573_s20 + $0x80] sm:$0xff] (%p1061_p6), %v647_v17  ;;  %650 = vst [vmem:[%s573_s20 + $0x90] sm:$0xff] (%p1061_p6), %v649_v18 }
 0x10b   : > { %551 = vst [vmem:[%s1164_s9 + $0x38] sm:$0xff] %v535_v8  ;;  %559 = vst [vmem:[%s1164_s9 + $0x78] sm:$0xff] %v543_v9  ;;  %v635_v6 = vld [vmem:[%s1164_s9 + $0x10] sm:$0xff] (%p1061_p6)  ;;  %v653_v20 = vld [vmem:[%s1164_s9 + $0x58] sm:$0xff] (%p1061_p6) }
 0x10c   : > { %550 = vst [vmem:[%s1164_s9 + $0x30] sm:$0xff] %v534_v10  ;;  %558 = vst [vmem:[%s1164_s9 + $0x70] sm:$0xff] %v542_v11  ;;  %v651_v19 = vld [vmem:[%s1164_s9 + $0x50] sm:$0xff] (%p1061_p6) }
 0x10d   : > { %636 = vst [vmem:[%s573_s20 + $0x20] sm:$0xff] %v635_v6  ;;  %638 = vst [vmem:[%s573_s20 + $0x30] sm:$0xff] %v637_v12 }
 0x10e   : > { %v641_v14 = vld [vmem:[%s1164_s9 + $0x28] sm:$0xff]  ;;  %652 = vst [vmem:[%s573_s20 + $0xa0] sm:$0xff] %v651_v19  ;;  %654 = vst [vmem:[%s573_s20 + $0xb0] sm:$0xff] %v653_v20 }
 0x10f   : > { %v639_v13 = vld [vmem:[%s1164_s9 + $0x20] sm:$0xff]  ;;  %v657_v22 = vld [vmem:[%s1164_s9 + $0x68] sm:$0xff]  ;;  %642 = vst [vmem:[%s573_s20 + $0x50] sm:$0xff] %v641_v14 }
 0x110   : > { %v655_v21 = vld [vmem:[%s1164_s9 + $0x60] sm:$0xff]  ;;  %640 = vst [vmem:[%s573_s20 + $0x40] sm:$0xff] %v639_v13  ;;  %658 = vst [vmem:[%s573_s20 + $0xd0] sm:$0xff] %v657_v22 }
 0x111   : > { %656 = vst [vmem:[%s573_s20 + $0xc0] sm:$0xff] %v655_v21 }
 0x112   : > { %v645_v16 = vld [vmem:[%s1164_s9 + $0x38] sm:$0xff] }
 0x113   : > { %v643_v15 = vld [vmem:[%s1164_s9 + $0x30] sm:$0xff]  ;;  %646 = vst [vmem:[%s573_s20 + $0x70] sm:$0xff] %v645_v16  ;;  %v661_v24 = vld [vmem:[%s1164_s9 + $0x78] sm:$0xff] }
 0x114   : > { %v659_v23 = vld [vmem:[%s1164_s9 + $0x70] sm:$0xff]  ;;  %644 = vst [vmem:[%s573_s20 + $0x60] sm:$0xff] %v643_v15  ;;  %662 = vst [vmem:[%s573_s20 + $0xf0] sm:$0xff] %v661_v24 }
 0x115   : > { %660 = vst [vmem:[%s573_s20 + $0xe0] sm:$0xff] %v659_v23 }
 0x116 PF: > { %s12_s17 = sadd.s32 1, %s985_s17   ;;  %s1254_s9 = smov %s957_s10 }
 0x117   : > { %p9_p13 = scmp.ge.s32.totalorder %s12_s17, 10   ;;  %s1255_s10 = smov %s1075_s29 }
 0x118   : > { %s1256_s11 = smov %s973_s14  ;;  %s1257_s12 = smov %s977_s15 }
 0x119   : > { %s1258_s13 = smov %s981_s16  ;;  %s1259_s14 = smov %s1263_s18 }
 0x11a   : > { %s1260_s15 = smov %s1267_s19  ;;  %s1261_s16 = smov %s1271_s21 }
 0x11b   :  { %11 = sbr.rel (!%p9_p13) target bundleno = 5 (0x5), region = 99 }

// kernel: dgcnn_leaky_forward.3
= control target key start
LH: loop header
LB: loop body
LE: loop exit
PB: predicated region body
PF: predicated region fallthrough
CT: control target
= control target key end

     0   :  { %s18573_s0 = inlined_call_operand.vmem [shape: bf16[2,10,256,6], index: 0, kind: input, shape index: {}]   ;;  %s18574_s1 = inlined_call_operand.vmem [shape: bf16[6,64], index: 1, kind: input, shape index: {}]   ;;  %s18575_s2 = inlined_call_operand.vmem [shape: f32[1,64], index: 2, kind: input, shape index: {}]   ;;  %s18576_s3 = inlined_call_operand.vmem [shape: bf16[64,64], index: 3, kind: input, shape index: {}]   ;;  %s18577_s4 = inlined_call_operand.vmem [shape: f32[1,64], index: 4, kind: input, shape index: {}]   ;;  %s18578_s5 = inlined_call_operand.vmem [shape: bf16[64,128], index: 5, kind: input, shape index: {}]   ;;  %s18579_s6 = inlined_call_operand.vmem [shape: f32[1,128], index: 6, kind: input, shape index: {}]   ;;  %s18580_s7 = inlined_call_operand.vmem [shape: bf16[128,256], index: 7, kind: input, shape index: {}]   ;;  %s18581_s8 = inlined_call_operand.vmem [shape: f32[1,256], index: 8, kind: input, shape index: {}]   ;;  %s18582_s9 = inlined_call_operand.vmem [shape: bf16[512,512], index: 9, kind: input, shape index: {}]   ;;  %s18583_s10 = inlined_call_operand.vmem [shape: f32[1,512], index: 10, kind: input, shape index: {}]   ;;  %s18584_s11 = inlined_call_operand.vmem [shape: f32[2,256,512], index: 11, kind: output, shape index: {0}]   ;;  %s18585_s12 = inlined_call_operand.vmem [shape: f32[2,256,256], index: 12, kind: output, shape index: {1}]   ;;  %s18586_s13 = inlined_call_operand.vmem [shape: f32[2,256,128], index: 13, kind: output, shape index: {2}]  }
   0x1   :  { %18839 = sst [smem:[#allocation125_spill]] %s18583_s10 }
   0x2   :  { %18840 = sst [smem:[#allocation126_spill]] %s18584_s11 }
   0x3   :  { %18841 = sst [smem:[#allocation127_spill]] %s18585_s12 }
   0x4   :  { %s11808_s25 = smov 0   ;;  %s11810_s26 = smov 0  }
   0x5   :  { %s11812_s27 = smov 0   ;;  %s11814_s28 = smov 0  }
   0x6   :  { %s11816_s29 = smov 0   ;;  %s11818_s30 = smov 0  }
   0x7   :  { %s11820_s14 = smov 0  }
   0x8 LB: > { %s33_s15 = sadd.s32 1, %s11726_s29  ;;  %s36_s16 = sadd.s32 1, %s11730_s30  ;;  %s11734_s14 = sphi %s11820_s14, %s24_s14   ;;  %s11730_s30 = sphi %s11818_s30, %s19710_s30   ;;  %s11726_s29 = sphi %s11816_s29, %s19709_s29   ;;  %s11722_s28 = sphi %s11814_s28, %s19708_s28   ;;  %s11718_s27 = sphi %s11812_s27, %s19707_s27   ;;  %s11714_s26 = sphi %s11810_s26, %s19706_s26   ;;  %s11710_s25 = sphi %s11808_s25, %s19705_s25  }
   0x9   : > { %p34_p0 = scmp.ge.s32.totalorder %s33_s15, 2  ;;  %p52_p1 = scmp.ne.s32.totalorder %s11714_s26, %s11710_s25 }
   0xa   : > { %p53_p2 = scmp.eq.s32.totalorder %s11734_s14, 0  ;;  %s45_s20 = sadd.s32 1, %s11714_s26 }
   0xb   : > { %s19712_s15 = smov (%p34_p0, %s33_s15), 0  ;;  %s19714_s16 = smov (!%p34_p0, %s36_s16), %s11730_s30 }
   0xc   : > { %18842 = sst [smem:[#allocation3_spill]] %s19712_s15  ;;  %p54_p3 = por %p53_p2, %p52_p1 }
   0xd   : > { %p38_p4 = scmp.ge.s32.totalorder %s19714_s16, 2  ;;  %s41_s17 = ssub.s32 %s11726_s29, %s19712_s15 }
   0xe   : > { %p9893_p6 = scmp.ge.s32.totalorder %s11734_s14, 4 }
   0xf   : > { %s19716_s16 = smov (%p38_p4, %s19714_s16), 0 }
  0x10   : > { %18843 = sst [smem:[#allocation4_spill]] %s19716_s16  ;;  %s40_s18 = ssub.s32 %s11730_s30, %s19716_s16 }
  0x11   : > { %s42_s19 = sor.u32 %s41_s17, %s40_s18  ;;  %402 = sbr.rel (%p9893_p6) target bundleno = 72 (0x48), region = 56 }
  0x12   : > { %p43_p5 = scmp.eq.s32.totalorder %s42_s19, 0 }
  0x14   : > { %s11859_s21 = scalar_select %p43_p5, %s11714_s26, %s45_s20  }
  0x18   : > { %405 = sbr.rel (!%p54_p3) target bundleno = 72 (0x48), region = 60  ;;  %s407_s22 = sand.u32 (%p54_p3), 1, %s11714_s26  }
  0x19   : > { %s11269_s23 = smul.u32 (%p54_p3), 640, %s407_s22  ;;  %s9894_s24 = sshll.u32 (%p54_p3), %s11726_s29, 4 }
  0x1a   : > { %s11270_s15 = smul.u32 (%p54_p3), 320, %s11730_s30 }
  0x1b   : > { %s11873_s18 = scalar_lea.vmem (%p54_p3), [#allocation2], %s11269_s23 }
  0x1c   : > { %s412_s11 = sadd.s32 (%p54_p3), %s11270_s15, %s9894_s24 }
  0x1d   : > { %s9895_s10 = sshll.u32 (%p54_p3), %s412_s11, 2 }
  0x1e   : > { %s11868_s17 = scalar_lea.vmem (%p54_p3), %s18573_s0, %s9895_s10 }
  0x1f   : > { %v430_v0 = vld [vmem:[%s11868_s17] sm:$0xff]   ;;  %v434_v1 = vld [vmem:[%s11868_s17 + $0x8] sm:$0xff]   ;;  %v438_v2 = vld [vmem:[%s11868_s17 + $0x10] sm:$0xff]  }
  0x20   : > { %431 = vst [vmem:[%s11873_s18] sm:$0xff] %v430_v0   ;;  %435 = vst [vmem:[%s11873_s18 + $0x8] sm:$0xff] %v434_v1   ;;  %v442_v3 = vld [vmem:[%s11868_s17 + $0x18] sm:$0xff]   ;;  %v446_v4 = vld [vmem:[%s11868_s17 + $0x20] sm:$0xff]  }
  0x21   : > { %439 = vst [vmem:[%s11873_s18 + $0x10] sm:$0xff] %v438_v2   ;;  %v450_v5 = vld [vmem:[%s11868_s17 + $0x28] sm:$0xff]   ;;  %443 = vst [vmem:[%s11873_s18 + $0x18] sm:$0xff] %v442_v3   ;;  %v454_v6 = vld [vmem:[%s11868_s17 + $0x30] sm:$0xff]  }
  0x22   : > { %447 = vst [vmem:[%s11873_s18 + $0x20] sm:$0xff] %v446_v4   ;;  %451 = vst [vmem:[%s11873_s18 + $0x28] sm:$0xff] %v450_v5   ;;  %v458_v7 = vld [vmem:[%s11868_s17 + $0x38] sm:$0xff]   ;;  %v462_v8 = vld [vmem:[%s11868_s17 + $0x80] sm:$0xff]  }
  0x23   : > { %455 = vst [vmem:[%s11873_s18 + $0x30] sm:$0xff] %v454_v6   ;;  %459 = vst [vmem:[%s11873_s18 + $0x38] sm:$0xff] %v458_v7   ;;  %v466_v9 = vld [vmem:[%s11868_s17 + $0x88] sm:$0xff]   ;;  %v470_v10 = vld [vmem:[%s11868_s17 + $0x90] sm:$0xff]  }
  0x24   : > { %463 = vst [vmem:[%s11873_s18 + $0x40] sm:$0xff] %v462_v8   ;;  %v474_v11 = vld [vmem:[%s11868_s17 + $0x98] sm:$0xff]   ;;  %467 = vst [vmem:[%s11873_s18 + $0x48] sm:$0xff] %v466_v9   ;;  %v478_v12 = vld [vmem:[%s11868_s17 + $0xa0] sm:$0xff]  }
  0x25   : > { %471 = vst [vmem:[%s11873_s18 + $0x50] sm:$0xff] %v470_v10   ;;  %475 = vst [vmem:[%s11873_s18 + $0x58] sm:$0xff] %v474_v11   ;;  %v482_v13 = vld [vmem:[%s11868_s17 + $0xa8] sm:$0xff]   ;;  %v486_v14 = vld [vmem:[%s11868_s17 + $0xb0] sm:$0xff]  }
  0x26   : > { %479 = vst [vmem:[%s11873_s18 + $0x60] sm:$0xff] %v478_v12   ;;  %483 = vst [vmem:[%s11873_s18 + $0x68] sm:$0xff] %v482_v13   ;;  %v490_v15 = vld [vmem:[%s11868_s17 + $0xb8] sm:$0xff]   ;;  %v494_v16 = vld [vmem:[%s11868_s17 + $0x100] sm:$0xff]  }
  0x27   : > { %487 = vst [vmem:[%s11873_s18 + $0x70] sm:$0xff] %v486_v14   ;;  %v498_v17 = vld [vmem:[%s11868_s17 + $0x108] sm:$0xff]   ;;  %491 = vst [vmem:[%s11873_s18 + $0x78] sm:$0xff] %v490_v15   ;;  %v502_v18 = vld [vmem:[%s11868_s17 + $0x110] sm:$0xff]  }
  0x28   : > { %495 = vst [vmem:[%s11873_s18 + $0x80] sm:$0xff] %v494_v16   ;;  %499 = vst [vmem:[%s11873_s18 + $0x88] sm:$0xff] %v498_v17   ;;  %v506_v19 = vld [vmem:[%s11868_s17 + $0x118] sm:$0xff]   ;;  %v510_v20 = vld [vmem:[%s11868_s17 + $0x120] sm:$0xff]  }
  0x29   : > { %503 = vst [vmem:[%s11873_s18 + $0x90] sm:$0xff] %v502_v18   ;;  %507 = vst [vmem:[%s11873_s18 + $0x98] sm:$0xff] %v506_v19   ;;  %v514_v21 = vld [vmem:[%s11868_s17 + $0x128] sm:$0xff]   ;;  %v518_v22 = vld [vmem:[%s11868_s17 + $0x130] sm:$0xff]  }
  0x2a   : > { %511 = vst [vmem:[%s11873_s18 + $0xa0] sm:$0xff] %v510_v20   ;;  %v522_v23 = vld [vmem:[%s11868_s17 + $0x138] sm:$0xff]   ;;  %515 = vst [vmem:[%s11873_s18 + $0xa8] sm:$0xff] %v514_v21   ;;  %v526_v24 = vld [vmem:[%s11868_s17 + $0x180] sm:$0xff]  }
  0x2b   : > { %519 = vst [vmem:[%s11873_s18 + $0xb0] sm:$0xff] %v518_v22   ;;  %523 = vst [vmem:[%s11873_s18 + $0xb8] sm:$0xff] %v522_v23   ;;  %v530_v25 = vld [vmem:[%s11868_s17 + $0x188] sm:$0xff]   ;;  %v534_v26 = vld [vmem:[%s11868_s17 + $0x190] sm:$0xff]  }
  0x2c   : > { %527 = vst [vmem:[%s11873_s18 + $0xc0] sm:$0xff] %v526_v24   ;;  %531 = vst [vmem:[%s11873_s18 + $0xc8] sm:$0xff] %v530_v25   ;;  %v538_v27 = vld [vmem:[%s11868_s17 + $0x198] sm:$0xff]   ;;  %v542_v28 = vld [vmem:[%s11868_s17 + $0x1a0] sm:$0xff]  }
  0x2d   : > { %535 = vst [vmem:[%s11873_s18 + $0xd0] sm:$0xff] %v534_v26   ;;  %v546_v29 = vld [vmem:[%s11868_s17 + $0x1a8] sm:$0xff]   ;;  %539 = vst [vmem:[%s11873_s18 + $0xd8] sm:$0xff] %v538_v27   ;;  %v550_v30 = vld [vmem:[%s11868_s17 + $0x1b0] sm:$0xff]  }
  0x2e   : > { %543 = vst [vmem:[%s11873_s18 + $0xe0] sm:$0xff] %v542_v28   ;;  %547 = vst [vmem:[%s11873_s18 + $0xe8] sm:$0xff] %v546_v29   ;;  %v554_v31 = vld [vmem:[%s11868_s17 + $0x1b8] sm:$0xff]   ;;  %v558_v32 = vld [vmem:[%s11868_s17 + $0x200] sm:$0xff]  }
  0x2f   : > { %551 = vst [vmem:[%s11873_s18 + $0xf0] sm:$0xff] %v550_v30   ;;  %555 = vst [vmem:[%s11873_s18 + $0xf8] sm:$0xff] %v554_v31   ;;  %v562_v33 = vld [vmem:[%s11868_s17 + $0x208] sm:$0xff]   ;;  %v566_v34 = vld [vmem:[%s11868_s17 + $0x210] sm:$0xff]  }
  0x30   : > { %559 = vst [vmem:[%s11873_s18 + $0x100] sm:$0xff] %v558_v32   ;;  %v570_v35 = vld [vmem:[%s11868_s17 + $0x218] sm:$0xff]   ;;  %563 = vst [vmem:[%s11873_s18 + $0x108] sm:$0xff] %v562_v33   ;;  %v574_v36 = vld [vmem:[%s11868_s17 + $0x220] sm:$0xff]  }
  0x31   : > { %567 = vst [vmem:[%s11873_s18 + $0x110] sm:$0xff] %v566_v34   ;;  %571 = vst [vmem:[%s11873_s18 + $0x118] sm:$0xff] %v570_v35   ;;  %v578_v37 = vld [vmem:[%s11868_s17 + $0x228] sm:$0xff]   ;;  %v582_v38 = vld [vmem:[%s11868_s17 + $0x230] sm:$0xff]  }
  0x32   : > { %575 = vst [vmem:[%s11873_s18 + $0x120] sm:$0xff] %v574_v36   ;;  %579 = vst [vmem:[%s11873_s18 + $0x128] sm:$0xff] %v578_v37   ;;  %v586_v39 = vld [vmem:[%s11868_s17 + $0x238] sm:$0xff]   ;;  %v590_v40 = vld [vmem:[%s11868_s17 + $0x280] sm:$0xff]  }
  0x33   : > { %583 = vst [vmem:[%s11873_s18 + $0x130] sm:$0xff] %v582_v38   ;;  %v594_v41 = vld [vmem:[%s11868_s17 + $0x288] sm:$0xff]   ;;  %587 = vst [vmem:[%s11873_s18 + $0x138] sm:$0xff] %v586_v39   ;;  %v598_v42 = vld [vmem:[%s11868_s17 + $0x290] sm:$0xff]  }
  0x34   : > { %591 = vst [vmem:[%s11873_s18 + $0x140] sm:$0xff] %v590_v40   ;;  %595 = vst [vmem:[%s11873_s18 + $0x148] sm:$0xff] %v594_v41   ;;  %v602_v43 = vld [vmem:[%s11868_s17 + $0x298] sm:$0xff]   ;;  %v606_v44 = vld [vmem:[%s11868_s17 + $0x2a0] sm:$0xff]  }
  0x35   : > { %599 = vst [vmem:[%s11873_s18 + $0x150] sm:$0xff] %v598_v42   ;;  %603 = vst [vmem:[%s11873_s18 + $0x158] sm:$0xff] %v602_v43   ;;  %v610_v45 = vld [vmem:[%s11868_s17 + $0x2a8] sm:$0xff]   ;;  %v614_v46 = vld [vmem:[%s11868_s17 + $0x2b0] sm:$0xff]  }
  0x36   : > { %607 = vst [vmem:[%s11873_s18 + $0x160] sm:$0xff] %v606_v44   ;;  %v618_v47 = vld [vmem:[%s11868_s17 + $0x2b8] sm:$0xff]   ;;  %611 = vst [vmem:[%s11873_s18 + $0x168] sm:$0xff] %v610_v45   ;;  %v622_v48 = vld [vmem:[%s11868_s17 + $0x300] sm:$0xff]  }
  0x37   : > { %615 = vst [vmem:[%s11873_s18 + $0x170] sm:$0xff] %v614_v46   ;;  %619 = vst [vmem:[%s11873_s18 + $0x178] sm:$0xff] %v618_v47   ;;  %v626_v49 = vld [vmem:[%s11868_s17 + $0x308] sm:$0xff]   ;;  %v630_v50 = vld [vmem:[%s11868_s17 + $0x310] sm:$0xff]  }
  0x38   : > { %623 = vst [vmem:[%s11873_s18 + $0x180] sm:$0xff] %v622_v48   ;;  %627 = vst [vmem:[%s11873_s18 + $0x188] sm:$0xff] %v626_v49   ;;  %v634_v51 = vld [vmem:[%s11868_s17 + $0x318] sm:$0xff]   ;;  %v638_v52 = vld [vmem:[%s11868_s17 + $0x320] sm:$0xff]  }
  0x39   : > { %631 = vst [vmem:[%s11873_s18 + $0x190] sm:$0xff] %v630_v50   ;;  %v642_v53 = vld [vmem:[%s11868_s17 + $0x328] sm:$0xff]   ;;  %635 = vst [vmem:[%s11873_s18 + $0x198] sm:$0xff] %v634_v51   ;;  %v646_v54 = vld [vmem:[%s11868_s17 + $0x330] sm:$0xff]  }
  0x3a   : > { %639 = vst [vmem:[%s11873_s18 + $0x1a0] sm:$0xff] %v638_v52   ;;  %643 = vst [vmem:[%s11873_s18 + $0x1a8] sm:$0xff] %v642_v53   ;;  %v650_v55 = vld [vmem:[%s11868_s17 + $0x338] sm:$0xff]   ;;  %v654_v56 = vld [vmem:[%s11868_s17 + $0x380] sm:$0xff]  }
  0x3b   : > { %647 = vst [vmem:[%s11873_s18 + $0x1b0] sm:$0xff] %v646_v54   ;;  %651 = vst [vmem:[%s11873_s18 + $0x1b8] sm:$0xff] %v650_v55   ;;  %v658_v57 = vld [vmem:[%s11868_s17 + $0x388] sm:$0xff]   ;;  %v662_v58 = vld [vmem:[%s11868_s17 + $0x390] sm:$0xff]  }
  0x3c   : > { %655 = vst [vmem:[%s11873_s18 + $0x1c0] sm:$0xff] %v654_v56   ;;  %v666_v59 = vld [vmem:[%s11868_s17 + $0x398] sm:$0xff]   ;;  %659 = vst [vmem:[%s11873_s18 + $0x1c8] sm:$0xff] %v658_v57   ;;  %v670_v60 = vld [vmem:[%s11868_s17 + $0x3a0] sm:$0xff]  }
  0x3d   : > { %663 = vst [vmem:[%s11873_s18 + $0x1d0] sm:$0xff] %v662_v58   ;;  %667 = vst [vmem:[%s11873_s18 + $0x1d8] sm:$0xff] %v666_v59   ;;  %v674_v61 = vld [vmem:[%s11868_s17 + $0x3a8] sm:$0xff]   ;;  %v678_v62 = vld [vmem:[%s11868_s17 + $0x3b0] sm:$0xff]  }
  0x3e   : > { %671 = vst [vmem:[%s11873_s18 + $0x1e0] sm:$0xff] %v670_v60   ;;  %675 = vst [vmem:[%s11873_s18 + $0x1e8] sm:$0xff] %v674_v61   ;;  %v682_v63 = vld [vmem:[%s11868_s17 + $0x3b8] sm:$0xff]   ;;  %v686_v0 = vld [vmem:[%s11868_s17 + $0x400] sm:$0xff]  }
  0x3f   : > { %679 = vst [vmem:[%s11873_s18 + $0x1f0] sm:$0xff] %v678_v62   ;;  %v690_v1 = vld [vmem:[%s11868_s17 + $0x408] sm:$0xff]   ;;  %683 = vst [vmem:[%s11873_s18 + $0x1f8] sm:$0xff] %v682_v63   ;;  %v694_v2 = vld [vmem:[%s11868_s17 + $0x410] sm:$0xff]  }
  0x40   : > { %687 = vst [vmem:[%s11873_s18 + $0x200] sm:$0xff] %v686_v0   ;;  %691 = vst [vmem:[%s11873_s18 + $0x208] sm:$0xff] %v690_v1   ;;  %v698_v3 = vld [vmem:[%s11868_s17 + $0x418] sm:$0xff]   ;;  %v702_v4 = vld [vmem:[%s11868_s17 + $0x420] sm:$0xff]  }
  0x41   : > { %695 = vst [vmem:[%s11873_s18 + $0x210] sm:$0xff] %v694_v2   ;;  %699 = vst [vmem:[%s11873_s18 + $0x218] sm:$0xff] %v698_v3   ;;  %v706_v5 = vld [vmem:[%s11868_s17 + $0x428] sm:$0xff]   ;;  %v710_v6 = vld [vmem:[%s11868_s17 + $0x430] sm:$0xff]  }
  0x42   : > { %703 = vst [vmem:[%s11873_s18 + $0x220] sm:$0xff] %v702_v4   ;;  %v714_v7 = vld [vmem:[%s11868_s17 + $0x438] sm:$0xff]   ;;  %707 = vst [vmem:[%s11873_s18 + $0x228] sm:$0xff] %v706_v5   ;;  %v718_v8 = vld [vmem:[%s11868_s17 + $0x480] sm:$0xff]  }
  0x43   : > { %711 = vst [vmem:[%s11873_s18 + $0x230] sm:$0xff] %v710_v6   ;;  %715 = vst [vmem:[%s11873_s18 + $0x238] sm:$0xff] %v714_v7   ;;  %v722_v9 = vld [vmem:[%s11868_s17 + $0x488] sm:$0xff]   ;;  %v726_v10 = vld [vmem:[%s11868_s17 + $0x490] sm:$0xff]  }
  0x44   : > { %719 = vst [vmem:[%s11873_s18 + $0x240] sm:$0xff] %v718_v8   ;;  %723 = vst [vmem:[%s11873_s18 + $0x248] sm:$0xff] %v722_v9   ;;  %v730_v11 = vld [vmem:[%s11868_s17 + $0x498] sm:$0xff]   ;;  %v734_v12 = vld [vmem:[%s11868_s17 + $0x4a0] sm:$0xff]  }
  0x45   : > { %727 = vst [vmem:[%s11873_s18 + $0x250] sm:$0xff] %v726_v10   ;;  %v738_v13 = vld [vmem:[%s11868_s17 + $0x4a8] sm:$0xff]   ;;  %731 = vst [vmem:[%s11873_s18 + $0x258] sm:$0xff] %v730_v11   ;;  %v742_v14 = vld [vmem:[%s11868_s17 + $0x4b0] sm:$0xff]  }
  0x46   : > { %735 = vst [vmem:[%s11873_s18 + $0x260] sm:$0xff] %v734_v12   ;;  %739 = vst [vmem:[%s11873_s18 + $0x268] sm:$0xff] %v738_v13   ;;  %v746_v15 = vld [vmem:[%s11868_s17 + $0x4b8] sm:$0xff]  }
  0x47   : > { %743 = vst [vmem:[%s11873_s18 + $0x270] sm:$0xff] %v742_v14   ;;  %747 = vst [vmem:[%s11873_s18 + $0x278] sm:$0xff] %v746_v15  }
  0x48 PF: > { %p9896_p7 = scmp.ge.s32.totalorder %s11734_s14, 1  ;;  %p1091_p8 = scmp.lt.s32.totalorder %s11734_s14, 5 }
  0x4a   : > { %p1092_p9 = pnand %p9896_p7, %p1091_p8 }
  0x4c   : > { %1095 = sbr.rel (%p1092_p9) target bundleno = 2083 (0x823), region = 101 }
  0x53   : > { %v1359_v16 = vld [vmem:[%s18574_s1] sm:$0x7]  ;;  %vm2008_vm0 = vcmask 1042432   ;;  %s1098_s12 = sand.u32 1, %s11710_s25   ;;  %vm1767_vm1 = vcmask 48128   ;;  %v11392_v19 = vld [vmem:[%s18576_s3 + $0x8] sm:$0xff]  }
  0x54   : > { %v11371_v17 = vld [vmem:[%s18576_s3] sm:$0xff]   ;;  %11268 = vmatprep.subr.msk.bf16.mxu0 %vm2008_vm0, %v1359_v16  ;;  %v2010_v18 = vsel %vm2008_vm0, %v1359_v16, 0  ;;  %s11271_s19 = smul.u32 640, %s1098_s12  ;;  %v11413_v33 = vld [vmem:[%s18576_s3 + $0x10] sm:$0xff]   ;;  %v11434_v53 = vld [vmem:[%s18576_s3 + $0x18] sm:$0xff]   ;;  %vm3268_vm2 = vcmask 523264  }
  0x55   : > { %10635 = vmatpush3.bf16.msra.mxu0 %v2010_v18  ;;  %11132 = vmatprep.subr.bf16.mxu1 %v11371_v17  ;;  %v12164_v13 = vld [vmem:[%s18575_s2] ss:$0 sm:$0xff]  ;;  %s11737_s10 = smov 64   ;;  %p1167_p10 = scmp.lt.s32.totalorder %s11722_s28, 1 }
  0x56   : > { %10796 = vmatprep.subr.bf16.mxu0 %v11371_v17  ;;  %11136 = vmatpush3.bf16.msra.mxu1 %v11371_v17  ;;  %s12044_s23 = scalar_lea.vmem [#allocation2], %s11271_s19 }
  0x57   : > { %v11370_v20 = vld [vmem:[%s12044_s23] sm:$0xff]   ;;  %11133 = vmatprep.subr.bf16.mxu1 %v11392_v19  ;;  %v11372_v21 = vld [vmem:[%s12044_s23 + $0x8] sm:$0xff]   ;;  %v11373_v22 = vld [vmem:[%s12044_s23 + $0x10] sm:$0xff]   ;;  %s19718_s28 = smov (!%p1167_p10, %s11722_s28), 1 }
  0x58   : > { %10636 = vmatprep.mubr.msk.bf16.mxu0 %vm1767_vm1, %v11370_v20  ;;  %v11374_v23 = vld [vmem:[%s12044_s23 + $0x18] sm:$0xff]   ;;  %v11375_v24 = vld [vmem:[%s12044_s23 + $0x20] sm:$0xff]   ;;  %v11376_v25 = vld [vmem:[%s12044_s23 + $0x28] sm:$0xff]   ;;  %s9906_s24 = sshll.u32 %s19718_s28, 5  ;;  %s9903_s16 = sshll.u32 %s19718_s28, 6 }
  0x59   : > { %10637 = vmatmul.mubr.msk.bf16.vlgmr.msra.gmra.mrb[0].mxu0 %vm1767_vm1, %v11372_v21  ;;  %v11377_v26 = vld [vmem:[%s12044_s23 + $0x30] sm:$0xff]   ;;  %v11378_v27 = vld [vmem:[%s12044_s23 + $0x38] sm:$0xff]   ;;  %v11379_v28 = vld [vmem:[%s12044_s23 + $0x40] sm:$0xff]   ;;  %s9899_s12 = sshll.u32 %s19718_s28, 7 }
  0x5a   : > { %11137 = vmatpush3.bf16.msra.mxu1 %v11392_v19  ;;  %10797 = vmatpush3.bf16.msra.mxu0 %v11371_v17  ;;  %v11380_v29 = vld [vmem:[%s12044_s23 + $0x48] sm:$0xff]   ;;  %v11381_v30 = vld [vmem:[%s12044_s23 + $0x50] sm:$0xff]   ;;  %v11382_v31 = vld [vmem:[%s12044_s23 + $0x58] sm:$0xff]  }
  0x5b   : > { %10640 = vmatprep.mubr.msk.bf16.mxu0 %vm1767_vm1, %v11373_v22  ;;  %10798 = vmatprep.subr.bf16.mxu0 %v11392_v19  ;;  %v11383_v32 = vld [vmem:[%s12044_s23 + $0x60] sm:$0xff]   ;;  %v11384_v34 = vld [vmem:[%s12044_s23 + $0x68] sm:$0xff]   ;;  %v11385_v35 = vld [vmem:[%s12044_s23 + $0x70] sm:$0xff]  }
  0x5c   : > { %11134 = vmatprep.subr.bf16.mxu1 %v11413_v33  ;;  %v11386_v36 = vld [vmem:[%s12044_s23 + $0x78] sm:$0xff]   ;;  %v11387_v37 = vld [vmem:[%s12044_s23 + $0x80] sm:$0xff]   ;;  %v11388_v38 = vld [vmem:[%s12044_s23 + $0x88] sm:$0xff]  }
  0x5d   : > { %v11389_v39 = vld [vmem:[%s12044_s23 + $0x90] sm:$0xff]   ;;  %v11390_v40 = vld [vmem:[%s12044_s23 + $0x98] sm:$0xff]   ;;  %v11391_v41 = vld [vmem:[%s12044_s23 + $0xa0] sm:$0xff]  }
  0x5e   : > { %10799 = vmatpush3.bf16.msra.mxu0 %v11392_v19  ;;  %11138 = vmatpush3.bf16.msra.mxu1 %v11413_v33  ;;  %v11393_v42 = vld [vmem:[%s12044_s23 + $0xa8] sm:$0xff]   ;;  %v11394_v43 = vld [vmem:[%s12044_s23 + $0xb0] sm:$0xff]   ;;  %v11395_v44 = vld [vmem:[%s12044_s23 + $0xb8] sm:$0xff]  }
  0x5f   : > { %10800 = vmatprep.subr.bf16.mxu0 %v11413_v33  ;;  %v11396_v45 = vld [vmem:[%s12044_s23 + $0xc0] sm:$0xff]   ;;  %v11397_v46 = vld [vmem:[%s12044_s23 + $0xc8] sm:$0xff]   ;;  %v11398_v47 = vld [vmem:[%s12044_s23 + $0xd0] sm:$0xff]   ;;  %11135 = vmatprep.subr.bf16.mxu1 %v11434_v53 }
  0x60   : > { %v11399_v48 = vld [vmem:[%s12044_s23 + $0xd8] sm:$0xff]   ;;  %v11400_v49 = vld [vmem:[%s12044_s23 + $0xe0] sm:$0xff]   ;;  %v11401_v50 = vld [vmem:[%s12044_s23 + $0xe8] sm:$0xff]  }
  0x61   : > { %10641 = vmatmul.mubr.msk.bf16.gmra.mrb[4].mxu0 %vm1767_vm1, %v11374_v23  ;;  %v11402_v51 = vld [vmem:[%s12044_s23 + $0xf0] sm:$0xff]   ;;  %v11403_v52 = vld [vmem:[%s12044_s23 + $0xf8] sm:$0xff]   ;;  %v11404_v54 = vld [vmem:[%s12044_s23 + $0x100] sm:$0xff]  }
  0x62   : > { %10644 = vmatprep.mubr.msk.bf16.mxu0 %vm1767_vm1, %v11375_v24  ;;  %10801 = vmatpush3.bf16.msra.mxu0 %v11413_v33  ;;  %v11405_v55 = vld [vmem:[%s12044_s23 + $0x108] sm:$0xff]   ;;  %v11406_v56 = vld [vmem:[%s12044_s23 + $0x110] sm:$0xff]   ;;  %v11407_v57 = vld [vmem:[%s12044_s23 + $0x118] sm:$0xff]  }
  0x63   : > { %10802 = vmatprep.subr.bf16.mxu0 %v11434_v53  ;;  %11139 = vmatpush3.bf16.msra.mxu1 %v11434_v53  ;;  %v11408_v58 = vld [vmem:[%s12044_s23 + $0x120] sm:$0xff]   ;;  %v11409_v59 = vld [vmem:[%s12044_s23 + $0x128] sm:$0xff]   ;;  %v11410_v60 = vld [vmem:[%s12044_s23 + $0x130] sm:$0xff]  }
  0x64   : > { %v11411_v61 = vld [vmem:[%s12044_s23 + $0x138] sm:$0xff]   ;;  %v11412_v62 = vld [vmem:[%s12044_s23 + $0x140] sm:$0xff]   ;;  %v11414_v63 = vld [vmem:[%s12044_s23 + $0x148] sm:$0xff]  }
  0x65   : > { %v11415_v0 = vld [vmem:[%s12044_s23 + $0x150] sm:$0xff]   ;;  %v11416_v1 = vld [vmem:[%s12044_s23 + $0x158] sm:$0xff]   ;;  %v11417_v2 = vld [vmem:[%s12044_s23 + $0x160] sm:$0xff]  }
  0x66   : > { %10803 = vmatpush3.bf16.msra.mxu0 %v11434_v53  ;;  %v11418_v3 = vld [vmem:[%s12044_s23 + $0x168] sm:$0xff]   ;;  %v11419_v4 = vld [vmem:[%s12044_s23 + $0x170] sm:$0xff]   ;;  %v11420_v5 = vld [vmem:[%s12044_s23 + $0x178] sm:$0xff]  }
  0x67   : > { %v11421_v6 = vld [vmem:[%s12044_s23 + $0x180] sm:$0xff]   ;;  %v11422_v7 = vld [vmem:[%s12044_s23 + $0x188] sm:$0xff]   ;;  %v11423_v8 = vld [vmem:[%s12044_s23 + $0x190] sm:$0xff]  }
  0x68   : > { %v11424_v9 = vld [vmem:[%s12044_s23 + $0x198] sm:$0xff]   ;;  %v11425_v10 = vld [vmem:[%s12044_s23 + $0x1a0] sm:$0xff]   ;;  %v11426_v11 = vld [vmem:[%s12044_s23 + $0x1a8] sm:$0xff]  }
  0x69   : > { %10645 = vmatmul.mubr.msk.bf16.gmra.mrb[8].mxu0 %vm1767_vm1, %v11376_v25  ;;  %v11427_v12 = vld [vmem:[%s12044_s23 + $0x1b0] sm:$0xff]   ;;  %v11428_v17 = vld [vmem:[%s12044_s23 + $0x1b8] sm:$0xff]   ;;  %v11429_v20 = vld [vmem:[%s12044_s23 + $0x1c0] sm:$0xff]  }
  0x6a   : > { %10648 = vmatprep.mubr.msk.bf16.mxu0 %vm1767_vm1, %v11377_v26 }
  0x71   : > { %10649 = vmatmul.mubr.msk.bf16.gmra.mrb[12].mxu0 %vm1767_vm1, %v11378_v27 }
  0x72   : > { %10652 = vmatprep.mubr.msk.bf16.mxu0 %vm1767_vm1, %v11379_v28 }
  0x79   : > { %10653 = vmatmul.mubr.msk.bf16.gmra.mrb[16].mxu0 %vm1767_vm1, %v11380_v29 }
  0x7a   : > { %10656 = vmatprep.mubr.msk.bf16.mxu0 %vm1767_vm1, %v11381_v30 }
  0x81   : > { %10657 = vmatmul.mubr.msk.bf16.gmra.mrb[20].mxu0 %vm1767_vm1, %v11382_v31 }
  0x82   : > { %10660 = vmatprep.mubr.msk.bf16.mxu0 %vm1767_vm1, %v11383_v32 }
  0x89   : > { %10661 = vmatmul.mubr.msk.bf16.gmra.mrb[24].mxu0 %vm1767_vm1, %v11384_v34 }
  0x8a   : > { %10664 = vmatprep.mubr.msk.bf16.mxu0 %vm1767_vm1, %v11385_v35 }
  0x91   : > { %10665 = vmatmul.mubr.msk.bf16.gmra.mrb[28].mxu0 %vm1767_vm1, %v11386_v36  ;;  %v11430_v36 = vld [vmem:[%s12044_s23 + $0x1c8] sm:$0xff]  }
  0x92   : > { %10668 = vmatprep.mubr.msk.bf16.mxu0 %vm1767_vm1, %v11387_v37 }
  0x99   : > { %10669 = vmatmul.mubr.msk.bf16.gmra.mrb[32].mxu0 %vm1767_vm1, %v11388_v38 }
  0x9a   : > { %10672 = vmatprep.mubr.msk.bf16.mxu0 %vm1767_vm1, %v11389_v39  ;;  %v11431_v39 = vld [vmem:[%s12044_s23 + $0x1d0] sm:$0xff]  }
  0xa1   : > { %10673 = vmatmul.mubr.msk.bf16.gmra.mrb[36].mxu0 %vm1767_vm1, %v11390_v40 }
  0xa2   : > { %10676 = vmatprep.mubr.msk.bf16.mxu0 %vm1767_vm1, %v11391_v41 }
  0xa9   : > { %10677 = vmatmul.mubr.msk.bf16.gmra.mrb[40].mxu0 %vm1767_vm1, %v11393_v42 }
  0xaa   : > { %10680 = vmatprep.mubr.msk.bf16.mxu0 %vm1767_vm1, %v11394_v43 }
  0xb1   : > { %10681 = vmatmul.mubr.msk.bf16.gmra.mrb[44].mxu0 %vm1767_vm1, %v11395_v44 }
  0xb2   : > { %10684 = vmatprep.mubr.msk.bf16.mxu0 %vm1767_vm1, %v11396_v45 }
  0xb9   : > { %10685 = vmatmul.mubr.msk.bf16.gmra.mrb[48].mxu0 %vm1767_vm1, %v11397_v46 }
  0xba   : > { %10688 = vmatprep.mubr.msk.bf16.mxu0 %vm1767_vm1, %v11398_v47 }
  0xc1   : > { %10689 = vmatmul.mubr.msk.bf16.gmra.mrb[52].mxu0 %vm1767_vm1, %v11399_v48 }
  0xc2   : > { %10692 = vmatprep.mubr.msk.bf16.mxu0 %vm1767_vm1, %v11400_v49 }
  0xc9   : > { %10693 = vmatmul.mubr.msk.bf16.gmra.mrb[56].mxu0 %vm1767_vm1, %v11401_v50 }
  0xca   : > { %10696 = vmatprep.mubr.msk.bf16.mxu0 %vm1767_vm1, %v11402_v51 }
  0xd1   : > { %10697 = vmatmul.mubr.msk.bf16.gmra.mrb[60].mxu0 %vm1767_vm1, %v11403_v52 }
  0xd2   : > { %10700 = vmatprep.mubr.msk.bf16.mxu0 %vm1767_vm1, %v11404_v54 }
  0xd9   : > { %10701 = vmatmul.mubr.msk.bf16.gmra.mrb[64].mxu0 %vm1767_vm1, %v11405_v55  ;;  %v11432_v55 = vld [vmem:[%s12044_s23 + $0x1d8] sm:$0xff]  }
  0xda   : > { %10704 = vmatprep.mubr.msk.bf16.mxu0 %vm1767_vm1, %v11406_v56 }
  0xe1   : > { %10705 = vmatmul.mubr.msk.bf16.gmra.mrb[68].mxu0 %vm1767_vm1, %v11407_v57 }
  0xe2   : > { %10708 = vmatprep.mubr.msk.bf16.mxu0 %vm1767_vm1, %v11408_v58 }
  0xe9   : > { %10709 = vmatmul.mubr.msk.bf16.gmra.mrb[72].mxu0 %vm1767_vm1, %v11409_v59  ;;  %v11433_v59 = vld [vmem:[%s12044_s23 + $0x1e0] sm:$0xff]  }
  0xea   : > { %10712 = vmatprep.mubr.msk.bf16.mxu0 %vm1767_vm1, %v11410_v60 }
  0xf1   : > { %10713 = vmatmul.mubr.msk.bf16.gmra.mrb[76].mxu0 %vm1767_vm1, %v11411_v61 }
  0xf2   : > { %10716 = vmatprep.mubr.msk.bf16.mxu0 %vm1767_vm1, %v11412_v62 }
  0xf9   : > { %10717 = vmatmul.mubr.msk.bf16.gmra.mrb[80].mxu0 %vm1767_vm1, %v11414_v63 }
  0xfa   : > { %10720 = vmatprep.mubr.msk.bf16.mxu0 %vm1767_vm1, %v11415_v0 }
 0x101   : > { %10721 = vmatmul.mubr.msk.bf16.gmra.mrb[84].mxu0 %vm1767_vm1, %v11416_v1 }
 0x102   : > { %10724 = vmatprep.mubr.msk.bf16.mxu0 %vm1767_vm1, %v11417_v2 }
 0x109   : > { %10725 = vmatmul.mubr.msk.bf16.gmra.mrb[88].mxu0 %vm1767_vm1, %v11418_v3 }
 0x10a   : > { %10728 = vmatprep.mubr.msk.bf16.mxu0 %vm1767_vm1, %v11419_v4 }
 0x111   : > { %10729 = vmatmul.mubr.msk.bf16.gmra.mrb[92].mxu0 %vm1767_vm1, %v11420_v5 }
 0x112   : > { %10732 = vmatprep.mubr.msk.bf16.mxu0 %vm1767_vm1, %v11421_v6 }
 0x119   : > { %10733 = vmatmul.mubr.msk.bf16.gmra.mrb[96].mxu0 %vm1767_vm1, %v11422_v7 }
 0x11a   : > { %10736 = vmatprep.mubr.msk.bf16.mxu0 %vm1767_vm1, %v11423_v8 }
 0x121   : > { %10737 = vmatmul.mubr.msk.bf16.gmra.mrb[100].mxu0 %vm1767_vm1, %v11424_v9 }
 0x122   : > { %10740 = vmatprep.mubr.msk.bf16.mxu0 %vm1767_vm1, %v11425_v10 }
 0x129   : > { %10741 = vmatmul.mubr.msk.bf16.gmra.mrb[104].mxu0 %vm1767_vm1, %v11426_v11  ;;  %v11435_v11 = vld [vmem:[%s12044_s23 + $0x1e8] sm:$0xff]  }
 0x12a   : > { %10744 = vmatprep.mubr.msk.bf16.mxu0 %vm1767_vm1, %v11427_v12 }
 0x12c   : > { %v10638_v14 = vpop.f32.mrb[0].mxu0 }
 0x12d   : > { %v2055_v15 = vadd.f32 %v10638_v14, %v12164_v13  ;;  %v2046_v16 = vpop.f32.mrb[1].mxu0 }
 0x12e   : > { %v2047_v18 = vadd.f32 %v12164_v13, %v2046_v16  ;;  %v10639_v19 = vpop.f32.mrb[2].mxu0  ;;  %v11436_v16 = vld [vmem:[%s12044_s23 + $0x1f0] sm:$0xff]  }
 0x12f   : > { %v2687_v21 = vmul.f32 0.2, %v2055_v15  ;;  %v2058_v22 = vadd.f32 %v10639_v19, %v12164_v13  ;;  %v2049_v23 = vpop.f32.mrb[3].mxu0 }
 0x130   : > { %v2685_v24 = vmul.f32 0.2, %v2047_v18  ;;  %v2050_v25 = vadd.f32 %v12164_v13, %v2049_v23 }
 0x131   : > { %v2688_v26 = vmul.f32 0.2, %v2058_v22  ;;  %10745 = vmatmul.mubr.msk.bf16.gmra.mrb[108].mxu0 %vm1767_vm1, %v11428_v17  ;;  %v12175_v28 = vmax.f32 %v2055_v15, %v2687_v21 }
 0x132   : > { %v2686_v27 = vmul.f32 0.2, %v2050_v25  ;;  %10748 = vmatprep.mubr.msk.bf16.mxu0 %vm1767_vm1, %v11429_v20  ;;  %v12179_v30 = vmax.f32 %v2047_v18, %v2685_v24 }
 0x133   : > { %v12177_v29 = vmax.f32 %v2058_v22, %v2688_v26 }
 0x134   : > { %v12181_v31 = vmax.f32 %v2050_v25, %v2686_v27  ;;  %v10642_v32 = vpop.f32.mrb[4].mxu0 }
 0x135   : > { %v2071_v34 = vadd.f32 %v10642_v32, %v12164_v13  ;;  %v2062_v35 = vpop.f32.mrb[5].mxu0 }
 0x136   : > { %v2063_v37 = vadd.f32 %v12164_v13, %v2062_v35  ;;  %v10643_v38 = vpop.f32.mrb[6].mxu0 }
 0x137   : > { %v2691_v41 = vmul.f32 0.2, %v2071_v34  ;;  %v2074_v42 = vadd.f32 %v10643_v38, %v12164_v13  ;;  %v2065_v43 = vpop.f32.mrb[7].mxu0 }
 0x138   : > { %v2689_v44 = vmul.f32 0.2, %v2063_v37  ;;  %v2066_v45 = vadd.f32 %v12164_v13, %v2065_v43 }
 0x139   : > { %v2692_v46 = vmul.f32 0.2, %v2074_v42  ;;  %10749 = vmatmul.mubr.msk.bf16.gmra.mrb[112].mxu0 %vm1767_vm1, %v11430_v36  ;;  %v12195_v48 = vmax.f32 %v2071_v34, %v2691_v41 }
 0x13a   : > { %v2690_v47 = vmul.f32 0.2, %v2066_v45  ;;  %10752 = vmatprep.mubr.msk.bf16.mxu0 %vm1767_vm1, %v11431_v39  ;;  %v12199_v50 = vmax.f32 %v2063_v37, %v2689_v44  ;;  %v11437_v37 = vld [vmem:[%s12044_s23 + $0x1f8] sm:$0xff]  }
 0x13b   : > { %v12197_v49 = vmax.f32 %v2074_v42, %v2692_v46  ;;  %v11438_v42 = vld [vmem:[%s12044_s23 + $0x200] sm:$0xff]  }
 0x13c   : > { %v12201_v51 = vmax.f32 %v2066_v45, %v2690_v47  ;;  %v10646_v52 = vpop.f32.mrb[8].mxu0 }
 0x13d   : > { %v2087_v53 = vadd.f32 %v10646_v52, %v12164_v13  ;;  %v2078_v54 = vpop.f32.mrb[9].mxu0 }
 0x13e   : > { %v2079_v57 = vadd.f32 %v12164_v13, %v2078_v54  ;;  %v10647_v58 = vpop.f32.mrb[10].mxu0 }
 0x13f   : > { %v2695_v61 = vmul.f32 0.2, %v2087_v53  ;;  %v2090_v62 = vadd.f32 %v10647_v58, %v12164_v13  ;;  %v2081_v63 = vpop.f32.mrb[11].mxu0 }
 0x140   : > { %v2693_v0 = vmul.f32 0.2, %v2079_v57  ;;  %v2082_v1 = vadd.f32 %v12164_v13, %v2081_v63 }
 0x141   : > { %v2696_v2 = vmul.f32 0.2, %v2090_v62  ;;  %10753 = vmatmul.mubr.msk.bf16.gmra.mrb[116].mxu0 %vm1767_vm1, %v11432_v55  ;;  %v12215_v4 = vmax.f32 %v2087_v53, %v2695_v61 }
 0x142   : > { %v2694_v3 = vmul.f32 0.2, %v2082_v1  ;;  %10756 = vmatprep.mubr.msk.bf16.mxu0 %vm1767_vm1, %v11433_v59  ;;  %v12219_v6 = vmax.f32 %v2079_v57, %v2693_v0 }
 0x143   : > { %v12217_v5 = vmax.f32 %v2090_v62, %v2696_v2 }
 0x144   : > { %v12221_v7 = vmax.f32 %v2082_v1, %v2694_v3  ;;  %v10650_v8 = vpop.f32.mrb[12].mxu0  ;;  %v11439_v3 = vld [vmem:[%s12044_s23 + $0x208] sm:$0xff]  }
 0x145   : > { %v2103_v9 = vadd.f32 %v10650_v8, %v12164_v13  ;;  %v2094_v10 = vpop.f32.mrb[13].mxu0 }
 0x146   : > { %v2095_v14 = vadd.f32 %v12164_v13, %v2094_v10  ;;  %v10651_v15 = vpop.f32.mrb[14].mxu0 }
 0x147   : > { %v2699_v18 = vmul.f32 0.2, %v2103_v9  ;;  %v2106_v19 = vadd.f32 %v10651_v15, %v12164_v13  ;;  %v2097_v20 = vpop.f32.mrb[15].mxu0  ;;  %v11440_v15 = vld [vmem:[%s12044_s23 + $0x210] sm:$0xff]  }
 0x148   : > { %v2697_v21 = vmul.f32 0.2, %v2095_v14  ;;  %v2098_v22 = vadd.f32 %v12164_v13, %v2097_v20 }
 0x149   : > { %v2700_v23 = vmul.f32 0.2, %v2106_v19  ;;  %10757 = vmatmul.mubr.msk.bf16.gmra.mrb[120].mxu0 %vm1767_vm1, %v11435_v11  ;;  %v12235_v25 = vmax.f32 %v2103_v9, %v2699_v18 }
 0x14a   : > { %v2698_v24 = vmul.f32 0.2, %v2098_v22  ;;  %10760 = vmatprep.mubr.msk.bf16.mxu0 %vm1767_vm1, %v11436_v16  ;;  %v12239_v27 = vmax.f32 %v2095_v14, %v2697_v21 }
 0x14b   : > { %v12237_v26 = vmax.f32 %v2106_v19, %v2700_v23 }
 0x14c   : > { %v12241_v32 = vmax.f32 %v2098_v22, %v2698_v24  ;;  %v10654_v34 = vpop.f32.mrb[16].mxu0 }
 0x14d   : > { %v2119_v35 = vadd.f32 %v10654_v34, %v12164_v13  ;;  %v2110_v36 = vpop.f32.mrb[17].mxu0 }
 0x14e   : > { %v2111_v39 = vadd.f32 %v12164_v13, %v2110_v36  ;;  %v10655_v41 = vpop.f32.mrb[18].mxu0 }
 0x14f   : > { %v2703_v44 = vmul.f32 0.2, %v2119_v35  ;;  %v2122_v45 = vadd.f32 %v10655_v41, %v12164_v13  ;;  %v2113_v46 = vpop.f32.mrb[19].mxu0 }
 0x150   : > { %v2114_v47 = vadd.f32 %v12164_v13, %v2113_v46  ;;  %v2701_v52 = vmul.f32 0.2, %v2111_v39  ;;  %v11441_v46 = vld [vmem:[%s12044_s23 + $0x218] sm:$0xff]  }
 0x151   : > { %v12253_v53 = vmax.f32 %v2119_v35, %v2703_v44  ;;  %v2704_v54 = vmul.f32 0.2, %v2122_v45  ;;  %10761 = vmatmul.mubr.msk.bf16.gmra.mrb[124].mxu0 %vm1767_vm1, %v11437_v37 }
 0x152   : > { %10764 = vmatprep.mubr.msk.bf16.mxu0 %vm1767_vm1, %v11438_v42  ;;  %v2702_v55 = vmul.f32 0.2, %v2114_v47  ;;  %v12257_v57 = vmax.f32 %v2111_v39, %v2701_v52 }
 0x153   : > { %v3007_v58 = vmax.f32 %v12175_v28, %v12253_v53  ;;  %v12261_v59 = vmax.f32 %v2122_v45, %v2704_v54 }
 0x154   : > { %v10658_v61 = vpop.f32.mrb[20].mxu0  ;;  %v3005_v62 = vmax.f32 %v12179_v30, %v12257_v57  ;;  %v12265_v63 = vmax.f32 %v2114_v47, %v2702_v55 }
 0x155   : > { %v3008_v0 = vmax.f32 %v12177_v29, %v12261_v59  ;;  %v2135_v1 = vadd.f32 %v10658_v61, %v12164_v13  ;;  %v2126_v2 = vpop.f32.mrb[21].mxu0  ;;  %v3158_v8 = vpack.c.bf16 %v12261_v59, %v12253_v53 }
 0x156   : > { %v2127_v9 = vadd.f32 %v12164_v13, %v2126_v2  ;;  %v10659_v10 = vpop.f32.mrb[22].mxu0  ;;  %v3006_v11 = vmax.f32 %v12181_v31, %v12265_v63  ;;  %v3157_v14 = vpack.c.bf16 %v12265_v63, %v12257_v57 }
 0x157   : > { %v2707_v16 = vmul.f32 0.2, %v2135_v1  ;;  %v2138_v18 = vadd.f32 %v10659_v10, %v12164_v13  ;;  %v2129_v19 = vpop.f32.mrb[23].mxu0 }
 0x158   : > { %v2705_v20 = vmul.f32 0.2, %v2127_v9  ;;  %v2130_v21 = vadd.f32 %v12164_v13, %v2129_v19  ;;  %10820 = vmatprep.mubr.msk.bf16.mxu1 %vm3268_vm2, %v3157_v14 }
 0x159   : > { %v12282_v22 = vmax.f32 %v2135_v1, %v2707_v16  ;;  %v2708_v23 = vmul.f32 0.2, %v2138_v18  ;;  %10765 = vmatmul.mubr.msk.bf16.gmra.mrb[128].mxu0 %vm1767_vm1, %v11439_v3  ;;  %10821 = vmatmul.mubr.msk.bf16.vlgmr.msra.gmra.mrb[0].mxu1 %vm3268_vm2, %v3158_v8  ;;  %v11442_v1 = vld [vmem:[%s12044_s23 + $0x220] sm:$0xff]  }
 0x15a   : > { %v12286_v24 = vmax.f32 %v2127_v9, %v2705_v20  ;;  %v2706_v34 = vmul.f32 0.2, %v2130_v21  ;;  %10768 = vmatprep.mubr.msk.bf16.mxu0 %vm1767_vm1, %v11440_v15 }
 0x15b   : > { %v3011_v35 = vmax.f32 %v12195_v48, %v12282_v22  ;;  %v12291_v36 = vmax.f32 %v2138_v18, %v2708_v23 }
 0x15c   : > { %v3009_v37 = vmax.f32 %v12199_v50, %v12286_v24  ;;  %v12295_v39 = vmax.f32 %v2130_v21, %v2706_v34  ;;  %v10662_v41 = vpop.f32.mrb[24].mxu0 }
 0x15d   : > { %v3012_v42 = vmax.f32 %v12197_v49, %v12291_v36  ;;  %v2151_v44 = vadd.f32 %v10662_v41, %v12164_v13  ;;  %v2142_v45 = vpop.f32.mrb[25].mxu0  ;;  %v3160_v47 = vpack.c.bf16 %v12291_v36, %v12282_v22 }
 0x15e   : > { %v3010_v52 = vmax.f32 %v12201_v51, %v12295_v39  ;;  %v2143_v54 = vadd.f32 %v12164_v13, %v2142_v45  ;;  %v10663_v55 = vpop.f32.mrb[26].mxu0  ;;  %v3159_v61 = vpack.c.bf16 %v12295_v39, %v12286_v24 }
 0x15f   : > { %v2711_v2 = vmul.f32 0.2, %v2151_v44  ;;  %v2154_v3 = vadd.f32 %v10663_v55, %v12164_v13  ;;  %v2145_v8 = vpop.f32.mrb[27].mxu0 }
 0x160   : > { %v2709_v9 = vmul.f32 0.2, %v2143_v54  ;;  %v2146_v10 = vadd.f32 %v12164_v13, %v2145_v8  ;;  %10824 = vmatprep.mubr.msk.bf16.mxu1 %vm3268_vm2, %v3159_v61 }
 0x161   : > { %v12312_v14 = vmax.f32 %v2151_v44, %v2711_v2  ;;  %v2712_v15 = vmul.f32 0.2, %v2154_v3  ;;  %10769 = vmatmul.mubr.msk.bf16.gmra.mrb[132].mxu0 %vm1767_vm1, %v11441_v46  ;;  %10825 = vmatmul.mubr.msk.bf16.gmra.mrb[4].mxu1 %vm3268_vm2, %v3160_v47  ;;  %v11443_v46 = vld [vmem:[%s12044_s23 + $0x228] sm:$0xff]   ;;  %v11444_v2 = vld [vmem:[%s12044_s23 + $0x230] sm:$0xff]  }
 0x162   : > { %v12316_v16 = vmax.f32 %v2143_v54, %v2709_v9  ;;  %v2710_v18 = vmul.f32 0.2, %v2146_v10  ;;  %10772 = vmatprep.mubr.msk.bf16.mxu0 %vm1767_vm1, %v11442_v1 }
 0x163   : > { %v3015_v19 = vmax.f32 %v12215_v4, %v12312_v14  ;;  %v12321_v20 = vmax.f32 %v2154_v3, %v2712_v15 }
 0x164   : > { %v3013_v21 = vmax.f32 %v12219_v6, %v12316_v16  ;;  %v12325_v23 = vmax.f32 %v2146_v10, %v2710_v18  ;;  %v10666_v34 = vpop.f32.mrb[28].mxu0 }
 0x165   : > { %v3016_v41 = vmax.f32 %v12217_v5, %v12321_v20  ;;  %v2167_v44 = vadd.f32 %v10666_v34, %v12164_v13  ;;  %v2158_v45 = vpop.f32.mrb[29].mxu0  ;;  %v3162_v47 = vpack.c.bf16 %v12321_v20, %v12312_v14 }
 0x166   : > { %v3014_v54 = vmax.f32 %v12221_v7, %v12325_v23  ;;  %v2159_v55 = vadd.f32 %v12164_v13, %v2158_v45  ;;  %v10667_v61 = vpop.f32.mrb[30].mxu0  ;;  %v3161_v1 = vpack.c.bf16 %v12325_v23, %v12316_v16 }
 0x167   : > { %v2715_v3 = vmul.f32 0.2, %v2167_v44  ;;  %v2170_v8 = vadd.f32 %v10667_v61, %v12164_v13  ;;  %v2161_v9 = vpop.f32.mrb[31].mxu0 }
 0x168   : > { %v2713_v10 = vmul.f32 0.2, %v2159_v55  ;;  %v2162_v15 = vadd.f32 %v12164_v13, %v2161_v9  ;;  %10828 = vmatprep.mubr.msk.bf16.mxu1 %vm3268_vm2, %v3161_v1 }
 0x169   : > { %v12342_v18 = vmax.f32 %v2167_v44, %v2715_v3  ;;  %v2716_v34 = vmul.f32 0.2, %v2170_v8  ;;  %10773 = vmatmul.mubr.msk.bf16.gmra.mrb[136].mxu0 %vm1767_vm1, %v11443_v46  ;;  %10829 = vmatmul.mubr.msk.bf16.gmra.mrb[8].mxu1 %vm3268_vm2, %v3162_v47 }
 0x16a   : > { %v12346_v45 = vmax.f32 %v2159_v55, %v2713_v10  ;;  %v2714_v38 = vmul.f32 0.2, %v2162_v15  ;;  %10776 = vmatprep.mubr.msk.bf16.mxu0 %vm1767_vm1, %v11444_v2  ;;  %v11445_v10 = vld [vmem:[%s12044_s23 + $0x238] sm:$0xff]  }
 0x16b   : > { %v3019_v61 = vmax.f32 %v12235_v25, %v12342_v18  ;;  %v12351_v9 = vmax.f32 %v2170_v8, %v2716_v34 }
 0x16c   : > { %v3017_v44 = vmax.f32 %v12239_v27, %v12346_v45  ;;  %v12355_v1 = vmax.f32 %v2162_v15, %v2714_v38  ;;  %v10670_v3 = vpop.f32.mrb[32].mxu0  ;;  %v11446_v15 = vld [vmem:[%s12044_s23 + $0x240] sm:$0xff]  }
 0x16d   : > { %v3020_v46 = vmax.f32 %v12237_v26, %v12351_v9  ;;  %v2183_v47 = vadd.f32 %v10670_v3, %v12164_v13  ;;  %v2174_v55 = vpop.f32.mrb[33].mxu0  ;;  %v3164_v2 = vpack.c.bf16 %v12351_v9, %v12342_v18 }
 0x16e   : > { %v2175_v34 = vadd.f32 %v12164_v13, %v2174_v55  ;;  %v10671_v43 = vpop.f32.mrb[34].mxu0  ;;  %v3163_v38 = vpack.c.bf16 %v12355_v1, %v12346_v45 }
 0x16f   : > { %v2719_v12 = vmul.f32 0.2, %v2183_v47  ;;  %v2186_v17 = vadd.f32 %v10671_v43, %v12164_v13  ;;  %v2177_v56 = vpop.f32.mrb[35].mxu0 }
 0x170   : > { %v2717_v3 = vmul.f32 0.2, %v2175_v34  ;;  %v2178_v60 = vadd.f32 %v12164_v13, %v2177_v56  ;;  %10832 = vmatprep.mubr.msk.bf16.mxu1 %vm3268_vm2, %v3163_v38 }
 0x171   : > { %v2879_v33 = vmax.f32 %v2183_v47, %v2719_v12  ;;  %v2720_v40 = vmul.f32 0.2, %v2186_v17  ;;  %10777 = vmatmul.mubr.msk.bf16.gmra.mrb[140].mxu0 %vm1767_vm1, %v11445_v10  ;;  %10833 = vmatmul.mubr.msk.bf16.gmra.mrb[12].mxu1 %vm3268_vm2, %v3164_v2 }
 0x172   : > { %v2877_v55 = vmax.f32 %v2175_v34, %v2717_v3  ;;  %v2718_v8 = vmul.f32 0.2, %v2178_v60  ;;  %10780 = vmatprep.mubr.msk.bf16.mxu0 %vm1767_vm1, %v11446_v15  ;;  %v11447_v15 = vld [vmem:[%s12044_s23 + $0x248] sm:$0xff]  }
 0x173   : > { %v12378_v43 = vmax.f32 %v3007_v58, %v2879_v33  ;;  %v2880_v56 = vmax.f32 %v2186_v17, %v2720_v40  ;;  %v11448_v58 = vld [vmem:[%s12044_s23 + $0x250] sm:$0xff]  }
 0x174   : > { %v12383_v12 = vmax.f32 %v3005_v62, %v2877_v55  ;;  %v2878_v47 = vmax.f32 %v2178_v60, %v2718_v8  ;;  %v10674_v10 = vpop.f32.mrb[36].mxu0 }
 0x175   : > { %v12388_v2 = vmax.f32 %v3008_v0, %v2880_v56  ;;  %v2199_v34 = vadd.f32 %v10674_v10, %v12164_v13  ;;  %v2190_v38 = vpop.f32.mrb[37].mxu0  ;;  %v3166_v53 = vpack.c.bf16 %v2880_v56, %v2879_v33 }
 0x176   : > { %v12395_v40 = vmax.f32 %v3006_v11, %v2878_v47  ;;  %v2191_v17 = vadd.f32 %v12164_v13, %v2190_v38  ;;  %v10675_v57 = vpop.f32.mrb[38].mxu0  ;;  %v3165_v60 = vpack.c.bf16 %v2878_v47, %v2877_v55 }
 0x177   : > { %v2723_v62 = vmul.f32 0.2, %v2199_v34  ;;  %v2202_v59 = vadd.f32 %v10675_v57, %v12164_v13  ;;  %v2193_v0 = vpop.f32.mrb[39].mxu0  ;;  %v11449_v57 = vld [vmem:[%s12044_s23 + $0x258] sm:$0xff]  }
 0x178   : > { %v2721_v8 = vmul.f32 0.2, %v2191_v17  ;;  %v2194_v3 = vadd.f32 %v12164_v13, %v2193_v0  ;;  %10836 = vmatprep.mubr.msk.bf16.mxu1 %vm3268_vm2, %v3165_v60 }
 0x179   : > { %v2883_v33 = vmax.f32 %v2199_v34, %v2723_v62  ;;  %v2724_v56 = vmul.f32 0.2, %v2202_v59  ;;  %10781 = vmatmul.mubr.msk.bf16.gmra.mrb[144].mxu0 %vm1767_vm1, %v11447_v15  ;;  %10837 = vmatmul.mubr.msk.bf16.gmra.mrb[16].mxu1 %vm3268_vm2, %v3166_v53 }
 0x17a   : > { %v2881_v63 = vmax.f32 %v2191_v17, %v2721_v8  ;;  %v2722_v11 = vmul.f32 0.2, %v2194_v3  ;;  %10784 = vmatprep.mubr.msk.bf16.mxu0 %vm1767_vm1, %v11448_v58  ;;  %v11450_v58 = vld [vmem:[%s12044_s23 + $0x260] sm:$0xff]  }
 0x17b   : > { %v12408_v55 = vmax.f32 %v3011_v35, %v2883_v33  ;;  %v2884_v47 = vmax.f32 %v2202_v59, %v2724_v56 }
 0x17c   : > { %v12413_v10 = vmax.f32 %v3009_v37, %v2881_v63  ;;  %v2882_v34 = vmax.f32 %v2194_v3, %v2722_v11  ;;  %v10678_v38 = vpop.f32.mrb[40].mxu0 }
 0x17d   : > { %v12418_v15 = vmax.f32 %v3012_v42, %v2884_v47  ;;  %v2215_v53 = vadd.f32 %v10678_v38, %v12164_v13  ;;  %v2206_v17 = vpop.f32.mrb[41].mxu0  ;;  %v3168_v22 = vpack.c.bf16 %v2884_v47, %v2883_v33 }
 0x17e   : > { %v12425_v35 = vmax.f32 %v3010_v52, %v2882_v34  ;;  %v2207_v24 = vadd.f32 %v12164_v13, %v2206_v17  ;;  %v10679_v37 = vpop.f32.mrb[42].mxu0  ;;  %v3167_v60 = vpack.c.bf16 %v2882_v34, %v2881_v63  ;;  %v11451_v17 = vld [vmem:[%s12044_s23 + $0x268] sm:$0xff]  }
 0x17f   : > { %v2727_v62 = vmul.f32 0.2, %v2215_v53  ;;  %v2218_v36 = vadd.f32 %v10679_v37, %v12164_v13  ;;  %v2209_v42 = vpop.f32.mrb[43].mxu0 }
 0x180   : > { %v2725_v59 = vmul.f32 0.2, %v2207_v24  ;;  %v2210_v0 = vadd.f32 %v12164_v13, %v2209_v42  ;;  %10840 = vmatprep.mubr.msk.bf16.mxu1 %vm3268_vm2, %v3167_v60 }
 0x181   : > { %v2887_v8 = vmax.f32 %v2215_v53, %v2727_v62  ;;  %v2728_v3 = vmul.f32 0.2, %v2218_v36  ;;  %10785 = vmatmul.mubr.msk.bf16.gmra.mrb[148].mxu0 %vm1767_vm1, %v11449_v57  ;;  %10841 = vmatmul.mubr.msk.bf16.gmra.mrb[20].mxu1 %vm3268_vm2, %v3168_v22  ;;  %v11452_v22 = vld [vmem:[%s12044_s23 + $0x270] sm:$0xff]  }
 0x182   : > { %v2885_v39 = vmax.f32 %v2207_v24, %v2725_v59  ;;  %v2726_v52 = vmul.f32 0.2, %v2210_v0  ;;  %10788 = vmatprep.mubr.msk.bf16.mxu0 %vm1767_vm1, %v11450_v58 }
 0x183   : > { %v12438_v33 = vmax.f32 %v3015_v19, %v2887_v8  ;;  %v2888_v56 = vmax.f32 %v2218_v36, %v2728_v3 }
 0x184   : > { %v12443_v63 = vmax.f32 %v3013_v21, %v2885_v39  ;;  %v2886_v11 = vmax.f32 %v2210_v0, %v2726_v52  ;;  %v10682_v47 = vpop.f32.mrb[44].mxu0 }
 0x185   : > { %v12448_v34 = vmax.f32 %v3016_v41, %v2888_v56  ;;  %v2231_v38 = vadd.f32 %v10682_v47, %v12164_v13  ;;  %v2222_v53 = vpop.f32.mrb[45].mxu0  ;;  %v3170_v14 = vpack.c.bf16 %v2888_v56, %v2887_v8  ;;  %v11453_v56 = vld [vmem:[%s12044_s23 + $0x278] sm:$0xff]   ;;  %s9897_s23 = sshll.u32 %s11718_s27, 4 }
 0x186   : > { %v12455_v19 = vmax.f32 %v3014_v54, %v2886_v11  ;;  %v2223_v16 = vadd.f32 %v12164_v13, %v2222_v53  ;;  %v10683_v21 = vpop.f32.mrb[46].mxu0  ;;  %v3169_v57 = vpack.c.bf16 %v2886_v11, %v2885_v39  ;;  %p16390_p11 = scmp.lt.s32.totalorder %s9897_s23, 31 }
 0x187   : > { %v2731_v24 = vmul.f32 0.2, %v2231_v38  ;;  %v2234_v20 = vadd.f32 %v10683_v21, %v12164_v13  ;;  %v2225_v41 = vpop.f32.mrb[47].mxu0 }
 0x188   : > { %v2729_v37 = vmul.f32 0.2, %v2223_v16  ;;  %v2226_v60 = vadd.f32 %v12164_v13, %v2225_v41  ;;  %10844 = vmatprep.mubr.msk.bf16.mxu1 %vm3268_vm2, %v3169_v57  ;;  %v18845_v57 = vpack.c.bf16 %v12181_v31, %v12179_v30  ;;  %s19720_s23 = smov (!%p16390_p11, %s9897_s23), 31 }
 0x189   : > { %v2891_v58 = vmax.f32 %v2231_v38, %v2731_v24  ;;  %v2732_v62 = vmul.f32 0.2, %v2234_v20  ;;  %10789 = vmatmul.mubr.msk.bf16.gmra.mrb[152].mxu0 %vm1767_vm1, %v11451_v17  ;;  %10845 = vmatmul.mubr.msk.bf16.gmra.mrb[24].mxu1 %vm3268_vm2, %v3170_v14  ;;  %s16468_s27 = sadd.s32 %s9906_s24, %s19720_s23  ;;  %s9902_s15 = sshll.u32 %s19720_s23, 1 }
 0x18a   : > { %v2889_v23 = vmax.f32 %v2223_v16, %v2729_v37  ;;  %v2730_v54 = vmul.f32 0.2, %v2226_v60  ;;  %10792 = vmatprep.mubr.msk.bf16.mxu0 %vm1767_vm1, %v11452_v22  ;;  %s9907_s17 = sshll.u32 %s16468_s27, 3  ;;  %s1184_s19 = sadd.s32 %s9903_s16, %s9902_s15 }
 0x18b   : > { %v12468_v36 = vmax.f32 %v3019_v61, %v2891_v58  ;;  %v2892_v42 = vmax.f32 %v2234_v20, %v2732_v62  ;;  %v18844_v61 = vmax.f32 %v12241_v32, %v12355_v1  ;;  %s16517_s11 = scalar_lea.vmem %s18586_s13, %s9907_s17  ;;  %s9904_s20 = sshll.u32 %s1184_s19, 3 }
 0x18c   : > { %v12473_v59 = vmax.f32 %v3017_v44, %v2889_v23  ;;  %v2890_v0 = vmax.f32 %v2226_v60, %v2730_v54  ;;  %v10686_v8 = vpop.f32.mrb[48].mxu0  ;;  %s19683_s24 = sld [smem:[#allocation127_spill]]  ;;  %s19702_s19 = sld [smem:[#allocation126_spill]] }
 0x18d   : > { %v12478_v3 = vmax.f32 %v3020_v46, %v2892_v42  ;;  %v2247_v39 = vadd.f32 %v10686_v8, %v12164_v13  ;;  %v2238_v52 = vpop.f32.mrb[49].mxu0  ;;  %v3172_v18 = vpack.c.bf16 %v2892_v42, %v2891_v58 }
 0x18e   : > { %v12485_v11 = vmax.f32 %v18844_v61, %v2890_v0  ;;  %v2239_v45 = vadd.f32 %v12164_v13, %v2238_v52  ;;  %v10687_v44 = vpop.f32.mrb[50].mxu0  ;;  %v3171_v47 = vpack.c.bf16 %v2890_v0, %v2889_v23 }
 0x18f   : > { %v2735_v38 = vmul.f32 0.2, %v2247_v39  ;;  %v2250_v53 = vadd.f32 %v10687_v44, %v12164_v13  ;;  %v2241_v9 = vpop.f32.mrb[51].mxu0 }
 0x190   : > { %v2733_v46 = vmul.f32 0.2, %v2239_v45  ;;  %v2242_v17 = vadd.f32 %v12164_v13, %v2241_v9  ;;  %10848 = vmatprep.mubr.msk.bf16.mxu1 %vm3268_vm2, %v3171_v47 }
 0x191   : > { %v12491_v14 = vmax.f32 %v2247_v39, %v2735_v38  ;;  %v2736_v16 = vmul.f32 0.2, %v2250_v53  ;;  %10793 = vmatmul.mubr.msk.bf16.gmra.mrb[156].mxu0 %vm1767_vm1, %v11453_v56  ;;  %10849 = vmatmul.mubr.msk.bf16.gmra.mrb[28].mxu1 %vm3268_vm2, %v3172_v18  ;;  %v18847_v38 = vpack.c.bf16 %v12201_v51, %v12199_v50 }
 0x192   : > { %v12495_v1 = vmax.f32 %v2239_v45, %v2733_v46  ;;  %v2734_v21 = vmul.f32 0.2, %v2242_v17  ;;  %10804 = vmatprep.mubr.msk.bf16.mxu0 %vm3268_vm2, %v18845_v57  ;;  %v18846_v45 = vpack.c.bf16 %v12177_v29, %v12175_v28  ;;  %s18031_s27 = scalar_lea.vmem %s19683_s24, %s9904_s20 }
 0x193   : > { %v3039_v22 = vmax.f32 %v12378_v43, %v12491_v14  ;;  %v12503_v24 = vmax.f32 %v2250_v53, %v2736_v16 }
 0x194   : > { %v3037_v20 = vmax.f32 %v12383_v12, %v12495_v1  ;;  %v12507_v41 = vmax.f32 %v2242_v17, %v2734_v21  ;;  %v10690_v37 = vpop.f32.mrb[52].mxu0 }
 0x195   : > { %v3040_v60 = vmax.f32 %v12388_v2, %v12503_v24  ;;  %v2263_v58 = vadd.f32 %v10690_v37, %v12164_v13  ;;  %v2254_v62 = vpop.f32.mrb[53].mxu0  ;;  %v3174_v30 = vpack.c.bf16 %v12503_v24, %v12491_v14 }
 0x196   : > { %v3038_v31 = vmax.f32 %v12395_v40, %v12507_v41  ;;  %v2255_v23 = vadd.f32 %v12164_v13, %v2254_v62  ;;  %v10691_v54 = vpop.f32.mrb[54].mxu0  ;;  %v3173_v42 = vpack.c.bf16 %v12507_v41, %v12495_v1 }
 0x197   : > { %v2739_v0 = vmul.f32 0.2, %v2263_v58  ;;  %v2266_v8 = vadd.f32 %v10691_v54, %v12164_v13  ;;  %v2257_v39 = vpop.f32.mrb[55].mxu0 }
 0x198   : > { %v2737_v52 = vmul.f32 0.2, %v2255_v23  ;;  %v2258_v56 = vadd.f32 %v12164_v13, %v2257_v39  ;;  %10852 = vmatprep.mubr.msk.bf16.mxu1 %vm3268_vm2, %v3173_v42  ;;  %v18848_v39 = vpack.c.bf16 %v12197_v49, %v12195_v48 }
 0x199   : > { %v12522_v18 = vmax.f32 %v2263_v58, %v2739_v0  ;;  %v2740_v61 = vmul.f32 0.2, %v2266_v8  ;;  %10805 = vmatmul.mubr.msk.bf16.vlgmr.msra.gmra.mrb[160].mxu0 %vm3268_vm2, %v18846_v45  ;;  %10853 = vmatmul.mubr.msk.bf16.gmra.mrb[32].mxu1 %vm3268_vm2, %v3174_v30 }
 0x19a   : > { %v12529_v44 = vmax.f32 %v2255_v23, %v2737_v52  ;;  %v2738_v47 = vmul.f32 0.2, %v2258_v56  ;;  %10808 = vmatprep.mubr.msk.bf16.mxu0 %vm3268_vm2, %v18847_v38 }
 0x19b   : > { %v3043_v53 = vmax.f32 %v12408_v55, %v12522_v18  ;;  %v12537_v9 = vmax.f32 %v2266_v8, %v2740_v61  ;;  %v18849_v61 = vpack.c.bf16 %v12221_v7, %v12219_v6 }
 0x19c   : > { %v3041_v28 = vmax.f32 %v12413_v10, %v12529_v44  ;;  %v12541_v29 = vmax.f32 %v2258_v56, %v2738_v47  ;;  %v10694_v46 = vpop.f32.mrb[56].mxu0 }
 0x19d   : > { %v3044_v17 = vmax.f32 %v12418_v15, %v12537_v9  ;;  %v2279_v16 = vadd.f32 %v10694_v46, %v12164_v13  ;;  %v2270_v21 = vpop.f32.mrb[57].mxu0  ;;  %v3176_v50 = vpack.c.bf16 %v12537_v9, %v12522_v18  ;;  %v11456_v15 = vld [vmem:[%s18580_s7 + $0x4] ss:$8 sps:$4 sm:$0xff]  }
 0x19e   : > { %v3042_v51 = vmax.f32 %v12425_v35, %v12541_v29  ;;  %v2271_v57 = vadd.f32 %v12164_v13, %v2270_v21  ;;  %v10695_v37 = vpop.f32.mrb[58].mxu0  ;;  %v3175_v58 = vpack.c.bf16 %v12541_v29, %v12529_v44  ;;  %6330 = vmatprep.subr.bf16.mxu1 %v11456_v15 }
 0x19f   : > { %v2743_v62 = vmul.f32 0.2, %v2279_v16  ;;  %v2282_v30 = vadd.f32 %v10695_v37, %v12164_v13  ;;  %v2273_v23 = vpop.f32.mrb[59].mxu0 }
 0x1a0   : > { %v2741_v54 = vmul.f32 0.2, %v2271_v57  ;;  %v2274_v42 = vadd.f32 %v12164_v13, %v2273_v23  ;;  %10856 = vmatprep.mubr.msk.bf16.mxu1 %vm3268_vm2, %v3175_v58 }
 0x1a1   : > { %v12556_v0 = vmax.f32 %v2279_v16, %v2743_v62  ;;  %v2744_v8 = vmul.f32 0.2, %v2282_v30  ;;  %10809 = vmatmul.mubr.msk.bf16.gmra.mrb[164].mxu0 %vm3268_vm2, %v18848_v39  ;;  %10857 = vmatmul.mubr.msk.bf16.gmra.mrb[36].mxu1 %vm3268_vm2, %v3176_v50  ;;  %v18850_v39 = vpack.c.bf16 %v12217_v5, %v12215_v4 }
 0x1a2   : > { %v12563_v52 = vmax.f32 %v2271_v57, %v2741_v54  ;;  %v2742_v56 = vmul.f32 0.2, %v2274_v42  ;;  %10812 = vmatprep.mubr.msk.bf16.mxu0 %vm3268_vm2, %v18849_v61 }
 0x1a3   : > { %v3047_v45 = vmax.f32 %v12438_v33, %v12556_v0  ;;  %v12571_v47 = vmax.f32 %v2282_v30, %v2744_v8 }
 0x1a4   : > { %v3045_v48 = vmax.f32 %v12443_v63, %v12563_v52  ;;  %v12575_v49 = vmax.f32 %v2274_v42, %v2742_v56  ;;  %v10698_v38 = vpop.f32.mrb[60].mxu0 }
 0x1a5   : > { %v3048_v46 = vmax.f32 %v12448_v34, %v12571_v47  ;;  %v2295_v16 = vadd.f32 %v10698_v38, %v12164_v13  ;;  %v2286_v21 = vpop.f32.mrb[61].mxu0  ;;  %v3178_v6 = vpack.c.bf16 %v12571_v47, %v12556_v0  ;;  %v18851_v38 = vpack.c.bf16 %v12241_v32, %v12239_v27 }
 0x1a6   : > { %v3046_v7 = vmax.f32 %v12455_v19, %v12575_v49  ;;  %v2287_v50 = vadd.f32 %v12164_v13, %v2286_v21  ;;  %v10699_v57 = vpop.f32.mrb[62].mxu0  ;;  %v3177_v37 = vpack.c.bf16 %v12575_v49, %v12563_v52  ;;  %v18852_v32 = vpack.c.bf16 %v12237_v26, %v12235_v25 }
 0x1a7   : > { %v2747_v58 = vmul.f32 0.2, %v2295_v16  ;;  %v2298_v62 = vadd.f32 %v10699_v57, %v12164_v13  ;;  %v2289_v30 = vpop.f32.mrb[63].mxu0 }
 0x1a8   : > { %v2745_v23 = vmul.f32 0.2, %v2287_v50  ;;  %v2290_v54 = vadd.f32 %v12164_v13, %v2289_v30  ;;  %10860 = vmatprep.mubr.msk.bf16.mxu1 %vm3268_vm2, %v3177_v37 }
 0x1a9   : > { %v12590_v42 = vmax.f32 %v2295_v16, %v2747_v58  ;;  %v2748_v8 = vmul.f32 0.2, %v2298_v62  ;;  %10813 = vmatmul.mubr.msk.bf16.gmra.mrb[168].mxu0 %vm3268_vm2, %v18850_v39  ;;  %10861 = vmatmul.mubr.msk.bf16.gmra.mrb[40].mxu1 %vm3268_vm2, %v3178_v6 }
 0x1aa   : > { %v12597_v56 = vmax.f32 %v2287_v50, %v2745_v23  ;;  %v2746_v61 = vmul.f32 0.2, %v2290_v54  ;;  %10816 = vmatprep.mubr.msk.bf16.mxu0 %vm3268_vm2, %v18851_v38 }
 0x1ab   : > { %v3051_v16 = vmax.f32 %v12468_v36, %v12590_v42  ;;  %v12605_v21 = vmax.f32 %v2298_v62, %v2748_v8 }
 0x1ac   : > { %v12609_v5 = vmax.f32 %v2290_v54, %v2746_v61  ;;  %v10702_v57 = vpop.f32.mrb[64].mxu0 }
 0x1ad   : > { %v2311_v50 = vadd.f32 %v10702_v57, %v12164_v13  ;;  %v2302_v37 = vpop.f32.mrb[65].mxu0  ;;  %v3180_v27 = vpack.c.bf16 %v12605_v21, %v12590_v42 }
 0x1ae   : > { %v2303_v58 = vadd.f32 %v12164_v13, %v2302_v37  ;;  %v10703_v62 = vpop.f32.mrb[66].mxu0  ;;  %v3179_v30 = vpack.c.bf16 %v12609_v5, %v12597_v56 }
 0x1af   : > { %v2751_v23 = vmul.f32 0.2, %v2311_v50  ;;  %v2314_v54 = vadd.f32 %v10703_v62, %v12164_v13  ;;  %v2305_v8 = vpop.f32.mrb[67].mxu0 }
 0x1b0   : > { %v2749_v39 = vmul.f32 0.2, %v2303_v58  ;;  %v2306_v61 = vadd.f32 %v12164_v13, %v2305_v8  ;;  %10864 = vmatprep.mubr.msk.bf16.mxu1 %vm3268_vm2, %v3179_v30 }
 0x1b1   : > { %v2911_v38 = vmax.f32 %v2311_v50, %v2751_v23  ;;  %v2752_v57 = vmul.f32 0.2, %v2314_v54  ;;  %10817 = vmatmul.mubr.msk.bf16.gmra.mrb[172].mxu0 %vm3268_vm2, %v18852_v32  ;;  %10865 = vmatmul.mubr.msk.bf16.gmra.mrb[44].mxu1 %vm3268_vm2, %v3180_v27 }
 0x1b2   : > { %v2909_v37 = vmax.f32 %v2303_v58, %v2749_v39  ;;  %v2750_v6 = vmul.f32 0.2, %v2306_v61 }
 0x1b3   : > { %v12632_v62 = vmax.f32 %v3039_v22, %v2911_v38  ;;  %v2912_v4 = vmax.f32 %v2314_v54, %v2752_v57 }
 0x1b4   : > { %v12637_v50 = vmax.f32 %v3037_v20, %v2909_v37  ;;  %v2910_v30 = vmax.f32 %v2306_v61, %v2750_v6  ;;  %v10706_v23 = vpop.f32.mrb[68].mxu0 }
 0x1b5   : > { %v12642_v25 = vmax.f32 %v3040_v60, %v2912_v4  ;;  %v2327_v26 = vadd.f32 %v10706_v23, %v12164_v13  ;;  %v2318_v27 = vpop.f32.mrb[69].mxu0  ;;  %v3182_v32 = vpack.c.bf16 %v2912_v4, %v2911_v38 }
 0x1b6   : > { %v12648_v43 = vmax.f32 %v3038_v31, %v2910_v30  ;;  %v2319_v12 = vadd.f32 %v12164_v13, %v2318_v27  ;;  %v10707_v14 = vpop.f32.mrb[70].mxu0  ;;  %v3181_v1 = vpack.c.bf16 %v2910_v30, %v2909_v37 }
 0x1b7   : > { %v2755_v22 = vmul.f32 0.2, %v2327_v26  ;;  %v2330_v20 = vadd.f32 %v10707_v14, %v12164_v13  ;;  %v2321_v6 = vpop.f32.mrb[71].mxu0 }
 0x1b8   : > { %v2753_v2 = vmul.f32 0.2, %v2319_v12  ;;  %v2322_v24 = vadd.f32 %v12164_v13, %v2321_v6  ;;  %10868 = vmatprep.mubr.msk.bf16.mxu1 %vm3268_vm2, %v3181_v1 }
 0x1b9   : > { %v2915_v60 = vmax.f32 %v2327_v26, %v2755_v22  ;;  %v2756_v4 = vmul.f32 0.2, %v2330_v20  ;;  %10869 = vmatmul.mubr.msk.bf16.gmra.mrb[48].mxu1 %vm3268_vm2, %v3182_v32 }
 0x1ba   : > { %v2913_v40 = vmax.f32 %v2319_v12, %v2753_v2  ;;  %v2754_v41 = vmul.f32 0.2, %v2322_v24 }
 0x1bb   : > { %v12658_v31 = vmax.f32 %v3043_v53, %v2915_v60  ;;  %v2916_v58 = vmax.f32 %v2330_v20, %v2756_v4  ;;  %v11454_v53 = vld [vmem:[%s18580_s7] ss:$8 sps:$4 sm:$0xff]  }
 0x1bc   : > { %v12663_v54 = vmax.f32 %v3041_v28, %v2913_v40  ;;  %v2914_v8 = vmax.f32 %v2322_v24, %v2754_v41  ;;  %v10710_v39 = vpop.f32.mrb[72].mxu0  ;;  %6331 = vmatpush1.bf16.msra.mxu1 %v11454_v53 }
 0x1bd   : > { %v12668_v61 = vmax.f32 %v3044_v17, %v2916_v58  ;;  %v2343_v38 = vadd.f32 %v10710_v39, %v12164_v13  ;;  %v2334_v57 = vpop.f32.mrb[73].mxu0  ;;  %v3184_v37 = vpack.c.bf16 %v2916_v58, %v2915_v60 }
 0x1be   : > { %v12674_v55 = vmax.f32 %v3042_v51, %v2914_v8  ;;  %v2335_v10 = vadd.f32 %v12164_v13, %v2334_v57  ;;  %v10711_v18 = vpop.f32.mrb[74].mxu0  ;;  %v3183_v44 = vpack.c.bf16 %v2914_v8, %v2913_v40  ;;  %v18853_v40 = vmax.f32 %v12473_v59, %v12597_v56 }
 0x1bf   : > { %v2759_v9 = vmul.f32 0.2, %v2343_v38  ;;  %v2346_v28 = vadd.f32 %v10711_v18, %v12164_v13  ;;  %v2337_v17 = vpop.f32.mrb[75].mxu0  ;;  %v18854_v8 = vmax.f32 %v12478_v3, %v12605_v21  ;;  %v18855_v59 = vmax.f32 %v12485_v11, %v12609_v5 }
 0x1c0   : > { %v2757_v30 = vmul.f32 0.2, %v2335_v10  ;;  %v2338_v35 = vadd.f32 %v12164_v13, %v2337_v17  ;;  %10872 = vmatprep.mubr.msk.bf16.mxu1 %vm3268_vm2, %v3183_v44 }
 0x1c1   : > { %v2919_v29 = vmax.f32 %v2343_v38, %v2759_v9  ;;  %v2760_v51 = vmul.f32 0.2, %v2346_v28  ;;  %10873 = vmatmul.mubr.msk.bf16.gmra.mrb[52].mxu1 %vm3268_vm2, %v3184_v37  ;;  %v12731_v38 = vld [vmem:[%s18575_s2] ss:$0 sm:$0xff] }
 0x1c2   : > { %v2917_v23 = vmax.f32 %v2335_v10, %v2757_v30  ;;  %v2758_v26 = vmul.f32 0.2, %v2338_v35 }
 0x1c3   : > { %v12690_v27 = vmax.f32 %v3047_v45, %v2919_v29  ;;  %v2920_v32 = vmax.f32 %v2346_v28, %v2760_v51 }
 0x1c4   : > { %v12695_v12 = vmax.f32 %v3045_v48, %v2917_v23  ;;  %v2918_v14 = vmax.f32 %v2338_v35, %v2758_v26  ;;  %v10714_v1 = vpop.f32.mrb[76].mxu0 }
 0x1c5   : > { %v12700_v22 = vmax.f32 %v3048_v46, %v2920_v32  ;;  %v2359_v20 = vadd.f32 %v10714_v1, %v12164_v13  ;;  %v2350_v6 = vpop.f32.mrb[77].mxu0  ;;  %v3186_v2 = vpack.c.bf16 %v2920_v32, %v2919_v29 }
 0x1c6   : > { %v12706_v33 = vmax.f32 %v3046_v7, %v2918_v14  ;;  %v2351_v63 = vadd.f32 %v12164_v13, %v2350_v6  ;;  %v10715_v0 = vpop.f32.mrb[78].mxu0  ;;  %v3185_v52 = vpack.c.bf16 %v2918_v14, %v2917_v23 }
 0x1c7   : > { %v2763_v45 = vmul.f32 0.2, %v2359_v20  ;;  %v2362_v48 = vadd.f32 %v10715_v0, %v12164_v13  ;;  %v2353_v24 = vpop.f32.mrb[79].mxu0 }
 0x1c8   : > { %v2761_v34 = vmul.f32 0.2, %v2351_v63  ;;  %v2354_v47 = vadd.f32 %v12164_v13, %v2353_v24  ;;  %10876 = vmatprep.mubr.msk.bf16.mxu1 %vm3268_vm2, %v3185_v52 }
 0x1c9   : > { %v2923_v46 = vmax.f32 %v2359_v20, %v2763_v45  ;;  %v2764_v60 = vmul.f32 0.2, %v2362_v48  ;;  %10877 = vmatmul.mubr.msk.bf16.gmra.mrb[56].mxu1 %vm3268_vm2, %v3186_v2 }
 0x1ca   : > { %v2921_v19 = vmax.f32 %v2351_v63, %v2761_v34  ;;  %v2762_v49 = vmul.f32 0.2, %v2354_v47 }
 0x1cb   : > { %v12716_v7 = vmax.f32 %v3051_v16, %v2923_v46  ;;  %v2924_v4 = vmax.f32 %v2362_v48, %v2764_v60 }
 0x1cc   : > { %v12721_v41 = vmax.f32 %v18853_v40, %v2921_v19  ;;  %v2922_v13 = vmax.f32 %v2354_v47, %v2762_v49  ;;  %v10718_v58 = vpop.f32.mrb[80].mxu0 }
 0x1cd   : > { %v12726_v39 = vmax.f32 %v18854_v8, %v2924_v4  ;;  %v2375_v36 = vadd.f32 %v12731_v38, %v10718_v58  ;;  %v2366_v42 = vpop.f32.mrb[81].mxu0  ;;  %v3188_v16 = vpack.c.bf16 %v2924_v4, %v2923_v46 }
 0x1ce   : > { %v12737_v56 = vmax.f32 %v18855_v59, %v2922_v13  ;;  %v2367_v57 = vadd.f32 %v12731_v38, %v2366_v42  ;;  %v10719_v37 = vpop.f32.mrb[82].mxu0  ;;  %v3187_v3 = vpack.c.bf16 %v2922_v13, %v2921_v19 }
 0x1cf   : > { %v2767_v21 = vmul.f32 0.2, %v2375_v36  ;;  %v2378_v10 = vadd.f32 %v12731_v38, %v10719_v37  ;;  %v2369_v18 = vpop.f32.mrb[83].mxu0  ;;  %v11460_v37 = vld [vmem:[%s18580_s7 + $0x14] ss:$8 sps:$4 sm:$0xff]  }
 0x1d0   : > { %v2765_v44 = vmul.f32 0.2, %v2367_v57  ;;  %v2370_v53 = vadd.f32 %v12731_v38, %v2369_v18  ;;  %10880 = vmatprep.mubr.msk.bf16.mxu1 %vm3268_vm2, %v3187_v3  ;;  %v11458_v18 = vld [vmem:[%s18580_s7 + $0x10] ss:$8 sps:$4 sm:$0xff]   ;;  %6332 = vmatprep.subr.bf16.mxu1 %v11460_v37 }
 0x1d1   : > { %v12743_v15 = vmax.f32 %v2375_v36, %v2767_v21  ;;  %v2768_v9 = vmul.f32 0.2, %v2378_v10  ;;  %10881 = vmatmul.mubr.msk.bf16.gmra.mrb[60].mxu1 %vm3268_vm2, %v3188_v16 }
 0x1d2   : > { %v12746_v11 = vmax.f32 %v2367_v57, %v2765_v44  ;;  %v2766_v5 = vmul.f32 0.2, %v2370_v53  ;;  %v11457_v57 = vld [vmem:[%s18578_s5] sm:$0xff]   ;;  %6333 = vmatpush1.bf16.msra.mxu1 %v11458_v18 }
 0x1d3   : > { %v3071_v28 = vmax.f32 %v12632_v62, %v12743_v15  ;;  %v12750_v17 = vmax.f32 %v2378_v10, %v2768_v9  ;;  %10964 = vmatprep.subr.bf16.mxu0 %v11457_v57  ;;  %v11463_v62 = vld [vmem:[%s18578_s5 + $0x18] sm:$0xff]  }
 0x1d4   : > { %v3069_v30 = vmax.f32 %v12637_v50, %v12746_v11  ;;  %v12754_v35 = vmax.f32 %v2370_v53, %v2766_v5  ;;  %v10722_v29 = vpop.f32.mrb[84].mxu0  ;;  %10965 = vmatpush3.bf16.msra.mxu0 %v11457_v57 }
 0x1d5   : > { %v3072_v51 = vmax.f32 %v12642_v25, %v12750_v17  ;;  %v2391_v23 = vadd.f32 %v12731_v38, %v10722_v29  ;;  %v2382_v26 = vpop.f32.mrb[85].mxu0  ;;  %v3190_v32 = vpack.c.bf16 %v12750_v17, %v12743_v15 }
 0x1d6   : > { %v3070_v14 = vmax.f32 %v12648_v43, %v12754_v35  ;;  %v2383_v1 = vadd.f32 %v12731_v38, %v2382_v26  ;;  %v10723_v20 = vpop.f32.mrb[86].mxu0  ;;  %v3189_v6 = vpack.c.bf16 %v12754_v35, %v12746_v11 }
 0x1d7   : > { %v2771_v2 = vmul.f32 0.2, %v2391_v23  ;;  %v2394_v63 = vadd.f32 %v12731_v38, %v10723_v20  ;;  %v2385_v0 = vpop.f32.mrb[87].mxu0 }
 0x1d8   : > { %v2769_v52 = vmul.f32 0.2, %v2383_v1  ;;  %v2386_v45 = vadd.f32 %v12731_v38, %v2385_v0  ;;  %10884 = vmatprep.mubr.msk.bf16.mxu1 %vm3268_vm2, %v3189_v6 }
 0x1d9   : > { %v12769_v48 = vmax.f32 %v2391_v23, %v2771_v2  ;;  %v2772_v24 = vmul.f32 0.2, %v2394_v63  ;;  %10885 = vmatmul.mubr.msk.bf16.gmra.mrb[64].mxu1 %vm3268_vm2, %v3190_v32 }
 0x1da   : > { %v12772_v34 = vmax.f32 %v2383_v1, %v2769_v52  ;;  %v2770_v47 = vmul.f32 0.2, %v2386_v45 }
 0x1db   : > { %v3075_v46 = vmax.f32 %v12658_v31, %v12769_v48  ;;  %v12776_v60 = vmax.f32 %v2394_v63, %v2772_v24 }
 0x1dc   : > { %v3073_v19 = vmax.f32 %v12663_v54, %v12772_v34  ;;  %v12780_v49 = vmax.f32 %v2386_v45, %v2770_v47  ;;  %v10726_v4 = vpop.f32.mrb[88].mxu0 }
 0x1dd   : > { %v3076_v40 = vmax.f32 %v12668_v61, %v12776_v60  ;;  %v2407_v13 = vadd.f32 %v12731_v38, %v10726_v4  ;;  %v2398_v58 = vpop.f32.mrb[89].mxu0  ;;  %v3192_v8 = vpack.c.bf16 %v12776_v60, %v12769_v48 }
 0x1de   : > { %v3074_v36 = vmax.f32 %v12674_v55, %v12780_v49  ;;  %v2399_v42 = vadd.f32 %v12731_v38, %v2398_v58  ;;  %v10727_v16 = vpop.f32.mrb[90].mxu0  ;;  %v3191_v59 = vpack.c.bf16 %v12780_v49, %v12772_v34 }
 0x1df   : > { %v2775_v3 = vmul.f32 0.2, %v2407_v13  ;;  %v2410_v21 = vadd.f32 %v12731_v38, %v10727_v16  ;;  %v2401_v10 = vpop.f32.mrb[91].mxu0 }
 0x1e0   : > { %v2773_v44 = vmul.f32 0.2, %v2399_v42  ;;  %v2402_v53 = vadd.f32 %v12731_v38, %v2401_v10  ;;  %10888 = vmatprep.mubr.msk.bf16.mxu1 %vm3268_vm2, %v3191_v59 }
 0x1e1   : > { %v12804_v9 = vmax.f32 %v2407_v13, %v2775_v3  ;;  %v2776_v5 = vmul.f32 0.2, %v2410_v21  ;;  %10889 = vmatmul.mubr.msk.bf16.gmra.mrb[68].mxu1 %vm3268_vm2, %v3192_v8  ;;  %v11461_v13 = vld [vmem:[%s18578_s5 + $0x8] sm:$0xff]  }
 0x1e2   : > { %v12807_v29 = vmax.f32 %v2399_v42, %v2773_v44  ;;  %v2774_v23 = vmul.f32 0.2, %v2402_v53  ;;  %10966 = vmatprep.subr.bf16.mxu0 %v11461_v13 }
 0x1e3   : > { %v3079_v26 = vmax.f32 %v12690_v27, %v12804_v9  ;;  %v12811_v32 = vmax.f32 %v2410_v21, %v2776_v5  ;;  %10967 = vmatpush3.bf16.msra.mxu0 %v11461_v13 }
 0x1e4   : > { %v3077_v1 = vmax.f32 %v12695_v12, %v12807_v29  ;;  %v12815_v20 = vmax.f32 %v2402_v53, %v2774_v23  ;;  %v10730_v6 = vpop.f32.mrb[92].mxu0 }
 0x1e5   : > { %v3080_v2 = vmax.f32 %v12700_v22, %v12811_v32  ;;  %v2423_v63 = vadd.f32 %v12731_v38, %v10730_v6  ;;  %v2414_v0 = vpop.f32.mrb[93].mxu0  ;;  %v3194_v52 = vpack.c.bf16 %v12811_v32, %v12804_v9 }
 0x1e6   : > { %v3078_v45 = vmax.f32 %v12706_v33, %v12815_v20  ;;  %v2415_v24 = vadd.f32 %v12731_v38, %v2414_v0  ;;  %v10731_v47 = vpop.f32.mrb[94].mxu0  ;;  %v3193_v4 = vpack.c.bf16 %v12815_v20, %v12807_v29 }
 0x1e7   : > { %v2779_v58 = vmul.f32 0.2, %v2423_v63  ;;  %v2426_v8 = vadd.f32 %v12731_v38, %v10731_v47  ;;  %v2417_v42 = vpop.f32.mrb[95].mxu0 }
 0x1e8   : > { %v2777_v16 = vmul.f32 0.2, %v2415_v24  ;;  %v2418_v59 = vadd.f32 %v12731_v38, %v2417_v42  ;;  %10892 = vmatprep.mubr.msk.bf16.mxu1 %vm3268_vm2, %v3193_v4  ;;  %v11462_v42 = vld [vmem:[%s18578_s5 + $0x10] sm:$0xff]  }
 0x1e9   : > { %v12833_v57 = vmax.f32 %v2423_v63, %v2779_v58  ;;  %v2780_v37 = vmul.f32 0.2, %v2426_v8  ;;  %10893 = vmatmul.mubr.msk.bf16.gmra.mrb[72].mxu1 %vm3268_vm2, %v3194_v52  ;;  %10968 = vmatprep.subr.bf16.mxu0 %v11462_v42 }
 0x1ea   : > { %v12836_v3 = vmax.f32 %v2415_v24, %v2777_v16  ;;  %v2778_v21 = vmul.f32 0.2, %v2418_v59  ;;  %10969 = vmatpush3.bf16.msra.mxu0 %v11462_v42 }
 0x1eb   : > { %v3083_v10 = vmax.f32 %v12716_v7, %v12833_v57  ;;  %v12840_v18 = vmax.f32 %v2426_v8, %v2780_v37  ;;  %10970 = vmatprep.subr.bf16.mxu0 %v11463_v62 }
 0x1ec   : > { %v3081_v44 = vmax.f32 %v12721_v41, %v12836_v3  ;;  %v12844_v53 = vmax.f32 %v2418_v59, %v2778_v21  ;;  %v10734_v5 = vpop.f32.mrb[96].mxu0 }
 0x1ed   : > { %v3084_v23 = vmax.f32 %v12726_v39, %v12840_v18  ;;  %v2439_v6 = vadd.f32 %v12731_v38, %v10734_v5  ;;  %v2430_v63 = vpop.f32.mrb[97].mxu0  ;;  %v3196_v0 = vpack.c.bf16 %v12840_v18, %v12833_v57 }
 0x1ee   : > { %v2431_v24 = vadd.f32 %v12731_v38, %v2430_v63  ;;  %v10735_v47 = vpop.f32.mrb[98].mxu0  ;;  %v3195_v4 = vpack.c.bf16 %v12844_v53, %v12836_v3  ;;  %10971 = vmatpush3.bf16.msra.mxu0 %v11463_v62 }
 0x1ef   : > { %v2783_v13 = vmul.f32 0.2, %v2439_v6  ;;  %v2442_v58 = vadd.f32 %v12731_v38, %v10735_v47  ;;  %v2433_v8 = vpop.f32.mrb[99].mxu0 }
 0x1f0   : > { %v2781_v16 = vmul.f32 0.2, %v2431_v24  ;;  %v2434_v59 = vadd.f32 %v12731_v38, %v2433_v8  ;;  %10896 = vmatprep.mubr.msk.bf16.mxu1 %vm3268_vm2, %v3195_v4 }
 0x1f1   : > { %v2943_v37 = vmax.f32 %v2439_v6, %v2783_v13  ;;  %v2784_v21 = vmul.f32 0.2, %v2442_v58  ;;  %10897 = vmatmul.mubr.msk.bf16.gmra.mrb[76].mxu1 %vm3268_vm2, %v3196_v0 }
 0x1f2   : > { %v2941_v5 = vmax.f32 %v2431_v24, %v2781_v16  ;;  %v2782_v63 = vmul.f32 0.2, %v2434_v59 }
 0x1f3   : > { %v12866_v47 = vmax.f32 %v3071_v28, %v2943_v37  ;;  %v2944_v52 = vmax.f32 %v2442_v58, %v2784_v21 }
 0x1f4   : > { %v12871_v8 = vmax.f32 %v3069_v30, %v2941_v5  ;;  %v2942_v4 = vmax.f32 %v2434_v59, %v2782_v63  ;;  %v10738_v6 = vpop.f32.mrb[100].mxu0 }
 0x1f5   : > { %v12876_v0 = vmax.f32 %v3072_v51, %v2944_v52  ;;  %v2455_v24 = vadd.f32 %v12731_v38, %v10738_v6  ;;  %v2446_v13 = vpop.f32.mrb[101].mxu0  ;;  %v3198_v42 = vpack.c.bf16 %v2944_v52, %v2943_v37 }
 0x1f6   : > { %v12885_v50 = vmax.f32 %v3070_v14, %v2942_v4  ;;  %v2447_v15 = vadd.f32 %v12731_v38, %v2446_v13  ;;  %v10739_v11 = vpop.f32.mrb[102].mxu0  ;;  %v3197_v28 = vpack.c.bf16 %v2942_v4, %v2941_v5 }
 0x1f7   : > { %v2787_v25 = vmul.f32 0.2, %v2455_v24  ;;  %v2458_v17 = vadd.f32 %v12731_v38, %v10739_v11  ;;  %v2449_v30 = vpop.f32.mrb[103].mxu0 }
 0x1f8   : > { %v2785_v51 = vmul.f32 0.2, %v2447_v15  ;;  %v2450_v52 = vadd.f32 %v12731_v38, %v2449_v30  ;;  %10900 = vmatprep.mubr.msk.bf16.mxu1 %vm3268_vm2, %v3197_v28 }
 0x1f9   : > { %v2947_v58 = vmax.f32 %v2455_v24, %v2787_v25  ;;  %v2788_v16 = vmul.f32 0.2, %v2458_v17  ;;  %10901 = vmatmul.mubr.msk.bf16.gmra.mrb[80].mxu1 %vm3268_vm2, %v3198_v42 }
 0x1fa   : > { %v2945_v43 = vmax.f32 %v2447_v15, %v2785_v51  ;;  %v2786_v35 = vmul.f32 0.2, %v2450_v52 }
 0x1fb   : > { %v12895_v14 = vmax.f32 %v3075_v46, %v2947_v58  ;;  %v2948_v59 = vmax.f32 %v2458_v17, %v2788_v16 }
 0x1fc   : > { %v12900_v37 = vmax.f32 %v3073_v19, %v2945_v43  ;;  %v2946_v21 = vmax.f32 %v2450_v52, %v2786_v35  ;;  %v10742_v5 = vpop.f32.mrb[104].mxu0 }
 0x1fd   : > { %v12905_v63 = vmax.f32 %v3076_v40, %v2948_v59  ;;  %v2471_v4 = vadd.f32 %v12731_v38, %v10742_v5  ;;  %v2462_v6 = vpop.f32.mrb[105].mxu0  ;;  %v3200_v24 = vpack.c.bf16 %v2948_v59, %v2947_v58  ;;  %v11466_v5 = vld [vmem:[%s18580_s7 + $0x24] ss:$8 sps:$4 sm:$0xff]  }
 0x1fe   : > { %v12911_v31 = vmax.f32 %v3074_v36, %v2946_v21  ;;  %v2463_v54 = vadd.f32 %v12731_v38, %v2462_v6  ;;  %v10743_v48 = vpop.f32.mrb[106].mxu0  ;;  %v3199_v34 = vpack.c.bf16 %v2946_v21, %v2945_v43  ;;  %v11464_v21 = vld [vmem:[%s18580_s7 + $0x20] ss:$8 sps:$4 sm:$0xff]   ;;  %6334 = vmatprep.subr.bf16.mxu1 %v11466_v5 }
 0x1ff   : > { %v2791_v46 = vmul.f32 0.2, %v2471_v4  ;;  %v2474_v19 = vadd.f32 %v12731_v38, %v10743_v48  ;;  %v2465_v13 = vpop.f32.mrb[107].mxu0  ;;  %6335 = vmatpush1.bf16.msra.mxu1 %v11464_v21 }
 0x200   : > { %v2789_v61 = vmul.f32 0.2, %v2463_v54  ;;  %v2466_v60 = vadd.f32 %v12731_v38, %v2465_v13  ;;  %10904 = vmatprep.mubr.msk.bf16.mxu1 %vm3268_vm2, %v3199_v34 }
 0x201   : > { %v2951_v40 = vmax.f32 %v2471_v4, %v2791_v46  ;;  %v2792_v42 = vmul.f32 0.2, %v2474_v19  ;;  %10905 = vmatmul.mubr.msk.bf16.gmra.mrb[84].mxu1 %vm3268_vm2, %v3200_v24 }
 0x202   : > { %v2949_v55 = vmax.f32 %v2463_v54, %v2789_v61  ;;  %v2790_v49 = vmul.f32 0.2, %v2466_v60 }
 0x203   : > { %v12921_v36 = vmax.f32 %v3079_v26, %v2951_v40  ;;  %v2952_v62 = vmax.f32 %v2474_v19, %v2792_v42 }
 0x204   : > { %v12926_v15 = vmax.f32 %v3077_v1, %v2949_v55  ;;  %v2950_v11 = vmax.f32 %v2466_v60, %v2790_v49  ;;  %v10746_v28 = vpop.f32.mrb[108].mxu0 }
 0x205   : > { %v12931_v25 = vmax.f32 %v3080_v2, %v2952_v62  ;;  %v2487_v17 = vadd.f32 %v12731_v38, %v10746_v28  ;;  %v2478_v30 = vpop.f32.mrb[109].mxu0  ;;  %v3202_v51 = vpack.c.bf16 %v2952_v62, %v2951_v40 }
 0x206   : > { %v12937_v27 = vmax.f32 %v3078_v45, %v2950_v11  ;;  %v2479_v12 = vadd.f32 %v12731_v38, %v2478_v30  ;;  %v10747_v9 = vpop.f32.mrb[110].mxu0  ;;  %v3201_v29 = vpack.c.bf16 %v2950_v11, %v2949_v55 }
 0x207   : > { %v2795_v26 = vmul.f32 0.2, %v2487_v17  ;;  %v2490_v1 = vadd.f32 %v12731_v38, %v10747_v9  ;;  %v2481_v52 = vpop.f32.mrb[111].mxu0 }
 0x208   : > { %v2793_v22 = vmul.f32 0.2, %v2479_v12  ;;  %v2482_v32 = vadd.f32 %v12731_v38, %v2481_v52  ;;  %10908 = vmatprep.mubr.msk.bf16.mxu1 %vm3268_vm2, %v3201_v29 }
 0x209   : > { %v2955_v2 = vmax.f32 %v2487_v17, %v2795_v26  ;;  %v2796_v58 = vmul.f32 0.2, %v2490_v1  ;;  %10909 = vmatmul.mubr.msk.bf16.gmra.mrb[88].mxu1 %vm3268_vm2, %v3202_v51 }
 0x20a   : > { %v2953_v33 = vmax.f32 %v2479_v12, %v2793_v22  ;;  %v2794_v20 = vmul.f32 0.2, %v2482_v32 }
 0x20b   : > { %v12947_v45 = vmax.f32 %v3083_v10, %v2955_v2  ;;  %v2956_v16 = vmax.f32 %v2490_v1, %v2796_v58  ;;  %v18856_v10 = vmax.f32 %v12737_v56, %v12844_v53 }
 0x20c   : > { %v12952_v43 = vmax.f32 %v3081_v44, %v2953_v33  ;;  %v2954_v35 = vmax.f32 %v2482_v32, %v2794_v20  ;;  %v10750_v59 = vpop.f32.mrb[112].mxu0 }
 0x20d   : > { %v12963_v7 = vmax.f32 %v3084_v23, %v2956_v16  ;;  %v2503_v57 = vadd.f32 %v12731_v38, %v10750_v59  ;;  %v2494_v41 = vpop.f32.mrb[113].mxu0  ;;  %v3204_v3 = vpack.c.bf16 %v2956_v16, %v2955_v2 }
 0x20e   : > { %v12969_v44 = vmax.f32 %v18856_v10, %v2954_v35  ;;  %v2495_v4 = vadd.f32 %v12731_v38, %v2494_v41  ;;  %v10751_v6 = vpop.f32.mrb[114].mxu0  ;;  %v3203_v24 = vpack.c.bf16 %v2954_v35, %v2953_v33 }
 0x20f   : > { %v2799_v54 = vmul.f32 0.2, %v2503_v57  ;;  %v2506_v48 = vadd.f32 %v12731_v38, %v10751_v6  ;;  %v2497_v39 = vpop.f32.mrb[115].mxu0 }
 0x210   : > { %v2797_v18 = vmul.f32 0.2, %v2495_v4  ;;  %v2498_v23 = vadd.f32 %v12731_v38, %v2497_v39  ;;  %10912 = vmatprep.mubr.msk.bf16.mxu1 %vm3268_vm2, %v3203_v24 }
 0x211   : > { %v12975_v34 = vmax.f32 %v2503_v57, %v2799_v54  ;;  %v2800_v56 = vmul.f32 0.2, %v2506_v48  ;;  %10913 = vmatmul.mubr.msk.bf16.gmra.mrb[92].mxu1 %vm3268_vm2, %v3204_v3 }
 0x212   : > { %v12978_v53 = vmax.f32 %v2495_v4, %v2797_v18  ;;  %v2798_v46 = vmul.f32 0.2, %v2498_v23 }
 0x213   : > { %v3103_v19 = vmax.f32 %v12866_v47, %v12975_v34  ;;  %v12982_v13 = vmax.f32 %v2506_v48, %v2800_v56 }
 0x214   : > { %v3101_v61 = vmax.f32 %v12871_v8, %v12978_v53  ;;  %v12986_v60 = vmax.f32 %v2498_v23, %v2798_v46  ;;  %v10754_v40 = vpop.f32.mrb[116].mxu0 }
 0x215   : > { %v3104_v42 = vmax.f32 %v12876_v0, %v12982_v13  ;;  %v2519_v55 = vadd.f32 %v12731_v38, %v10754_v40  ;;  %v2510_v49 = vpop.f32.mrb[117].mxu0  ;;  %v3206_v62 = vpack.c.bf16 %v12982_v13, %v12975_v34 }
 0x216   : > { %v3102_v11 = vmax.f32 %v12885_v50, %v12986_v60  ;;  %v2511_v28 = vadd.f32 %v12731_v38, %v2510_v49  ;;  %v10755_v17 = vpop.f32.mrb[118].mxu0  ;;  %v3205_v30 = vpack.c.bf16 %v12986_v60, %v12978_v53 }
 0x217   : > { %v2803_v51 = vmul.f32 0.2, %v2519_v55  ;;  %v2522_v12 = vadd.f32 %v12731_v38, %v10755_v17  ;;  %v2513_v9 = vpop.f32.mrb[119].mxu0 }
 0x218   : > { %v2801_v29 = vmul.f32 0.2, %v2511_v28  ;;  %v2514_v26 = vadd.f32 %v12731_v38, %v2513_v9  ;;  %10916 = vmatprep.mubr.msk.bf16.mxu1 %vm3268_vm2, %v3205_v30 }
 0x219   : > { %v13001_v1 = vmax.f32 %v2519_v55, %v2803_v51  ;;  %v2804_v52 = vmul.f32 0.2, %v2522_v12  ;;  %10917 = vmatmul.mubr.msk.bf16.gmra.mrb[96].mxu1 %vm3268_vm2, %v3206_v62 }
 0x21a   : > { %v13004_v22 = vmax.f32 %v2511_v28, %v2801_v29  ;;  %v2802_v32 = vmul.f32 0.2, %v2514_v26 }
 0x21b   : > { %v3107_v2 = vmax.f32 %v12895_v14, %v13001_v1  ;;  %v13008_v58 = vmax.f32 %v2522_v12, %v2804_v52 }
 0x21c   : > { %v3105_v33 = vmax.f32 %v12900_v37, %v13004_v22  ;;  %v13012_v20 = vmax.f32 %v2514_v26, %v2802_v32  ;;  %v10758_v16 = vpop.f32.mrb[120].mxu0 }
 0x21d   : > { %v2535_v59 = vadd.f32 %v12731_v38, %v10758_v16  ;;  %v2526_v21 = vpop.f32.mrb[121].mxu0  ;;  %v3208_v5 = vpack.c.bf16 %v13008_v58, %v13001_v1  ;;  %v18869_v1 = vmax.f32 %v12905_v63, %v13008_v58 }
 0x21e   : > { %v2527_v41 = vadd.f32 %v12731_v38, %v2526_v21  ;;  %v10759_v3 = vpop.f32.mrb[122].mxu0  ;;  %v3207_v10 = vpack.c.bf16 %v13012_v20, %v13004_v22 }
 0x21f   : > { %v2807_v4 = vmul.f32 0.2, %v2535_v59  ;;  %v2538_v6 = vadd.f32 %v12731_v38, %v10759_v3  ;;  %v2529_v24 = vpop.f32.mrb[123].mxu0 }
 0x220   : > { %v2805_v54 = vmul.f32 0.2, %v2527_v41  ;;  %v2530_v48 = vadd.f32 %v12731_v38, %v2529_v24  ;;  %10920 = vmatprep.mubr.msk.bf16.mxu1 %vm3268_vm2, %v3207_v10  ;;  %v13067_v24 = vld [vmem:[%s18577_s4] ss:$0 sm:$0xff] }
 0x221   : > { %v13027_v39 = vmax.f32 %v2535_v59, %v2807_v4  ;;  %v2808_v18 = vmul.f32 0.2, %v2538_v6  ;;  %10921 = vmatmul.mubr.msk.bf16.gmra.mrb[100].mxu1 %vm3268_vm2, %v3208_v5  ;;  %v11467_v59 = vld [vmem:[%s18580_s7 + $0x30] ss:$8 sps:$4 sm:$0xff]  }
 0x222   : > { %v13030_v23 = vmax.f32 %v2527_v41, %v2805_v54  ;;  %v2806_v56 = vmul.f32 0.2, %v2530_v48  ;;  %v11469_v41 = vld [vmem:[%s18580_s7 + $0x34] ss:$8 sps:$4 sm:$0xff]  }
 0x223   : > { %v13034_v40 = vmax.f32 %v2538_v6, %v2808_v18  ;;  %6336 = vmatprep.subr.bf16.mxu1 %v11469_v41 }
 0x224   : > { %v13038_v49 = vmax.f32 %v2530_v48, %v2806_v56  ;;  %v10762_v62 = vpop.f32.mrb[124].mxu0  ;;  %6337 = vmatpush1.bf16.msra.mxu1 %v11467_v59 }
 0x225   : > { %v2551_v17 = vadd.f32 %v12731_v38, %v10762_v62  ;;  %v2542_v30 = vpop.f32.mrb[125].mxu0  ;;  %v3210_v51 = vpack.c.bf16 %v13034_v40, %v13027_v39 }
 0x226   : > { %v2543_v9 = vadd.f32 %v12731_v38, %v2542_v30  ;;  %v10763_v29 = vpop.f32.mrb[126].mxu0  ;;  %v3209_v26 = vpack.c.bf16 %v13038_v49, %v13030_v23 }
 0x227   : > { %v2811_v52 = vmul.f32 0.2, %v2551_v17  ;;  %v2554_v32 = vadd.f32 %v12731_v38, %v10763_v29  ;;  %v2545_v16 = vpop.f32.mrb[127].mxu0 }
 0x228   : > { %v2809_v21 = vmul.f32 0.2, %v2543_v9  ;;  %v2546_v5 = vadd.f32 %v12731_v38, %v2545_v16  ;;  %10924 = vmatprep.mubr.msk.bf16.mxu1 %vm3268_vm2, %v3209_v26 }
 0x229   : > { %v13059_v3 = vmax.f32 %v2551_v17, %v2811_v52  ;;  %v2812_v10 = vmul.f32 0.2, %v2554_v32  ;;  %10925 = vmatmul.mubr.msk.bf16.gmra.mrb[104].mxu1 %vm3268_vm2, %v3210_v51 }
 0x22a   : > { %v13062_v4 = vmax.f32 %v2543_v9, %v2809_v21  ;;  %v2810_v6 = vmul.f32 0.2, %v2546_v5 }
 0x22b   : > { %v13071_v48 = vmax.f32 %v2554_v32, %v2812_v10 }
 0x22c   : > { %v13075_v56 = vmax.f32 %v2546_v5, %v2810_v6  ;;  %v10766_v62 = vpop.f32.mrb[128].mxu0  ;;  %v10822_v17 = vpop.f32.mrb[0].mxu1 }
 0x22d   : > { %v2567_v51 = vadd.f32 %v12731_v38, %v10766_v62  ;;  %v3616_v9 = vadd.f32 %v10822_v17, %v13067_v24  ;;  %v2558_v29 = vpop.f32.mrb[129].mxu0  ;;  %v3607_v26 = vpop.f32.mrb[1].mxu1  ;;  %v3212_v52 = vpack.c.bf16 %v13071_v48, %v13059_v3 }
 0x22e   : > { %v2559_v16 = vadd.f32 %v12731_v38, %v2558_v29  ;;  %v3608_v59 = vadd.f32 %v13067_v24, %v3607_v26  ;;  %v10767_v21 = vpop.f32.mrb[130].mxu0  ;;  %v10823_v5 = vpop.f32.mrb[2].mxu1  ;;  %v3211_v41 = vpack.c.bf16 %v13075_v56, %v13062_v4 }
 0x22f   : > { %v2815_v10 = vmul.f32 0.2, %v2567_v51  ;;  %v4200_v6 = vmul.f32 0.2, %v3616_v9  ;;  %v2570_v62 = vadd.f32 %v12731_v38, %v10767_v21  ;;  %v3619_v17 = vadd.f32 %v10823_v5, %v13067_v24  ;;  %v2561_v30 = vpop.f32.mrb[131].mxu0  ;;  %v3610_v18 = vpop.f32.mrb[3].mxu1 }
 0x230   : > { %v2813_v54 = vmul.f32 0.2, %v2559_v16  ;;  %v4198_v12 = vmul.f32 0.2, %v3608_v59  ;;  %v2562_v32 = vadd.f32 %v12731_v38, %v2561_v30  ;;  %v3611_v29 = vadd.f32 %v13067_v24, %v3610_v18  ;;  %10928 = vmatprep.mubr.msk.bf16.mxu1 %vm3268_vm2, %v3211_v41 }
 0x231   : > { %v2975_v26 = vmax.f32 %v2567_v51, %v2815_v10  ;;  %v2816_v28 = vmul.f32 0.2, %v2570_v62  ;;  %v4201_v55 = vmul.f32 0.2, %v3619_v17  ;;  %10929 = vmatmul.mubr.msk.bf16.gmra.mrb[108].mxu1 %vm3268_vm2, %v3212_v52  ;;  %v13100_v35 = vmax.f32 %v3616_v9, %v4200_v6 }
 0x232   : > { %v2973_v46 = vmax.f32 %v2559_v16, %v2813_v54  ;;  %v2814_v57 = vmul.f32 0.2, %v2562_v32  ;;  %v4199_v21 = vmul.f32 0.2, %v3611_v29  ;;  %v13102_v30 = vmax.f32 %v3608_v59, %v4198_v12 }
 0x233   : > { %v13098_v5 = vmax.f32 %v3103_v19, %v2975_v26  ;;  %18858 = vst [vmem:[#allocation6_spill] sm:$0xff] %v13100_v35  ;;  %v2976_v18 = vmax.f32 %v2570_v62, %v2816_v28  ;;  %v13109_v41 = vmax.f32 %v3619_v17, %v4201_v55 }
 0x234   : > { %v13107_v51 = vmax.f32 %v3101_v61, %v2973_v46  ;;  %v2974_v54 = vmax.f32 %v2562_v32, %v2814_v57  ;;  %v13111_v52 = vmax.f32 %v3611_v29, %v4199_v21  ;;  %v10770_v16 = vpop.f32.mrb[132].mxu0  ;;  %v10826_v10 = vpop.f32.mrb[4].mxu1 }
 0x235   : > { %18857 = vst [vmem:[#allocation5_spill] sm:$0xff] %v13098_v5  ;;  %18860 = vst [vmem:[#allocation8_spill] sm:$0xff] %v13109_v41  ;;  %v13116_v47 = vmax.f32 %v3104_v42, %v2976_v18  ;;  %v2583_v34 = vadd.f32 %v12731_v38, %v10770_v16  ;;  %v3632_v19 = vadd.f32 %v10826_v10, %v13067_v24  ;;  %v2574_v28 = vpop.f32.mrb[133].mxu0  ;;  %v3623_v8 = vpop.f32.mrb[5].mxu1 }
 0x236   : > { %18859 = vst [vmem:[#allocation7_spill] sm:$0xff] %v13107_v51  ;;  %v3214_v53 = vpack.c.bf16 %v2976_v18, %v2975_v26  ;;  %v13123_v61 = vmax.f32 %v3102_v11, %v2974_v54  ;;  %v2575_v57 = vadd.f32 %v12731_v38, %v2574_v28  ;;  %v3624_v55 = vadd.f32 %v13067_v24, %v3623_v8  ;;  %v10771_v12 = vpop.f32.mrb[134].mxu0  ;;  %v10827_v0 = vpop.f32.mrb[6].mxu1 }
 0x237   : > { %18861 = vst [vmem:[#allocation9_spill] sm:$0xff] %v13116_v47  ;;  %v3213_v13 = vpack.c.bf16 %v2974_v54, %v2973_v46  ;;  %v2819_v42 = vmul.f32 0.2, %v2583_v34  ;;  %v4204_v9 = vmul.f32 0.2, %v3632_v19  ;;  %v2586_v32 = vadd.f32 %v12731_v38, %v10771_v12  ;;  %v2577_v6 = vpop.f32.mrb[135].mxu0 }
 0x238   : > { %18862 = vst [vmem:[#allocation10_spill] sm:$0xff] %v13123_v61  ;;  %v3635_v59 = vadd.f32 %v10827_v0, %v13067_v24  ;;  %v3626_v62 = vpop.f32.mrb[7].mxu1  ;;  %v2817_v17 = vmul.f32 0.2, %v2575_v57  ;;  %v4202_v29 = vmul.f32 0.2, %v3624_v55  ;;  %v2578_v50 = vadd.f32 %v12731_v38, %v2577_v6 }
 0x239   : > { %v3627_v60 = vadd.f32 %v13067_v24, %v3626_v62  ;;  %10932 = vmatprep.mubr.msk.bf16.mxu1 %vm3268_vm2, %v3213_v13  ;;  %v2979_v11 = vmax.f32 %v2583_v34, %v2819_v42  ;;  %v13132_v26 = vmax.f32 %v3632_v19, %v4204_v9  ;;  %v2820_v46 = vmul.f32 0.2, %v2586_v32 }
 0x23a   : > { %v4205_v21 = vmul.f32 0.2, %v3635_v59  ;;  %10933 = vmatmul.mubr.msk.bf16.gmra.mrb[112].mxu1 %vm3268_vm2, %v3214_v53  ;;  %v2977_v18 = vmax.f32 %v2575_v57, %v2817_v17  ;;  %v13135_v54 = vmax.f32 %v3624_v55, %v4202_v29  ;;  %v2818_v16 = vmul.f32 0.2, %v2578_v50 }
 0x23b   : > { %18863 = vst [vmem:[#allocation11_spill] sm:$0xff] %v13132_v26  ;;  %v4203_v10 = vmul.f32 0.2, %v3627_v60  ;;  %v13140_v28 = vmax.f32 %v3107_v2, %v2979_v11  ;;  %v2980_v8 = vmax.f32 %v2586_v32, %v2820_v46  ;;  %v18871_v9 = vmax.f32 %v12911_v31, %v13012_v20 }
 0x23c   : > { %18864 = vst [vmem:[#allocation12_spill] sm:$0xff] %v13135_v54  ;;  %v13142_v12 = vmax.f32 %v3635_v59, %v4205_v21  ;;  %v13149_v19 = vmax.f32 %v3105_v33, %v2977_v18  ;;  %v2978_v53 = vmax.f32 %v2578_v50, %v2818_v16  ;;  %v10774_v55 = vpop.f32.mrb[136].mxu0  ;;  %v10830_v0 = vpop.f32.mrb[8].mxu1 }
 0x23d   : > { %18865 = vst [vmem:[#allocation13_spill] sm:$0xff] %v13140_v28  ;;  %v13151_v57 = vmax.f32 %v3627_v60, %v4203_v10  ;;  %v13158_v2 = vmax.f32 %v18869_v1, %v2980_v8  ;;  %v2599_v13 = vadd.f32 %v12731_v38, %v10774_v55  ;;  %v3648_v42 = vadd.f32 %v10830_v0, %v13067_v24  ;;  %v2590_v37 = vpop.f32.mrb[137].mxu0  ;;  %v3639_v22 = vpop.f32.mrb[9].mxu1 }
 0x23e   : > { %18866 = vst [vmem:[#allocation14_spill] sm:$0xff] %v13142_v12  ;;  %18867 = vst [vmem:[#allocation15_spill] sm:$0xff] %v13149_v19  ;;  %v3216_v33 = vpack.c.bf16 %v2980_v8, %v2979_v11  ;;  %v13165_v32 = vmax.f32 %v18871_v9, %v2978_v53  ;;  %v2591_v59 = vadd.f32 %v12731_v38, %v2590_v37  ;;  %v10775_v62 = vpop.f32.mrb[138].mxu0  ;;  %v10831_v63 = vpop.f32.mrb[10].mxu1 }
 0x23f   : > { %18868 = vst [vmem:[#allocation16_spill] sm:$0xff] %v13151_v57  ;;  %18870 = vst [vmem:[#allocation17_spill] sm:$0xff] %v13158_v2  ;;  %v3640_v6 = vadd.f32 %v13067_v24, %v3639_v22  ;;  %v3215_v58 = vpack.c.bf16 %v2978_v53, %v2977_v18  ;;  %v2823_v17 = vmul.f32 0.2, %v2599_v13  ;;  %v4208_v29 = vmul.f32 0.2, %v3648_v42 }
 0x240   : > { %18872 = vst [vmem:[#allocation18_spill] sm:$0xff] %v13165_v32  ;;  %v2602_v50 = vadd.f32 %v12731_v38, %v10775_v62  ;;  %v3651_v60 = vadd.f32 %v10831_v63, %v13067_v24  ;;  %v2593_v46 = vpop.f32.mrb[139].mxu0  ;;  %v3642_v11 = vpop.f32.mrb[11].mxu1  ;;  %v2821_v21 = vmul.f32 0.2, %v2591_v59  ;;  %v18875_v22 = vmax.f32 %v12921_v36, %v13027_v39 }
 0x241   : > { %v4206_v16 = vmul.f32 0.2, %v3640_v6  ;;  %v2594_v31 = vadd.f32 %v12731_v38, %v2593_v46  ;;  %v3643_v20 = vadd.f32 %v13067_v24, %v3642_v11  ;;  %10936 = vmatprep.mubr.msk.bf16.mxu1 %vm3268_vm2, %v3215_v58  ;;  %v2983_v10 = vmax.f32 %v2599_v13, %v2823_v17 }
 0x242   : > { %v13174_v8 = vmax.f32 %v3648_v42, %v4208_v29  ;;  %v2824_v18 = vmul.f32 0.2, %v2602_v50  ;;  %v4209_v53 = vmul.f32 0.2, %v3651_v60  ;;  %10937 = vmatmul.mubr.msk.bf16.gmra.mrb[116].mxu1 %vm3268_vm2, %v3216_v33  ;;  %v2981_v55 = vmax.f32 %v2591_v59, %v2821_v21 }
 0x243   : > { %v13177_v0 = vmax.f32 %v3640_v6, %v4206_v16  ;;  %v2822_v1 = vmul.f32 0.2, %v2594_v31  ;;  %v4207_v37 = vmul.f32 0.2, %v3643_v20  ;;  %v13182_v9 = vmax.f32 %v18875_v22, %v2983_v10 }
 0x244   : > { %18873 = vst [vmem:[#allocation19_spill] sm:$0xff] %v13174_v8  ;;  %v2984_v62 = vmax.f32 %v2602_v50, %v2824_v18  ;;  %v13184_v63 = vmax.f32 %v3651_v60, %v4209_v53  ;;  %v18878_v42 = vmax.f32 %v12926_v15, %v13030_v23  ;;  %v10778_v58 = vpop.f32.mrb[140].mxu0  ;;  %v10834_v17 = vpop.f32.mrb[12].mxu1  ;;  %v18881_v39 = vmax.f32 %v12931_v25, %v13034_v40 }
 0x245   : > { %18874 = vst [vmem:[#allocation20_spill] sm:$0xff] %v13177_v0  ;;  %18876 = vst [vmem:[#allocation21_spill] sm:$0xff] %v13182_v9  ;;  %v2982_v59 = vmax.f32 %v2594_v31, %v2822_v1  ;;  %v13193_v6 = vmax.f32 %v3643_v20, %v4207_v37  ;;  %v2615_v50 = vadd.f32 %v12731_v38, %v10778_v58  ;;  %v2606_v15 = vpop.f32.mrb[141].mxu0  ;;  %v3655_v23 = vpop.f32.mrb[13].mxu1 }
 0x246   : > { %18877 = vst [vmem:[#allocation22_spill] sm:$0xff] %v13184_v63  ;;  %v13191_v33 = vmax.f32 %v18878_v42, %v2981_v55  ;;  %v13200_v29 = vmax.f32 %v18881_v39, %v2984_v62  ;;  %v3664_v60 = vadd.f32 %v10834_v17, %v13067_v24  ;;  %v3218_v46 = vpack.c.bf16 %v2984_v62, %v2983_v10  ;;  %v10779_v20 = vpop.f32.mrb[142].mxu0  ;;  %v10835_v25 = vpop.f32.mrb[14].mxu1 }
 0x247   : > { %18880 = vst [vmem:[#allocation24_spill] sm:$0xff] %v13193_v6  ;;  %v18883_v11 = vmax.f32 %v12937_v27, %v13038_v49  ;;  %v2607_v16 = vadd.f32 %v12731_v38, %v2606_v15  ;;  %v3656_v31 = vadd.f32 %v13067_v24, %v3655_v23  ;;  %v3217_v40 = vpack.c.bf16 %v2982_v59, %v2981_v55  ;;  %v2609_v22 = vpop.f32.mrb[143].mxu0  ;;  %v3658_v10 = vpop.f32.mrb[15].mxu1 }
 0x248   : > { %18879 = vst [vmem:[#allocation23_spill] sm:$0xff] %v13191_v33  ;;  %18882 = vst [vmem:[#allocation25_spill] sm:$0xff] %v13200_v29  ;;  %v2827_v18 = vmul.f32 0.2, %v2615_v50  ;;  %v4212_v53 = vmul.f32 0.2, %v3664_v60  ;;  %v2618_v1 = vadd.f32 %v12731_v38, %v10779_v20  ;;  %v3667_v37 = vadd.f32 %v10835_v25, %v13067_v24 }
 0x249   : > { %v13207_v21 = vmax.f32 %v18883_v11, %v2982_v59  ;;  %v2825_v62 = vmul.f32 0.2, %v2607_v16  ;;  %v4210_v42 = vmul.f32 0.2, %v3656_v31  ;;  %v2610_v27 = vadd.f32 %v12731_v38, %v2609_v22  ;;  %10940 = vmatprep.mubr.msk.bf16.mxu1 %vm3268_vm2, %v3217_v40 }
 0x24a   : > { %v3659_v49 = vadd.f32 %v13067_v24, %v3658_v10  ;;  %v2987_v58 = vmax.f32 %v2615_v50, %v2827_v18  ;;  %v13216_v17 = vmax.f32 %v3664_v60, %v4212_v53  ;;  %v2828_v55 = vmul.f32 0.2, %v2618_v1  ;;  %10941 = vmatmul.mubr.msk.bf16.gmra.mrb[120].mxu1 %vm3268_vm2, %v3218_v46 }
 0x24b   : > { %18884 = vst [vmem:[#allocation26_spill] sm:$0xff] %v13207_v21  ;;  %v4213_v59 = vmul.f32 0.2, %v3667_v37  ;;  %v2985_v39 = vmax.f32 %v2607_v16, %v2825_v62  ;;  %v13219_v15 = vmax.f32 %v3656_v31, %v4210_v42  ;;  %v2826_v23 = vmul.f32 0.2, %v2610_v27 }
 0x24c   : > { %18885 = vst [vmem:[#allocation27_spill] sm:$0xff] %v13216_v17  ;;  %v4211_v11 = vmul.f32 0.2, %v3659_v49  ;;  %v18887_v20 = vmax.f32 %v12947_v45, %v13059_v3  ;;  %v2988_v22 = vmax.f32 %v2618_v1, %v2828_v55  ;;  %v18889_v60 = vmax.f32 %v12952_v43, %v13062_v4  ;;  %v10782_v40 = vpop.f32.mrb[144].mxu0  ;;  %v10838_v18 = vpop.f32.mrb[16].mxu1 }
 0x24d   : > { %18886 = vst [vmem:[#allocation28_spill] sm:$0xff] %v13219_v15  ;;  %v13226_v10 = vmax.f32 %v3667_v37, %v4213_v59  ;;  %v2986_v16 = vmax.f32 %v2610_v27, %v2826_v23  ;;  %v18891_v3 = vmax.f32 %v12963_v7, %v13071_v48  ;;  %v2631_v1 = vadd.f32 %v12731_v38, %v10782_v40  ;;  %v2622_v43 = vpop.f32.mrb[145].mxu0  ;;  %v3671_v4 = vpop.f32.mrb[17].mxu1  ;;  %v11470_v23 = vld [vmem:[%s18580_s7 + $0x40] ss:$8 sps:$4 sm:$0xff]  }
 0x24e   : > { %v13224_v25 = vmax.f32 %v18887_v20, %v2987_v58  ;;  %v13233_v46 = vmax.f32 %v18889_v60, %v2985_v39  ;;  %v13235_v31 = vmax.f32 %v3659_v49, %v4211_v11  ;;  %v3680_v37 = vadd.f32 %v10838_v18, %v13067_v24  ;;  %v10783_v59 = vpop.f32.mrb[146].mxu0  ;;  %v10839_v7 = vpop.f32.mrb[18].mxu1 }
 0x24f   : > { %v13242_v53 = vmax.f32 %v18891_v3, %v2988_v22  ;;  %v3220_v62 = vpack.c.bf16 %v2988_v22, %v2987_v58  ;;  %v18893_v42 = vmax.f32 %v12969_v44, %v13075_v56  ;;  %v2623_v49 = vadd.f32 %v12731_v38, %v2622_v43  ;;  %v11472_v58 = vld [vmem:[%s18580_s7 + $0x44] ss:$8 sps:$4 sm:$0xff]   ;;  %v2625_v22 = vpop.f32.mrb[147].mxu0  ;;  %v3674_v60 = vpop.f32.mrb[19].mxu1 }
 0x250   : > { %18888 = vst [vmem:[#allocation29_spill] sm:$0xff] %v13224_v25  ;;  %18890 = vst [vmem:[#allocation30_spill] sm:$0xff] %v13233_v46  ;;  %v3672_v55 = vadd.f32 %v13067_v24, %v3671_v4  ;;  %v3219_v48 = vpack.c.bf16 %v2986_v16, %v2985_v39  ;;  %v2831_v11 = vmul.f32 0.2, %v2631_v1  ;;  %v4216_v20 = vmul.f32 0.2, %v3680_v37  ;;  %6338 = vmatprep.subr.bf16.mxu1 %v11472_v58 }
 0x251   : > { %18892 = vst [vmem:[#allocation31_spill] sm:$0xff] %v13242_v53  ;;  %v13249_v27 = vmax.f32 %v18893_v42, %v2986_v16  ;;  %v2634_v44 = vadd.f32 %v12731_v38, %v10783_v59  ;;  %v3683_v56 = vadd.f32 %v10839_v7, %v13067_v24  ;;  %v2829_v40 = vmul.f32 0.2, %v2623_v49  ;;  %6339 = vmatpush1.bf16.msra.mxu1 %v11470_v23 }
 0x252   : > { %v4214_v18 = vmul.f32 0.2, %v3672_v55  ;;  %v2626_v39 = vadd.f32 %v12731_v38, %v2625_v22  ;;  %v3675_v16 = vadd.f32 %v13067_v24, %v3674_v60  ;;  %10944 = vmatprep.mubr.msk.bf16.mxu1 %vm3268_vm2, %v3219_v48  ;;  %v13264_v3 = vmax.f32 %v2631_v1, %v2831_v11 }
 0x253   : > { %18894 = vst [vmem:[#allocation32_spill] sm:$0xff] %v13249_v27  ;;  %v13266_v43 = vmax.f32 %v3680_v37, %v4216_v20  ;;  %v2832_v4 = vmul.f32 0.2, %v2634_v44  ;;  %v4217_v42 = vmul.f32 0.2, %v3683_v56  ;;  %10945 = vmatmul.mubr.msk.bf16.gmra.mrb[124].mxu1 %vm3268_vm2, %v3220_v62  ;;  %v13269_v59 = vmax.f32 %v2623_v49, %v2829_v40 }
 0x254   : > { %18895 = vst [vmem:[#allocation33_spill] sm:$0xff] %v13264_v3  ;;  %v13271_v7 = vmax.f32 %v3672_v55, %v4214_v18  ;;  %v2830_v45 = vmul.f32 0.2, %v2626_v39  ;;  %v4215_v50 = vmul.f32 0.2, %v3675_v16  ;;  %v10786_v58 = vpop.f32.mrb[148].mxu0 }
 0x255   : > { %18896 = vst [vmem:[#allocation34_spill] sm:$0xff] %v13266_v43  ;;  %18897 = vst [vmem:[#allocation35_spill] sm:$0xff] %v13269_v59  ;;  %v13277_v48 = vmax.f32 %v2634_v44, %v2832_v4  ;;  %v13279_v37 = vmax.f32 %v3683_v56, %v4217_v42  ;;  %v10842_v11 = vpop.f32.mrb[20].mxu1  ;;  %v2638_v22 = vpop.f32.mrb[149].mxu0  ;;  %v18915_v47 = vmax.f32 %v13266_v43, %v13100_v35 }
 0x256   : > { %18898 = vst [vmem:[#allocation36_spill] sm:$0xff] %v13271_v7  ;;  %v13283_v49 = vmax.f32 %v2626_v39, %v2830_v45  ;;  %v13285_v55 = vmax.f32 %v3675_v16, %v4215_v50  ;;  %v13298_v45 = vld [vmem:[%s18575_s2] ss:$0 sm:$0xff]  ;;  %v3687_v60 = vpop.f32.mrb[21].mxu1  ;;  %v3696_v39 = vadd.f32 %v10842_v11, %v13067_v24  ;;  %v10787_v4 = vpop.f32.mrb[150].mxu0 }
 0x257   : > { %18899 = vst [vmem:[#allocation37_spill] sm:$0xff] %v13277_v48  ;;  %18900 = vst [vmem:[#allocation38_spill] sm:$0xff] %v13279_v37  ;;  %v3222_v44 = vpack.c.bf16 %v13277_v48, %v13264_v3  ;;  %v2647_v50 = vadd.f32 %v13298_v45, %v10786_v58  ;;  %v2639_v16 = vadd.f32 %v13298_v45, %v2638_v22  ;;  %v10843_v42 = vpop.f32.mrb[22].mxu1  ;;  %v2641_v23 = vpop.f32.mrb[151].mxu0 }
 0x258   : > { %18901 = vst [vmem:[#allocation39_spill] sm:$0xff] %v13283_v49  ;;  %18902 = vst [vmem:[#allocation40_spill] sm:$0xff] %v13285_v55  ;;  %v3221_v18 = vpack.c.bf16 %v13283_v49, %v13269_v59  ;;  %v3688_v20 = vadd.f32 %v13067_v24, %v3687_v60  ;;  %v2650_v62 = vadd.f32 %v13298_v45, %v10787_v4  ;;  %v3690_v36 = vpop.f32.mrb[23].mxu1  ;;  %v4220_v13 = vmul.f32 0.2, %v3696_v39 }
 0x259   : > { %v2835_v38 = vmul.f32 0.2, %v2647_v50  ;;  %v3699_v58 = vadd.f32 %v10843_v42, %v13067_v24  ;;  %v2833_v40 = vmul.f32 0.2, %v2639_v16  ;;  %v2642_v14 = vadd.f32 %v13298_v45, %v2641_v23 }
 0x25a   : > { %v3691_v34 = vadd.f32 %v13067_v24, %v3690_v36  ;;  %10948 = vmatprep.mubr.msk.bf16.mxu1 %vm3268_vm2, %v3221_v18  ;;  %v4218_v22 = vmul.f32 0.2, %v3688_v20  ;;  %v2836_v56 = vmul.f32 0.2, %v2650_v62  ;;  %v13316_v60 = vmax.f32 %v3696_v39, %v4220_v13 }
 0x25b   : > { %v13313_v11 = vmax.f32 %v2647_v50, %v2835_v38  ;;  %v4221_v1 = vmul.f32 0.2, %v3699_v58  ;;  %10949 = vmatmul.mubr.msk.bf16.gmra.mrb[128].mxu1 %vm3268_vm2, %v3222_v44  ;;  %v13318_v4 = vmax.f32 %v2639_v16, %v2833_v40  ;;  %v2834_v42 = vmul.f32 0.2, %v2642_v14 }
 0x25c   : > { %v4219_v3 = vmul.f32 0.2, %v3691_v34  ;;  %v13322_v5 = vmax.f32 %v3688_v20, %v4218_v22  ;;  %v13324_v36 = vmax.f32 %v2650_v62, %v2836_v56  ;;  %v10790_v18 = vpop.f32.mrb[152].mxu0  ;;  %v10846_v39 = vpop.f32.mrb[24].mxu1 }
 0x25d   : > { %18903 = vst [vmem:[#allocation41_spill] sm:$0xff] %v13313_v11  ;;  %18904 = vst [vmem:[#allocation42_spill] sm:$0xff] %v13318_v4  ;;  %v13326_v38 = vmax.f32 %v3699_v58, %v4221_v1  ;;  %v13332_v44 = vmax.f32 %v2642_v14, %v2834_v42  ;;  %v2663_v56 = vadd.f32 %v13298_v45, %v10790_v18  ;;  %v2654_v16 = vpop.f32.mrb[153].mxu0  ;;  %v3703_v58 = vpop.f32.mrb[25].mxu1 }
 0x25e   : > { %18905 = vst [vmem:[#allocation43_spill] sm:$0xff] %v13324_v36  ;;  %v13334_v40 = vmax.f32 %v3691_v34, %v4219_v3  ;;  %v3224_v62 = vpack.c.bf16 %v13324_v36, %v13313_v11  ;;  %v3712_v3 = vadd.f32 %v10846_v39, %v13067_v24  ;;  %v2655_v22 = vadd.f32 %v13298_v45, %v2654_v16  ;;  %v10791_v42 = vpop.f32.mrb[154].mxu0  ;;  %v10847_v23 = vpop.f32.mrb[26].mxu1 }
 0x25f   : > { %18906 = vst [vmem:[#allocation44_spill] sm:$0xff] %v13332_v44  ;;  %v3223_v34 = vpack.c.bf16 %v13332_v44, %v13318_v4  ;;  %v2839_v20 = vmul.f32 0.2, %v2663_v56  ;;  %v3704_v13 = vadd.f32 %v13067_v24, %v3703_v58  ;;  %v2666_v1 = vadd.f32 %v13298_v45, %v10791_v42  ;;  %v2657_v50 = vpop.f32.mrb[155].mxu0  ;;  %v3706_v11 = vpop.f32.mrb[27].mxu1 }
 0x260   : > { %v3715_v18 = vadd.f32 %v10847_v23, %v13067_v24  ;;  %v4224_v28 = vmul.f32 0.2, %v3712_v3  ;;  %v2837_v14 = vmul.f32 0.2, %v2655_v22  ;;  %v2658_v36 = vadd.f32 %v13298_v45, %v2657_v50 }
 0x261   : > { %v3707_v2 = vadd.f32 %v13067_v24, %v3706_v11  ;;  %10952 = vmatprep.mubr.msk.bf16.mxu1 %vm3268_vm2, %v3223_v34  ;;  %v13355_v39 = vmax.f32 %v2663_v56, %v2839_v20  ;;  %v4222_v16 = vmul.f32 0.2, %v3704_v13  ;;  %v2840_v4 = vmul.f32 0.2, %v2666_v1 }
 0x262   : > { %v4225_v19 = vmul.f32 0.2, %v3715_v18  ;;  %v13358_v58 = vmax.f32 %v3712_v3, %v4224_v28  ;;  %v13360_v23 = vmax.f32 %v2655_v22, %v2837_v14  ;;  %v2838_v42 = vmul.f32 0.2, %v2658_v36 }
 0x263   : > { %18907 = vst [vmem:[#allocation45_spill] sm:$0xff] %v13355_v39  ;;  %10953 = vmatmul.mubr.msk.bf16.gmra.mrb[132].mxu1 %vm3268_vm2, %v3224_v62  ;;  %v4223_v44 = vmul.f32 0.2, %v3707_v2  ;;  %v13364_v32 = vmax.f32 %v3704_v13, %v4222_v16  ;;  %v13366_v11 = vmax.f32 %v2666_v1, %v2840_v4 }
 0x264   : > { %18908 = vst [vmem:[#allocation46_spill] sm:$0xff] %v13360_v23  ;;  %v13368_v20 = vmax.f32 %v3715_v18, %v4225_v19  ;;  %v13374_v62 = vmax.f32 %v2658_v36, %v2838_v42  ;;  %v10794_v34 = vpop.f32.mrb[156].mxu0  ;;  %v10850_v3 = vpop.f32.mrb[28].mxu1 }
 0x265   : > { %18909 = vst [vmem:[#allocation47_spill] sm:$0xff] %v13366_v11  ;;  %v13376_v14 = vmax.f32 %v3707_v2, %v4223_v44  ;;  %v3226_v19 = vpack.c.bf16 %v13366_v11, %v13355_v39  ;;  %v2670_v22 = vpop.f32.mrb[157].mxu0  ;;  %v3719_v18 = vpop.f32.mrb[29].mxu1  ;;  %v2679_v16 = vadd.f32 %v13298_v45, %v10794_v34  ;;  %v3728_v50 = vadd.f32 %v10850_v3, %v13067_v24 }
 0x266   : > { %18910 = vst [vmem:[#allocation48_spill] sm:$0xff] %v13374_v62  ;;  %v3225_v36 = vpack.c.bf16 %v13374_v62, %v13360_v23  ;;  %v10795_v42 = vpop.f32.mrb[158].mxu0  ;;  %v10851_v28 = vpop.f32.mrb[30].mxu1  ;;  %v2671_v4 = vadd.f32 %v13298_v45, %v2670_v22  ;;  %v3720_v1 = vadd.f32 %v13067_v24, %v3719_v18 }
 0x267   : > { %v2682_v13 = vadd.f32 %v13298_v45, %v10795_v42  ;;  %v2673_v56 = vpop.f32.mrb[159].mxu0  ;;  %v3722_v2 = vpop.f32.mrb[31].mxu1  ;;  %v2843_v33 = vmul.f32 0.2, %v2679_v16  ;;  %v3731_v23 = vadd.f32 %v10851_v28, %v13067_v24  ;;  %v4228_v34 = vmul.f32 0.2, %v3728_v50 }
 0x268   : > { %v2674_v62 = vadd.f32 %v13298_v45, %v2673_v56  ;;  %v3723_v44 = vadd.f32 %v13067_v24, %v3722_v2  ;;  %10956 = vmatprep.mubr.msk.bf16.mxu1 %vm3268_vm2, %v3225_v36  ;;  %v2841_v21 = vmul.f32 0.2, %v2671_v4  ;;  %v4226_v3 = vmul.f32 0.2, %v3720_v1 }
 0x269   : > { %v13404_v18 = vmax.f32 %v2679_v16, %v2843_v33  ;;  %v2844_v42 = vmul.f32 0.2, %v2682_v13  ;;  %v4229_v39 = vmul.f32 0.2, %v3731_v23  ;;  %v13406_v28 = vmax.f32 %v3728_v50, %v4228_v34 }
 0x26a   : > { %v2842_v9 = vmul.f32 0.2, %v2674_v62  ;;  %v13408_v45 = vmax.f32 %v2671_v4, %v2841_v21  ;;  %v13410_v56 = vmax.f32 %v3720_v1, %v4226_v3  ;;  %v4227_v2 = vmul.f32 0.2, %v3723_v44 }
 0x26b   : > { %10957 = vmatmul.mubr.msk.bf16.gmra.mrb[136].mxu1 %vm3268_vm2, %v3226_v19  ;;  %18911 = vst [vmem:[#allocation49_spill] sm:$0xff] %v13404_v18  ;;  %v13414_v11 = vmax.f32 %v2682_v13, %v2844_v42  ;;  %v13416_v19 = vmax.f32 %v3731_v23, %v4229_v39  ;;  %v11473_v23 = vld [vmem:[%s18580_s7 + $0x50] ss:$8 sps:$4 sm:$0xff]  }
 0x26c   : > { %18912 = vst [vmem:[#allocation50_spill] sm:$0xff] %v13408_v45  ;;  %v13418_v22 = vmax.f32 %v2674_v62, %v2842_v9  ;;  %v10806_v33 = vpop.f32.mrb[160].mxu0  ;;  %v10854_v16 = vpop.f32.mrb[32].mxu1  ;;  %v13426_v1 = vmax.f32 %v3723_v44, %v4227_v2  ;;  %v11475_v62 = vld [vmem:[%s18580_s7 + $0x54] ss:$8 sps:$4 sm:$0xff]  }
 0x26d   : > { %18913 = vst [vmem:[#allocation51_spill] sm:$0xff] %v13414_v11  ;;  %v3543_v34 = vpop.f32.mrb[161].mxu0  ;;  %v3735_v13 = vpop.f32.mrb[33].mxu1  ;;  %v3228_v9 = vpack.c.bf16 %v13414_v11, %v13404_v18  ;;  %v3552_v21 = vadd.f32 %v10806_v33, %v13067_v24  ;;  %v3744_v36 = vadd.f32 %v10854_v16, %v13067_v24  ;;  %6340 = vmatprep.subr.bf16.mxu1 %v11475_v62 }
 0x26e   : > { %18914 = vst [vmem:[#allocation52_spill] sm:$0xff] %v13418_v22  ;;  %v10807_v3 = vpop.f32.mrb[162].mxu0  ;;  %v10855_v42 = vpop.f32.mrb[34].mxu1  ;;  %v3227_v44 = vpack.c.bf16 %v13418_v22, %v13408_v45  ;;  %v3544_v50 = vadd.f32 %v13067_v24, %v3543_v34  ;;  %v3736_v45 = vadd.f32 %v13067_v24, %v3735_v13  ;;  %6341 = vmatpush1.bf16.msra.mxu1 %v11473_v23 }
 0x26f   : > { %v3546_v39 = vpop.f32.mrb[163].mxu0  ;;  %v3738_v4 = vpop.f32.mrb[35].mxu1  ;;  %v3555_v2 = vadd.f32 %v10807_v3, %v13067_v24  ;;  %v3747_v33 = vadd.f32 %v10855_v42, %v13067_v24  ;;  %v4184_v46 = vmul.f32 0.2, %v3552_v21  ;;  %v4232_v16 = vmul.f32 0.2, %v3744_v36 }
 0x270   : > { %v3547_v22 = vadd.f32 %v13067_v24, %v3546_v39  ;;  %v3739_v27 = vadd.f32 %v13067_v24, %v3738_v4  ;;  %10960 = vmatprep.mubr.msk.bf16.mxu1 %vm3268_vm2, %v3227_v44  ;;  %v4182_v18 = vmul.f32 0.2, %v3544_v50  ;;  %v4230_v25 = vmul.f32 0.2, %v3736_v45 }
 0x271   : > { %v4185_v11 = vmul.f32 0.2, %v3555_v2  ;;  %v4344_v13 = vmax.f32 %v3552_v21, %v4184_v46  ;;  %v13458_v3 = vmax.f32 %v3744_v36, %v4232_v16  ;;  %v4233_v42 = vmul.f32 0.2, %v3747_v33 }
 0x272   : > { %v4183_v53 = vmul.f32 0.2, %v3547_v22  ;;  %v4342_v39 = vmax.f32 %v3544_v50, %v4182_v18  ;;  %v13460_v29 = vmax.f32 %v3736_v45, %v4230_v25  ;;  %v4231_v44 = vmul.f32 0.2, %v3739_v27 }
 0x273   : > { %10961 = vmatmul.mubr.msk.bf16.gmra.mrb[140].mxu1 %vm3268_vm2, %v3228_v9  ;;  %v4345_v4 = vmax.f32 %v3555_v2, %v4185_v11  ;;  %v13465_v9 = vmax.f32 %v18915_v47, %v4344_v13  ;;  %v13467_v59 = vmax.f32 %v3747_v33, %v4233_v42  ;;  %v18916_v25 = vmax.f32 %v13279_v37, %v13109_v41 }
 0x274   : > { %v10810_v62 = vpop.f32.mrb[164].mxu0  ;;  %v10858_v48 = vpop.f32.mrb[36].mxu1  ;;  %v4343_v46 = vmax.f32 %v3547_v22, %v4183_v53  ;;  %v4502_v18 = vmax.f32 %v4342_v39, %v13102_v30  ;;  %v13476_v50 = vmax.f32 %v3739_v27, %v4231_v44 }
 0x275   : > { %v3568_v36 = vadd.f32 %v10810_v62, %v13067_v24  ;;  %v3559_v21 = vpop.f32.mrb[165].mxu0  ;;  %v3751_v16 = vpop.f32.mrb[37].mxu1  ;;  %v13474_v11 = vmax.f32 %v18916_v25, %v4345_v4  ;;  %v4647_v45 = vpack.c.bf16 %v4345_v4, %v4344_v13  ;;  %v3760_v27 = vadd.f32 %v10858_v48, %v13067_v24 }
 0x276   : > { %v10811_v23 = vpop.f32.mrb[166].mxu0  ;;  %v10859_v47 = vpop.f32.mrb[38].mxu1  ;;  %v4503_v53 = vmax.f32 %v4343_v46, %v13111_v52  ;;  %v4646_v22 = vpack.c.bf16 %v4343_v46, %v4342_v39  ;;  %v13482_v34 = vmax.f32 %v4502_v18, %v13271_v7  ;;  %v3560_v13 = vadd.f32 %v13067_v24, %v3559_v21 }
 0x277   : > { %v4188_v33 = vmul.f32 0.2, %v3568_v36  ;;  %v3562_v42 = vpop.f32.mrb[167].mxu0  ;;  %v3754_v62 = vpop.f32.mrb[39].mxu1  ;;  %v3752_v39 = vadd.f32 %v13067_v24, %v3751_v16  ;;  %v3571_v46 = vadd.f32 %v10811_v23, %v13067_v24  ;;  %v4236_v2 = vmul.f32 0.2, %v3760_v27 }
 0x278   : > { %v13489_v4 = vmax.f32 %v4503_v53, %v13285_v55  ;;  %10972 = vmatprep.mubr.msk.bf16.mxu0 %vm3268_vm2, %v4646_v22  ;;  %v4186_v25 = vmul.f32 0.2, %v3560_v13  ;;  %v3763_v48 = vadd.f32 %v10859_v47, %v13067_v24  ;;  %v3563_v51 = vadd.f32 %v13067_v24, %v3562_v42 }
 0x279   : > { %v13491_v44 = vmax.f32 %v3568_v36, %v4188_v33  ;;  %10973 = vmatmul.mubr.msk.bf16.vlgmr.msra.gmra.mrb[176].mxu0 %vm3268_vm2, %v4647_v45  ;;  %v18917_v36 = vmax.f32 %v13316_v60, %v13132_v26  ;;  %v4234_v23 = vmul.f32 0.2, %v3752_v39  ;;  %v4189_v53 = vmul.f32 0.2, %v3571_v46 }
 0x27a   : > { %v13508_v22 = vmax.f32 %v3760_v27, %v4236_v2  ;;  %v4346_v33 = vmax.f32 %v3560_v13, %v4186_v25  ;;  %v4237_v18 = vmul.f32 0.2, %v3763_v48  ;;  %v3755_v21 = vadd.f32 %v13067_v24, %v3754_v62 }
 0x27b   : > { %v13506_v16 = vmax.f32 %v18917_v36, %v13491_v44  ;;  %v13511_v45 = vmax.f32 %v3752_v39, %v4234_v23  ;;  %v4349_v61 = vmax.f32 %v3571_v46, %v4189_v53  ;;  %v4187_v27 = vmul.f32 0.2, %v3563_v51 }
 0x27c   : > { %18918 = vst [vmem:[#allocation53_spill] sm:$0xff] %v13508_v22  ;;  %v10814_v47 = vpop.f32.mrb[168].mxu0  ;;  %v10862_v49 = vpop.f32.mrb[40].mxu1  ;;  %v4506_v2 = vmax.f32 %v4346_v33, %v13135_v54  ;;  %v13518_v25 = vmax.f32 %v3763_v48, %v4237_v18  ;;  %v18921_v39 = vmax.f32 %v13326_v38, %v13142_v12  ;;  %v4235_v23 = vmul.f32 0.2, %v3755_v21 }
 0x27d   : > { %18919 = vst [vmem:[#allocation54_spill] sm:$0xff] %v13511_v45  ;;  %v3584_v37 = vadd.f32 %v10814_v47, %v13067_v24  ;;  %v3575_v43 = vpop.f32.mrb[169].mxu0  ;;  %v3767_v36 = vpop.f32.mrb[41].mxu1  ;;  %v4649_v62 = vpack.c.bf16 %v4349_v61, %v13491_v44  ;;  %v4347_v26 = vmax.f32 %v3563_v51, %v4187_v27  ;;  %v3776_v18 = vadd.f32 %v10862_v49, %v13067_v24 }
 0x27e   : > { %18920 = vst [vmem:[#allocation55_spill] sm:$0xff] %v13518_v25  ;;  %v10815_v42 = vpop.f32.mrb[170].mxu0  ;;  %v10863_v13 = vpop.f32.mrb[42].mxu1  ;;  %v13523_v46 = vmax.f32 %v18921_v39, %v4349_v61  ;;  %v13527_v7 = vmax.f32 %v4506_v2, %v13322_v5  ;;  %v3576_v48 = vadd.f32 %v13067_v24, %v3575_v43  ;;  %v13533_v12 = vmax.f32 %v3755_v21, %v4235_v23 }
 0x27f   : > { %v4192_v53 = vmul.f32 0.2, %v3584_v37  ;;  %v3578_v47 = vpop.f32.mrb[171].mxu0  ;;  %v3770_v55 = vpop.f32.mrb[43].mxu1  ;;  %v3768_v61 = vadd.f32 %v13067_v24, %v3767_v36  ;;  %v4507_v2 = vmax.f32 %v4347_v26, %v13151_v57  ;;  %v4648_v35 = vpack.c.bf16 %v4347_v26, %v4346_v33 }
 0x280   : > { %18922 = vst [vmem:[#allocation56_spill] sm:$0xff] %v13523_v46  ;;  %18923 = vst [vmem:[#allocation57_spill] sm:$0xff] %v13533_v12  ;;  %v4240_v51 = vmul.f32 0.2, %v3776_v18  ;;  %v18924_v43 = vmax.f32 %v13358_v58, %v13174_v8  ;;  %v4190_v27 = vmul.f32 0.2, %v3576_v48  ;;  %v3579_v26 = vadd.f32 %v13067_v24, %v3578_v47 }
 0x281   : > { %v13535_v39 = vmax.f32 %v3584_v37, %v4192_v53  ;;  %v4238_v21 = vmul.f32 0.2, %v3768_v61  ;;  %v3587_v37 = vadd.f32 %v10815_v42, %v13067_v24  ;;  %v13549_v23 = vmax.f32 %v4507_v2, %v13334_v40  ;;  %10976 = vmatprep.mubr.msk.bf16.mxu0 %vm3268_vm2, %v4648_v35 }
 0x282   : > { %v13551_v36 = vmax.f32 %v3776_v18, %v4240_v51  ;;  %v3779_v53 = vadd.f32 %v10863_v13, %v13067_v24  ;;  %v4350_v44 = vmax.f32 %v3576_v48, %v4190_v27  ;;  %v3771_v57 = vadd.f32 %v13067_v24, %v3770_v55  ;;  %10977 = vmatmul.mubr.msk.bf16.gmra.mrb[180].mxu0 %vm3268_vm2, %v4649_v62 }
 0x283   : > { %v13545_v49 = vmax.f32 %v18924_v43, %v13535_v39  ;;  %18926 = vst [vmem:[#allocation59_spill] sm:$0xff] %v13549_v23  ;;  %v13556_v43 = vmax.f32 %v3768_v61, %v4238_v21  ;;  %v4193_v8 = vmul.f32 0.2, %v3587_v37  ;;  %v4191_v35 = vmul.f32 0.2, %v3579_v26 }
 0x284   : > { %v10818_v33 = vpop.f32.mrb[172].mxu0  ;;  %v10866_v54 = vpop.f32.mrb[44].mxu1  ;;  %v4241_v47 = vmul.f32 0.2, %v3779_v53  ;;  %v18927_v48 = vmax.f32 %v13364_v32, %v13177_v0  ;;  %v4239_v27 = vmul.f32 0.2, %v3771_v57 }
 0x285   : > { %18925 = vst [vmem:[#allocation58_spill] sm:$0xff] %v13545_v49  ;;  %v3591_v42 = vpop.f32.mrb[173].mxu0  ;;  %v3783_v2 = vpop.f32.mrb[45].mxu1  ;;  %v4353_v55 = vmax.f32 %v3587_v37, %v4193_v8  ;;  %v3600_v62 = vadd.f32 %v10818_v33, %v13067_v24  ;;  %v4351_v18 = vmax.f32 %v3579_v26, %v4191_v35  ;;  %v3792_v13 = vadd.f32 %v10866_v54, %v13067_v24 }
 0x286   : > { %v10819_v51 = vpop.f32.mrb[174].mxu0  ;;  %v10867_v41 = vpop.f32.mrb[46].mxu1  ;;  %v13567_v61 = vmax.f32 %v18927_v48, %v4350_v44  ;;  %v13570_v25 = vmax.f32 %v3779_v53, %v4241_v47  ;;  %v3592_v49 = vadd.f32 %v13067_v24, %v3591_v42  ;;  %v18928_v48 = vmax.f32 %v13368_v20, %v13184_v63 }
 0x287   : > { %v3594_v21 = vpop.f32.mrb[175].mxu0  ;;  %v3786_v46 = vpop.f32.mrb[47].mxu1  ;;  %v4651_v8 = vpack.c.bf16 %v4353_v55, %v13535_v39  ;;  %v13582_v37 = vmax.f32 %v3771_v57, %v4239_v27  ;;  %v18929_v53 = vmax.f32 %v13376_v14, %v13193_v6  ;;  %v4650_v54 = vpack.c.bf16 %v4351_v18, %v4350_v44  ;;  %v13600_v44 = vld [vmem:[%s18577_s4] ss:$0 sm:$0xff] }
 0x288   : > { %v13579_v0 = vmax.f32 %v18928_v48, %v4353_v55  ;;  %v4196_v33 = vmul.f32 0.2, %v3600_v62  ;;  %v4244_v42 = vmul.f32 0.2, %v3792_v13  ;;  %v4194_v35 = vmul.f32 0.2, %v3592_v49 }
 0x289   : > { %v13587_v26 = vmax.f32 %v18929_v53, %v4351_v18  ;;  %v3784_v23 = vadd.f32 %v13067_v24, %v3783_v2  ;;  %v3603_v48 = vadd.f32 %v10819_v51, %v13067_v24  ;;  %v3795_v18 = vadd.f32 %v13600_v44, %v10867_v41  ;;  %10980 = vmatprep.mubr.msk.bf16.mxu0 %vm3268_vm2, %v4650_v54 }
 0x28a   : > { %v4356_v39 = vmax.f32 %v3600_v62, %v4196_v33  ;;  %v13595_v55 = vmax.f32 %v3792_v13, %v4244_v42  ;;  %v4354_v53 = vmax.f32 %v3592_v49, %v4194_v35  ;;  %v3595_v24 = vadd.f32 %v13600_v44, %v3594_v21  ;;  %10981 = vmatmul.mubr.msk.bf16.gmra.mrb[184].mxu0 %vm3268_vm2, %v4651_v8 }
 0x28b   : > { %v4242_v2 = vmul.f32 0.2, %v3784_v23  ;;  %v4197_v47 = vmul.f32 0.2, %v3603_v48  ;;  %v18930_v13 = vmax.f32 %v13406_v28, %v13216_v17  ;;  %v4245_v33 = vmul.f32 0.2, %v3795_v18 }
 0x28c   : > { %v10870_v27 = vpop.f32.mrb[48].mxu1  ;;  %v3787_v42 = vadd.f32 %v13600_v44, %v3786_v46  ;;  %v18931_v49 = vmax.f32 %v13410_v56, %v13219_v15  ;;  %v4195_v57 = vmul.f32 0.2, %v3595_v24  ;;  %v18933_v15 = vmax.f32 %v13416_v19, %v13226_v10 }
 0x28d   : > { %v3799_v51 = vpop.f32.mrb[49].mxu1  ;;  %v13609_v62 = vmax.f32 %v18930_v13, %v4356_v39  ;;  %v3808_v41 = vadd.f32 %v13600_v44, %v10870_v27  ;;  %v13618_v21 = vmax.f32 %v3784_v23, %v4242_v2  ;;  %v4357_v8 = vmax.f32 %v3603_v48, %v4197_v47 }
 0x28e   : > { %v10871_v54 = vpop.f32.mrb[50].mxu1  ;;  %v13616_v35 = vmax.f32 %v18931_v49, %v4354_v53  ;;  %v13622_v17 = vmax.f32 %v3795_v18, %v4245_v33  ;;  %v4243_v6 = vmul.f32 0.2, %v3787_v42  ;;  %v4355_v2 = vmax.f32 %v3595_v24, %v4195_v57  ;;  %v18956_v33 = vld [vmem:[#allocation6_spill] sm:$0xff] }
 0x28f   : > { %v3802_v63 = vpop.f32.mrb[51].mxu1  ;;  %v4248_v46 = vmul.f32 0.2, %v3808_v41  ;;  %v13629_v49 = vmax.f32 %v18933_v15, %v4357_v8  ;;  %v4653_v23 = vpack.c.bf16 %v4357_v8, %v4356_v39  ;;  %v3800_v13 = vadd.f32 %v13600_v44, %v3799_v51 }
 0x290   : > { %18932 = vst [vmem:[#allocation60_spill] sm:$0xff] %v13616_v35  ;;  %v13631_v47 = vmax.f32 %v3787_v42, %v4243_v6  ;;  %v3811_v18 = vadd.f32 %v13600_v44, %v10871_v54  ;;  %v18935_v27 = vmax.f32 %v13426_v1, %v13235_v31  ;;  %v4652_v15 = vpack.c.bf16 %v4355_v2, %v4354_v53 }
 0x291   : > { %v13633_v48 = vmax.f32 %v3808_v41, %v4248_v46  ;;  %v3803_v39 = vadd.f32 %v13600_v44, %v3802_v63  ;;  %v18936_v6 = vmax.f32 %v13465_v9, %v13458_v3  ;;  %v4246_v24 = vmul.f32 0.2, %v3800_v13  ;;  %v11476_v9 = vld [vmem:[%s18580_s7 + $0x60] ss:$8 sps:$4 sm:$0xff]   ;;  %v18955_v41 = vld [vmem:[#allocation8_spill] sm:$0xff] }
 0x292   : > { %v13642_v35 = vmax.f32 %v18935_v27, %v4355_v2  ;;  %v4249_v51 = vmul.f32 0.2, %v3811_v18  ;;  %10984 = vmatprep.mubr.msk.bf16.mxu0 %vm3268_vm2, %v4652_v15 }
 0x293   : > { %18934 = vst [vmem:[#allocation61_spill] sm:$0xff] %v13633_v48  ;;  %v13649_v57 = vmax.f32 %v18936_v6, %v13633_v48  ;;  %v4247_v54 = vmul.f32 0.2, %v3803_v39  ;;  %v13660_v46 = vmax.f32 %v3800_v13, %v4246_v24  ;;  %10985 = vmatmul.mubr.msk.bf16.gmra.mrb[188].mxu0 %vm3268_vm2, %v4653_v23  ;;  %v18940_v13 = vpack.c.bf16 %v13111_v52, %v13102_v30 }
 0x294   : > { %v10874_v42 = vpop.f32.mrb[52].mxu1  ;;  %v13662_v27 = vmax.f32 %v3811_v18, %v4249_v51 }
 0x295   : > { %v3824_v8 = vadd.f32 %v13600_v44, %v10874_v42  ;;  %v3815_v53 = vpop.f32.mrb[53].mxu1  ;;  %18937 = vst [vmem:[#allocation62_spill] sm:$0xff] %v13660_v46  ;;  %v11478_v42 = vld [vmem:[%s18580_s7 + $0x64] ss:$8 sps:$4 sm:$0xff]   ;;  %v13671_v63 = vmax.f32 %v3803_v39, %v4247_v54  ;;  %10988 = vmatprep.mubr.msk.bf16.mxu0 %vm3268_vm2, %v18940_v13  ;;  %v18942_v39 = vmax.f32 %v13474_v11, %v13467_v59 }
 0x296   : > { %18938 = vst [vmem:[#allocation63_spill] sm:$0xff] %v13662_v27  ;;  %v3816_v2 = vadd.f32 %v13600_v44, %v3815_v53  ;;  %v10875_v6 = vpop.f32.mrb[54].mxu1  ;;  %v18941_v53 = vmax.f32 %v13482_v34, %v13460_v29  ;;  %6342 = vmatprep.subr.bf16.mxu1 %v11478_v42 }
 0x297   : > { %18939 = vst [vmem:[#allocation64_spill] sm:$0xff] %v13671_v63  ;;  %v4252_v18 = vmul.f32 0.2, %v3824_v8  ;;  %v3827_v23 = vadd.f32 %v13600_v44, %v10875_v6  ;;  %v3818_v24 = vpop.f32.mrb[55].mxu1  ;;  %v13690_v30 = vmax.f32 %v18942_v39, %v13662_v27  ;;  %v18943_v6 = vmax.f32 %v13489_v4, %v13476_v50  ;;  %6343 = vmatpush1.bf16.msra.mxu1 %v11476_v9  ;;  %v18996_v27 = vld [vmem:[#allocation38_spill] sm:$0xff] }
 0x298   : > { %v13684_v15 = vmax.f32 %v18941_v53, %v13660_v46  ;;  %v4250_v52 = vmul.f32 0.2, %v3816_v2  ;;  %v3819_v54 = vadd.f32 %v13600_v44, %v3818_v24  ;;  %v18946_v4 = vmax.f32 %v13506_v16, %v13508_v22  ;;  %v18958_v22 = vld [vmem:[#allocation16_spill] sm:$0xff] }
 0x299   : > { %v13697_v13 = vmax.f32 %v18943_v6, %v13671_v63  ;;  %v13699_v51 = vmax.f32 %v3824_v8, %v4252_v18  ;;  %v4253_v34 = vmul.f32 0.2, %v3827_v23 }
 0x29a   : > { %v13703_v11 = vmax.f32 %v3816_v2, %v4250_v52  ;;  %v4251_v39 = vmul.f32 0.2, %v3819_v54  ;;  %v18948_v52 = vmax.f32 %v13527_v7, %v13511_v45 }
 0x29b   : > { %18944 = vst [vmem:[#allocation65_spill] sm:$0xff] %v13699_v51  ;;  %v13713_v8 = vmax.f32 %v18946_v4, %v13699_v51  ;;  %v13715_v18 = vmax.f32 %v3827_v23, %v4253_v34  ;;  %v18950_v23 = vld [vmem:[#allocation55_spill] sm:$0xff]  ;;  %v18951_v4 = vld [vmem:[#allocation56_spill] sm:$0xff] }
 0x29c   : > { %18945 = vst [vmem:[#allocation66_spill] sm:$0xff] %v13703_v11  ;;  %v13725_v6 = vmax.f32 %v18948_v52, %v13703_v11  ;;  %v13727_v42 = vmax.f32 %v3819_v54, %v4251_v39  ;;  %v10878_v24 = vpop.f32.mrb[56].mxu1  ;;  %v18952_v9 = vmax.f32 %v18951_v4, %v18950_v23  ;;  %v18953_v52 = vld [vmem:[#allocation59_spill] sm:$0xff]  ;;  %v18957_v4 = vpack.c.bf16 %v18955_v41, %v18956_v33  ;;  %v18959_v23 = vld [vmem:[#allocation12_spill] sm:$0xff]  ;;  %v18963_v41 = vld [vmem:[#allocation58_spill] sm:$0xff] }
 0x29d   : > { %18947 = vst [vmem:[#allocation67_spill] sm:$0xff] %v13715_v18  ;;  %v3840_v53 = vadd.f32 %v13600_v44, %v10878_v24  ;;  %v3831_v7 = vpop.f32.mrb[57].mxu1  ;;  %v18954_v16 = vmax.f32 %v18953_v52, %v13533_v12  ;;  %v18960_v45 = vpack.c.bf16 %v18958_v22, %v18959_v23  ;;  %v18964_v46 = vmax.f32 %v18963_v41, %v13551_v36  ;;  %v18973_v22 = vld [vmem:[#allocation24_spill] sm:$0xff] }
 0x29e   : > { %18949 = vst [vmem:[#allocation68_spill] sm:$0xff] %v13727_v42  ;;  %v13737_v2 = vmax.f32 %v18952_v9, %v13715_v18  ;;  %10989 = vmatmul.mubr.msk.bf16.gmra.mrb[192].mxu0 %vm3268_vm2, %v18957_v4  ;;  %v3832_v24 = vadd.f32 %v13600_v44, %v3831_v7  ;;  %v10879_v9 = vpop.f32.mrb[58].mxu1  ;;  %v18974_v51 = vld [vmem:[#allocation20_spill] sm:$0xff] }
 0x29f   : > { %v13748_v34 = vmax.f32 %v18954_v16, %v13727_v42  ;;  %10992 = vmatprep.mubr.msk.bf16.mxu0 %vm3268_vm2, %v18960_v45  ;;  %v4256_v16 = vmul.f32 0.2, %v3840_v53  ;;  %v3843_v52 = vadd.f32 %v13600_v44, %v10879_v9  ;;  %v3834_v33 = vpop.f32.mrb[59].mxu1  ;;  %v18995_v42 = vld [vmem:[#allocation34_spill] sm:$0xff] }
 0x2a0   : > { %v4254_v4 = vmul.f32 0.2, %v3832_v24  ;;  %v3835_v54 = vadd.f32 %v13600_v44, %v3834_v33  ;;  %v18966_v33 = vmax.f32 %v13567_v61, %v13556_v43  ;;  %v18969_v61 = vmax.f32 %v13587_v26, %v13582_v37 }
 0x2a1   : > { %v13773_v45 = vmax.f32 %v3840_v53, %v4256_v16  ;;  %v4257_v23 = vmul.f32 0.2, %v3843_v52 }
 0x2a2   : > { %v13775_v9 = vmax.f32 %v3832_v24, %v4254_v4  ;;  %v4255_v12 = vmul.f32 0.2, %v3835_v54  ;;  %v18968_v24 = vmax.f32 %v13579_v0, %v13570_v25 }
 0x2a3   : > { %18961 = vst [vmem:[#allocation56_spill] sm:$0xff] %v13773_v45  ;;  %v13781_v7 = vmax.f32 %v18964_v46, %v13773_v45  ;;  %v13783_v48 = vmax.f32 %v3843_v52, %v4257_v23  ;;  %v18975_v52 = vpack.c.bf16 %v18973_v22, %v18974_v51 }
 0x2a4   : > { %18962 = vst [vmem:[#allocation59_spill] sm:$0xff] %v13775_v9  ;;  %v13789_v39 = vmax.f32 %v18966_v33, %v13775_v9  ;;  %v13791_v53 = vmax.f32 %v3835_v54, %v4255_v12  ;;  %v10882_v16 = vpop.f32.mrb[60].mxu1  ;;  %v18970_v12 = vld [vmem:[#allocation14_spill] sm:$0xff]  ;;  %v18971_v54 = vld [vmem:[#allocation11_spill] sm:$0xff] }
 0x2a5   : > { %18965 = vst [vmem:[#allocation8_spill] sm:$0xff] %v13783_v48  ;;  %v13797_v4 = vmax.f32 %v18968_v24, %v13783_v48  ;;  %v3856_v46 = vadd.f32 %v13600_v44, %v10882_v16  ;;  %v3847_v41 = vpop.f32.mrb[61].mxu1  ;;  %v18972_v33 = vpack.c.bf16 %v18970_v12, %v18971_v54  ;;  %v18978_v16 = vmax.f32 %v13609_v62, %v13595_v55 }
 0x2a6   : > { %18967 = vst [vmem:[#allocation6_spill] sm:$0xff] %v13791_v53  ;;  %v13806_v23 = vmax.f32 %v18969_v61, %v13791_v53  ;;  %v3848_v0 = vadd.f32 %v13600_v44, %v3847_v41  ;;  %v10883_v24 = vpop.f32.mrb[62].mxu1 }
 0x2a7   : > { %10993 = vmatmul.mubr.msk.bf16.gmra.mrb[196].mxu0 %vm3268_vm2, %v18972_v33  ;;  %v4260_v45 = vmul.f32 0.2, %v3856_v46  ;;  %v3859_v26 = vadd.f32 %v13600_v44, %v10883_v24  ;;  %v3850_v61 = vpop.f32.mrb[63].mxu1 }
 0x2a8   : > { %10996 = vmatprep.mubr.msk.bf16.mxu0 %vm3268_vm2, %v18975_v52  ;;  %v4258_v48 = vmul.f32 0.2, %v3848_v0  ;;  %v3851_v12 = vadd.f32 %v13600_v44, %v3850_v61  ;;  %v18980_v52 = vld [vmem:[#allocation60_spill] sm:$0xff]  ;;  %v18984_v61 = vmax.f32 %v13642_v35, %v13631_v47 }
 0x2a9   : > { %v13821_v54 = vmax.f32 %v3856_v46, %v4260_v45  ;;  %v4261_v33 = vmul.f32 0.2, %v3859_v26  ;;  %v18981_v24 = vmax.f32 %v18980_v52, %v13618_v21 }
 0x2aa   : > { %v13823_v41 = vmax.f32 %v3848_v0, %v4258_v48  ;;  %v4259_v18 = vmul.f32 0.2, %v3851_v12  ;;  %v18983_v48 = vmax.f32 %v13629_v49, %v13622_v17 }
 0x2ab   : > { %18976 = vst [vmem:[#allocation16_spill] sm:$0xff] %v13821_v54  ;;  %v13829_v51 = vmax.f32 %v18978_v16, %v13821_v54  ;;  %v13831_v22 = vmax.f32 %v3859_v26, %v4261_v33 }
 0x2ac   : > { %18977 = vst [vmem:[#allocation12_spill] sm:$0xff] %v13823_v41  ;;  %v13837_v9 = vmax.f32 %v18981_v24, %v13823_v41  ;;  %v13839_v45 = vmax.f32 %v3851_v12, %v4259_v18  ;;  %v10886_v46 = vpop.f32.mrb[64].mxu1  ;;  %v18985_v18 = vld [vmem:[#allocation22_spill] sm:$0xff]  ;;  %v18986_v12 = vld [vmem:[#allocation19_spill] sm:$0xff] }
 0x2ad   : > { %18979 = vst [vmem:[#allocation58_spill] sm:$0xff] %v13831_v22  ;;  %v13845_v0 = vmax.f32 %v18983_v48, %v13831_v22  ;;  %v3872_v62 = vadd.f32 %v13600_v44, %v10886_v46  ;;  %v3863_v16 = vpop.f32.mrb[65].mxu1  ;;  %v18987_v52 = vpack.c.bf16 %v18985_v18, %v18986_v12  ;;  %v18988_v48 = vld [vmem:[#allocation28_spill] sm:$0xff] }
 0x2ae   : > { %18982 = vst [vmem:[#allocation14_spill] sm:$0xff] %v13839_v45  ;;  %v13854_v33 = vmax.f32 %v18984_v61, %v13839_v45  ;;  %v3864_v49 = vadd.f32 %v13600_v44, %v3863_v16  ;;  %v10887_v24 = vpop.f32.mrb[66].mxu1  ;;  %v18989_v26 = vpack.c.bf16 %v13235_v31, %v18988_v48  ;;  %v18992_v48 = vld [vmem:[#allocation40_spill] sm:$0xff] }
 0x2af   : > { %10997 = vmatmul.mubr.msk.bf16.gmra.mrb[200].mxu0 %vm3268_vm2, %v18987_v52  ;;  %v4264_v54 = vmul.f32 0.2, %v3872_v62  ;;  %v3875_v35 = vadd.f32 %v13600_v44, %v10887_v24  ;;  %v3866_v61 = vpop.f32.mrb[67].mxu1  ;;  %v18993_v31 = vld [vmem:[#allocation36_spill] sm:$0xff] }
 0x2b0   : > { %11000 = vmatprep.mubr.msk.bf16.mxu0 %vm3268_vm2, %v18989_v26  ;;  %v4262_v22 = vmul.f32 0.2, %v3864_v49  ;;  %v3867_v18 = vadd.f32 %v13600_v44, %v3866_v61 }
 0x2b1   : > { %v13869_v12 = vmax.f32 %v3872_v62, %v4264_v54  ;;  %v4265_v52 = vmul.f32 0.2, %v3875_v35  ;;  %v18994_v54 = vpack.c.bf16 %v18992_v48, %v18993_v31 }
 0x2b2   : > { %v13871_v16 = vmax.f32 %v3864_v49, %v4262_v22  ;;  %v4263_v53 = vmul.f32 0.2, %v3867_v18 }
 0x2b3   : > { %v13875_v41 = vmax.f32 %v3875_v35, %v4265_v52  ;;  %v18990_v35 = vld [vmem:[#allocation27_spill] sm:$0xff] }
 0x2b4   : > { %v13879_v26 = vmax.f32 %v3867_v18, %v4263_v53  ;;  %v10890_v24 = vpop.f32.mrb[68].mxu1  ;;  %v18991_v61 = vpack.c.bf16 %v13226_v10, %v18990_v35  ;;  %v11479_v10 = vld [vmem:[%s18580_s7 + $0x70] ss:$8 sps:$4 sm:$0xff]  }
 0x2b5   : > { %v3888_v22 = vadd.f32 %v13600_v44, %v10890_v24  ;;  %v3879_v62 = vpop.f32.mrb[69].mxu1 }
 0x2b6   : > { %v3880_v53 = vadd.f32 %v13600_v44, %v3879_v62  ;;  %v10891_v18 = vpop.f32.mrb[70].mxu1 }
 0x2b7   : > { %11001 = vmatmul.mubr.msk.bf16.gmra.mrb[204].mxu0 %vm3268_vm2, %v18991_v61  ;;  %v4268_v24 = vmul.f32 0.2, %v3888_v22  ;;  %v3891_v46 = vadd.f32 %v13600_v44, %v10891_v18  ;;  %v3882_v49 = vpop.f32.mrb[71].mxu1  ;;  %v11481_v61 = vld [vmem:[%s18580_s7 + $0x74] ss:$8 sps:$4 sm:$0xff]  }
 0x2b8   : > { %11004 = vmatprep.mubr.msk.bf16.mxu0 %vm3268_vm2, %v18994_v54  ;;  %v4266_v35 = vmul.f32 0.2, %v3880_v53  ;;  %v3883_v62 = vadd.f32 %v13600_v44, %v3882_v49  ;;  %6344 = vmatprep.subr.bf16.mxu1 %v11481_v61 }
 0x2b9   : > { %v13907_v52 = vmax.f32 %v3888_v22, %v4268_v24  ;;  %v4269_v31 = vmul.f32 0.2, %v3891_v46  ;;  %6345 = vmatpush1.bf16.msra.mxu1 %v11479_v10  ;;  %v4663_v22 = vpack.c.bf16 %v18996_v27, %v18995_v42  ;;  %v18997_v42 = vpack.c.bf16 %v13334_v40, %v13322_v5 }
 0x2ba   : > { %v13909_v48 = vmax.f32 %v3880_v53, %v4266_v35  ;;  %v4267_v54 = vmul.f32 0.2, %v3883_v62 }
 0x2bb   : > { %v13913_v45 = vmax.f32 %v3891_v46, %v4269_v31 }
 0x2bc   : > { %v13917_v11 = vmax.f32 %v3883_v62, %v4267_v54  ;;  %v10894_v24 = vpop.f32.mrb[72].mxu1 }
 0x2bd   : > { %v3904_v61 = vadd.f32 %v13600_v44, %v10894_v24  ;;  %v3895_v46 = vpop.f32.mrb[73].mxu1 }
 0x2be   : > { %v3896_v62 = vadd.f32 %v13600_v44, %v3895_v46  ;;  %v10895_v31 = vpop.f32.mrb[74].mxu1 }
 0x2bf   : > { %11005 = vmatmul.mubr.msk.bf16.gmra.mrb[208].mxu0 %vm3268_vm2, %v4663_v22  ;;  %v4272_v54 = vmul.f32 0.2, %v3904_v61  ;;  %v3907_v24 = vadd.f32 %v13600_v44, %v10895_v31  ;;  %v3898_v35 = vpop.f32.mrb[75].mxu1 }
 0x2c0   : > { %11008 = vmatprep.mubr.msk.bf16.mxu0 %vm3268_vm2, %v18997_v42  ;;  %v4270_v53 = vmul.f32 0.2, %v3896_v62  ;;  %v3899_v10 = vadd.f32 %v13600_v44, %v3898_v35 }
 0x2c1   : > { %v13938_v49 = vmax.f32 %v3904_v61, %v4272_v54  ;;  %v4273_v22 = vmul.f32 0.2, %v3907_v24  ;;  %v18998_v54 = vpack.c.bf16 %v13326_v38, %v13316_v60 }
 0x2c2   : > { %v13940_v46 = vmax.f32 %v3896_v62, %v4270_v53  ;;  %v4271_v18 = vmul.f32 0.2, %v3899_v10 }
 0x2c3   : > { %v13944_v63 = vmax.f32 %v3907_v24, %v4273_v22  ;;  %v18999_v22 = vpack.c.bf16 %v13376_v14, %v13364_v32 }
 0x2c4   : > { %v13948_v40 = vmax.f32 %v3899_v10, %v4271_v18  ;;  %v10898_v31 = vpop.f32.mrb[76].mxu1 }
 0x2c5   : > { %v3920_v53 = vadd.f32 %v13600_v44, %v10898_v31  ;;  %v3911_v62 = vpop.f32.mrb[77].mxu1 }
 0x2c6   : > { %v3912_v18 = vadd.f32 %v13600_v44, %v3911_v62  ;;  %v10899_v10 = vpop.f32.mrb[78].mxu1 }
 0x2c7   : > { %11009 = vmatmul.mubr.msk.bf16.gmra.mrb[212].mxu0 %vm3268_vm2, %v18998_v54  ;;  %v4276_v31 = vmul.f32 0.2, %v3920_v53  ;;  %v3923_v61 = vadd.f32 %v13600_v44, %v10899_v10  ;;  %v3914_v42 = vpop.f32.mrb[79].mxu1 }
 0x2c8   : > { %11012 = vmatprep.mubr.msk.bf16.mxu0 %vm3268_vm2, %v18999_v22  ;;  %v4274_v35 = vmul.f32 0.2, %v3912_v18  ;;  %v3915_v60 = vadd.f32 %v13600_v44, %v3914_v42 }
 0x2c9   : > { %v13970_v38 = vmax.f32 %v3920_v53, %v4276_v31  ;;  %v4277_v54 = vmul.f32 0.2, %v3923_v61 }
 0x2ca   : > { %v13972_v62 = vmax.f32 %v3912_v18, %v4274_v35  ;;  %v4275_v5 = vmul.f32 0.2, %v3915_v60 }
 0x2cb   : > { %19000 = vst [vmem:[#allocation11_spill] sm:$0xff] %v13970_v38  ;;  %v13976_v27 = vmax.f32 %v3923_v61, %v4277_v54  ;;  %v19001_v61 = vpack.c.bf16 %v13368_v20, %v13358_v58  ;;  %v19002_v54 = vpack.c.bf16 %v13426_v1, %v13410_v56 }
 0x2cc   : > { %v13980_v14 = vmax.f32 %v3915_v60, %v4275_v5  ;;  %v10902_v10 = vpop.f32.mrb[80].mxu1  ;;  %v19005_v60 = vmax.f32 %v13649_v57, %v13869_v12 }
 0x2cd   : > { %v3936_v35 = vadd.f32 %v13600_v44, %v10902_v10  ;;  %v3927_v18 = vpop.f32.mrb[81].mxu1 }
 0x2ce   : > { %v3928_v5 = vadd.f32 %v13600_v44, %v3927_v18  ;;  %v10903_v31 = vpop.f32.mrb[82].mxu1 }
 0x2cf   : > { %11013 = vmatmul.mubr.msk.bf16.gmra.mrb[216].mxu0 %vm3268_vm2, %v19001_v61  ;;  %v4280_v10 = vmul.f32 0.2, %v3936_v35  ;;  %v3939_v53 = vadd.f32 %v13600_v44, %v10903_v31  ;;  %v3930_v22 = vpop.f32.mrb[83].mxu1  ;;  %v19007_v31 = vmax.f32 %v13684_v15, %v13871_v16  ;;  %v19010_v15 = vmax.f32 %v13697_v13, %v13879_v26 }
 0x2d0   : > { %11016 = vmatprep.mubr.msk.bf16.mxu0 %vm3268_vm2, %v19002_v54  ;;  %v4278_v42 = vmul.f32 0.2, %v3928_v5  ;;  %v3931_v58 = vadd.f32 %v13600_v44, %v3930_v22 }
 0x2d1   : > { %v14002_v20 = vmax.f32 %v3936_v35, %v4280_v10  ;;  %v4281_v61 = vmul.f32 0.2, %v3939_v53 }
 0x2d2   : > { %v14004_v18 = vmax.f32 %v3928_v5, %v4278_v42  ;;  %v4279_v32 = vmul.f32 0.2, %v3931_v58  ;;  %v19009_v42 = vmax.f32 %v13690_v30, %v13875_v41 }
 0x2d3   : > { %19003 = vst [vmem:[#allocation24_spill] sm:$0xff] %v14002_v20  ;;  %v14010_v56 = vmax.f32 %v19005_v60, %v14002_v20  ;;  %v14012_v1 = vmax.f32 %v3939_v53, %v4281_v61  ;;  %v19015_v61 = vmax.f32 %v13713_v8, %v13907_v52 }
 0x2d4   : > { %19004 = vst [vmem:[#allocation20_spill] sm:$0xff] %v14004_v18  ;;  %v14018_v54 = vmax.f32 %v19007_v31, %v14004_v18  ;;  %v14020_v35 = vmax.f32 %v3931_v58, %v4279_v32  ;;  %v10906_v22 = vpop.f32.mrb[84].mxu1  ;;  %v19011_v32 = vpack.c.bf16 %v13416_v19, %v13406_v28  ;;  %v19012_v31 = vpack.c.bf16 %v13476_v50, %v13460_v29 }
 0x2d5   : > { %19006 = vst [vmem:[#allocation60_spill] sm:$0xff] %v14012_v1  ;;  %v14026_v5 = vmax.f32 %v19009_v42, %v14012_v1  ;;  %v3952_v53 = vadd.f32 %v13600_v44, %v10906_v22  ;;  %v3943_v60 = vpop.f32.mrb[85].mxu1 }
 0x2d6   : > { %19008 = vst [vmem:[#allocation22_spill] sm:$0xff] %v14020_v35  ;;  %v14035_v10 = vmax.f32 %v19010_v15, %v14020_v35  ;;  %v3944_v30 = vadd.f32 %v13600_v44, %v3943_v60  ;;  %v10907_v58 = vpop.f32.mrb[86].mxu1 }
 0x2d7   : > { %11017 = vmatmul.mubr.msk.bf16.gmra.mrb[220].mxu0 %vm3268_vm2, %v19011_v32  ;;  %v4284_v22 = vmul.f32 0.2, %v3952_v53  ;;  %v3955_v13 = vadd.f32 %v13600_v44, %v10907_v58  ;;  %v3946_v42 = vpop.f32.mrb[87].mxu1  ;;  %v19017_v58 = vmax.f32 %v13725_v6, %v13909_v48  ;;  %v19020_v6 = vmax.f32 %v13748_v34, %v13917_v11 }
 0x2d8   : > { %11020 = vmatprep.mubr.msk.bf16.mxu0 %vm3268_vm2, %v19012_v31  ;;  %v4282_v15 = vmul.f32 0.2, %v3944_v30  ;;  %v3947_v28 = vadd.f32 %v13600_v44, %v3946_v42 }
 0x2d9   : > { %v14050_v19 = vmax.f32 %v3952_v53, %v4284_v22  ;;  %v4285_v32 = vmul.f32 0.2, %v3955_v13 }
 0x2da   : > { %v14052_v60 = vmax.f32 %v3944_v30, %v4282_v15  ;;  %v4283_v57 = vmul.f32 0.2, %v3947_v28  ;;  %v19019_v30 = vmax.f32 %v13737_v2, %v13913_v45 }
 0x2db   : > { %19013 = vst [vmem:[#allocation19_spill] sm:$0xff] %v14050_v19  ;;  %v14058_v29 = vmax.f32 %v19015_v61, %v14050_v19  ;;  %v14060_v50 = vmax.f32 %v3955_v13, %v4285_v32 }
 0x2dc   : > { %19014 = vst [vmem:[#allocation28_spill] sm:$0xff] %v14052_v60  ;;  %v14066_v31 = vmax.f32 %v19017_v58, %v14052_v60  ;;  %v14068_v53 = vmax.f32 %v3947_v28, %v4283_v57  ;;  %v10910_v22 = vpop.f32.mrb[88].mxu1  ;;  %v19021_v57 = vpack.c.bf16 %v13467_v59, %v13458_v3  ;;  %v19022_v58 = vld [vmem:[#allocation57_spill] sm:$0xff] }
 0x2dd   : > { %19016 = vst [vmem:[#allocation27_spill] sm:$0xff] %v14060_v50  ;;  %v14074_v42 = vmax.f32 %v19019_v30, %v14060_v50  ;;  %v3968_v61 = vadd.f32 %v13600_v44, %v10910_v22  ;;  %v3959_v13 = vpop.f32.mrb[89].mxu1  ;;  %v19023_v22 = vld [vmem:[#allocation54_spill] sm:$0xff] }
 0x2de   : > { %19018 = vst [vmem:[#allocation40_spill] sm:$0xff] %v14068_v53  ;;  %v14083_v15 = vmax.f32 %v19020_v6, %v14068_v53  ;;  %v3960_v2 = vadd.f32 %v13600_v44, %v3959_v13  ;;  %v10911_v28 = vpop.f32.mrb[90].mxu1  ;;  %v19024_v30 = vpack.c.bf16 %v19022_v58, %v19023_v22  ;;  %v18664_v13 = vmov 0  }
 0x2df   : > { %11021 = vmatmul.mubr.msk.bf16.gmra.mrb[224].mxu0 %vm3268_vm2, %v19021_v57  ;;  %v4288_v8 = vmul.f32 0.2, %v3968_v61  ;;  %v3971_v34 = vadd.f32 %v13600_v44, %v10911_v28  ;;  %v3962_v6 = vpop.f32.mrb[91].mxu1  ;;  %6362 = vmatprep.mubr.bf16.mxu1 %v18664_v13  ;;  %v19027_v58 = vmax.f32 %v13781_v7, %v13938_v49  ;;  %v19039_v13 = vmax.f32 %v13829_v51, %v13970_v38 }
 0x2e0   : > { %11024 = vmatprep.mubr.msk.bf16.mxu0 %vm3268_vm2, %v19024_v30  ;;  %v4286_v24 = vmul.f32 0.2, %v3960_v2  ;;  %v3963_v59 = vadd.f32 %v13600_v44, %v3962_v6 }
 0x2e1   : > { %v14098_v3 = vmax.f32 %v3968_v61, %v4288_v8  ;;  %v4289_v57 = vmul.f32 0.2, %v3971_v34  ;;  %v19029_v8 = vmax.f32 %v13789_v39, %v13940_v46  ;;  %v19032_v39 = vmax.f32 %v13806_v23, %v13948_v40 }
 0x2e2   : > { %v14101_v19 = vmax.f32 %v3960_v2, %v4286_v24  ;;  %v4287_v32 = vmul.f32 0.2, %v3963_v59  ;;  %v19031_v24 = vmax.f32 %v13797_v4, %v13944_v63 }
 0x2e3   : > { %19025 = vst [vmem:[#allocation36_spill] sm:$0xff] %v14098_v3  ;;  %v14107_v22 = vmax.f32 %v19027_v58, %v14098_v3  ;;  %v14109_v28 = vmax.f32 %v3971_v34, %v4289_v57 }
 0x2e4   : > { %19026 = vst [vmem:[#allocation34_spill] sm:$0xff] %v14101_v19  ;;  %v14115_v61 = vmax.f32 %v19029_v8, %v14101_v19  ;;  %v14117_v30 = vmax.f32 %v3963_v59, %v4287_v32  ;;  %v10914_v6 = vpop.f32.mrb[92].mxu1  ;;  %v19033_v32 = vld [vmem:[#allocation55_spill] sm:$0xff]  ;;  %v19034_v59 = vld [vmem:[#allocation53_spill] sm:$0xff] }
 0x2e5   : > { %19028 = vst [vmem:[#allocation38_spill] sm:$0xff] %v14109_v28  ;;  %v14123_v2 = vmax.f32 %v19031_v24, %v14109_v28  ;;  %v3984_v34 = vadd.f32 %v13600_v44, %v10914_v6  ;;  %v3975_v57 = vpop.f32.mrb[93].mxu1  ;;  %v19035_v8 = vpack.c.bf16 %v19033_v32, %v19034_v59  ;;  %v19036_v6 = vpack.c.bf16 %v13582_v37, %v13556_v43 }
 0x2e6   : > { %19030 = vst [vmem:[#allocation57_spill] sm:$0xff] %v14117_v30  ;;  %v14132_v58 = vmax.f32 %v19032_v39, %v14117_v30  ;;  %v3976_v4 = vadd.f32 %v13600_v44, %v3975_v57  ;;  %v10915_v24 = vpop.f32.mrb[94].mxu1 }
 0x2e7   : > { %11025 = vmatmul.mubr.msk.bf16.gmra.mrb[228].mxu0 %vm3268_vm2, %v19035_v8  ;;  %v4292_v7 = vmul.f32 0.2, %v3984_v34  ;;  %v3987_v23 = vadd.f32 %v13600_v44, %v10915_v24  ;;  %v3978_v39 = vpop.f32.mrb[95].mxu1  ;;  %v19041_v24 = vmax.f32 %v13837_v9, %v13972_v62  ;;  %v19044_v9 = vmax.f32 %v13854_v33, %v13980_v14 }
 0x2e8   : > { %11028 = vmatprep.mubr.msk.bf16.mxu0 %vm3268_vm2, %v19036_v6  ;;  %v4290_v3 = vmul.f32 0.2, %v3976_v4  ;;  %v3979_v32 = vadd.f32 %v13600_v44, %v3978_v39 }
 0x2e9   : > { %v14147_v59 = vmax.f32 %v3984_v34, %v4292_v7  ;;  %v4293_v8 = vmul.f32 0.2, %v3987_v23 }
 0x2ea   : > { %v14149_v57 = vmax.f32 %v3976_v4, %v4290_v3  ;;  %v4291_v28 = vmul.f32 0.2, %v3979_v32  ;;  %v19043_v3 = vmax.f32 %v13845_v0, %v13976_v27 }
 0x2eb   : > { %19037 = vst [vmem:[#allocation54_spill] sm:$0xff] %v14147_v59  ;;  %v14155_v43 = vmax.f32 %v19039_v13, %v14147_v59  ;;  %v14157_v37 = vmax.f32 %v3987_v23, %v4293_v8 }
 0x2ec   : > { %19038 = vst [vmem:[#allocation55_spill] sm:$0xff] %v14149_v57  ;;  %v14163_v6 = vmax.f32 %v19041_v24, %v14149_v57  ;;  %v14165_v7 = vmax.f32 %v3979_v32, %v4291_v28  ;;  %v10918_v34 = vpop.f32.mrb[96].mxu1  ;;  %v19045_v28 = vpack.c.bf16 %v13570_v25, %v13551_v36  ;;  %v19046_v24 = vpack.c.bf16 %v13631_v47, %v13618_v21 }
 0x2ed   : > { %19040 = vst [vmem:[#allocation53_spill] sm:$0xff] %v14157_v37  ;;  %v14171_v4 = vmax.f32 %v19043_v3, %v14157_v37  ;;  %v4000_v13 = vadd.f32 %v13600_v44, %v10918_v34  ;;  %v3991_v23 = vpop.f32.mrb[97].mxu1 }
 0x2ee   : > { %19042 = vst [vmem:[#allocation69_spill] sm:$0xff] %v14165_v7  ;;  %v14180_v39 = vmax.f32 %v19044_v9, %v14165_v7  ;;  %v3992_v0 = vadd.f32 %v13600_v44, %v3991_v23  ;;  %v10919_v32 = vpop.f32.mrb[98].mxu1 }
 0x2ef   : > { %11029 = vmatmul.mubr.msk.bf16.gmra.mrb[232].mxu0 %vm3268_vm2, %v19045_v28  ;;  %v4296_v34 = vmul.f32 0.2, %v4000_v13  ;;  %v4003_v33 = vadd.f32 %v13600_v44, %v10919_v32  ;;  %v3994_v3 = vpop.f32.mrb[99].mxu1 }
 0x2f0   : > { %11032 = vmatprep.mubr.msk.bf16.mxu0 %vm3268_vm2, %v19046_v24  ;;  %v4294_v9 = vmul.f32 0.2, %v3992_v0  ;;  %v3995_v25 = vadd.f32 %v13600_v44, %v3994_v3  ;;  %v19047_v3 = vpack.c.bf16 %v13622_v17, %v13595_v55  ;;  %v19049_v24 = vld [vmem:[#allocation62_spill] sm:$0xff] }
 0x2f1   : > { %v14195_v36 = vmax.f32 %v4000_v13, %v4296_v34  ;;  %v4297_v28 = vmul.f32 0.2, %v4003_v33 }
 0x2f2   : > { %v14197_v23 = vmax.f32 %v3992_v0, %v4294_v9  ;;  %v4295_v51 = vmul.f32 0.2, %v3995_v25 }
 0x2f3   : > { %v14201_v59 = vmax.f32 %v4003_v33, %v4297_v28  ;;  %v19048_v28 = vld [vmem:[#allocation64_spill] sm:$0xff] }
 0x2f4   : > { %v14203_v21 = vmax.f32 %v3995_v25, %v4295_v51  ;;  %v10922_v47 = vpop.f32.mrb[100].mxu1  ;;  %v19050_v13 = vpack.c.bf16 %v19048_v28, %v19049_v24  ;;  %v19054_v28 = vld [vmem:[#allocation68_spill] sm:$0xff] }
 0x2f5   : > { %v4016_v0 = vadd.f32 %v13600_v44, %v10922_v47  ;;  %v4007_v34 = vpop.f32.mrb[101].mxu1 }
 0x2f6   : > { %v4008_v51 = vadd.f32 %v13600_v44, %v4007_v34  ;;  %v10923_v33 = vpop.f32.mrb[102].mxu1 }
 0x2f7   : > { %11033 = vmatmul.mubr.msk.bf16.gmra.mrb[236].mxu0 %vm3268_vm2, %v19047_v3  ;;  %v4300_v47 = vmul.f32 0.2, %v4016_v0  ;;  %v4019_v32 = vadd.f32 %v13600_v44, %v10923_v33  ;;  %v4010_v17 = vpop.f32.mrb[103].mxu1  ;;  %v19055_v33 = vld [vmem:[#allocation66_spill] sm:$0xff] }
 0x2f8   : > { %11036 = vmatprep.mubr.msk.bf16.mxu0 %vm3268_vm2, %v19050_v13  ;;  %v4298_v55 = vmul.f32 0.2, %v4008_v51  ;;  %v4011_v3 = vadd.f32 %v13600_v44, %v4010_v17  ;;  %v19051_v17 = vld [vmem:[#allocation63_spill] sm:$0xff] }
 0x2f9   : > { %v14227_v34 = vmax.f32 %v4016_v0, %v4300_v47  ;;  %v4301_v8 = vmul.f32 0.2, %v4019_v32  ;;  %v19056_v0 = vpack.c.bf16 %v19054_v28, %v19055_v33  ;;  %v19060_v33 = vld [vmem:[#allocation6_spill] sm:$0xff] }
 0x2fa   : > { %v14229_v37 = vmax.f32 %v4008_v51, %v4298_v55  ;;  %v4299_v9 = vmul.f32 0.2, %v4011_v3  ;;  %v19052_v55 = vld [vmem:[#allocation61_spill] sm:$0xff] }
 0x2fb   : > { %v14233_v57 = vmax.f32 %v4019_v32, %v4301_v8  ;;  %v19053_v25 = vpack.c.bf16 %v19051_v17, %v19052_v55 }
 0x2fc   : > { %v14235_v24 = vmax.f32 %v4011_v3, %v4299_v9  ;;  %v10926_v13 = vpop.f32.mrb[104].mxu1  ;;  %v19061_v3 = vld [vmem:[#allocation59_spill] sm:$0xff] }
 0x2fd   : > { %v4032_v51 = vadd.f32 %v13600_v44, %v10926_v13  ;;  %v4023_v47 = vpop.f32.mrb[105].mxu1 }
 0x2fe   : > { %v4024_v8 = vadd.f32 %v13600_v44, %v4023_v47  ;;  %v10927_v32 = vpop.f32.mrb[106].mxu1 }
 0x2ff   : > { %11037 = vmatmul.mubr.msk.bf16.gmra.mrb[240].mxu0 %vm3268_vm2, %v19053_v25  ;;  %v4304_v13 = vmul.f32 0.2, %v4032_v51  ;;  %v4035_v7 = vadd.f32 %v13600_v44, %v10927_v32  ;;  %v4026_v17 = vpop.f32.mrb[107].mxu1  ;;  %v19067_v32 = vld [vmem:[#allocation12_spill] sm:$0xff] }
 0x300   : > { %11040 = vmatprep.mubr.msk.bf16.mxu0 %vm3268_vm2, %v19056_v0  ;;  %v4302_v55 = vmul.f32 0.2, %v4024_v8  ;;  %v4027_v25 = vadd.f32 %v13600_v44, %v4026_v17 }
 0x301   : > { %v14259_v47 = vmax.f32 %v4032_v51, %v4304_v13  ;;  %v4305_v19 = vmul.f32 0.2, %v4035_v7  ;;  %v19062_v51 = vpack.c.bf16 %v19060_v33, %v19061_v3  ;;  %v19066_v3 = vld [vmem:[#allocation14_spill] sm:$0xff] }
 0x302   : > { %v14261_v30 = vmax.f32 %v4024_v8, %v4302_v55  ;;  %v4303_v9 = vmul.f32 0.2, %v4027_v25 }
 0x303   : > { %v14265_v50 = vmax.f32 %v4035_v7, %v4305_v19  ;;  %v19057_v19 = vld [vmem:[#allocation67_spill] sm:$0xff]  ;;  %v19058_v7 = vld [vmem:[#allocation65_spill] sm:$0xff] }
 0x304   : > { %v14269_v28 = vmax.f32 %v4027_v25, %v4303_v9  ;;  %v10930_v0 = vpop.f32.mrb[108].mxu1  ;;  %v19059_v55 = vpack.c.bf16 %v19057_v19, %v19058_v7 }
 0x305   : > { %v4048_v8 = vadd.f32 %v13600_v44, %v10930_v0  ;;  %v4039_v13 = vpop.f32.mrb[109].mxu1 }
 0x306   : > { %v4040_v9 = vadd.f32 %v13600_v44, %v4039_v13  ;;  %v10931_v25 = vpop.f32.mrb[110].mxu1 }
 0x307   : > { %11041 = vmatmul.mubr.msk.bf16.gmra.mrb[244].mxu0 %vm3268_vm2, %v19059_v55  ;;  %v4308_v0 = vmul.f32 0.2, %v4048_v8  ;;  %v4051_v60 = vadd.f32 %v13600_v44, %v10931_v25  ;;  %v4042_v17 = vpop.f32.mrb[111].mxu1 }
 0x308   : > { %11044 = vmatprep.mubr.msk.bf16.mxu0 %vm3268_vm2, %v19062_v51  ;;  %v4306_v53 = vmul.f32 0.2, %v4040_v9  ;;  %v4043_v19 = vadd.f32 %v13600_v44, %v4042_v17  ;;  %v19070_v17 = vmax.f32 %v14010_v56, %v14195_v36 }
 0x309   : > { %v14291_v7 = vmax.f32 %v4048_v8, %v4308_v0  ;;  %v4309_v55 = vmul.f32 0.2, %v4051_v60  ;;  %v19064_v0 = vld [vmem:[#allocation56_spill] sm:$0xff]  ;;  %v19068_v8 = vpack.c.bf16 %v19066_v3, %v19067_v32 }
 0x30a   : > { %v14293_v13 = vmax.f32 %v4040_v9, %v4306_v53  ;;  %v4307_v20 = vmul.f32 0.2, %v4043_v19 }
 0x30b   : > { %v14297_v1 = vmax.f32 %v4051_v60, %v4309_v55  ;;  %v19063_v60 = vld [vmem:[#allocation8_spill] sm:$0xff] }
 0x30c   : > { %v14301_v33 = vmax.f32 %v4043_v19, %v4307_v20  ;;  %v19065_v55 = vpack.c.bf16 %v19063_v60, %v19064_v0 }
 0x30d   : > { %v10934_v51 = vpop.f32.mrb[112].mxu1 }
 0x30e   : > { %v4064_v53 = vadd.f32 %v13600_v44, %v10934_v51  ;;  %v4055_v9 = vpop.f32.mrb[113].mxu1 }
 0x30f   : > { %11045 = vmatmul.mubr.msk.bf16.gmra.mrb[248].mxu0 %vm3268_vm2, %v19065_v55  ;;  %v4056_v20 = vadd.f32 %v13600_v44, %v4055_v9  ;;  %v10935_v19 = vpop.f32.mrb[114].mxu1 }
 0x310   : > { %11048 = vmatprep.mubr.msk.bf16.mxu0 %vm3268_vm2, %v19068_v8  ;;  %v4312_v51 = vmul.f32 0.2, %v4064_v53  ;;  %v4067_v18 = vadd.f32 %v13600_v44, %v10935_v19  ;;  %v4058_v25 = vpop.f32.mrb[115].mxu1 }
 0x311   : > { %v4310_v35 = vmul.f32 0.2, %v4056_v20  ;;  %v4059_v60 = vadd.f32 %v13600_v44, %v4058_v25 }
 0x312   : > { %v14323_v0 = vmax.f32 %v4064_v53, %v4312_v51  ;;  %v4313_v55 = vmul.f32 0.2, %v4067_v18  ;;  %v19072_v53 = vmax.f32 %v14018_v54, %v14197_v23  ;;  %v19075_v51 = vld [vmem:[#allocation16_spill] sm:$0xff] }
 0x313   : > { %v14325_v9 = vmax.f32 %v4056_v20, %v4310_v35  ;;  %v4311_v38 = vmul.f32 0.2, %v4059_v60  ;;  %v19073_v35 = vmax.f32 %v14026_v5, %v14201_v59  ;;  %v19077_v5 = vmax.f32 %v14035_v10, %v14203_v21 }
 0x314   : > { %19069 = vst [vmem:[#allocation64_spill] sm:$0xff] %v14323_v0  ;;  %v14331_v32 = vmax.f32 %v19070_v17, %v14323_v0  ;;  %v14333_v3 = vmax.f32 %v4067_v18, %v4313_v55  ;;  %v19074_v17 = vld [vmem:[#allocation58_spill] sm:$0xff] }
 0x315   : > { %v14335_v8 = vmax.f32 %v4059_v60, %v4311_v38  ;;  %v10938_v19 = vpop.f32.mrb[116].mxu1  ;;  %v14341_v25 = vmax.f32 %v19072_v53, %v14325_v9  ;;  %v19076_v60 = vpack.c.bf16 %v19074_v17, %v19075_v51 }
 0x316   : > { %19071 = vst [vmem:[#allocation62_spill] sm:$0xff] %v14333_v3  ;;  %v14347_v20 = vmax.f32 %v19073_v35, %v14333_v3  ;;  %v4080_v18 = vadd.f32 %v13600_v44, %v10938_v19  ;;  %v4071_v38 = vpop.f32.mrb[117].mxu1  ;;  %v19078_v19 = vpack.c.bf16 %v13879_v26, %v13871_v16  ;;  %v19079_v35 = vmax.f32 %v14058_v29, %v14227_v34 }
 0x317   : > { %11049 = vmatmul.mubr.msk.bf16.gmra.mrb[252].mxu0 %vm3268_vm2, %v19076_v60  ;;  %v4072_v54 = vadd.f32 %v13600_v44, %v4071_v38  ;;  %v10939_v55 = vpop.f32.mrb[118].mxu1  ;;  %v14361_v53 = vmax.f32 %v19077_v5, %v14335_v8 }
 0x318   : > { %11052 = vmatprep.mubr.msk.bf16.mxu0 %vm3268_vm2, %v19078_v19  ;;  %v4316_v17 = vmul.f32 0.2, %v4080_v18  ;;  %v4083_v51 = vadd.f32 %v13600_v44, %v10939_v55  ;;  %v4074_v60 = vpop.f32.mrb[119].mxu1 }
 0x319   : > { %v4314_v38 = vmul.f32 0.2, %v4072_v54  ;;  %v4075_v56 = vadd.f32 %v13600_v44, %v4074_v60 }
 0x31a   : > { %v14371_v0 = vmax.f32 %v4080_v18, %v4316_v17  ;;  %v4317_v10 = vmul.f32 0.2, %v4083_v51  ;;  %v19080_v18 = vmax.f32 %v14066_v31, %v14229_v37 }
 0x31b   : > { %v14373_v5 = vmax.f32 %v4072_v54, %v4314_v38  ;;  %v4315_v3 = vmul.f32 0.2, %v4075_v56  ;;  %v19081_v54 = vmax.f32 %v14074_v42, %v14233_v57  ;;  %v19083_v42 = vmax.f32 %v14083_v15, %v14235_v24 }
 0x31c   : > { %v14379_v16 = vmax.f32 %v19079_v35, %v14371_v0  ;;  %v14381_v26 = vmax.f32 %v4083_v51, %v4317_v10  ;;  %v19085_v10 = vmax.f32 %v14107_v22, %v14259_v47 }
 0x31d   : > { %v14383_v19 = vmax.f32 %v4075_v56, %v4315_v3  ;;  %v10942_v55 = vpop.f32.mrb[120].mxu1  ;;  %v14389_v17 = vmax.f32 %v19080_v18, %v14373_v5  ;;  %v19082_v56 = vpack.c.bf16 %v13875_v41, %v13869_v12 }
 0x31e   : > { %v14395_v60 = vmax.f32 %v19081_v54, %v14381_v26  ;;  %v4096_v35 = vadd.f32 %v13600_v44, %v10942_v55  ;;  %v4087_v3 = vpop.f32.mrb[121].mxu1  ;;  %v19084_v55 = vpack.c.bf16 %v13917_v11, %v13909_v48 }
 0x31f   : > { %11053 = vmatmul.mubr.msk.bf16.gmra.mrb[0].mxu0 %vm3268_vm2, %v19082_v56  ;;  %v4088_v31 = vadd.f32 %v13600_v44, %v4087_v3  ;;  %v10943_v51 = vpop.f32.mrb[122].mxu1  ;;  %v14409_v38 = vmax.f32 %v19083_v42, %v14383_v19 }
 0x320   : > { %11056 = vmatprep.mubr.msk.bf16.mxu0 %vm3268_vm2, %v19084_v55  ;;  %v4320_v41 = vmul.f32 0.2, %v4096_v35  ;;  %v4099_v12 = vadd.f32 %v13600_v44, %v10943_v51  ;;  %v4090_v18 = vpop.f32.mrb[123].mxu1  ;;  %v19086_v51 = vmax.f32 %v14115_v61, %v14261_v30  ;;  %v19088_v61 = vmax.f32 %v14132_v58, %v14269_v28  ;;  %v14468_v58 = vld [vmem:[%s18577_s4] ss:$0 sm:$0xff] }
 0x321   : > { %v4318_v54 = vmul.f32 0.2, %v4088_v31  ;;  %v4091_v3 = vadd.f32 %v13600_v44, %v4090_v18 }
 0x322   : > { %v14419_v56 = vmax.f32 %v4096_v35, %v4320_v41  ;;  %v4321_v15 = vmul.f32 0.2, %v4099_v12 }
 0x323   : > { %v14421_v42 = vmax.f32 %v4088_v31, %v4318_v54  ;;  %v4319_v29 = vmul.f32 0.2, %v4091_v3  ;;  %v19087_v31 = vmax.f32 %v14123_v2, %v14265_v50 }
 0x324   : > { %v14427_v11 = vmax.f32 %v19085_v10, %v14419_v56  ;;  %v14429_v48 = vmax.f32 %v4099_v12, %v4321_v15 }
 0x325   : > { %v14435_v55 = vmax.f32 %v19086_v51, %v14421_v42  ;;  %v14437_v35 = vmax.f32 %v4091_v3, %v4319_v29  ;;  %v19089_v29 = vpack.c.bf16 %v13913_v45, %v13907_v52  ;;  %v19090_v51 = vpack.c.bf16 %v13948_v40, %v13940_v46 }
 0x326   : > { %v10946_v41 = vpop.f32.mrb[124].mxu1  ;;  %v14443_v18 = vmax.f32 %v19087_v31, %v14429_v48  ;;  %v19092_v40 = vmax.f32 %v14155_v43, %v14291_v7 }
 0x327   : > { %v4112_v10 = vadd.f32 %v13600_v44, %v10946_v41  ;;  %v4103_v12 = vpop.f32.mrb[125].mxu1  ;;  %v14452_v54 = vmax.f32 %v19088_v61, %v14437_v35  ;;  %11057 = vmatmul.mubr.msk.bf16.gmra.mrb[4].mxu0 %vm3268_vm2, %v19089_v29 }
 0x328   : > { %v4104_v2 = vadd.f32 %v13600_v44, %v4103_v12  ;;  %v10947_v3 = vpop.f32.mrb[126].mxu1  ;;  %11060 = vmatprep.mubr.msk.bf16.mxu0 %vm3268_vm2, %v19090_v51 }
 0x329   : > { %v4324_v41 = vmul.f32 0.2, %v4112_v10  ;;  %v4115_v45 = vadd.f32 %v14468_v58, %v10947_v3  ;;  %v4106_v52 = vpop.f32.mrb[127].mxu1  ;;  %v19094_v3 = vmax.f32 %v14163_v6, %v14293_v13  ;;  %v19096_v6 = vmax.f32 %v14180_v39, %v14301_v33 }
 0x32a   : > { %v4322_v31 = vmul.f32 0.2, %v4104_v2  ;;  %v4107_v44 = vadd.f32 %v14468_v58, %v4106_v52 }
 0x32b   : > { %v14472_v12 = vmax.f32 %v4112_v10, %v4324_v41  ;;  %v4325_v61 = vmul.f32 0.2, %v4115_v45 }
 0x32c   : > { %v14474_v29 = vmax.f32 %v4104_v2, %v4322_v31  ;;  %v4323_v46 = vmul.f32 0.2, %v4107_v44  ;;  %v19095_v2 = vmax.f32 %v14171_v4, %v14297_v1 }
 0x32d   : > { %19091 = vst [vmem:[#allocation63_spill] sm:$0xff] %v14472_v12  ;;  %v14480_v51 = vmax.f32 %v19092_v40, %v14472_v12  ;;  %v14482_v22 = vmax.f32 %v4115_v45, %v4325_v61 }
 0x32e   : > { %v14488_v15 = vmax.f32 %v19094_v3, %v14474_v29  ;;  %v14490_v10 = vmax.f32 %v4107_v44, %v4323_v46  ;;  %v10950_v41 = vpop.f32.mrb[128].mxu1  ;;  %v19097_v44 = vpack.c.bf16 %v13944_v63, %v13938_v49  ;;  %v19098_v3 = vpack.c.bf16 %v13980_v14, %v13972_v62 }
 0x32f   : > { %19093 = vst [vmem:[#allocation61_spill] sm:$0xff] %v14482_v22  ;;  %v14496_v52 = vmax.f32 %v19095_v2, %v14482_v22  ;;  %v4128_v45 = vadd.f32 %v14468_v58, %v10950_v41  ;;  %v4119_v31 = vpop.f32.mrb[129].mxu1 }
 0x330   : > { %v14505_v61 = vmax.f32 %v19096_v6, %v14490_v10  ;;  %11061 = vmatmul.mubr.msk.bf16.gmra.mrb[8].mxu0 %vm3268_vm2, %v19097_v44  ;;  %v4120_v4 = vadd.f32 %v14468_v58, %v4119_v31  ;;  %v10951_v46 = vpop.f32.mrb[130].mxu1 }
 0x331   : > { %11064 = vmatprep.mubr.msk.bf16.mxu0 %vm3268_vm2, %v19098_v3  ;;  %v4328_v41 = vmul.f32 0.2, %v4128_v45  ;;  %v4131_v39 = vadd.f32 %v14468_v58, %v10951_v46  ;;  %v4122_v2 = vpop.f32.mrb[131].mxu1 }
 0x332   : > { %v4326_v6 = vmul.f32 0.2, %v4120_v4  ;;  %v4123_v63 = vadd.f32 %v14468_v58, %v4122_v2  ;;  %v19101_v2 = vld [vmem:[#allocation11_spill] sm:$0xff] }
 0x333   : > { %v14520_v49 = vmax.f32 %v4128_v45, %v4328_v41  ;;  %v4329_v44 = vmul.f32 0.2, %v4131_v39 }
 0x334   : > { %v4327_v31 = vmul.f32 0.2, %v4123_v63  ;;  %v14522_v43 = vmax.f32 %v4120_v4, %v4326_v6 }
 0x335   : > { %19099 = vst [vmem:[#allocation68_spill] sm:$0xff] %v14520_v49  ;;  %v4632_v40 = vmax.f32 %v14331_v32, %v14520_v49  ;;  %v14526_v12 = vmax.f32 %v4131_v39, %v4329_v44  ;;  %v19102_v32 = vpack.c.bf16 %v13976_v27, %v19101_v2  ;;  %v19104_v44 = vld [vmem:[#allocation20_spill] sm:$0xff] }
 0x336   : > { %v10954_v62 = vpop.f32.mrb[132].mxu1  ;;  %v14528_v14 = vmax.f32 %v4123_v63, %v4327_v31  ;;  %v4630_v46 = vmax.f32 %v14341_v25, %v14522_v43  ;;  %v19103_v63 = vld [vmem:[#allocation22_spill] sm:$0xff] }
 0x337   : > { %19100 = vst [vmem:[#allocation66_spill] sm:$0xff] %v14526_v12  ;;  %v4633_v3 = vmax.f32 %v14347_v20, %v14526_v12  ;;  %v4144_v4 = vadd.f32 %v14468_v58, %v10954_v62  ;;  %v4135_v41 = vpop.f32.mrb[133].mxu1  ;;  %v19105_v31 = vpack.c.bf16 %v19103_v63, %v19104_v44 }
 0x338   : > { %11065 = vmatmul.mubr.msk.bf16.gmra.mrb[12].mxu0 %vm3268_vm2, %v19102_v32  ;;  %v4136_v39 = vadd.f32 %v14468_v58, %v4135_v41  ;;  %v10955_v6 = vpop.f32.mrb[134].mxu1  ;;  %v4631_v25 = vmax.f32 %v14361_v53, %v14528_v14 }
 0x339   : > { %11068 = vmatprep.mubr.msk.bf16.mxu0 %vm3268_vm2, %v19105_v31  ;;  %v4332_v62 = vmul.f32 0.2, %v4144_v4  ;;  %v4147_v45 = vadd.f32 %v14468_v58, %v10955_v6  ;;  %v4138_v27 = vpop.f32.mrb[135].mxu1  ;;  %v11335_v2 = vpack.i.bf16 %v4633_v3, %v4632_v40  ;;  %v19107_v31 = vld [vmem:[#allocation24_spill] sm:$0xff] }
 0x33a   : > { %v4330_v32 = vmul.f32 0.2, %v4136_v39  ;;  %v4139_v41 = vadd.f32 %v14468_v58, %v4138_v27  ;;  %v11330_v49 = vpack.i.bf16 %v4631_v25, %v4630_v46  ;;  %v19106_v25 = vld [vmem:[#allocation60_spill] sm:$0xff] }
 0x33b   : > { %v14552_v12 = vmax.f32 %v4144_v4, %v4332_v62  ;;  %v4333_v53 = vmul.f32 0.2, %v4147_v45  ;;  %v19109_v62 = vld [vmem:[#allocation40_spill] sm:$0xff] }
 0x33c   : > { %v4331_v22 = vmul.f32 0.2, %v4139_v41  ;;  %11331 = vrot.lane.b32.xlu0 %v11330_v49, %s11737_s10  ;;  %v14555_v20 = vmax.f32 %v4136_v39, %v4330_v32  ;;  %v19110_v27 = vld [vmem:[#allocation28_spill] sm:$0xff] }
 0x33d   : > { %v4636_v63 = vmax.f32 %v14379_v16, %v14552_v12  ;;  %v14559_v44 = vmax.f32 %v4147_v45, %v4333_v53  ;;  %v19108_v16 = vpack.c.bf16 %v19106_v25, %v19107_v31  ;;  %v19111_v32 = vpack.c.bf16 %v19109_v62, %v19110_v27 }
 0x33e   : > { %v10958_v6 = vpop.f32.mrb[136].mxu1  ;;  %v14561_v40 = vmax.f32 %v4139_v41, %v4331_v22  ;;  %v4634_v46 = vmax.f32 %v14389_v17, %v14555_v20 }
 0x33f   : > { %v4637_v3 = vmax.f32 %v14395_v60, %v14559_v44  ;;  %v4160_v49 = vadd.f32 %v14468_v58, %v10958_v6  ;;  %v4151_v39 = vpop.f32.mrb[137].mxu1 }
 0x340   : > { %11069 = vmatmul.mubr.msk.bf16.gmra.mrb[16].mxu0 %vm3268_vm2, %v19108_v16  ;;  %v4152_v22 = vadd.f32 %v14468_v58, %v4151_v39  ;;  %v10959_v45 = vpop.f32.mrb[138].mxu1  ;;  %11336 = vrot.lane.b32.xlu0 %v11335_v2, %s11737_s10  ;;  %v4635_v17 = vmax.f32 %v14409_v38, %v14561_v40 }
 0x341   : > { %11072 = vmatprep.mubr.msk.bf16.mxu0 %vm3268_vm2, %v19111_v32  ;;  %v4336_v41 = vmul.f32 0.2, %v4160_v49  ;;  %v4163_v53 = vadd.f32 %v14468_v58, %v10959_v45  ;;  %v4154_v6 = vpop.f32.mrb[139].mxu1  ;;  %v11345_v25 = vpack.i.bf16 %v4637_v3, %v4636_v63  ;;  %v19113_v32 = vld [vmem:[#allocation19_spill] sm:$0xff] }
 0x342   : > { %v4334_v39 = vmul.f32 0.2, %v4152_v22  ;;  %v4155_v31 = vadd.f32 %v14468_v58, %v4154_v6  ;;  %v11340_v2 = vpack.i.bf16 %v4635_v17, %v4634_v46  ;;  %v19112_v17 = vld [vmem:[#allocation27_spill] sm:$0xff] }
 0x343   : > { %v14586_v16 = vmax.f32 %v4160_v49, %v4336_v41  ;;  %v4337_v38 = vmul.f32 0.2, %v4163_v53 }
 0x344   : > { %v14588_v4 = vmax.f32 %v4152_v22, %v4334_v39  ;;  %v4335_v60 = vmul.f32 0.2, %v4155_v31  ;;  %11341 = vrot.lane.b32.xlu1 %v11340_v2, %s11737_s10 }
 0x345   : > { %v4640_v62 = vmax.f32 %v14427_v11, %v14586_v16  ;;  %v14593_v27 = vmax.f32 %v4163_v53, %v4337_v38  ;;  %v19114_v11 = vpack.c.bf16 %v19112_v17, %v19113_v32  ;;  %v19116_v53 = vld [vmem:[#allocation34_spill] sm:$0xff] }
 0x346   : > { %v4638_v63 = vmax.f32 %v14435_v55, %v14588_v4  ;;  %v14597_v3 = vmax.f32 %v4155_v31, %v4335_v60  ;;  %v10962_v22 = vpop.f32.mrb[140].mxu1  ;;  %v19115_v60 = vld [vmem:[#allocation57_spill] sm:$0xff] }
 0x347   : > { %v4641_v46 = vmax.f32 %v14443_v18, %v14593_v27  ;;  %v4176_v41 = vadd.f32 %v14468_v58, %v10962_v22  ;;  %v4167_v55 = vpop.f32.mrb[141].mxu1  ;;  %v19117_v6 = vpack.c.bf16 %v19115_v60, %v19116_v53 }
 0x348   : > { %v4639_v45 = vmax.f32 %v14452_v54, %v14597_v3  ;;  %11073 = vmatmul.mubr.msk.bf16.gmra.mrb[20].mxu0 %vm3268_vm2, %v19114_v11  ;;  %11346 = vrot.lane.b32.xlu1 %v11345_v25, %s11737_s10  ;;  %v4168_v54 = vadd.f32 %v14468_v58, %v4167_v55  ;;  %v10963_v39 = vpop.f32.mrb[142].mxu1 }
 0x349   : > { %11076 = vmatprep.mubr.msk.bf16.mxu0 %vm3268_vm2, %v19117_v6  ;;  %v11355_v31 = vpack.i.bf16 %v4641_v46, %v4640_v62  ;;  %v4340_v2 = vmul.f32 0.2, %v4176_v41  ;;  %v4179_v38 = vadd.f32 %v14468_v58, %v10963_v39  ;;  %v4170_v17 = vpop.f32.mrb[143].mxu1  ;;  %v14629_v62 = vld [vmem:[%s18579_s6] ss:$0 sm:$0xff]  ;;  %v19119_v39 = vld [vmem:[#allocation36_spill] sm:$0xff] }
 0x34a   : > { %v11350_v22 = vpack.i.bf16 %v4639_v45, %v4638_v63  ;;  %v4338_v32 = vmul.f32 0.2, %v4168_v54  ;;  %v4171_v25 = vadd.f32 %v14468_v58, %v4170_v17 }
 0x34b   : > { %v14620_v11 = vmax.f32 %v4176_v41, %v4340_v2  ;;  %v4341_v49 = vmul.f32 0.2, %v4179_v38  ;;  %v19121_v2 = vld [vmem:[#allocation69_spill] sm:$0xff] }
 0x34c   : > { %11356 = vrot.lane.b32.xlu1 %v11355_v31, %s11737_s10  ;;  %11351 = vrot.lane.b32.xlu0 %v11350_v22, %s11737_s10  ;;  %v14624_v60 = vmax.f32 %v4168_v54, %v4338_v32  ;;  %v4339_v55 = vmul.f32 0.2, %v4171_v25  ;;  %v10974_v41 = vpop.f32.mrb[176].mxu0  ;;  %v19118_v54 = vld [vmem:[#allocation38_spill] sm:$0xff] }
 0x34d   : > { %v4644_v63 = vmax.f32 %v14480_v51, %v14620_v11  ;;  %v14633_v46 = vmax.f32 %v4179_v38, %v4341_v49  ;;  %v19120_v31 = vpack.c.bf16 %v19118_v54, %v19119_v39  ;;  %v5048_v51 = vadd.f32 %v10974_v41, %v14629_v62  ;;  %v5039_v49 = vpop.f32.mrb[177].mxu0  ;;  %v19122_v38 = vld [vmem:[#allocation55_spill] sm:$0xff] }
 0x34e   : > { %v4642_v58 = vmax.f32 %v14488_v15, %v14624_v60  ;;  %v14637_v45 = vmax.f32 %v4171_v25, %v4339_v55  ;;  %v19123_v17 = vpack.c.bf16 %v19121_v2, %v19122_v38  ;;  %v10975_v22 = vpop.f32.mrb[178].mxu0 }
 0x34f   : > { %v4645_v53 = vmax.f32 %v14496_v52, %v14633_v46  ;;  %v5040_v52 = vadd.f32 %v14629_v62, %v5039_v49  ;;  %v5680_v25 = vmul.f32 0.2, %v5048_v51  ;;  %v5051_v55 = vadd.f32 %v10975_v22, %v14629_v62  ;;  %v5042_v54 = vpop.f32.mrb[179].mxu0  ;;  %v19124_v22 = vld [vmem:[#allocation53_spill] sm:$0xff] }
 0x350   : > { %11077 = vmatmul.mubr.msk.bf16.gmra.mrb[24].mxu0 %vm3268_vm2, %v19120_v31  ;;  %v4643_v15 = vmax.f32 %v14505_v61, %v14637_v45  ;;  %v5043_v31 = vadd.f32 %v14629_v62, %v5042_v54 }
 0x351   : > { %11080 = vmatprep.mubr.msk.bf16.mxu0 %vm3268_vm2, %v19123_v17  ;;  %v11365_v41 = vpack.i.bf16 %v4645_v53, %v4644_v63  ;;  %v5678_v39 = vmul.f32 0.2, %v5040_v52  ;;  %v5681_v6 = vmul.f32 0.2, %v5051_v55  ;;  %v14661_v49 = vmax.f32 %v5048_v51, %v5680_v25  ;;  %v19125_v63 = vld [vmem:[#allocation54_spill] sm:$0xff] }
 0x352   : > { %v11360_v61 = vpack.i.bf16 %v4643_v15, %v4642_v58  ;;  %v5679_v2 = vmul.f32 0.2, %v5043_v31  ;;  %v19126_v53 = vpack.c.bf16 %v19124_v22, %v19125_v63  ;;  %v19127_v51 = vpack.c.bf16 %v14203_v21, %v14197_v23 }
 0x353   : > { %11366 = vrot.lane.b32.xlu1 %v11365_v41, %s11737_s10  ;;  %v14663_v38 = vmax.f32 %v5051_v55, %v5681_v6  ;;  %v14665_v17 = vmax.f32 %v5040_v52, %v5678_v39  ;;  %v19128_v41 = vmov 0   ;;  %v19129_v63 = vpack.c.bf16 %v14201_v59, %v14195_v36 }
 0x354   : > { %11361 = vrot.lane.b32.xlu0 %v11360_v61, %s11737_s10  ;;  %v14667_v32 = vmax.f32 %v5043_v31, %v5679_v2  ;;  %s19698_s10 = sld [smem:[#allocation125_spill]] }
 0x355   : > { %v6143_v58 = vpack.c.bf16 %v14663_v38, %v14661_v49  ;;  %v10978_v6 = vpop.f32.mrb[180].mxu0 }
 0x356   : > { %v6142_v15 = vpack.c.bf16 %v14667_v32, %v14665_v17  ;;  %v5064_v52 = vadd.f32 %v10978_v6, %v14629_v62  ;;  %v5055_v25 = vpop.f32.mrb[181].mxu0 }
 0x357   : > { %v5056_v55 = vadd.f32 %v14629_v62, %v5055_v25  ;;  %v10979_v54 = vpop.f32.mrb[182].mxu0 }
 0x358   : > { %11081 = vmatmul.mubr.msk.bf16.gmra.mrb[28].mxu0 %vm3268_vm2, %v19126_v53  ;;  %6363 = vmatmul.mubr.bf16.vlgmr.msra.gmra.mrb[144].mxu1 %v6142_v15  ;;  %v5684_v39 = vmul.f32 0.2, %v5064_v52  ;;  %v5067_v31 = vadd.f32 %v10979_v54, %v14629_v62  ;;  %v5058_v61 = vpop.f32.mrb[183].mxu0 }
 0x359   : > { %11084 = vmatprep.mubr.msk.bf16.mxu0 %vm3268_vm2, %v19127_v51  ;;  %6372 = vmatprep.mubr.bf16.mxu1 %v19128_v41  ;;  %v5682_v2 = vmul.f32 0.2, %v5056_v55  ;;  %v5059_v22 = vadd.f32 %v14629_v62, %v5058_v61  ;;  %v19130_v51 = vpack.c.bf16 %v14235_v24, %v14229_v37 }
 0x35a   : > { %v5685_v23 = vmul.f32 0.2, %v5067_v31  ;;  %v14690_v53 = vmax.f32 %v5064_v52, %v5684_v39 }
 0x35b   : > { %v5683_v21 = vmul.f32 0.2, %v5059_v22  ;;  %v14698_v6 = vmax.f32 %v5056_v55, %v5682_v2 }
 0x35c   : > { %v14692_v15 = vmax.f32 %v5067_v31, %v5685_v23  ;;  %v19131_v23 = vpack.c.bf16 %v14233_v57, %v14227_v34 }
 0x35d   : > { %v14700_v25 = vmax.f32 %v5059_v22, %v5683_v21  ;;  %v10982_v54 = vpop.f32.mrb[184].mxu0 }
 0x35e   : > { %v5080_v61 = vadd.f32 %v10982_v54, %v14629_v62  ;;  %v5071_v18 = vpop.f32.mrb[185].mxu0  ;;  %v6145_v59 = vpack.c.bf16 %v14692_v15, %v14690_v53 }
 0x35f   : > { %v5072_v36 = vadd.f32 %v14629_v62, %v5071_v18  ;;  %v10983_v52 = vpop.f32.mrb[186].mxu0  ;;  %v6144_v37 = vpack.c.bf16 %v14700_v25, %v14698_v6 }
 0x360   : > { %11085 = vmatmul.mubr.msk.bf16.gmra.mrb[32].mxu0 %vm3268_vm2, %v19129_v63  ;;  %6373 = vmatmul.mubr.bf16.gmra.mrb[148].mxu1 %v6143_v58  ;;  %v5688_v24 = vmul.f32 0.2, %v5080_v61  ;;  %v5083_v55 = vadd.f32 %v10983_v52, %v14629_v62  ;;  %v5074_v39 = vpop.f32.mrb[187].mxu0  ;;  %v19132_v63 = vpack.c.bf16 %v14269_v28, %v14261_v30 }
 0x361   : > { %11088 = vmatprep.mubr.msk.bf16.mxu0 %vm3268_vm2, %v19130_v51  ;;  %6382 = vmatprep.mubr.bf16.mxu1 %v19128_v41  ;;  %v5686_v31 = vmul.f32 0.2, %v5072_v36  ;;  %v5075_v2 = vadd.f32 %v14629_v62, %v5074_v39 }
 0x362   : > { %v5689_v22 = vmul.f32 0.2, %v5083_v55  ;;  %v14715_v18 = vmax.f32 %v5080_v61, %v5688_v24 }
 0x363   : > { %v5687_v58 = vmul.f32 0.2, %v5075_v2  ;;  %v14723_v51 = vmax.f32 %v5072_v36, %v5686_v31 }
 0x364   : > { %v14717_v21 = vmax.f32 %v5083_v55, %v5689_v22  ;;  %v19133_v22 = vpack.c.bf16 %v14265_v50, %v14259_v47 }
 0x365   : > { %v14725_v54 = vmax.f32 %v5075_v2, %v5687_v58 }
 0x366   : > { %v10986_v52 = vpop.f32.mrb[188].mxu0  ;;  %v6147_v57 = vpack.c.bf16 %v14717_v21, %v14715_v18 }
 0x367   : > { %v5096_v34 = vadd.f32 %v10986_v52, %v14629_v62  ;;  %v5087_v61 = vpop.f32.mrb[189].mxu0  ;;  %v6146_v24 = vpack.c.bf16 %v14725_v54, %v14723_v51 }
 0x368   : > { %11089 = vmatmul.mubr.msk.bf16.gmra.mrb[36].mxu0 %vm3268_vm2, %v19131_v23  ;;  %6383 = vmatmul.mubr.bf16.gmra.mrb[152].mxu1 %v6144_v37  ;;  %v5088_v30 = vadd.f32 %v14629_v62, %v5087_v61  ;;  %v10987_v28 = vpop.f32.mrb[190].mxu0  ;;  %v19134_v23 = vpack.c.bf16 %v14301_v33, %v14293_v13 }
 0x369   : > { %11092 = vmatprep.mubr.msk.bf16.mxu0 %vm3268_vm2, %v19132_v63  ;;  %6392 = vmatprep.mubr.bf16.mxu1 %v19128_v41  ;;  %v5692_v36 = vmul.f32 0.2, %v5096_v34  ;;  %v5099_v55 = vadd.f32 %v10987_v28, %v14629_v62  ;;  %v5090_v39 = vpop.f32.mrb[191].mxu0 }
 0x36a   : > { %v5690_v31 = vmul.f32 0.2, %v5088_v30  ;;  %v5091_v37 = vadd.f32 %v14629_v62, %v5090_v39 }
 0x36b   : > { %v5693_v2 = vmul.f32 0.2, %v5099_v55  ;;  %v14744_v63 = vmax.f32 %v5096_v34, %v5692_v36 }
 0x36c   : > { %v5691_v58 = vmul.f32 0.2, %v5091_v37  ;;  %v14748_v61 = vmax.f32 %v5088_v30, %v5690_v31 }
 0x36d   : > { %v14746_v52 = vmax.f32 %v5099_v55, %v5693_v2 }
 0x36e   : > { %v14750_v28 = vmax.f32 %v5091_v37, %v5691_v58  ;;  %v19135_v58 = vpack.c.bf16 %v14297_v1, %v14291_v7 }
 0x370   : > { %11093 = vmatmul.mubr.msk.bf16.gmra.mrb[40].mxu0 %vm3268_vm2, %v19133_v22  ;;  %6393 = vmatmul.mubr.bf16.gmra.mrb[156].mxu1 %v6145_v59  ;;  %v6148_v36 = vpack.c.bf16 %v14750_v28, %v14748_v61 }
 0x371   : > { %11096 = vmatprep.mubr.msk.bf16.mxu0 %vm3268_vm2, %v19134_v23  ;;  %v10990_v39 = vpop.f32.mrb[192].mxu0  ;;  %6402 = vmatprep.mubr.bf16.mxu1 %v19128_v41 }
 0x372   : > { %v5112_v50 = vadd.f32 %v10990_v39, %v14629_v62  ;;  %v5103_v47 = vpop.f32.mrb[193].mxu0 }
 0x373   : > { %v5104_v33 = vadd.f32 %v14629_v62, %v5103_v47  ;;  %v10991_v34 = vpop.f32.mrb[194].mxu0  ;;  %v19136_v47 = vpack.c.bf16 %v14335_v8, %v14325_v9  ;;  %v19137_v8 = vld [vmem:[#allocation62_spill] sm:$0xff] }
 0x374   : > { %v5696_v30 = vmul.f32 0.2, %v5112_v50  ;;  %v5115_v55 = vadd.f32 %v10991_v34, %v14629_v62  ;;  %v5106_v31 = vpop.f32.mrb[195].mxu0  ;;  %v19138_v34 = vld [vmem:[#allocation64_spill] sm:$0xff] }
 0x375   : > { %v5694_v37 = vmul.f32 0.2, %v5104_v33  ;;  %v5107_v59 = vadd.f32 %v14629_v62, %v5106_v31  ;;  %v19139_v13 = vpack.c.bf16 %v19137_v8, %v19138_v34 }
 0x376   : > { %v14761_v2 = vmax.f32 %v5112_v50, %v5696_v30  ;;  %v5697_v22 = vmul.f32 0.2, %v5115_v55 }
 0x377   : > { %v14767_v23 = vmax.f32 %v5104_v33, %v5694_v37  ;;  %v5695_v39 = vmul.f32 0.2, %v5107_v59 }
 0x378   : > { %11097 = vmatmul.mubr.msk.bf16.gmra.mrb[44].mxu0 %vm3268_vm2, %v19135_v58  ;;  %v14775_v31 = vmax.f32 %v5115_v55, %v5697_v22  ;;  %6403 = vmatmul.mubr.bf16.gmra.mrb[160].mxu1 %v6146_v24  ;;  %v19140_v24 = vpack.c.bf16 %v14383_v19, %v14373_v5 }
 0x379   : > { %11100 = vmatprep.mubr.msk.bf16.mxu0 %vm3268_vm2, %v19136_v47  ;;  %v14779_v30 = vmax.f32 %v5107_v59, %v5695_v39  ;;  %6412 = vmatprep.mubr.bf16.mxu1 %v19128_v41 }
 0x37a   : > { %v10994_v1 = vpop.f32.mrb[196].mxu0 }
 0x37b   : > { %v5128_v33 = vadd.f32 %v10994_v1, %v14629_v62  ;;  %v5119_v9 = vpop.f32.mrb[197].mxu0 }
 0x37c   : > { %v5120_v37 = vadd.f32 %v14629_v62, %v5119_v9  ;;  %v10995_v59 = vpop.f32.mrb[198].mxu0 }
 0x37d   : > { %v5700_v22 = vmul.f32 0.2, %v5128_v33  ;;  %v5131_v58 = vadd.f32 %v10995_v59, %v14629_v62  ;;  %v5122_v39 = vpop.f32.mrb[199].mxu0 }
 0x37e   : > { %v5698_v47 = vmul.f32 0.2, %v5120_v37  ;;  %v5123_v1 = vadd.f32 %v14629_v62, %v5122_v39 }
 0x37f   : > { %v14794_v7 = vmax.f32 %v5128_v33, %v5700_v22  ;;  %v5701_v50 = vmul.f32 0.2, %v5131_v58 }
 0x380   : > { %11101 = vmatmul.mubr.msk.bf16.gmra.mrb[48].mxu0 %vm3268_vm2, %v19139_v13  ;;  %v14800_v9 = vmax.f32 %v5120_v37, %v5698_v47  ;;  %v5699_v55 = vmul.f32 0.2, %v5123_v1  ;;  %6413 = vmatmul.mubr.bf16.gmra.mrb[164].mxu1 %v6147_v57  ;;  %v19142_v57 = vpack.c.bf16 %v14437_v35, %v14421_v42 }
 0x381   : > { %11104 = vmatprep.mubr.msk.bf16.mxu0 %vm3268_vm2, %v19140_v24  ;;  %v14808_v39 = vmax.f32 %v5131_v58, %v5701_v50  ;;  %6422 = vmatprep.mubr.bf16.mxu1 %v19128_v41  ;;  %v19141_v50 = vpack.c.bf16 %v14381_v26, %v14371_v0 }
 0x382   : > { %v14812_v22 = vmax.f32 %v5123_v1, %v5699_v55  ;;  %v10998_v34 = vpop.f32.mrb[200].mxu0 }
 0x383   : > { %v5144_v19 = vadd.f32 %v10998_v34, %v14629_v62  ;;  %v5135_v13 = vpop.f32.mrb[201].mxu0 }
 0x384   : > { %v5136_v55 = vadd.f32 %v14629_v62, %v5135_v13  ;;  %v10999_v37 = vpop.f32.mrb[202].mxu0 }
 0x385   : > { %v5704_v24 = vmul.f32 0.2, %v5144_v19  ;;  %v5147_v58 = vadd.f32 %v10999_v37, %v14629_v62  ;;  %v5138_v47 = vpop.f32.mrb[203].mxu0  ;;  %v19147_v37 = vld [vmem:[#allocation63_spill] sm:$0xff] }
 0x386   : > { %v5702_v1 = vmul.f32 0.2, %v5136_v55  ;;  %v5139_v34 = vadd.f32 %v14629_v62, %v5138_v47 }
 0x387   : > { %v14830_v5 = vmax.f32 %v5144_v19, %v5704_v24  ;;  %v5705_v33 = vmul.f32 0.2, %v5147_v58 }
 0x388   : > { %11105 = vmatmul.mubr.msk.bf16.gmra.mrb[52].mxu0 %vm3268_vm2, %v19141_v50  ;;  %v14836_v13 = vmax.f32 %v5136_v55, %v5702_v1  ;;  %v5703_v8 = vmul.f32 0.2, %v5139_v34  ;;  %6423 = vmatmul.mubr.bf16.gmra.mrb[168].mxu1 %v6148_v36  ;;  %v19144_v36 = vpack.c.bf16 %v14490_v10, %v14474_v29 }
 0x389   : > { %11108 = vmatprep.mubr.msk.bf16.mxu0 %vm3268_vm2, %v19142_v57  ;;  %v14844_v47 = vmax.f32 %v5147_v58, %v5705_v33  ;;  %6432 = vmatprep.mubr.bf16.mxu1 %v19128_v41  ;;  %v19143_v33 = vpack.c.bf16 %v14429_v48, %v14419_v56  ;;  %v19145_v48 = vpack.c.bf16 %v14746_v52, %v14744_v63 }
 0x38a   : > { %v14848_v24 = vmax.f32 %v5139_v34, %v5703_v8  ;;  %v11002_v0 = vpop.f32.mrb[204].mxu0 }
 0x38b   : > { %v5160_v42 = vadd.f32 %v11002_v0, %v14629_v62  ;;  %v5151_v35 = vpop.f32.mrb[205].mxu0 }
 0x38c   : > { %v5152_v8 = vadd.f32 %v14629_v62, %v5151_v35  ;;  %v11003_v55 = vpop.f32.mrb[206].mxu0 }
 0x38d   : > { %v5708_v57 = vmul.f32 0.2, %v5160_v42  ;;  %v5163_v58 = vadd.f32 %v11003_v55, %v14629_v62  ;;  %v5154_v1 = vpop.f32.mrb[207].mxu0 }
 0x38e   : > { %v5706_v34 = vmul.f32 0.2, %v5152_v8  ;;  %v5155_v0 = vadd.f32 %v14629_v62, %v5154_v1 }
 0x38f   : > { %v14866_v26 = vmax.f32 %v5160_v42, %v5708_v57  ;;  %v5709_v19 = vmul.f32 0.2, %v5163_v58 }
 0x390   : > { %11109 = vmatmul.mubr.msk.bf16.gmra.mrb[56].mxu0 %vm3268_vm2, %v19143_v33  ;;  %v14872_v35 = vmax.f32 %v5152_v8, %v5706_v34  ;;  %v5707_v50 = vmul.f32 0.2, %v5155_v0  ;;  %6433 = vmatmul.mubr.bf16.gmra.mrb[172].mxu1 %v19145_v48 }
 0x391   : > { %11112 = vmatprep.mubr.msk.bf16.mxu0 %vm3268_vm2, %v19144_v36  ;;  %v14880_v1 = vmax.f32 %v5163_v58, %v5709_v19  ;;  %6442 = vmatprep.mubr.bf16.mxu1 %v19128_v41  ;;  %v19146_v19 = vld [vmem:[#allocation61_spill] sm:$0xff]  ;;  %v19149_v58 = vpack.c.bf16 %v14528_v14, %v14522_v43  ;;  %v19152_v43 = vpack.c.bf16 %v14779_v30, %v14767_v23 }
 0x392   : > { %v14884_v57 = vmax.f32 %v5155_v0, %v5707_v50  ;;  %v11006_v56 = vpop.f32.mrb[208].mxu0  ;;  %v19148_v59 = vpack.c.bf16 %v19146_v19, %v19147_v37  ;;  %v19153_v14 = vmax.f32 %v14663_v38, %v14775_v31  ;;  %v19158_v38 = vpack.c.bf16 %v14561_v40, %v14555_v20 }
 0x393   : > { %v5176_v10 = vadd.f32 %v11006_v56, %v14629_v62  ;;  %v5167_v33 = vpop.f32.mrb[209].mxu0  ;;  %v19161_v20 = vpack.c.bf16 %v14775_v31, %v14761_v2  ;;  %v19162_v40 = vmax.f32 %v14692_v15, %v14808_v39 }
 0x394   : > { %v5168_v8 = vadd.f32 %v14629_v62, %v5167_v33  ;;  %v11007_v36 = vpop.f32.mrb[210].mxu0 }
 0x395   : > { %v5712_v34 = vmul.f32 0.2, %v5176_v10  ;;  %v5179_v0 = vadd.f32 %v11007_v36, %v14629_v62  ;;  %v5170_v48 = vpop.f32.mrb[211].mxu0  ;;  %v19150_v36 = vmax.f32 %v14661_v49, %v14761_v2 }
 0x396   : > { %v5710_v56 = vmul.f32 0.2, %v5168_v8  ;;  %v5171_v29 = vadd.f32 %v14629_v62, %v5170_v48 }
 0x397   : > { %v14902_v42 = vmax.f32 %v5176_v10, %v5712_v34  ;;  %v5713_v55 = vmul.f32 0.2, %v5179_v0 }
 0x398   : > { %11113 = vmatmul.mubr.msk.bf16.gmra.mrb[60].mxu0 %vm3268_vm2, %v19148_v59  ;;  %v14908_v33 = vmax.f32 %v5168_v8, %v5710_v56  ;;  %v5711_v50 = vmul.f32 0.2, %v5171_v29  ;;  %v19151_v59 = vmax.f32 %v14665_v17, %v14767_v23  ;;  %6443 = vmatmul.mubr.bf16.gmra.mrb[176].mxu1 %v19152_v43  ;;  %v19155_v17 = vld [vmem:[#allocation66_spill] sm:$0xff] }
 0x399   : > { %11116 = vmatprep.mubr.msk.bf16.mxu0 %vm3268_vm2, %v19149_v58  ;;  %v14918_v10 = vmax.f32 %v19150_v36, %v14902_v42  ;;  %v14920_v34 = vmax.f32 %v5179_v0, %v5713_v55  ;;  %6452 = vmatprep.mubr.bf16.mxu1 %v19128_v41 }
 0x39a   : > { %v14926_v37 = vmax.f32 %v19151_v59, %v14908_v33  ;;  %v14928_v19 = vmax.f32 %v5171_v29, %v5711_v50  ;;  %v11010_v8 = vpop.f32.mrb[212].mxu0  ;;  %v19154_v29 = vmax.f32 %v14667_v32, %v14779_v30  ;;  %v19156_v32 = vld [vmem:[#allocation68_spill] sm:$0xff] }
 0x39b   : > { %v14937_v49 = vmax.f32 %v19153_v14, %v14920_v34  ;;  %v5192_v55 = vadd.f32 %v11010_v8, %v14629_v62  ;;  %v5183_v58 = vpop.f32.mrb[213].mxu0  ;;  %v19157_v30 = vpack.c.bf16 %v19155_v17, %v19156_v32  ;;  %v19160_v17 = vmax.f32 %v14698_v6, %v14800_v9  ;;  %v19178_v6 = vld [vmem:[#allocation10_spill] sm:$0xff] }
 0x39c   : > { %v14947_v23 = vmax.f32 %v19154_v29, %v14928_v19  ;;  %v5184_v50 = vadd.f32 %v14629_v62, %v5183_v58  ;;  %v11011_v0 = vpop.f32.mrb[214].mxu0 }
 0x39d   : > { %v5716_v48 = vmul.f32 0.2, %v5192_v55  ;;  %v5195_v56 = vadd.f32 %v11011_v0, %v14629_v62  ;;  %v5186_v36 = vpop.f32.mrb[215].mxu0  ;;  %v19159_v0 = vmax.f32 %v14690_v53, %v14794_v7 }
 0x39e   : > { %v5714_v59 = vmul.f32 0.2, %v5184_v50  ;;  %v5187_v8 = vadd.f32 %v14629_v62, %v5186_v36 }
 0x39f   : > { %v14954_v43 = vmax.f32 %v5192_v55, %v5716_v48  ;;  %v5717_v14 = vmul.f32 0.2, %v5195_v56 }
 0x3a0   : > { %11117 = vmatmul.mubr.msk.bf16.gmra.mrb[64].mxu0 %vm3268_vm2, %v19157_v30  ;;  %v14960_v58 = vmax.f32 %v5184_v50, %v5714_v59  ;;  %v5715_v29 = vmul.f32 0.2, %v5187_v8  ;;  %6453 = vmatmul.mubr.bf16.gmra.mrb[180].mxu1 %v19161_v20 }
 0x3a1   : > { %11120 = vmatprep.mubr.msk.bf16.mxu0 %vm3268_vm2, %v19158_v38  ;;  %v14970_v55 = vmax.f32 %v19159_v0, %v14954_v43  ;;  %v14972_v48 = vmax.f32 %v5195_v56, %v5717_v14  ;;  %6462 = vmatprep.mubr.bf16.mxu1 %v19128_v41 }
 0x3a2   : > { %v14978_v50 = vmax.f32 %v19160_v17, %v14960_v58  ;;  %v14980_v36 = vmax.f32 %v5187_v8, %v5715_v29  ;;  %v11014_v59 = vpop.f32.mrb[216].mxu0  ;;  %v19163_v8 = vmax.f32 %v14700_v25, %v14812_v22  ;;  %v19165_v25 = vpack.c.bf16 %v14559_v44, %v14552_v12 }
 0x3a3   : > { %v14989_v53 = vmax.f32 %v19162_v40, %v14972_v48  ;;  %v5208_v38 = vadd.f32 %v11014_v59, %v14629_v62  ;;  %v5199_v56 = vpop.f32.mrb[217].mxu0  ;;  %v19170_v12 = vmax.f32 %v14723_v51, %v14836_v13 }
 0x3a4   : > { %v14999_v2 = vmax.f32 %v19163_v8, %v14980_v36  ;;  %v5200_v31 = vadd.f32 %v14629_v62, %v5199_v56  ;;  %v11015_v14 = vpop.f32.mrb[218].mxu0  ;;  %v19167_v8 = vpack.c.bf16 %v14597_v3, %v14588_v4  ;;  %v19171_v4 = vpack.c.bf16 %v14812_v22, %v14800_v9 }
 0x3a5   : > { %v5720_v32 = vmul.f32 0.2, %v5208_v38  ;;  %v5211_v30 = vadd.f32 %v11015_v14, %v14629_v62  ;;  %v5202_v29 = vpop.f32.mrb[219].mxu0  ;;  %v19168_v14 = vmax.f32 %v14715_v18, %v14830_v5  ;;  %v19172_v3 = vmax.f32 %v14717_v21, %v14844_v47 }
 0x3a6   : > { %v5718_v0 = vmul.f32 0.2, %v5200_v31  ;;  %v5203_v17 = vadd.f32 %v14629_v62, %v5202_v29 }
 0x3a7   : > { %v15006_v59 = vmax.f32 %v5208_v38, %v5720_v32  ;;  %v5721_v20 = vmul.f32 0.2, %v5211_v30 }
 0x3a8   : > { %11121 = vmatmul.mubr.msk.bf16.gmra.mrb[68].mxu0 %vm3268_vm2, %v19165_v25  ;;  %v15012_v40 = vmax.f32 %v5200_v31, %v5718_v0  ;;  %v5719_v56 = vmul.f32 0.2, %v5203_v17  ;;  %6463 = vmatmul.mubr.bf16.gmra.mrb[184].mxu1 %v19171_v4 }
 0x3a9   : > { %19164 = vst [vmem:[#allocation67_spill] sm:$0xff] %v15006_v59  ;;  %11124 = vmatprep.mubr.msk.bf16.mxu0 %vm3268_vm2, %v19167_v8  ;;  %v15022_v38 = vmax.f32 %v19168_v14, %v15006_v59  ;;  %v15024_v32 = vmax.f32 %v5211_v30, %v5721_v20  ;;  %6472 = vmatprep.mubr.bf16.mxu1 %v19128_v41 }
 0x3aa   : > { %19166 = vst [vmem:[#allocation65_spill] sm:$0xff] %v15012_v40  ;;  %v15030_v44 = vmax.f32 %v19170_v12, %v15012_v40  ;;  %v15032_v31 = vmax.f32 %v5203_v17, %v5719_v56  ;;  %v11018_v29 = vpop.f32.mrb[220].mxu0  ;;  %v19173_v17 = vmax.f32 %v14725_v54, %v14848_v24 }
 0x3ab   : > { %19169 = vst [vmem:[#allocation6_spill] sm:$0xff] %v15024_v32  ;;  %v15041_v18 = vmax.f32 %v19172_v3, %v15024_v32  ;;  %v5224_v30 = vadd.f32 %v11018_v29, %v14629_v62  ;;  %v5215_v0 = vpop.f32.mrb[221].mxu0  ;;  %v19233_v32 = vld [vmem:[#allocation29_spill] sm:$0xff] }
 0x3ac   : > { %v15051_v9 = vmax.f32 %v19173_v17, %v15032_v31  ;;  %v5216_v22 = vadd.f32 %v14629_v62, %v5215_v0  ;;  %v11019_v20 = vpop.f32.mrb[222].mxu0  ;;  %v19175_v0 = vpack.c.bf16 %v14593_v27, %v14586_v16  ;;  %v19184_v27 = vmax.f32 %v14744_v63, %v14866_v26 }
 0x3ad   : > { %v5724_v25 = vmul.f32 0.2, %v5224_v30  ;;  %v5227_v56 = vadd.f32 %v11019_v20, %v14629_v62  ;;  %v5218_v8 = vpop.f32.mrb[223].mxu0  ;;  %v19177_v20 = vpack.c.bf16 %v14637_v45, %v14624_v60 }
 0x3ae   : > { %v11332_v14 = vpop.permute.xlu0 %11331  ;;  %v5722_v12 = vmul.f32 0.2, %v5216_v22  ;;  %v5219_v29 = vadd.f32 %v14629_v62, %v5218_v8  ;;  %v19179_v8 = vld [vmem:[#allocation39_spill] sm:$0xff] }
 0x3af   : > { %v11334_v4 = vunpack.i.h.bf16 %v11332_v14  ;;  %v11333_v3 = vunpack.i.l.bf16 %v11332_v14  ;;  %v15058_v51 = vmax.f32 %v5224_v30, %v5724_v25  ;;  %v5725_v54 = vmul.f32 0.2, %v5227_v56  ;;  %v19181_v25 = vld [vmem:[#allocation7_spill] sm:$0xff] }
 0x3b0   : > { %11125 = vmatmul.mubr.msk.bf16.gmra.mrb[72].mxu0 %vm3268_vm2, %v19175_v0  ;;  %v15064_v17 = vmax.f32 %v5216_v22, %v5722_v12  ;;  %v5723_v21 = vmul.f32 0.2, %v5219_v29  ;;  %v19180_v15 = vmax.f32 %v19178_v6, %v19179_v8  ;;  %v19182_v14 = vld [vmem:[#allocation35_spill] sm:$0xff]  ;;  %v19187_v6 = vmax.f32 %v14748_v61, %v14872_v35 }
 0x3b1   : > { %19174 = vst [vmem:[#allocation59_spill] sm:$0xff] %v15058_v51  ;;  %11128 = vmatprep.mubr.msk.bf16.mxu0 %vm3268_vm2, %v19177_v20  ;;  %v19183_v59 = vmax.f32 %v19181_v25, %v19182_v14  ;;  %v15082_v22 = vmax.f32 %v19184_v27, %v15058_v51  ;;  %v15084_v12 = vmax.f32 %v5227_v56, %v5725_v54  ;;  %v19196_v27 = vld [vmem:[#allocation33_spill] sm:$0xff] }
 0x3b2   : > { %19176 = vst [vmem:[#allocation8_spill] sm:$0xff] %v15064_v17  ;;  %v8156_v30 = vsel %vm3268_vm2, %v19180_v15, %v11334_v4  ;;  %v11337_v45 = vpop.permute.xlu0 %11336  ;;  %v15092_v15 = vmax.f32 %v19187_v6, %v15064_v17  ;;  %v15094_v4 = vmax.f32 %v5219_v29, %v5723_v21  ;;  %v19190_v56 = vmax.f32 %v14746_v52, %v14880_v1  ;;  %v19192_v52 = vld [vmem:[#allocation9_spill] sm:$0xff] }
 0x3b3   : > { %v8155_v16 = vsel %vm3268_vm2, %v19183_v59, %v11333_v3  ;;  %19185 = vst [vmem:[#allocation56_spill] sm:$0xff] %v15084_v12  ;;  %v11022_v59 = vpop.f32.mrb[224].mxu0  ;;  %v19189_v3 = vpack.c.bf16 %v14808_v39, %v14794_v7  ;;  %v11339_v63 = vunpack.i.h.bf16 %v11337_v45  ;;  %v11338_v0 = vunpack.i.l.bf16 %v11337_v45 }
 0x3b4   : > { %v15086_v60 = vpack.c.bf16 %v8156_v30, %v8155_v16  ;;  %19188 = vst [vmem:[#allocation12_spill] sm:$0xff] %v15094_v4  ;;  %v15103_v54 = vmax.f32 %v19190_v56, %v15084_v12  ;;  %v5240_v20 = vadd.f32 %v11022_v59, %v14629_v62  ;;  %v5231_v61 = vpop.f32.mrb[225].mxu0  ;;  %v19191_v7 = vmax.f32 %v14750_v28, %v14884_v57  ;;  %v19193_v30 = vld [vmem:[#allocation37_spill] sm:$0xff] }
 0x3b5   : > { %6473 = vmatmul.mubr.bf16.gmra.mrb[188].mxu1 %v19189_v3  ;;  %v5232_v29 = vadd.f32 %v14629_v62, %v5231_v61  ;;  %v11023_v8 = vpop.f32.mrb[226].mxu0  ;;  %v19194_v25 = vmax.f32 %v19192_v52, %v19193_v30  ;;  %v19195_v16 = vld [vmem:[#allocation5_spill] sm:$0xff] }
 0x3b6   : > { %19186 = vst [vmem:[#allocation14_spill] sm:$0xff] %v15086_v60  ;;  %6482 = vmatprep.mubr.bf16.mxu1 %v19128_v41  ;;  %v15113_v39 = vmax.f32 %v19191_v7, %v15094_v4  ;;  %v19197_v45 = vmax.f32 %v19195_v16, %v19196_v27  ;;  %v5728_v59 = vmul.f32 0.2, %v5240_v20  ;;  %v5243_v3 = vadd.f32 %v11023_v8, %v14629_v62  ;;  %v5234_v56 = vpop.f32.mrb[227].mxu0  ;;  %v11342_v7 = vpop.permute.xlu1 %11341  ;;  %v19200_v27 = vld [vmem:[#allocation18_spill] sm:$0xff]  ;;  %v19219_v12 = vld [vmem:[#allocation45_spill] sm:$0xff] }
 0x3b7   : > { %v8158_v14 = vsel %vm3268_vm2, %v19194_v25, %v11339_v63  ;;  %v5726_v21 = vmul.f32 0.2, %v5232_v29  ;;  %v5235_v52 = vadd.f32 %v14629_v62, %v5234_v56  ;;  %v11344_v30 = vunpack.i.h.bf16 %v11342_v7  ;;  %v19204_v56 = vld [vmem:[#allocation42_spill] sm:$0xff] }
 0x3b8   : > { %v8157_v6 = vsel %vm3268_vm2, %v19197_v45, %v11338_v0  ;;  %v11343_v63 = vunpack.i.l.bf16 %v11342_v7  ;;  %v15130_v25 = vmax.f32 %v5240_v20, %v5728_v59  ;;  %v5729_v16 = vmul.f32 0.2, %v5243_v3  ;;  %v19201_v45 = vld [vmem:[#allocation44_spill] sm:$0xff] }
 0x3b9   : > { %v15125_v28 = vpack.c.bf16 %v8158_v14, %v8157_v6  ;;  %v19199_v0 = vpack.c.bf16 %v14633_v46, %v14620_v11  ;;  %v15136_v8 = vmax.f32 %v5232_v29, %v5726_v21  ;;  %v5727_v14 = vmul.f32 0.2, %v5235_v52 }
 0x3ba   : > { %v19202_v6 = vmax.f32 %v19200_v27, %v19201_v45  ;;  %v15148_v7 = vmax.f32 %v5243_v3, %v5729_v16  ;;  %v11347_v46 = vpop.permute.xlu1 %11346  ;;  %v19208_v45 = vld [vmem:[#allocation17_spill] sm:$0xff] }
 0x3bb   : > { %19198 = vst [vmem:[#allocation58_spill] sm:$0xff] %v15125_v28  ;;  %11129 = vmatmul.mubr.msk.bf16.gmra.mrb[76].mxu0 %vm3268_vm2, %v19199_v0  ;;  %v19203_v28 = vld [vmem:[#allocation15_spill] sm:$0xff]  ;;  %v15154_v29 = vmax.f32 %v5235_v52, %v5727_v14  ;;  %v11026_v0 = vpop.f32.mrb[228].mxu0  ;;  %v11348_v27 = vunpack.i.l.bf16 %v11347_v46 }
 0x3bc   : > { %v8160_v61 = vsel %vm3268_vm2, %v19202_v6, %v11344_v30  ;;  %v19205_v60 = vmax.f32 %v19203_v28, %v19204_v56  ;;  %v11349_v30 = vunpack.i.h.bf16 %v11347_v46  ;;  %v19207_v28 = vpack.c.bf16 %v14848_v24, %v14836_v13  ;;  %v19209_v13 = vld [vmem:[#allocation43_spill] sm:$0xff]  ;;  %v19211_v56 = vld [vmem:[#allocation13_spill] sm:$0xff] }
 0x3bd   : > { %v5256_v3 = vadd.f32 %v11026_v0, %v14629_v62  ;;  %v19210_v24 = vmax.f32 %v19208_v45, %v19209_v13 }
 0x3be   : > { %v8159_v20 = vsel %vm3268_vm2, %v19205_v60, %v11343_v63  ;;  %6483 = vmatmul.mubr.bf16.gmra.mrb[192].mxu1 %v19207_v28  ;;  %v11357_v52 = vpop.permute.xlu1 %11356 }
 0x3bf   : > { %v15150_v11 = vpack.c.bf16 %v8160_v61, %v8159_v20  ;;  %v5247_v61 = vpop.f32.mrb[229].mxu0  ;;  %6492 = vmatprep.mubr.bf16.mxu1 %v19128_v41  ;;  %v8162_v6 = vsel %vm3268_vm2, %v19210_v24, %v11349_v30  ;;  %v19212_v20 = vld [vmem:[#allocation41_spill] sm:$0xff]  ;;  %v5732_v28 = vmul.f32 0.2, %v5256_v3  ;;  %v11359_v13 = vunpack.i.h.bf16 %v11357_v52  ;;  %v11352_v24 = vpop.permute.xlu0 %11351 }
 0x3c0   : > { %v5248_v16 = vadd.f32 %v14629_v62, %v5247_v61  ;;  %v11027_v14 = vpop.f32.mrb[230].mxu0  ;;  %v19213_v46 = vmax.f32 %v19211_v56, %v19212_v20  ;;  %v11358_v30 = vunpack.i.l.bf16 %v11357_v52  ;;  %v11353_v20 = vunpack.i.l.bf16 %v11352_v24  ;;  %v19218_v61 = vld [vmem:[#allocation21_spill] sm:$0xff] }
 0x3c1   : > { %19206 = vst [vmem:[#allocation16_spill] sm:$0xff] %v15150_v11  ;;  %v5259_v60 = vadd.f32 %v11027_v14, %v14629_v62  ;;  %v5250_v63 = vpop.f32.mrb[231].mxu0  ;;  %v15182_v11 = vmax.f32 %v5256_v3, %v5732_v28  ;;  %v19220_v17 = vmax.f32 %v19218_v61, %v19219_v12  ;;  %v19225_v61 = vld [vmem:[#allocation23_spill] sm:$0xff] }
 0x3c2   : > { %v8161_v0 = vsel %vm3268_vm2, %v19213_v46, %v11348_v27  ;;  %v5730_v59 = vmul.f32 0.2, %v5248_v16  ;;  %v5251_v45 = vadd.f32 %v14629_v62, %v5250_v63  ;;  %v11354_v27 = vunpack.i.h.bf16 %v11352_v24  ;;  %v11030_v12 = vpop.f32.mrb[232].mxu0  ;;  %v19230_v3 = vld [vmem:[#allocation31_spill] sm:$0xff] }
 0x3c3   : > { %v15177_v21 = vpack.c.bf16 %v8162_v6, %v8161_v0  ;;  %v5733_v56 = vmul.f32 0.2, %v5259_v60  ;;  %v19215_v6 = vld [vmem:[#allocation25_spill] sm:$0xff]  ;;  %v19216_v0 = vld [vmem:[#allocation47_spill] sm:$0xff]  ;;  %v8165_v63 = vsel %vm3268_vm2, %v19220_v17, %v11358_v30  ;;  %v19226_v17 = vld [vmem:[#allocation46_spill] sm:$0xff] }
 0x3c4   : > { %v15184_v46 = vmax.f32 %v5248_v16, %v5730_v59  ;;  %v5731_v14 = vmul.f32 0.2, %v5251_v45  ;;  %v19222_v59 = vld [vmem:[#allocation26_spill] sm:$0xff]  ;;  %v19223_v16 = vld [vmem:[#allocation48_spill] sm:$0xff]  ;;  %v19227_v30 = vmax.f32 %v19225_v61, %v19226_v17 }
 0x3c5   : > { %19214 = vst [vmem:[#allocation11_spill] sm:$0xff] %v15177_v21  ;;  %v19217_v21 = vmax.f32 %v19215_v6, %v19216_v0  ;;  %v15196_v52 = vmax.f32 %v5259_v60, %v5733_v56  ;;  %v19224_v24 = vmax.f32 %v19222_v59, %v19223_v16  ;;  %v5272_v56 = vadd.f32 %v11030_v12, %v14629_v62  ;;  %v5263_v0 = vpop.f32.mrb[233].mxu0  ;;  %v11367_v12 = vpop.permute.xlu1 %11366 }
 0x3c6   : > { %v8163_v6 = vsel %vm3268_vm2, %v19227_v30, %v11353_v20  ;;  %v11031_v20 = vpop.f32.mrb[234].mxu0  ;;  %v11369_v30 = vunpack.i.h.bf16 %v11367_v12 }
 0x3c7   : > { %v8166_v51 = vsel %vm3268_vm2, %v19217_v21, %v11359_v13  ;;  %v8164_v4 = vsel %vm3268_vm2, %v19224_v24, %v11354_v27  ;;  %v15206_v13 = vmax.f32 %v5251_v45, %v5731_v14  ;;  %v5264_v14 = vadd.f32 %v14629_v62, %v5263_v0  ;;  %v5266_v24 = vpop.f32.mrb[235].mxu0 }
 0x3c8   : > { %v15198_v28 = vpack.c.bf16 %v8166_v51, %v8165_v63  ;;  %v19228_v51 = vpack.c.bf16 %v14844_v47, %v14830_v5  ;;  %v15218_v27 = vpack.c.bf16 %v8164_v4, %v8163_v6  ;;  %v11482_v4 = vld [vmem:[%s18582_s9] ss:$16 sps:$4 sm:$0xff]   ;;  %v11484_v63 = vld [vmem:[%s18582_s9 + $0x4] ss:$16 sps:$4 sm:$0xff]   ;;  %v5736_v59 = vmul.f32 0.2, %v5272_v56 }
 0x3c9   : > { %v5275_v16 = vadd.f32 %v11031_v20, %v14629_v62  ;;  %v5734_v61 = vmul.f32 0.2, %v5264_v14  ;;  %v5267_v17 = vadd.f32 %v14629_v62, %v5266_v24  ;;  %v11368_v6 = vunpack.i.l.bf16 %v11367_v12  ;;  %8993 = vmatprep.subr.bf16.mxu0 %v11484_v63  ;;  %v19231_v20 = vld [vmem:[#allocation51_spill] sm:$0xff]  ;;  %v19234_v24 = vld [vmem:[#allocation49_spill] sm:$0xff] }
 0x3ca   : > { %19221 = vst [vmem:[#allocation22_spill] sm:$0xff] %v15198_v28  ;;  %6493 = vmatmul.mubr.bf16.gmra.mrb[196].mxu1 %v19228_v51  ;;  %19229 = vst [vmem:[#allocation20_spill] sm:$0xff] %v15218_v27  ;;  %v11362_v51 = vpop.permute.xlu0 %11361  ;;  %v15236_v0 = vmax.f32 %v5272_v56, %v5736_v59  ;;  %8994 = vmatpush1.bf16.msra.mxu0 %v11482_v4  ;;  %v19232_v28 = vmax.f32 %v19230_v3, %v19231_v20  ;;  %v19238_v4 = vld [vmem:[#allocation52_spill] sm:$0xff]  ;;  %v11506_v3 = vld [vmem:[%s18582_s9 + $0x100] ss:$16 sps:$4 sm:$0xff]  }
 0x3cb   : > { %6502 = vmatprep.mubr.bf16.mxu1 %v19128_v41  ;;  %v5737_v47 = vmul.f32 0.2, %v5275_v16  ;;  %v11364_v5 = vunpack.i.h.bf16 %v11362_v51  ;;  %v11363_v45 = vunpack.i.l.bf16 %v11362_v51  ;;  %v15238_v60 = vmax.f32 %v5264_v14, %v5734_v61  ;;  %v19237_v14 = vld [vmem:[#allocation32_spill] sm:$0xff] }
 0x3cc   : > { %v5735_v21 = vmul.f32 0.2, %v5267_v17  ;;  %v8170_v27 = vsel %vm3268_vm2, %v19232_v28, %v11369_v30  ;;  %v19235_v40 = vmax.f32 %v19233_v32, %v19234_v24  ;;  %v19239_v61 = vmax.f32 %v19237_v14, %v19238_v4  ;;  %v11034_v32 = vpop.f32.mrb[236].mxu0  ;;  %v19240_v30 = vld [vmem:[#allocation30_spill] sm:$0xff]  ;;  %v11487_v14 = vld [vmem:[%s18582_s9 + $0x24] ss:$16 sps:$4 sm:$0xff]  }
 0x3cd   : > { %v15250_v63 = vmax.f32 %v5275_v16, %v5737_v47  ;;  %v5288_v16 = vadd.f32 %v11034_v32, %v14629_v62  ;;  %8995 = vmatprep.subr.bf16.mxu0 %v11487_v14 }
 0x3ce   : > { %v8169_v12 = vsel %vm3268_vm2, %v19235_v40, %v11368_v6  ;;  %v8168_v51 = vsel %vm3268_vm2, %v19239_v61, %v11364_v5  ;;  %v15260_v28 = vmax.f32 %v5267_v17, %v5735_v21  ;;  %v19241_v40 = vld [vmem:[#allocation50_spill] sm:$0xff]  ;;  %v5279_v17 = vpop.f32.mrb[237].mxu0  ;;  %v11494_v5 = vld [vmem:[%s18582_s9 + $0x80] ss:$16 sps:$4 sm:$0xff]  }
 0x3cf   : > { %v15252_v59 = vpack.c.bf16 %v8170_v27, %v8169_v12  ;;  %v19242_v6 = vmax.f32 %v19240_v30, %v19241_v40  ;;  %v19243_v27 = vpack.c.bf16 %v14884_v57, %v14872_v35  ;;  %v5280_v57 = vadd.f32 %v14629_v62, %v5279_v17  ;;  %v11035_v24 = vpop.f32.mrb[238].mxu0  ;;  %v11485_v12 = vld [vmem:[%s18582_s9 + $0x20] ss:$16 sps:$4 sm:$0xff]   ;;  %v11490_v40 = vld [vmem:[%s18582_s9 + $0x44] ss:$16 sps:$4 sm:$0xff]  }
 0x3d0   : > { %v5740_v4 = vmul.f32 0.2, %v5288_v16  ;;  %v5291_v61 = vadd.f32 %v11035_v24, %v14629_v62  ;;  %8996 = vmatpush1.bf16.msra.mxu0 %v11485_v12  ;;  %v19247_v12 = vpack.c.bf16 %v14880_v1, %v14866_v26 }
 0x3d1   : > { %19236 = vst [vmem:[#allocation60_spill] sm:$0xff] %v15252_v59  ;;  %v8167_v20 = vsel %vm3268_vm2, %v19242_v6, %v11363_v45  ;;  %v5738_v32 = vmul.f32 0.2, %v5280_v57  ;;  %8997 = vmatprep.subr.bf16.mxu0 %v11490_v40 }
 0x3d2   : > { %6503 = vmatmul.mubr.bf16.gmra.mrb[200].mxu1 %v19243_v27  ;;  %v15274_v21 = vpack.c.bf16 %v8168_v51, %v8167_v20  ;;  %v5282_v51 = vpop.f32.mrb[239].mxu0  ;;  %v15293_v6 = vmax.f32 %v5288_v16, %v5740_v4  ;;  %v5741_v20 = vmul.f32 0.2, %v5291_v61  ;;  %v11488_v27 = vld [vmem:[%s18582_s9 + $0x40] ss:$16 sps:$4 sm:$0xff]  }
 0x3d3   : > { %6512 = vmatprep.mubr.bf16.mxu1 %v19128_v41  ;;  %v5283_v30 = vadd.f32 %v14629_v62, %v5282_v51  ;;  %v15298_v17 = vmax.f32 %v5280_v57, %v5738_v32  ;;  %v11038_v4 = vpop.f32.mrb[240].mxu0 }
 0x3d4   : > { %19244 = vst [vmem:[#allocation24_spill] sm:$0xff] %v15274_v21  ;;  %19245 = vst [vmem:[#allocation40_spill] sm:$0xff] %v15293_v6  ;;  %v15302_v14 = vmax.f32 %v5291_v61, %v5741_v20  ;;  %v5304_v40 = vadd.f32 %v11038_v4, %v14629_v62  ;;  %v5295_v61 = vpop.f32.mrb[241].mxu0  ;;  %8998 = vmatpush1.bf16.msra.mxu0 %v11488_v27  ;;  %v11493_v4 = vld [vmem:[%s18582_s9 + $0x64] ss:$16 sps:$4 sm:$0xff]  }
 0x3d5   : > { %v5739_v24 = vmul.f32 0.2, %v5283_v30  ;;  %v5296_v26 = vadd.f32 %v14629_v62, %v5295_v61  ;;  %v11039_v1 = vpop.f32.mrb[242].mxu0  ;;  %8999 = vmatprep.subr.bf16.mxu0 %v11493_v4  ;;  %v11496_v61 = vld [vmem:[%s18582_s9 + $0x84] ss:$16 sps:$4 sm:$0xff]  }
 0x3d6   : > { %19246 = vst [vmem:[#allocation28_spill] sm:$0xff] %v15302_v14  ;;  %v5307_v27 = vadd.f32 %v11039_v1, %v14629_v62  ;;  %v5298_v32 = vpop.f32.mrb[243].mxu0 }
 0x3d7   : > { %v15306_v16 = vmax.f32 %v5283_v30, %v5739_v24  ;;  %v11491_v24 = vld [vmem:[%s18582_s9 + $0x60] ss:$16 sps:$4 sm:$0xff]   ;;  %v5742_v35 = vmul.f32 0.2, %v5296_v26  ;;  %v5299_v30 = vadd.f32 %v14629_v62, %v5298_v32  ;;  %v19250_v32 = vmax.f32 %v14918_v10, %v15130_v25 }
 0x3d8   : > { %v5745_v57 = vmul.f32 0.2, %v5307_v27  ;;  %9000 = vmatpush1.bf16.msra.mxu0 %v11491_v24  ;;  %v19255_v10 = vmax.f32 %v14937_v49, %v15148_v7  ;;  %v11500_v49 = vld [vmem:[%s18582_s9 + $0xc0] ss:$16 sps:$4 sm:$0xff]  }
 0x3d9   : > { %v15338_v51 = vmax.f32 %v5296_v26, %v5742_v35  ;;  %v5743_v1 = vmul.f32 0.2, %v5299_v30  ;;  %9001 = vmatprep.subr.bf16.mxu0 %v11496_v61  ;;  %v19254_v26 = vpack.c.bf16 %v14928_v19, %v14908_v33  ;;  %v19256_v33 = vmax.f32 %v14947_v23, %v15154_v29 }
 0x3da   : > { %6513 = vmatmul.mubr.bf16.gmra.mrb[204].mxu1 %v19247_v12  ;;  %v5744_v12 = vmul.f32 0.2, %v5304_v40  ;;  %v15346_v45 = vmax.f32 %v5307_v27, %v5745_v57  ;;  %v11042_v35 = vpop.f32.mrb[244].mxu0 }
 0x3db   : > { %6522 = vmatprep.mubr.bf16.mxu1 %v19128_v41  ;;  %19249 = vst [vmem:[#allocation19_spill] sm:$0xff] %v15338_v51  ;;  %v5311_v27 = vpop.f32.mrb[245].mxu0 }
 0x3dc   : > { %v15333_v20 = vmax.f32 %v5304_v40, %v5744_v12  ;;  %19251 = vst [vmem:[#allocation57_spill] sm:$0xff] %v15346_v45  ;;  %v19252_v40 = vmax.f32 %v14926_v37, %v15136_v8  ;;  %v15354_v12 = vmax.f32 %v5299_v30, %v5743_v1  ;;  %v15363_v61 = vmax.f32 %v19255_v10, %v15346_v45  ;;  %v11043_v1 = vpop.f32.mrb[246].mxu0 }
 0x3dd   : > { %v5320_v37 = vadd.f32 %v11042_v35, %v14629_v62  ;;  %9002 = vmatpush1.bf16.msra.mxu0 %v11494_v5  ;;  %v5312_v30 = vadd.f32 %v14629_v62, %v5311_v27  ;;  %v11499_v5 = vld [vmem:[%s18582_s9 + $0xa4] ss:$16 sps:$4 sm:$0xff]   ;;  %v5323_v35 = vadd.f32 %v11043_v1, %v14629_v62  ;;  %v5314_v23 = vpop.f32.mrb[247].mxu0 }
 0x3de   : > { %19248 = vst [vmem:[#allocation27_spill] sm:$0xff] %v15333_v20  ;;  %v15344_v4 = vmax.f32 %v19250_v32, %v15333_v20  ;;  %v15352_v24 = vmax.f32 %v19252_v40, %v15338_v51  ;;  %19253 = vst [vmem:[#allocation34_spill] sm:$0xff] %v15354_v12  ;;  %v15373_v19 = vmax.f32 %v19256_v33, %v15354_v12  ;;  %v11497_v32 = vld [vmem:[%s18582_s9 + $0xa0] ss:$16 sps:$4 sm:$0xff]   ;;  %9003 = vmatprep.subr.bf16.mxu0 %v11499_v5  ;;  %v11502_v27 = vld [vmem:[%s18582_s9 + $0xc4] ss:$16 sps:$4 sm:$0xff]  }
 0x3df   : > { %v5748_v40 = vmul.f32 0.2, %v5320_v37  ;;  %v5315_v10 = vadd.f32 %v14629_v62, %v5314_v23  ;;  %v5749_v57 = vmul.f32 0.2, %v5323_v35  ;;  %v19259_v62 = vmax.f32 %v14970_v55, %v15182_v11  ;;  %v19308_v51 = vld [vmem:[#allocation56_spill] sm:$0xff]  ;;  %v19309_v12 = vld [vmem:[#allocation59_spill] sm:$0xff] }
 0x3e0   : > { %v19264_v55 = vmax.f32 %v14989_v53, %v15196_v52 }
 0x3e1   : > { %v15389_v33 = vmax.f32 %v5320_v37, %v5748_v40  ;;  %9004 = vmatpush1.bf16.msra.mxu0 %v11497_v32  ;;  %v5747_v1 = vmul.f32 0.2, %v5315_v10  ;;  %v15402_v23 = vmax.f32 %v5323_v35, %v5749_v57  ;;  %v19261_v37 = vmax.f32 %v14978_v50, %v15184_v46  ;;  %v15426_v50 = vld [vmem:[%s18579_s6] ss:$0 sm:$0xff] }
 0x3e2   : > { %6523 = vmatmul.mubr.bf16.gmra.mrb[208].mxu1 %v19254_v26  ;;  %v5746_v26 = vmul.f32 0.2, %v5312_v30  ;;  %9005 = vmatprep.subr.bf16.mxu0 %v11502_v27 }
 0x3e3   : > { %6532 = vmatprep.mubr.bf16.mxu1 %v19128_v41  ;;  %19257 = vst [vmem:[#allocation38_spill] sm:$0xff] %v15389_v33  ;;  %v15400_v5 = vmax.f32 %v19259_v62, %v15389_v33  ;;  %19260 = vst [vmem:[#allocation69_spill] sm:$0xff] %v15402_v23  ;;  %v15410_v40 = vmax.f32 %v5315_v10, %v5747_v1  ;;  %v15419_v27 = vmax.f32 %v19264_v55, %v15402_v23 }
 0x3e4   : > { %v15394_v47 = vmax.f32 %v5312_v30, %v5746_v26  ;;  %v11046_v30 = vpop.f32.mrb[248].mxu0  ;;  %v19263_v26 = vpack.c.bf16 %v14920_v34, %v14902_v42  ;;  %v19265_v42 = vmax.f32 %v14999_v2, %v15206_v13 }
 0x3e5   : > { %19262 = vst [vmem:[#allocation55_spill] sm:$0xff] %v15410_v40  ;;  %v5336_v35 = vadd.f32 %v15426_v50, %v11046_v30  ;;  %v5327_v10 = vpop.f32.mrb[249].mxu0  ;;  %9006 = vmatpush1.bf16.msra.mxu0 %v11500_v49  ;;  %v11505_v49 = vld [vmem:[%s18582_s9 + $0xe4] ss:$16 sps:$4 sm:$0xff]  }
 0x3e6   : > { %19258 = vst [vmem:[#allocation36_spill] sm:$0xff] %v15394_v47  ;;  %v15408_v32 = vmax.f32 %v19261_v37, %v15394_v47  ;;  %v15434_v34 = vmax.f32 %v19265_v42, %v15410_v40  ;;  %v5328_v1 = vadd.f32 %v15426_v50, %v5327_v10  ;;  %v11047_v62 = vpop.f32.mrb[250].mxu0  ;;  %v11503_v37 = vld [vmem:[%s18582_s9 + $0xe0] ss:$16 sps:$4 sm:$0xff]   ;;  %9007 = vmatprep.subr.bf16.mxu0 %v11505_v49  ;;  %v11508_v10 = vld [vmem:[%s18582_s9 + $0x104] ss:$16 sps:$4 sm:$0xff]  }
 0x3e7   : > { %v5752_v30 = vmul.f32 0.2, %v5336_v35  ;;  %v5330_v2 = vpop.f32.mrb[251].mxu0  ;;  %v19268_v49 = vmax.f32 %v15022_v38, %v15236_v0  ;;  %v19273_v38 = vmax.f32 %v15041_v18, %v15250_v63  ;;  %v11512_v18 = vld [vmem:[%s18582_s9 + $0x140] ss:$16 sps:$4 sm:$0xff]   ;;  %v19301_v40 = vld [vmem:[#allocation12_spill] sm:$0xff] }
 0x3e8   : > { %v5750_v55 = vmul.f32 0.2, %v5328_v1  ;;  %v5331_v42 = vadd.f32 %v15426_v50, %v5330_v2 }
 0x3e9   : > { %v15450_v57 = vmax.f32 %v5336_v35, %v5752_v30  ;;  %9008 = vmatpush1.bf16.msra.mxu0 %v11503_v37  ;;  %v19270_v35 = vmax.f32 %v15030_v44, %v15238_v60 }
 0x3ea   : > { %6533 = vmatmul.mubr.bf16.gmra.mrb[212].mxu1 %v19263_v26  ;;  %v5339_v26 = vadd.f32 %v15426_v50, %v11047_v62  ;;  %v15455_v56 = vmax.f32 %v5328_v1, %v5750_v55  ;;  %v5751_v62 = vmul.f32 0.2, %v5331_v42  ;;  %9009 = vmatprep.subr.bf16.mxu0 %v11508_v10  ;;  %v11050_v1 = vpop.f32.mrb[252].mxu0  ;;  %v19272_v55 = vpack.c.bf16 %v14980_v36, %v14960_v58 }
 0x3eb   : > { %6542 = vmatprep.mubr.bf16.mxu1 %v19128_v41  ;;  %19266 = vst [vmem:[#allocation53_spill] sm:$0xff] %v15450_v57  ;;  %v15461_v2 = vmax.f32 %v19268_v49, %v15450_v57  ;;  %v5352_v44 = vadd.f32 %v15426_v50, %v11050_v1  ;;  %v19274_v58 = vmax.f32 %v15051_v9, %v15260_v28  ;;  %v11509_v49 = vld [vmem:[%s18582_s9 + $0x120] ss:$16 sps:$4 sm:$0xff]  }
 0x3ec   : > { %v5753_v53 = vmul.f32 0.2, %v5339_v26  ;;  %19267 = vst [vmem:[#allocation54_spill] sm:$0xff] %v15455_v56  ;;  %v15469_v37 = vmax.f32 %v19270_v35, %v15455_v56  ;;  %v15471_v30 = vmax.f32 %v5331_v42, %v5751_v62 }
 0x3ed   : > { %9010 = vmatpush1.bf16.msra.mxu0 %v11506_v3  ;;  %v11511_v3 = vld [vmem:[%s18582_s9 + $0x124] ss:$16 sps:$4 sm:$0xff]   ;;  %v5756_v35 = vmul.f32 0.2, %v5352_v44 }
 0x3ee   : > { %v15463_v59 = vmax.f32 %v5339_v26, %v5753_v53  ;;  %19271 = vst [vmem:[#allocation64_spill] sm:$0xff] %v15471_v30  ;;  %v5343_v26 = vpop.f32.mrb[253].mxu0  ;;  %v15490_v36 = vmax.f32 %v19274_v58, %v15471_v30  ;;  %9011 = vmatprep.subr.bf16.mxu0 %v11511_v3  ;;  %v19277_v3 = vmax.f32 %v15082_v22, %v15293_v6 }
 0x3ef   : > { %v5344_v42 = vadd.f32 %v15426_v50, %v5343_v26  ;;  %v11051_v62 = vpop.f32.mrb[254].mxu0  ;;  %v11514_v26 = vld [vmem:[%s18582_s9 + $0x144] ss:$16 sps:$4 sm:$0xff]   ;;  %v15506_v58 = vmax.f32 %v5352_v44, %v5756_v35  ;;  %v19279_v44 = vmax.f32 %v15092_v15, %v15298_v17  ;;  %v19282_v22 = vmax.f32 %v15103_v54, %v15302_v14  ;;  %v11518_v54 = vld [vmem:[%s18582_s9 + $0x180] ss:$16 sps:$4 sm:$0xff]  }
 0x3f0   : > { %19269 = vst [vmem:[#allocation62_spill] sm:$0xff] %v15463_v59  ;;  %v15480_v10 = vmax.f32 %v19273_v38, %v15463_v59  ;;  %v5355_v1 = vadd.f32 %v15426_v50, %v11051_v62  ;;  %v5346_v9 = vpop.f32.mrb[255].mxu0 }
 0x3f1   : > { %v5347_v38 = vadd.f32 %v15426_v50, %v5346_v9  ;;  %19275 = vst [vmem:[#allocation61_spill] sm:$0xff] %v15506_v58  ;;  %9012 = vmatpush1.bf16.msra.mxu0 %v11509_v49  ;;  %v15517_v9 = vmax.f32 %v19277_v3, %v15506_v58  ;;  %v11515_v3 = vld [vmem:[%s18582_s9 + $0x160] ss:$16 sps:$4 sm:$0xff]  }
 0x3f2   : > { %6543 = vmatmul.mubr.bf16.gmra.mrb[216].mxu1 %v19272_v55  ;;  %v5754_v55 = vmul.f32 0.2, %v5344_v42  ;;  %v5757_v53 = vmul.f32 0.2, %v5355_v1  ;;  %9013 = vmatprep.subr.bf16.mxu0 %v11514_v26 }
 0x3f3   : > { %6552 = vmatprep.mubr.bf16.mxu1 %v19128_v41  ;;  %v5755_v62 = vmul.f32 0.2, %v5347_v38 }
 0x3f4   : > { %v15511_v21 = vmax.f32 %v5344_v42, %v5754_v55  ;;  %v15519_v57 = vmax.f32 %v5355_v1, %v5757_v53  ;;  %v11054_v42 = vpop.f32.mrb[0].mxu0  ;;  %v19281_v55 = vpack.c.bf16 %v14972_v48, %v14954_v43  ;;  %v19283_v43 = vmax.f32 %v15113_v39, %v15306_v16 }
 0x3f5   : > { %v15527_v35 = vmax.f32 %v5347_v38, %v5755_v62  ;;  %v5368_v15 = vadd.f32 %v15426_v50, %v11054_v42  ;;  %v5359_v1 = vpop.f32.mrb[1].mxu0  ;;  %9014 = vmatpush1.bf16.msra.mxu0 %v11512_v18  ;;  %v11517_v18 = vld [vmem:[%s18582_s9 + $0x164] ss:$16 sps:$4 sm:$0xff]  }
 0x3f6   : > { %19276 = vst [vmem:[#allocation63_spill] sm:$0xff] %v15511_v21  ;;  %19278 = vst [vmem:[#allocation66_spill] sm:$0xff] %v15519_v57  ;;  %v15525_v49 = vmax.f32 %v19279_v44, %v15511_v21  ;;  %v15536_v26 = vmax.f32 %v19282_v22, %v15519_v57  ;;  %v5360_v38 = vadd.f32 %v15426_v50, %v5359_v1  ;;  %v11055_v62 = vpop.f32.mrb[2].mxu0  ;;  %9015 = vmatprep.subr.bf16.mxu0 %v11517_v18  ;;  %v11520_v1 = vld [vmem:[%s18582_s9 + $0x184] ss:$16 sps:$4 sm:$0xff]  }
 0x3f7   : > { %19280 = vst [vmem:[#allocation68_spill] sm:$0xff] %v15527_v35  ;;  %v15546_v48 = vmax.f32 %v19283_v43, %v15527_v35  ;;  %v5760_v44 = vmul.f32 0.2, %v5368_v15  ;;  %v5371_v42 = vadd.f32 %v15426_v50, %v11055_v62  ;;  %v5362_v39 = vpop.f32.mrb[3].mxu0 }
 0x3f8   : > { %v5363_v22 = vadd.f32 %v15426_v50, %v5362_v39 }
 0x3f9   : > { %v15562_v43 = vmax.f32 %v5368_v15, %v5760_v44  ;;  %v5761_v53 = vmul.f32 0.2, %v5371_v42  ;;  %9016 = vmatpush1.bf16.msra.mxu0 %v11515_v3  ;;  %v19288_v3 = vld [vmem:[#allocation65_spill] sm:$0xff] }
 0x3fa   : > { %6553 = vmatmul.mubr.bf16.gmra.mrb[220].mxu1 %v19281_v55  ;;  %v5758_v55 = vmul.f32 0.2, %v5360_v38  ;;  %v5759_v62 = vmul.f32 0.2, %v5363_v22  ;;  %9017 = vmatprep.subr.bf16.mxu0 %v11520_v1  ;;  %v11058_v44 = vpop.f32.mrb[4].mxu0  ;;  %v19289_v21 = vpack.c.bf16 %v15032_v31, %v19288_v3 }
 0x3fb   : > { %6562 = vmatprep.mubr.bf16.mxu1 %v19128_v41  ;;  %19284 = vst [vmem:[#allocation10_spill] sm:$0xff] %v15562_v43  ;;  %v15571_v18 = vmax.f32 %v5371_v42, %v5761_v53  ;;  %v5384_v1 = vadd.f32 %v15426_v50, %v11058_v44  ;;  %v5375_v53 = vpop.f32.mrb[5].mxu0  ;;  %v11523_v42 = vld [vmem:[%s18582_s9 + $0x1a4] ss:$16 sps:$4 sm:$0xff]  }
 0x3fc   : > { %v15567_v58 = vmax.f32 %v5360_v38, %v5758_v55  ;;  %v15575_v15 = vmax.f32 %v5363_v22, %v5759_v62  ;;  %v5376_v31 = vadd.f32 %v15426_v50, %v5375_v53  ;;  %v11526_v53 = vld [vmem:[%s18582_s9 + $0x1c4] ss:$16 sps:$4 sm:$0xff]  }
 0x3fd   : > { %19286 = vst [vmem:[#allocation7_spill] sm:$0xff] %v15571_v18  ;;  %9018 = vmatpush1.bf16.msra.mxu0 %v11518_v54  ;;  %v5764_v62 = vmul.f32 0.2, %v5384_v1  ;;  %v11521_v54 = vld [vmem:[%s18582_s9 + $0x1a0] ss:$16 sps:$4 sm:$0xff]  }
 0x3fe   : > { %19285 = vst [vmem:[#allocation39_spill] sm:$0xff] %v15567_v58  ;;  %19287 = vst [vmem:[#allocation35_spill] sm:$0xff] %v15575_v15  ;;  %v5762_v55 = vmul.f32 0.2, %v5376_v31  ;;  %9019 = vmatprep.subr.bf16.mxu0 %v11523_v42 }
 0x3ff   : > { %v15599_v57 = vmax.f32 %v5384_v1, %v5764_v62  ;;  %v11524_v1 = vld [vmem:[%s18582_s9 + $0x1c0] ss:$16 sps:$4 sm:$0xff]  }
 0x400   : > { %v11527_v62 = vld [vmem:[%s18582_s9 + $0x1e0] ss:$16 sps:$4 sm:$0xff]  }
 0x401   : > { %19290 = vst [vmem:[#allocation9_spill] sm:$0xff] %v15599_v57  ;;  %9020 = vmatpush1.bf16.msra.mxu0 %v11521_v54 }
 0x402   : > { %6563 = vmatmul.mubr.bf16.gmra.mrb[224].mxu1 %v19289_v21  ;;  %v11059_v21 = vpop.f32.mrb[6].mxu0  ;;  %9021 = vmatprep.subr.bf16.mxu0 %v11526_v53 }
 0x403   : > { %6572 = vmatprep.mubr.bf16.mxu1 %v19128_v41  ;;  %v5387_v3 = vadd.f32 %v15426_v50, %v11059_v21  ;;  %v5378_v38 = vpop.f32.mrb[7].mxu0  ;;  %v15604_v21 = vmax.f32 %v5376_v31, %v5762_v55  ;;  %v19294_v55 = vld [vmem:[#allocation6_spill] sm:$0xff]  ;;  %v19295_v31 = vld [vmem:[#allocation67_spill] sm:$0xff] }
 0x404   : > { %v5379_v44 = vadd.f32 %v15426_v50, %v5378_v38  ;;  %v11062_v56 = vpop.f32.mrb[8].mxu0  ;;  %v19296_v30 = vpack.c.bf16 %v19294_v55, %v19295_v31 }
 0x405   : > { %v5765_v22 = vmul.f32 0.2, %v5387_v3  ;;  %19291 = vst [vmem:[#allocation37_spill] sm:$0xff] %v15604_v21  ;;  %v5391_v54 = vpop.f32.mrb[9].mxu0  ;;  %9022 = vmatpush1.bf16.msra.mxu0 %v11524_v1 }
 0x406   : > { %v5763_v39 = vmul.f32 0.2, %v5379_v44  ;;  %v11063_v53 = vpop.f32.mrb[10].mxu0 }
 0x407   : > { %v15608_v35 = vmax.f32 %v5387_v3, %v5765_v22  ;;  %v5400_v3 = vadd.f32 %v15426_v50, %v11062_v56  ;;  %v5403_v31 = vadd.f32 %v15426_v50, %v11063_v53  ;;  %v5394_v42 = vpop.f32.mrb[11].mxu0 }
 0x408   : > { %v15615_v59 = vmax.f32 %v5379_v44, %v5763_v39  ;;  %v5395_v56 = vadd.f32 %v15426_v50, %v5394_v42  ;;  %v11529_v39 = vld [vmem:[%s18582_s9 + $0x1e4] ss:$16 sps:$4 sm:$0xff]  }
 0x409   : > { %19292 = vst [vmem:[#allocation5_spill] sm:$0xff] %v15608_v35  ;;  %v5768_v55 = vmul.f32 0.2, %v5400_v3  ;;  %9023 = vmatprep.subr.bf16.mxu0 %v11529_v39 }
 0x40a   : > { %19293 = vst [vmem:[#allocation33_spill] sm:$0xff] %v15615_v59  ;;  %6573 = vmatmul.mubr.bf16.gmra.mrb[228].mxu1 %v19296_v30  ;;  %v5392_v30 = vadd.f32 %v15426_v50, %v5391_v54  ;;  %v5769_v54 = vmul.f32 0.2, %v5403_v31  ;;  %v5767_v33 = vmul.f32 0.2, %v5395_v56  ;;  %9024 = vmatpush1.bf16.msra.mxu0 %v11527_v62 }
 0x40b   : > { %6582 = vmatprep.mubr.bf16.mxu1 %v19128_v41  ;;  %v15639_v44 = vmax.f32 %v5400_v3, %v5768_v55  ;;  %v11066_v47 = vpop.f32.mrb[12].mxu0  ;;  %v19302_v3 = vld [vmem:[#allocation8_spill] sm:$0xff] }
 0x40c   : > { %v5766_v22 = vmul.f32 0.2, %v5392_v30  ;;  %v15645_v53 = vmax.f32 %v5403_v31, %v5769_v54  ;;  %v15649_v23 = vmax.f32 %v5395_v56, %v5767_v33  ;;  %v19303_v55 = vpack.c.bf16 %v19301_v40, %v19302_v3  ;;  %v5407_v31 = vpop.f32.mrb[13].mxu0 }
 0x40d   : > { %19297 = vst [vmem:[#allocation18_spill] sm:$0xff] %v15639_v44  ;;  %v5408_v40 = vadd.f32 %v15426_v50, %v5407_v31  ;;  %v11067_v56 = vpop.f32.mrb[14].mxu0 }
 0x40e   : > { %v15641_v38 = vmax.f32 %v5392_v30, %v5766_v22  ;;  %19299 = vst [vmem:[#allocation15_spill] sm:$0xff] %v15645_v53  ;;  %19300 = vst [vmem:[#allocation42_spill] sm:$0xff] %v15649_v23  ;;  %v5416_v30 = vadd.f32 %v15426_v50, %v11066_v47  ;;  %v5419_v3 = vadd.f32 %v15426_v50, %v11067_v56 }
 0x40f   : > { %v5770_v22 = vmul.f32 0.2, %v5408_v40 }
 0x410   : > { %19298 = vst [vmem:[#allocation44_spill] sm:$0xff] %v15641_v38  ;;  %v5772_v54 = vmul.f32 0.2, %v5416_v30  ;;  %v5773_v42 = vmul.f32 0.2, %v5419_v3 }
 0x411   : > { %v15669_v1 = vmax.f32 %v5408_v40, %v5770_v22 }
 0x412   : > { %6583 = vmatmul.mubr.bf16.gmra.mrb[232].mxu1 %v19303_v55  ;;  %v5410_v55 = vpop.f32.mrb[15].mxu0  ;;  %v15667_v47 = vmax.f32 %v5416_v30, %v5772_v54  ;;  %v15673_v62 = vmax.f32 %v5419_v3, %v5773_v42 }
 0x413   : > { %6592 = vmatprep.mubr.bf16.mxu1 %v19128_v41  ;;  %v5411_v39 = vadd.f32 %v15426_v50, %v5410_v55  ;;  %19305 = vst [vmem:[#allocation43_spill] sm:$0xff] %v15669_v1  ;;  %v11070_v56 = vpop.f32.mrb[16].mxu0  ;;  %v19310_v55 = vpack.c.bf16 %v19308_v51, %v19309_v12 }
 0x414   : > { %19304 = vst [vmem:[#allocation17_spill] sm:$0xff] %v15667_v47  ;;  %19306 = vst [vmem:[#allocation13_spill] sm:$0xff] %v15673_v62  ;;  %v5432_v40 = vadd.f32 %v15426_v50, %v11070_v56  ;;  %v5423_v42 = vpop.f32.mrb[17].mxu0 }
 0x415   : > { %v5771_v20 = vmul.f32 0.2, %v5411_v39  ;;  %v5424_v51 = vadd.f32 %v15426_v50, %v5423_v42  ;;  %v11071_v12 = vpop.f32.mrb[18].mxu0 }
 0x416   : > { %v5776_v54 = vmul.f32 0.2, %v5432_v40  ;;  %v5435_v3 = vadd.f32 %v15426_v50, %v11071_v12  ;;  %v19315_v12 = vmax.f32 %v15352_v24, %v15567_v58 }
 0x417   : > { %v15677_v45 = vmax.f32 %v5411_v39, %v5771_v20  ;;  %v5774_v22 = vmul.f32 0.2, %v5424_v51  ;;  %v19313_v39 = vmax.f32 %v15344_v4, %v15562_v43  ;;  %v19318_v4 = vmax.f32 %v15363_v61, %v15571_v18 }
 0x418   : > { %v15695_v56 = vmax.f32 %v5432_v40, %v5776_v54  ;;  %v5777_v31 = vmul.f32 0.2, %v5435_v3 }
 0x419   : > { %19307 = vst [vmem:[#allocation41_spill] sm:$0xff] %v15677_v45  ;;  %v15697_v33 = vmax.f32 %v5424_v51, %v5774_v22  ;;  %v19317_v22 = vpack.c.bf16 %v15154_v29, %v15136_v8 }
 0x41a   : > { %6593 = vmatmul.mubr.bf16.gmra.mrb[236].mxu1 %v19310_v55  ;;  %v5426_v55 = vpop.f32.mrb[19].mxu0  ;;  %19311 = vst [vmem:[#allocation25_spill] sm:$0xff] %v15695_v56  ;;  %v15703_v20 = vmax.f32 %v19313_v39, %v15695_v56  ;;  %v15705_v42 = vmax.f32 %v5435_v3, %v5777_v31 }
 0x41b   : > { %6602 = vmatprep.mubr.bf16.mxu1 %v19128_v41  ;;  %v5427_v30 = vadd.f32 %v15426_v50, %v5426_v55  ;;  %19312 = vst [vmem:[#allocation47_spill] sm:$0xff] %v15697_v33  ;;  %v15711_v14 = vmax.f32 %v19315_v12, %v15697_v33  ;;  %v11074_v54 = vpop.f32.mrb[20].mxu0 }
 0x41c   : > { %19314 = vst [vmem:[#allocation21_spill] sm:$0xff] %v15705_v42  ;;  %v15722_v39 = vmax.f32 %v19318_v4, %v15705_v42  ;;  %v5448_v24 = vadd.f32 %v15426_v50, %v11074_v54  ;;  %v5439_v51 = vpop.f32.mrb[21].mxu0 }
 0x41d   : > { %v5775_v6 = vmul.f32 0.2, %v5427_v30  ;;  %v5440_v61 = vadd.f32 %v15426_v50, %v5439_v51 }
 0x41e   : > { %v5780_v3 = vmul.f32 0.2, %v5448_v24 }
 0x41f   : > { %v15713_v40 = vmax.f32 %v5427_v30, %v5775_v6  ;;  %v19319_v6 = vmax.f32 %v15373_v19, %v15575_v15  ;;  %v11075_v30 = vpop.f32.mrb[22].mxu0  ;;  %v5778_v54 = vmul.f32 0.2, %v5440_v61 }
 0x420   : > { %v5451_v55 = vadd.f32 %v15426_v50, %v11075_v30  ;;  %v5442_v12 = vpop.f32.mrb[23].mxu0  ;;  %v15739_v4 = vmax.f32 %v5448_v24, %v5780_v3  ;;  %v19324_v30 = vmax.f32 %v15408_v32, %v15604_v21 }
 0x421   : > { %19316 = vst [vmem:[#allocation45_spill] sm:$0xff] %v15713_v40  ;;  %v15732_v8 = vmax.f32 %v19319_v6, %v15713_v40  ;;  %v15741_v56 = vmax.f32 %v5440_v61, %v5778_v54  ;;  %v19322_v6 = vmax.f32 %v15400_v5, %v15599_v57  ;;  %v19326_v61 = vpack.c.bf16 %v15148_v7, %v15130_v25 }
 0x422   : > { %6603 = vmatmul.mubr.bf16.gmra.mrb[240].mxu1 %v19317_v22  ;;  %v5443_v22 = vadd.f32 %v15426_v50, %v5442_v12  ;;  %19320 = vst [vmem:[#allocation26_spill] sm:$0xff] %v15739_v4  ;;  %v5781_v31 = vmul.f32 0.2, %v5451_v55  ;;  %v19327_v5 = vmax.f32 %v15419_v27, %v15608_v35  ;;  %v19328_v54 = vmax.f32 %v15434_v34, %v15615_v59 }
 0x423   : > { %6612 = vmatprep.mubr.bf16.mxu1 %v19128_v41  ;;  %19321 = vst [vmem:[#allocation48_spill] sm:$0xff] %v15741_v56  ;;  %v15747_v29 = vmax.f32 %v19322_v6, %v15739_v4  ;;  %v15755_v42 = vmax.f32 %v19324_v30, %v15741_v56  ;;  %v11078_v3 = vpop.f32.mrb[24].mxu0 }
 0x424   : > { %v5779_v19 = vmul.f32 0.2, %v5443_v22  ;;  %v15749_v51 = vmax.f32 %v5451_v55, %v5781_v31  ;;  %v5464_v32 = vadd.f32 %v15426_v50, %v11078_v3  ;;  %v5455_v55 = vpop.f32.mrb[25].mxu0 }
 0x425   : > { %v5456_v27 = vadd.f32 %v15426_v50, %v5455_v55 }
 0x426   : > { %19323 = vst [vmem:[#allocation23_spill] sm:$0xff] %v15749_v51  ;;  %v15757_v24 = vmax.f32 %v5443_v22, %v5779_v19  ;;  %v15766_v12 = vmax.f32 %v19327_v5, %v15749_v51  ;;  %v11079_v22 = vpop.f32.mrb[26].mxu0  ;;  %v5784_v19 = vmul.f32 0.2, %v5464_v32 }
 0x427   : > { %v5467_v6 = vadd.f32 %v15426_v50, %v11079_v22  ;;  %v5458_v30 = vpop.f32.mrb[27].mxu0  ;;  %v5782_v3 = vmul.f32 0.2, %v5456_v27  ;;  %v19333_v22 = vmax.f32 %v15469_v37, %v15641_v38 }
 0x428   : > { %19325 = vst [vmem:[#allocation46_spill] sm:$0xff] %v15757_v24  ;;  %v15776_v25 = vmax.f32 %v19328_v54, %v15757_v24  ;;  %v15783_v5 = vmax.f32 %v5464_v32, %v5784_v19  ;;  %v19331_v54 = vmax.f32 %v15461_v2, %v15639_v44  ;;  %v19337_v2 = vmax.f32 %v15480_v10, %v15645_v53 }
 0x429   : > { %v5785_v31 = vmul.f32 0.2, %v5467_v6  ;;  %v15785_v4 = vmax.f32 %v5456_v27, %v5782_v3  ;;  %v19336_v27 = vpack.c.bf16 %v15206_v13, %v15184_v46  ;;  %v19339_v3 = vmax.f32 %v15490_v36, %v15649_v23 }
 0x42a   : > { %6613 = vmatmul.mubr.bf16.gmra.mrb[244].mxu1 %v19326_v61  ;;  %v5459_v61 = vadd.f32 %v15426_v50, %v5458_v30  ;;  %19329 = vst [vmem:[#allocation31_spill] sm:$0xff] %v15783_v5  ;;  %v15791_v7 = vmax.f32 %v19331_v54, %v15783_v5 }
 0x42b   : > { %6622 = vmatprep.mubr.bf16.mxu1 %v19128_v41  ;;  %19330 = vst [vmem:[#allocation51_spill] sm:$0xff] %v15785_v4  ;;  %v15793_v55 = vmax.f32 %v5467_v6, %v5785_v31  ;;  %v15799_v51 = vmax.f32 %v19333_v22, %v15785_v4  ;;  %v11082_v19 = vpop.f32.mrb[28].mxu0 }
 0x42c   : > { %v5783_v34 = vmul.f32 0.2, %v5459_v61  ;;  %v5480_v37 = vadd.f32 %v15426_v50, %v11082_v19  ;;  %v5471_v6 = vpop.f32.mrb[29].mxu0  ;;  %v15826_v19 = vpop.f32.mrb[144].mxu1 }
 0x42d   : > { %19332 = vst [vmem:[#allocation29_spill] sm:$0xff] %v15793_v55  ;;  %19334 = vst [vmem:[#allocation49_spill] sm:$0xff] %v15799_v51  ;;  %v15810_v30 = vmax.f32 %v19337_v2, %v15793_v55  ;;  %v5472_v10 = vadd.f32 %v15426_v50, %v5471_v6  ;;  %v15829_v31 = vpop.f32.mrb[145].mxu1 }
 0x42e   : > { %v15801_v32 = vmax.f32 %v5459_v61, %v5783_v34  ;;  %v11083_v61 = vpop.f32.mrb[30].mxu0  ;;  %v5788_v34 = vmul.f32 0.2, %v5480_v37  ;;  %v15833_v5 = vpop.f32.mrb[146].mxu1 }
 0x42f   : > { %19338 = vst [vmem:[#allocation52_spill] sm:$0xff] %v15810_v30  ;;  %v5483_v54 = vadd.f32 %v15426_v50, %v11083_v61  ;;  %v5474_v22 = vpop.f32.mrb[31].mxu0  ;;  %v15837_v55 = vpop.f32.mrb[147].mxu1  ;;  %v19343_v61 = vmax.f32 %v15517_v9, %v15667_v47  ;;  %v19348_v9 = vmax.f32 %v15536_v26, %v15673_v62 }
 0x430   : > { %19335 = vst [vmem:[#allocation32_spill] sm:$0xff] %v15801_v32  ;;  %v15820_v46 = vmax.f32 %v19339_v3, %v15801_v32  ;;  %v5475_v2 = vadd.f32 %v15426_v50, %v5474_v22  ;;  %v15831_v36 = vmax.f32 %v5480_v37, %v5788_v34  ;;  %v19345_v37 = vmax.f32 %v15525_v49, %v15669_v1 }
 0x431   : > { %v5789_v3 = vmul.f32 0.2, %v5483_v54 }
 0x432   : > { %6623 = vmatmul.mubr.bf16.gmra.mrb[248].mxu1 %v19336_v27  ;;  %19340 = vst [vmem:[#allocation30_spill] sm:$0xff] %v15820_v46  ;;  %v5786_v27 = vmul.f32 0.2, %v5472_v10  ;;  %19341 = vst [vmem:[#allocation50_spill] sm:$0xff] %v15831_v36  ;;  %v5787_v6 = vmul.f32 0.2, %v5475_v2  ;;  %v15843_v4 = vmax.f32 %v19343_v61, %v15831_v36 }
 0x433   : > { %6632 = vmatprep.mubr.bf16.mxu1 %v19128_v41  ;;  %v15845_v32 = vmax.f32 %v5483_v54, %v5789_v3  ;;  %v6240_v3 = vlaneseq }
 0x434   : > { %v15835_v13 = vmax.f32 %v5472_v10, %v5786_v27  ;;  %v15853_v22 = vmax.f32 %v5475_v2, %v5787_v6  ;;  %v11086_v10 = vpop.f32.mrb[32].mxu0  ;;  %v19347_v27 = vpack.c.bf16 %v15196_v52, %v15182_v11  ;;  %v19349_v11 = vmax.f32 %v15546_v48, %v15677_v45 }
 0x435   : > { %19344 = vst [vmem:[#allocation6_spill] sm:$0xff] %v15845_v32  ;;  %v15862_v61 = vmax.f32 %v19348_v9, %v15845_v32  ;;  %v5496_v49 = vadd.f32 %v15426_v50, %v11086_v10  ;;  %v15878_v10 = vpop.f32.mrb[148].mxu1  ;;  %v15883_v48 = vshrl.u32 %v6240_v3, 7 }
 0x436   : > { %19342 = vst [vmem:[#allocation65_spill] sm:$0xff] %v15835_v13  ;;  %v15851_v34 = vmax.f32 %v19345_v37, %v15835_v13  ;;  %19346 = vst [vmem:[#allocation67_spill] sm:$0xff] %v15853_v22  ;;  %v5487_v37 = vpop.f32.mrb[33].mxu0  ;;  %v15872_v52 = vmax.f32 %v19349_v11, %v15853_v22  ;;  %v15881_v56 = vpop.f32.mrb[149].mxu1 }
 0x437   : > { %v5488_v2 = vadd.f32 %v15426_v50, %v5487_v37  ;;  %v11087_v6 = vpop.f32.mrb[34].mxu0  ;;  %19350 = vst [vmem:[#allocation12_spill] sm:$0xff] %v15883_v48  ;;  %v15887_v26 = vpop.f32.mrb[150].mxu1  ;;  %v19358_v45 = vsub.s32 1, %v15883_v48 }
 0x438   : > { %v5499_v9 = vadd.f32 %v15426_v50, %v11087_v6  ;;  %v5490_v54 = vpop.f32.mrb[35].mxu0  ;;  %v15891_v22 = vpop.f32.mrb[151].mxu1 }
 0x439   : > { %v5790_v36 = vmul.f32 0.2, %v5488_v2  ;;  %v5491_v32 = vadd.f32 %v15426_v50, %v5490_v54 }
 0x43a   : > { %6633 = vmatmul.mubr.bf16.gmra.mrb[252].mxu1 %v19347_v27  ;;  %v5792_v27 = vmul.f32 0.2, %v5496_v49  ;;  %v5793_v24 = vmul.f32 0.2, %v5499_v9 }
 0x43b   : > { %6642 = vmatprep.mubr.bf16.mxu1 %v19128_v41  ;;  %v15889_v37 = vmax.f32 %v5488_v2, %v5790_v36  ;;  %v5791_v13 = vmul.f32 0.2, %v5491_v32  ;;  %v15921_v36 = vpop.f32.mrb[152].mxu1 }
 0x43c   : > { %v15885_v11 = vmax.f32 %v5496_v49, %v5792_v27  ;;  %v15895_v33 = vmax.f32 %v5499_v9, %v5793_v24  ;;  %v11090_v49 = vpop.f32.mrb[36].mxu0  ;;  %v19355_v27 = vpack.c.bf16 %v15260_v28, %v15238_v60  ;;  %v15924_v62 = vpop.f32.mrb[153].mxu1  ;;  %v19356_v60 = vsub.s32 0, %v15883_v48 }
 0x43d   : > { %19352 = vst [vmem:[#allocation56_spill] sm:$0xff] %v15889_v37  ;;  %v15899_v3 = vmax.f32 %v5491_v32, %v5791_v13  ;;  %v5512_v24 = vadd.f32 %v15426_v50, %v11090_v49  ;;  %v5503_v9 = vpop.f32.mrb[37].mxu0  ;;  %v6238_v32 = vld [vmem:[%s18581_s8] sm:$0x3] }
 0x43e   : > { %19351 = vst [vmem:[#allocation8_spill] sm:$0xff] %v15885_v11  ;;  %19353 = vst [vmem:[#allocation59_spill] sm:$0xff] %v15895_v33  ;;  %v11091_v6 = vpop.f32.mrb[38].mxu0  ;;  %v15928_v28 = vrot.slane %v6238_v32, %v19356_v60 }
 0x43f   : > { %19354 = vst [vmem:[#allocation70_spill] sm:$0xff] %v15899_v3  ;;  %v5796_v2 = vmul.f32 0.2, %v5512_v24  ;;  %v5515_v49 = vadd.f32 %v15426_v50, %v11091_v6  ;;  %v5506_v54 = vpop.f32.mrb[39].mxu0  ;;  %v15936_v6 = vrot.slane %v6238_v32, %v19358_v45  ;;  %v19362_v45 = vpack.c.bf16 %v15250_v63, %v15236_v0 }
 0x440   : > { %v5507_v47 = vadd.f32 %v15426_v50, %v5506_v54 }
 0x441   : > { %v15930_v1 = vmax.f32 %v5512_v24, %v5796_v2  ;;  %v5797_v13 = vmul.f32 0.2, %v5515_v49 }
 0x442   : > { %6643 = vmatmul.mubr.bf16.gmra.mrb[0].mxu1 %v19355_v27  ;;  %v5504_v27 = vadd.f32 %v15426_v50, %v5503_v9  ;;  %v15932_v9 = vpop.f32.mrb[154].mxu1  ;;  %v5795_v53 = vmul.f32 0.2, %v5507_v47 }
 0x443   : > { %6652 = vmatprep.mubr.bf16.mxu1 %v19128_v41  ;;  %19357 = vst [vmem:[#allocation71_spill] sm:$0xff] %v15930_v1  ;;  %v15940_v38 = vpop.f32.mrb[155].mxu1  ;;  %v15944_v23 = vmax.f32 %v5515_v49, %v5797_v13  ;;  %v11094_v60 = vpop.f32.mrb[40].mxu0 }
 0x444   : > { %v5794_v40 = vmul.f32 0.2, %v5504_v27  ;;  %v15948_v24 = vmax.f32 %v5507_v47, %v5795_v53  ;;  %v5519_v49 = vpop.f32.mrb[41].mxu0  ;;  %v15965_v53 = vadd.f32 %v15829_v31, %v15936_v6  ;;  %v15977_v2 = vpop.f32.mrb[156].mxu1  ;;  %v15981_v31 = vadd.f32 %v15837_v55, %v15936_v6 }
 0x445   : > { %19360 = vst [vmem:[#allocation73_spill] sm:$0xff] %v15944_v23  ;;  %v5520_v47 = vadd.f32 %v15426_v50, %v5519_v49  ;;  %v15984_v54 = vpop.f32.mrb[157].mxu1 }
 0x446   : > { %v15938_v44 = vmax.f32 %v5504_v27, %v5794_v40  ;;  %19361 = vst [vmem:[#allocation74_spill] sm:$0xff] %v15948_v24  ;;  %v15955_v40 = vadd.f32 %v15826_v19, %v15928_v28  ;;  %v5528_v27 = vadd.f32 %v15426_v50, %v11094_v60  ;;  %19364 = vst [vmem:[#allocation76_spill] sm:$0xff] %v15965_v53  ;;  %v11095_v19 = vpop.f32.mrb[42].mxu0  ;;  %v15995_v57 = vpop.f32.mrb[158].mxu1  ;;  %v15998_v55 = vmul.f32 0.2, %v15965_v53 }
 0x447   : > { %v5531_v13 = vadd.f32 %v15426_v50, %v11095_v19  ;;  %v5522_v32 = vpop.f32.mrb[43].mxu0  ;;  %19365 = vst [vmem:[#allocation77_spill] sm:$0xff] %v15981_v31  ;;  %v5798_v0 = vmul.f32 0.2, %v5520_v47  ;;  %v16006_v59 = vpop.f32.mrb[159].mxu1 }
 0x448   : > { %19359 = vst [vmem:[#allocation72_spill] sm:$0xff] %v15938_v44  ;;  %19363 = vst [vmem:[#allocation75_spill] sm:$0xff] %v15955_v40  ;;  %v5800_v60 = vmul.f32 0.2, %v5528_v27  ;;  %v5523_v63 = vadd.f32 %v15426_v50, %v5522_v32  ;;  %v15987_v49 = vmul.f32 0.2, %v15955_v40  ;;  %v16002_v32 = vadd.f32 %v15881_v56, %v15936_v6 }
 0x449   : > { %v5801_v48 = vmul.f32 0.2, %v5531_v13  ;;  %19369 = vst [vmem:[#allocation81_spill] sm:$0xff] %v15998_v55  ;;  %v16004_v35 = vmax.f32 %v5520_v47, %v5798_v0  ;;  %v16020_v56 = vmul.f32 0.2, %v15981_v31  ;;  %v16024_v0 = vadd.f32 %v15891_v22, %v15936_v6 }
 0x44a   : > { %6653 = vmatmul.mubr.bf16.gmra.mrb[4].mxu1 %v19362_v45  ;;  %v15974_v45 = vadd.f32 %v15833_v5, %v15928_v28  ;;  %19366 = vst [vmem:[#allocation78_spill] sm:$0xff] %v15987_v49  ;;  %v15991_v5 = vadd.f32 %v15878_v10, %v15928_v28  ;;  %v15993_v19 = vmax.f32 %v5528_v27, %v5800_v60  ;;  %19370 = vst [vmem:[#allocation82_spill] sm:$0xff] %v16002_v32 }
 0x44b   : > { %6662 = vmatprep.mubr.bf16.mxu1 %v19128_v41  ;;  %19371 = vst [vmem:[#allocation83_spill] sm:$0xff] %v16004_v35  ;;  %v5799_v21 = vmul.f32 0.2, %v5523_v63  ;;  %v16013_v27 = vadd.f32 %v15887_v26, %v15928_v28  ;;  %v16017_v43 = vmax.f32 %v5531_v13, %v5801_v48  ;;  %19374 = vst [vmem:[#allocation86_spill] sm:$0xff] %v16020_v56  ;;  %v11098_v58 = vpop.f32.mrb[44].mxu0  ;;  %v16056_v30 = vpop.f32.mrb[160].mxu1 }
 0x44c   : > { %19367 = vst [vmem:[#allocation79_spill] sm:$0xff] %v15991_v5  ;;  %19368 = vst [vmem:[#allocation80_spill] sm:$0xff] %v15993_v19  ;;  %v16009_v10 = vmul.f32 0.2, %v15974_v45  ;;  %v19377_v26 = vpack.c.bf16 %v15306_v16, %v15298_v17  ;;  %v16034_v48 = vmul.f32 0.2, %v15991_v5  ;;  %v5544_v60 = vadd.f32 %v15426_v50, %v11098_v58 }
 0x44d   : > { %19372 = vst [vmem:[#allocation84_spill] sm:$0xff] %v16013_v27  ;;  %19373 = vst [vmem:[#allocation85_spill] sm:$0xff] %v16017_v43  ;;  %v16028_v18 = vmax.f32 %v5523_v63, %v5799_v21  ;;  %v5535_v15 = vpop.f32.mrb[45].mxu0  ;;  %v16043_v21 = vmul.f32 0.2, %v16002_v32  ;;  %v16064_v46 = vpop.f32.mrb[161].mxu1 }
 0x44e   : > { %19375 = vst [vmem:[#allocation87_spill] sm:$0xff] %v16024_v0  ;;  %19378 = vst [vmem:[#allocation89_spill] sm:$0xff] %v16034_v48  ;;  %v5536_v63 = vadd.f32 %v15426_v50, %v5535_v15  ;;  %v16053_v58 = vmul.f32 0.2, %v16013_v27  ;;  %v5804_v13 = vmul.f32 0.2, %v5544_v60 }
 0x44f   : > { %19376 = vst [vmem:[#allocation88_spill] sm:$0xff] %v16028_v18  ;;  %19379 = vst [vmem:[#allocation90_spill] sm:$0xff] %v16043_v21  ;;  %v16061_v16 = vmul.f32 0.2, %v16024_v0  ;;  %v16074_v35 = vpop.f32.mrb[162].mxu1  ;;  %v19388_v21 = vld [vmem:[#allocation28_spill] sm:$0xff] }
 0x450   : > { %19380 = vst [vmem:[#allocation91_spill] sm:$0xff] %v16053_v58  ;;  %v5802_v15 = vmul.f32 0.2, %v5536_v63  ;;  %v16072_v49 = vmax.f32 %v5544_v60, %v5804_v13  ;;  %v16082_v51 = vpop.f32.mrb[163].mxu1  ;;  %v16088_v60 = vadd.f32 %v15924_v62, %v15936_v6  ;;  %v19389_v62 = vld [vmem:[#allocation40_spill] sm:$0xff] }
 0x451   : > { %19381 = vst [vmem:[#allocation92_spill] sm:$0xff] %v16061_v16  ;;  %v19390_v32 = vpack.c.bf16 %v19388_v21, %v19389_v62 }
 0x452   : > { %6663 = vmatmul.mubr.bf16.gmra.mrb[8].mxu1 %v19377_v26  ;;  %v11099_v26 = vpop.f32.mrb[46].mxu0  ;;  %19383 = vst [vmem:[#allocation94_spill] sm:$0xff] %v16072_v49  ;;  %v16080_v55 = vmax.f32 %v5536_v63, %v5802_v15  ;;  %19385 = vst [vmem:[#allocation96_spill] sm:$0xff] %v16088_v60 }
 0x453   : > { %6672 = vmatprep.mubr.bf16.mxu1 %v19128_v41  ;;  %v5547_v47 = vadd.f32 %v15426_v50, %v11099_v26  ;;  %v5538_v43 = vpop.f32.mrb[47].mxu0  ;;  %v16070_v26 = vadd.f32 %v15921_v36, %v15928_v28  ;;  %v16131_v16 = vpop.f32.mrb[164].mxu1 }
 0x454   : > { %v5539_v18 = vadd.f32 %v15426_v50, %v5538_v43  ;;  %19384 = vst [vmem:[#allocation95_spill] sm:$0xff] %v16080_v55  ;;  %v11102_v36 = vpop.f32.mrb[48].mxu0  ;;  %v16142_v58 = vpop.f32.mrb[165].mxu1 }
 0x455   : > { %19382 = vst [vmem:[#allocation93_spill] sm:$0xff] %v16070_v26  ;;  %v5805_v40 = vmul.f32 0.2, %v5547_v47  ;;  %v16106_v13 = vmul.f32 0.2, %v16070_v26  ;;  %v5560_v63 = vadd.f32 %v15426_v50, %v11102_v36  ;;  %v5551_v43 = vpop.f32.mrb[49].mxu0  ;;  %v16128_v36 = vadd.f32 %v15940_v38, %v15936_v6 }
 0x456   : > { %v5803_v53 = vmul.f32 0.2, %v5539_v18  ;;  %v5552_v21 = vadd.f32 %v15426_v50, %v5551_v43  ;;  %v11103_v62 = vpop.f32.mrb[50].mxu0  ;;  %v16139_v43 = vadd.f32 %v15984_v54, %v15936_v6  ;;  %v16152_v48 = vpop.f32.mrb[166].mxu1 }
 0x457   : > { %v16092_v22 = vmax.f32 %v5547_v47, %v5805_v40  ;;  %19391 = vst [vmem:[#allocation28_spill] sm:$0xff] %v16106_v13  ;;  %v16124_v47 = vmul.f32 0.2, %v16088_v60  ;;  %19393 = vst [vmem:[#allocation99_spill] sm:$0xff] %v16128_v36  ;;  %v5808_v40 = vmul.f32 0.2, %v5560_v63 }
 0x458   : > { %v16100_v17 = vmax.f32 %v5539_v18, %v5803_v53  ;;  %v16116_v18 = vadd.f32 %v15932_v9, %v15928_v28  ;;  %v5563_v9 = vadd.f32 %v15426_v50, %v11103_v62  ;;  %v5554_v15 = vpop.f32.mrb[51].mxu0  ;;  %v16135_v53 = vadd.f32 %v15977_v2, %v15928_v28  ;;  %v16163_v38 = vpop.f32.mrb[167].mxu1 }
 0x459   : > { %19386 = vst [vmem:[#allocation97_spill] sm:$0xff] %v16092_v22  ;;  %19392 = vst [vmem:[#allocation40_spill] sm:$0xff] %v16124_v47  ;;  %v5555_v0 = vadd.f32 %v15426_v50, %v5554_v15  ;;  %v16148_v62 = vadd.f32 %v15995_v57, %v15928_v28  ;;  %v16150_v27 = vmax.f32 %v5560_v63, %v5808_v40  ;;  %v16168_v63 = vmul.f32 0.2, %v16128_v36 }
 0x45a   : > { %19387 = vst [vmem:[#allocation98_spill] sm:$0xff] %v16100_v17  ;;  %6673 = vmatmul.mubr.bf16.gmra.mrb[12].mxu1 %v19390_v32  ;;  %v5806_v32 = vmul.f32 0.2, %v5552_v21  ;;  %v5809_v2 = vmul.f32 0.2, %v5563_v9  ;;  %v16159_v15 = vadd.f32 %v16006_v59, %v15936_v6  ;;  %v19397_v40 = vmax.f32 %v15703_v20, %v15885_v11  ;;  %v19401_v20 = vld [vmem:[#allocation34_spill] sm:$0xff] }
 0x45b   : > { %6682 = vmatprep.mubr.bf16.mxu1 %v19128_v41  ;;  %19394 = vst [vmem:[#allocation100_spill] sm:$0xff] %v16150_v27  ;;  %v16155_v54 = vmul.f32 0.2, %v16116_v18  ;;  %v5807_v56 = vmul.f32 0.2, %v5555_v0  ;;  %19396 = vst [vmem:[#allocation102_spill] sm:$0xff] %v16168_v63 }
 0x45c   : > { %v16161_v5 = vmax.f32 %v5552_v21, %v5806_v32  ;;  %v16174_v13 = vmax.f32 %v19397_v40, %v16150_v27  ;;  %v16176_v26 = vmax.f32 %v5563_v9, %v5809_v2  ;;  %v16179_v59 = vmul.f32 0.2, %v16135_v53  ;;  %v11106_v60 = vpop.f32.mrb[52].mxu0  ;;  %v19402_v40 = vld [vmem:[#allocation19_spill] sm:$0xff] }
 0x45d   : > { %v16182_v32 = vmul.f32 0.2, %v16139_v43  ;;  %v19399_v21 = vmax.f32 %v15711_v14, %v15889_v37  ;;  %v16190_v47 = vmax.f32 %v5555_v0, %v5807_v56  ;;  %v19403_v11 = vpack.c.bf16 %v19401_v20, %v19402_v40  ;;  %v5567_v0 = vpop.f32.mrb[53].mxu0 }
 0x45e   : > { %19395 = vst [vmem:[#allocation101_spill] sm:$0xff] %v16161_v5  ;;  %19398 = vst [vmem:[#allocation103_spill] sm:$0xff] %v16176_v26  ;;  %v16196_v9 = vmul.f32 0.2, %v16148_v62  ;;  %v19404_v2 = vmax.f32 %v15722_v39, %v15895_v33  ;;  %v5576_v56 = vadd.f32 %v15426_v50, %v11106_v60  ;;  %v5568_v40 = vadd.f32 %v15426_v50, %v5567_v0 }
 0x45f   : > { %v16188_v57 = vmax.f32 %v19399_v21, %v16161_v5  ;;  %19400 = vst [vmem:[#allocation104_spill] sm:$0xff] %v16190_v47  ;;  %v16209_v21 = vmul.f32 0.2, %v16159_v15  ;;  %v16224_v14 = vadd.f32 %v16056_v30, %v15928_v28  ;;  %v16233_v0 = vadd.f32 %v16064_v46, %v15936_v6 }
 0x460   : > { %v16202_v31 = vmax.f32 %v19404_v2, %v16176_v26  ;;  %v11107_v2 = vpop.f32.mrb[54].mxu0  ;;  %v5812_v27 = vmul.f32 0.2, %v5576_v56  ;;  %v5810_v39 = vmul.f32 0.2, %v5568_v40 }
 0x461   : > { %v5579_v26 = vadd.f32 %v15426_v50, %v11107_v2  ;;  %v5570_v33 = vpop.f32.mrb[55].mxu0  ;;  %19406 = vst [vmem:[#allocation34_spill] sm:$0xff] %v16233_v0  ;;  %v16255_v30 = vmul.f32 0.2, %v16224_v14 }
 0x462   : > { %6683 = vmatmul.mubr.bf16.gmra.mrb[16].mxu1 %v19403_v11  ;;  %v19405_v11 = vmax.f32 %v15732_v8, %v15899_v3  ;;  %v16227_v8 = vpop.f32.mrb[168].mxu1  ;;  %v5571_v60 = vadd.f32 %v15426_v50, %v5570_v33  ;;  %v16250_v33 = vmax.f32 %v5568_v40, %v5810_v39  ;;  %v16270_v39 = vmul.f32 0.2, %v16233_v0 }
 0x463   : > { %6692 = vmatprep.mubr.bf16.mxu1 %v19128_v41  ;;  %v16236_v5 = vpop.f32.mrb[169].mxu1  ;;  %v5813_v37 = vmul.f32 0.2, %v5579_v26  ;;  %v16274_v40 = vadd.f32 %v16082_v51, %v15936_v6  ;;  %v19420_v51 = vmax.f32 %v15766_v12, %v15944_v23 }
 0x464   : > { %v16215_v20 = vmax.f32 %v19405_v11, %v16190_v47  ;;  %v16242_v47 = vmax.f32 %v5576_v56, %v5812_v27  ;;  %v16244_v3 = vpop.f32.mrb[170].mxu1  ;;  %19409 = vst [vmem:[#allocation106_spill] sm:$0xff] %v16250_v33  ;;  %v5811_v63 = vmul.f32 0.2, %v5571_v60  ;;  %v16259_v27 = vadd.f32 %v16074_v35, %v15928_v28  ;;  %19414 = vst [vmem:[#allocation110_spill] sm:$0xff] %v16270_v39 }
 0x465   : > { %19408 = vst [vmem:[#allocation105_spill] sm:$0xff] %v16244_v3  ;;  %v16252_v36 = vpop.f32.mrb[171].mxu1  ;;  %v19412_v56 = vmax.f32 %v15747_v29, %v15930_v1  ;;  %v16267_v2 = vmax.f32 %v5579_v26, %v5813_v37  ;;  %v19415_v35 = vmax.f32 %v15755_v42, %v15938_v44  ;;  %v11110_v29 = vpop.f32.mrb[56].mxu0  ;;  %v19418_v1 = vld [vmem:[#allocation27_spill] sm:$0xff]  ;;  %v16289_v26 = vadd.f32 %v16131_v16, %v15928_v28 }
 0x466   : > { %19407 = vst [vmem:[#allocation19_spill] sm:$0xff] %v16242_v47  ;;  %19410 = vst [vmem:[#allocation107_spill] sm:$0xff] %v16252_v36  ;;  %v16282_v36 = vmax.f32 %v5571_v60, %v5811_v63  ;;  %v5592_v63 = vadd.f32 %v15426_v50, %v11110_v29  ;;  %v5583_v60 = vpop.f32.mrb[57].mxu0  ;;  %v19421_v16 = vmax.f32 %v15776_v25, %v15948_v24  ;;  %v16316_v50 = vld [vmem:[%s18579_s6] ss:$0 sm:$0xff]  ;;  %v16327_v42 = vpop.f32.mrb[172].mxu1 }
 0x467   : > { %19411 = vst [vmem:[#allocation108_spill] sm:$0xff] %v16259_v27  ;;  %v16265_v46 = vmax.f32 %v19412_v56, %v16242_v47  ;;  %19413 = vst [vmem:[#allocation109_spill] sm:$0xff] %v16267_v2  ;;  %v16280_v11 = vmax.f32 %v19415_v35, %v16250_v33  ;;  %v19417_v56 = vld [vmem:[#allocation57_spill] sm:$0xff]  ;;  %v16295_v3 = vmax.f32 %v19420_v51, %v16267_v2  ;;  %v16330_v12 = vmul.f32 0.2, %v16274_v40  ;;  %v16337_v33 = vpop.f32.mrb[173].mxu1 }
 0x468   : > { %19416 = vst [vmem:[#allocation111_spill] sm:$0xff] %v16282_v36  ;;  %v19419_v37 = vpack.c.bf16 %v19417_v56, %v19418_v1  ;;  %v16303_v1 = vadd.f32 %v16142_v58, %v15936_v6  ;;  %v16309_v35 = vmax.f32 %v19421_v16, %v16282_v36  ;;  %v5584_v29 = vadd.f32 %v16316_v50, %v5583_v60  ;;  %v11111_v56 = vpop.f32.mrb[58].mxu0  ;;  %v16347_v44 = vpop.f32.mrb[174].mxu1 }
 0x469   : > { %v16320_v58 = vmul.f32 0.2, %v16259_v27  ;;  %v16324_v25 = vadd.f32 %v16152_v48, %v15928_v28  ;;  %v5595_v51 = vadd.f32 %v16316_v50, %v11111_v56  ;;  %v5586_v16 = vpop.f32.mrb[59].mxu0  ;;  %19424 = vst [vmem:[#allocation112_spill] sm:$0xff] %v16327_v42  ;;  %v16334_v60 = vadd.f32 %v16163_v38, %v15936_v6  ;;  %19426 = vst [vmem:[#allocation114_spill] sm:$0xff] %v16337_v33  ;;  %v16357_v48 = vpop.f32.mrb[175].mxu1 }
 0x46a   : > { %6693 = vmatmul.mubr.bf16.gmra.mrb[20].mxu1 %v19419_v37  ;;  %v5816_v37 = vmul.f32 0.2, %v5592_v63  ;;  %v5814_v47 = vmul.f32 0.2, %v5584_v29  ;;  %v5587_v2 = vadd.f32 %v16316_v50, %v5586_v16  ;;  %v16343_v56 = vmul.f32 0.2, %v16289_v26 }
 0x46b   : > { %6702 = vmatprep.mubr.bf16.mxu1 %v19128_v41  ;;  %19422 = vst [vmem:[#allocation57_spill] sm:$0xff] %v16320_v58  ;;  %19423 = vst [vmem:[#allocation27_spill] sm:$0xff] %v16324_v25  ;;  %v5817_v23 = vmul.f32 0.2, %v5595_v51  ;;  %v16353_v16 = vmul.f32 0.2, %v16303_v1  ;;  %v19433_v38 = vmax.f32 %v15791_v7, %v15993_v19 }
 0x46c   : > { %19425 = vst [vmem:[#allocation113_spill] sm:$0xff] %v16334_v60  ;;  %v16345_v36 = vmax.f32 %v5592_v63, %v5816_v37  ;;  %19428 = vst [vmem:[#allocation116_spill] sm:$0xff] %v16347_v44  ;;  %v16355_v24 = vmax.f32 %v5584_v29, %v5814_v47  ;;  %v5815_v33 = vmul.f32 0.2, %v5587_v2  ;;  %v16362_v37 = vmul.f32 0.2, %v16324_v25 }
 0x46d   : > { %19429 = vst [vmem:[#allocation117_spill] sm:$0xff] %v16353_v16  ;;  %19431 = vst [vmem:[#allocation119_spill] sm:$0xff] %v16357_v48  ;;  %v16370_v42 = vmax.f32 %v5595_v51, %v5817_v23  ;;  %v16375_v29 = vmul.f32 0.2, %v16334_v60  ;;  %v19436_v63 = vld [vmem:[#allocation49_spill] sm:$0xff]  ;;  %v19437_v48 = vld [vmem:[#allocation83_spill] sm:$0xff] }
 0x46e   : > { %19427 = vst [vmem:[#allocation115_spill] sm:$0xff] %v16345_v36  ;;  %19430 = vst [vmem:[#allocation118_spill] sm:$0xff] %v16355_v24  ;;  %v16368_v44 = vmax.f32 %v19433_v38, %v16345_v36  ;;  %v19438_v58 = vmax.f32 %v19436_v63, %v19437_v48  ;;  %v16383_v39 = vmax.f32 %v5587_v2, %v5815_v33  ;;  %v11114_v0 = vpop.f32.mrb[60].mxu0  ;;  %v19440_v7 = vld [vmem:[#allocation55_spill] sm:$0xff]  ;;  %v19441_v38 = vld [vmem:[#allocation36_spill] sm:$0xff] }
 0x46f   : > { %19432 = vst [vmem:[#allocation120_spill] sm:$0xff] %v16362_v37  ;;  %19434 = vst [vmem:[#allocation121_spill] sm:$0xff] %v16370_v42  ;;  %v19442_v19 = vpack.c.bf16 %v19440_v7, %v19441_v38  ;;  %v19444_v51 = vld [vmem:[#allocation52_spill] sm:$0xff]  ;;  %v19445_v63 = vld [vmem:[#allocation85_spill] sm:$0xff]  ;;  %v5608_v33 = vadd.f32 %v16316_v50, %v11114_v0 }
 0x470   : > { %19435 = vst [vmem:[#allocation122_spill] sm:$0xff] %v16375_v29  ;;  %v16381_v27 = vmax.f32 %v19438_v58, %v16355_v24  ;;  %19439 = vst [vmem:[#allocation49_spill] sm:$0xff] %v16383_v39  ;;  %v19446_v58 = vmax.f32 %v19444_v51, %v19445_v63  ;;  %v19447_v38 = vld [vmem:[#allocation30_spill] sm:$0xff]  ;;  %v19448_v51 = vld [vmem:[#allocation88_spill] sm:$0xff]  ;;  %v16426_v63 = vadd.f32 %v16227_v8, %v15928_v28 }
 0x471   : > { %v5820_v7 = vmul.f32 0.2, %v5608_v33  ;;  %v16441_v8 = vadd.f32 %v16236_v5, %v15936_v6  ;;  %v19454_v5 = vmax.f32 %v15843_v4, %v16072_v49  ;;  %v19458_v49 = vld [vmem:[#allocation69_spill] sm:$0xff] }
 0x472   : > { %6703 = vmatmul.mubr.bf16.gmra.mrb[24].mxu1 %v19442_v19  ;;  %v16400_v47 = vmax.f32 %v19446_v58, %v16370_v42  ;;  %v5599_v19 = vpop.f32.mrb[61].mxu0  ;;  %v19449_v58 = vmax.f32 %v19447_v38, %v19448_v51  ;;  %19450 = vst [vmem:[#allocation55_spill] sm:$0xff] %v16426_v63 }
 0x473   : > { %6712 = vmatprep.mubr.bf16.mxu1 %v19128_v41  ;;  %v5600_v2 = vadd.f32 %v16316_v50, %v5599_v19  ;;  %v11115_v36 = vpop.f32.mrb[62].mxu0  ;;  %19451 = vst [vmem:[#allocation36_spill] sm:$0xff] %v16441_v8 }
 0x474   : > { %v16417_v23 = vmax.f32 %v19449_v58, %v16383_v39  ;;  %v5611_v48 = vadd.f32 %v16316_v50, %v11115_v36  ;;  %v5602_v38 = vpop.f32.mrb[63].mxu0  ;;  %v6444_v58 = vpop.f32.mrb[176].mxu1  ;;  %v16443_v36 = vmax.f32 %v5608_v33, %v5820_v7 }
 0x475   : > { %v5818_v0 = vmul.f32 0.2, %v5600_v2  ;;  %v5603_v19 = vadd.f32 %v16316_v50, %v5602_v38  ;;  %v6445_v24 = vadd.f32 %v6444_v58, %v15928_v28  ;;  %v6446_v42 = vpop.f32.mrb[177].mxu1  ;;  %v11118_v4 = vpop.f32.mrb[64].mxu0 }
 0x476   : > { %19452 = vst [vmem:[#allocation52_spill] sm:$0xff] %v16443_v36  ;;  %v5821_v39 = vmul.f32 0.2, %v5611_v48  ;;  %v6447_v51 = vadd.f32 %v6446_v42, %v15936_v6  ;;  %v6448_v29 = vpop.f32.mrb[178].mxu1  ;;  %v16454_v8 = vmax.f32 %v19454_v5, %v16443_v36  ;;  %v19456_v42 = vmax.f32 %v15851_v34, %v16080_v55  ;;  %v19466_v34 = vld [vmem:[#allocation76_spill] sm:$0xff]  ;;  %v19467_v36 = vld [vmem:[#allocation81_spill] sm:$0xff] }
 0x477   : > { %v16447_v38 = vmax.f32 %v5600_v2, %v5818_v0  ;;  %v5819_v58 = vmul.f32 0.2, %v5603_v19  ;;  %v7195_v60 = vmul.f32 0.2, %v6445_v24  ;;  %v6449_v37 = vadd.f32 %v6448_v29, %v15928_v28  ;;  %v6450_v25 = vpop.f32.mrb[179].mxu1 }
 0x478   : > { %v16456_v33 = vmax.f32 %v5611_v48, %v5821_v39  ;;  %v7196_v7 = vmul.f32 0.2, %v6447_v51  ;;  %v6451_v63 = vadd.f32 %v6450_v25, %v15936_v6  ;;  %v19459_v39 = vld [vmem:[#allocation38_spill] sm:$0xff]  ;;  %v19461_v25 = vmax.f32 %v15862_v61, %v16092_v22  ;;  %v6454_v61 = vpop.f32.mrb[180].mxu1 }
 0x479   : > { %19453 = vst [vmem:[#allocation30_spill] sm:$0xff] %v16447_v38  ;;  %v16463_v2 = vmax.f32 %v19456_v42, %v16447_v38  ;;  %v16465_v0 = vmax.f32 %v5603_v19, %v5819_v58  ;;  %v7515_v29 = vmax.f32 %v6445_v24, %v7195_v60  ;;  %v7197_v5 = vmul.f32 0.2, %v6449_v37  ;;  %v5615_v19 = vpop.f32.mrb[65].mxu0  ;;  %v19463_v42 = vld [vmem:[#allocation75_spill] sm:$0xff] }
 0x47a   : > { %19455 = vst [vmem:[#allocation123_spill] sm:$0xff] %v16456_v33  ;;  %v19460_v48 = vpack.c.bf16 %v19458_v49, %v19459_v39  ;;  %v16477_v16 = vmax.f32 %v19461_v25, %v16456_v33  ;;  %v5624_v24 = vadd.f32 %v16316_v50, %v11118_v4  ;;  %v7516_v60 = vmax.f32 %v6447_v51, %v7196_v7  ;;  %v19464_v39 = vld [vmem:[#allocation78_spill] sm:$0xff]  ;;  %v11119_v51 = vpop.f32.mrb[66].mxu0 }
 0x47b   : > { %19457 = vst [vmem:[#allocation124_spill] sm:$0xff] %v16465_v0  ;;  %v19462_v49 = vmax.f32 %v15872_v52, %v16100_v17  ;;  %v5616_v4 = vadd.f32 %v16316_v50, %v5615_v19  ;;  %v19468_v33 = vmax.f32 %v19466_v34, %v19467_v36  ;;  %v7517_v52 = vmax.f32 %v6449_v37, %v7197_v5  ;;  %v5618_v55 = vpop.f32.mrb[67].mxu0  ;;  %v6456_v19 = vpop.f32.mrb[181].mxu1  ;;  %v19478_v17 = vld [vmem:[#allocation64_spill] sm:$0xff] }
 0x47c   : > { %6713 = vmatmul.mubr.bf16.gmra.mrb[28].mxu1 %v19460_v48  ;;  %v19465_v48 = vmax.f32 %v19463_v42, %v19464_v39  ;;  %v5824_v7 = vmul.f32 0.2, %v5624_v24  ;;  %v6455_v42 = vadd.f32 %v6454_v61, %v15928_v28  ;;  %v6457_v37 = vadd.f32 %v6456_v19, %v15936_v6  ;;  %v6458_v5 = vpop.f32.mrb[182].mxu1  ;;  %v19473_v19 = vld [vmem:[#allocation77_spill] sm:$0xff] }
 0x47d   : > { %6722 = vmatprep.mubr.bf16.mxu1 %v19128_v41  ;;  %v16487_v58 = vmax.f32 %v19462_v49, %v16465_v0  ;;  %v16501_v22 = vmax.f32 %v19468_v33, %v7516_v60  ;;  %v5627_v49 = vadd.f32 %v16316_v50, %v11119_v51  ;;  %v5822_v38 = vmul.f32 0.2, %v5616_v4  ;;  %v6460_v61 = vpop.f32.mrb[183].mxu1 }
 0x47e   : > { %v16494_v25 = vmax.f32 %v19465_v48, %v7515_v29  ;;  %v7198_v0 = vmul.f32 0.2, %v6451_v63  ;;  %v5619_v29 = vadd.f32 %v16316_v50, %v5618_v55  ;;  %v16506_v39 = vmax.f32 %v5624_v24, %v5824_v7 }
 0x47f   : > { %v19470_v48 = vmax.f32 %v15974_v45, %v16009_v10  ;;  %v5825_v33 = vmul.f32 0.2, %v5627_v49  ;;  %v16519_v55 = vmax.f32 %v5616_v4, %v5822_v38  ;;  %v7199_v60 = vmul.f32 0.2, %v6455_v42  ;;  %v19474_v38 = vld [vmem:[#allocation86_spill] sm:$0xff] }
 0x480   : > { %19469 = vst [vmem:[#allocation69_spill] sm:$0xff] %v16506_v39  ;;  %v7518_v34 = vmax.f32 %v6451_v63, %v7198_v0  ;;  %v5823_v24 = vmul.f32 0.2, %v5619_v29  ;;  %v16523_v45 = vmax.f32 %v16174_v13, %v16506_v39  ;;  %v7200_v51 = vmul.f32 0.2, %v6457_v37  ;;  %v11122_v13 = vpop.f32.mrb[68].mxu0 }
 0x481   : > { %v16511_v36 = vmax.f32 %v19470_v48, %v7517_v52  ;;  %19471 = vst [vmem:[#allocation38_spill] sm:$0xff] %v16519_v55  ;;  %v16525_v10 = vmax.f32 %v5627_v49, %v5825_v33  ;;  %v6459_v7 = vadd.f32 %v6458_v5, %v15928_v28  ;;  %v6126_v52 = vmax.f32 %v16188_v57, %v16519_v55  ;;  %v19479_v49 = vld [vmem:[#allocation54_spill] sm:$0xff] }
 0x482   : > { %v19475_v4 = vmax.f32 %v19473_v19, %v19474_v38  ;;  %v16535_v0 = vmax.f32 %v5619_v29, %v5823_v24  ;;  %v7519_v48 = vmax.f32 %v6455_v42, %v7199_v60  ;;  %v19480_v33 = vpack.c.bf16 %v19478_v17, %v19479_v49  ;;  %9671 = vst [vmem:[%s16517_s11 + $0x10] sm:$0xff] %v16523_v45  ;;  %v5631_v42 = vpop.f32.mrb[69].mxu0  ;;  %v19481_v60 = vld [vmem:[#allocation79_spill] sm:$0xff]  ;;  %v19486_v49 = vld [vmem:[#allocation90_spill] sm:$0xff] }
 0x483   : > { %19472 = vst [vmem:[#allocation75_spill] sm:$0xff] %v16525_v10  ;;  %v16544_v5 = vmax.f32 %v16202_v31, %v16525_v10  ;;  %v7520_v29 = vmax.f32 %v6457_v37, %v7200_v51  ;;  %9669 = vst [vmem:[%s16517_s11] sm:$0xff] %v6126_v52  ;;  %v19482_v31 = vld [vmem:[#allocation89_spill] sm:$0xff]  ;;  %v19485_v51 = vld [vmem:[#allocation82_spill] sm:$0xff]  ;;  %v6464_v10 = vpop.f32.mrb[184].mxu1 }
 0x484   : > { %v16533_v63 = vmax.f32 %v19475_v4, %v7518_v34  ;;  %19477 = vst [vmem:[#allocation76_spill] sm:$0xff] %v16535_v0  ;;  %6723 = vmatmul.mubr.bf16.gmra.mrb[32].mxu1 %v19480_v33  ;;  %v5640_v34 = vadd.f32 %v16316_v50, %v11122_v13  ;;  %v6127_v17 = vmax.f32 %v16215_v20, %v16535_v0  ;;  %v11123_v13 = vpop.f32.mrb[70].mxu0  ;;  %v7201_v20 = vmul.f32 0.2, %v6459_v7 }
 0x485   : > { %6732 = vmatprep.mubr.bf16.mxu1 %v19128_v41  ;;  %v19483_v19 = vmax.f32 %v19481_v60, %v19482_v31  ;;  %v5632_v4 = vadd.f32 %v16316_v50, %v5631_v42  ;;  %9672 = vst [vmem:[%s16517_s11 + $0x18] sm:$0xff] %v16544_v5  ;;  %v19487_v33 = vmax.f32 %v19485_v51, %v19486_v49  ;;  %v5634_v24 = vpop.f32.mrb[71].mxu0 }
 0x486   : > { %19476 = vst [vmem:[#allocation78_spill] sm:$0xff] %v16533_v63  ;;  %v5828_v37 = vmul.f32 0.2, %v5640_v34  ;;  %v5643_v39 = vadd.f32 %v16316_v50, %v11123_v13  ;;  %9670 = vst [vmem:[%s16517_s11 + $0x8] sm:$0xff] %v6127_v17  ;;  %v5635_v42 = vadd.f32 %v16316_v50, %v5634_v24  ;;  %v16572_v31 = vpack.c.bf16 %v6127_v17, %v6126_v52  ;;  %v19498_v63 = vld [vmem:[#allocation62_spill] sm:$0xff] }
 0x487   : > { %v16558_v38 = vmax.f32 %v19483_v19, %v7519_v48  ;;  %v16566_v57 = vmax.f32 %v19487_v33, %v7520_v29  ;;  %v5826_v60 = vmul.f32 0.2, %v5632_v4  ;;  %v6461_v48 = vadd.f32 %v6460_v61, %v15936_v6  ;;  %v6466_v19 = vpop.f32.mrb[185].mxu1 }
 0x488   : > { %19489 = vst [vmem:[#allocation86_spill] sm:$0xff] %v16572_v31  ;;  %v16574_v55 = vmax.f32 %v5640_v34, %v5828_v37  ;;  %v7521_v0 = vmax.f32 %v6459_v7, %v7201_v20  ;;  %v5829_v51 = vmul.f32 0.2, %v5643_v39  ;;  %v6465_v29 = vadd.f32 %v6464_v10, %v15928_v28  ;;  %v6468_v49 = vpop.f32.mrb[186].mxu1  ;;  %9025 = vmatprep.mubr.bf16.mxu0 %v16572_v31  ;;  %v19492_v34 = vld [vmem:[#allocation84_spill] sm:$0xff]  ;;  %v19493_v7 = vld [vmem:[#allocation91_spill] sm:$0xff] }
 0x489   : > { %19484 = vst [vmem:[#allocation81_spill] sm:$0xff] %v16558_v38  ;;  %19488 = vst [vmem:[#allocation77_spill] sm:$0xff] %v16566_v57  ;;  %v16577_v33 = vmax.f32 %v5632_v4, %v5826_v60  ;;  %v7202_v13 = vmul.f32 0.2, %v6461_v48  ;;  %v5827_v57 = vmul.f32 0.2, %v5635_v42  ;;  %v6467_v61 = vadd.f32 %v6466_v19, %v15936_v6 }
 0x48a   : > { %19490 = vst [vmem:[#allocation64_spill] sm:$0xff] %v16574_v55  ;;  %v6470_v24 = vpop.f32.mrb[187].mxu1  ;;  %v16583_v52 = vmax.f32 %v16265_v46, %v16574_v55  ;;  %v19494_v17 = vmax.f32 %v19492_v34, %v19493_v7  ;;  %v16590_v10 = vmax.f32 %v5643_v39, %v5829_v51  ;;  %v7203_v4 = vmul.f32 0.2, %v6465_v29  ;;  %v19496_v20 = vld [vmem:[#allocation14_spill] sm:$0xff]  ;;  %v11126_v46 = vpop.f32.mrb[72].mxu0 }
 0x48b   : > { %19491 = vst [vmem:[#allocation54_spill] sm:$0xff] %v16577_v33  ;;  %9026 = vmatmul.mubr.bf16.vlgmr.msra.gmra.mrb[80].mxu0 %v19496_v20  ;;  %v16595_v60 = vmax.f32 %v16280_v11, %v16577_v33  ;;  %v7522_v19 = vmax.f32 %v6461_v48, %v7202_v13  ;;  %v16597_v31 = vmax.f32 %v5635_v42, %v5827_v57  ;;  %v7204_v38 = vmul.f32 0.2, %v6467_v61  ;;  %v19499_v34 = vld [vmem:[#allocation53_spill] sm:$0xff]  ;;  %v5647_v48 = vpop.f32.mrb[73].mxu0  ;;  %v19502_v42 = vld [vmem:[#allocation92_spill] sm:$0xff] }
 0x48c   : > { %v16588_v37 = vmax.f32 %v19494_v17, %v7521_v0  ;;  %19495 = vst [vmem:[#allocation79_spill] sm:$0xff] %v16590_v10  ;;  %v19500_v0 = vpack.c.bf16 %v19498_v63, %v19499_v34  ;;  %9675 = vst [vmem:[%s16517_s11 + $0x30] sm:$0xff] %v16583_v52  ;;  %v16606_v39 = vmax.f32 %v16295_v3, %v16590_v10  ;;  %v19501_v63 = vld [vmem:[#allocation87_spill] sm:$0xff]  ;;  %v19506_v34 = vld [vmem:[#allocation28_spill] sm:$0xff] }
 0x48d   : > { %19497 = vst [vmem:[#allocation89_spill] sm:$0xff] %v16597_v31  ;;  %v7523_v51 = vmax.f32 %v6465_v29, %v7203_v4  ;;  %v5656_v57 = vadd.f32 %v16316_v50, %v11126_v46  ;;  %9673 = vst [vmem:[%s16517_s11 + $0x20] sm:$0xff] %v16595_v60  ;;  %v19503_v13 = vmax.f32 %v19501_v63, %v19502_v42  ;;  %v11127_v4 = vpop.f32.mrb[74].mxu0  ;;  %v19505_v46 = vld [vmem:[#allocation93_spill] sm:$0xff]  ;;  %v6474_v42 = vpop.f32.mrb[188].mxu1 }
 0x48e   : > { %6733 = vmatmul.mubr.bf16.gmra.mrb[36].mxu1 %v19500_v0  ;;  %v6131_v3 = vmax.f32 %v16309_v35, %v16597_v31  ;;  %v7524_v29 = vmax.f32 %v6467_v61, %v7204_v38  ;;  %9676 = vst [vmem:[%s16517_s11 + $0x38] sm:$0xff] %v16606_v39  ;;  %v19507_v0 = vmax.f32 %v19505_v46, %v19506_v34  ;;  %v5650_v35 = vpop.f32.mrb[75].mxu0  ;;  %v19511_v38 = vld [vmem:[#allocation40_spill] sm:$0xff]  ;;  %v6476_v34 = vpop.f32.mrb[189].mxu1 }
 0x48f   : > { %6742 = vmatprep.mubr.bf16.mxu1 %v19128_v41  ;;  %v16617_v7 = vmax.f32 %v19503_v13, %v7522_v19  ;;  %v5832_v20 = vmul.f32 0.2, %v5656_v57  ;;  %v16632_v19 = vpack.c.bf16 %v16544_v5, %v16523_v45  ;;  %v5648_v63 = vadd.f32 %v16316_v50, %v5647_v48  ;;  %v19510_v13 = vld [vmem:[#allocation96_spill] sm:$0xff]  ;;  %v6478_v10 = vpop.f32.mrb[190].mxu1  ;;  %v11130_v31 = vpop.f32.mrb[76].mxu0 }
 0x490   : > { %v16628_v11 = vmax.f32 %v19507_v0, %v7523_v51  ;;  %9674 = vst [vmem:[%s16517_s11 + $0x28] sm:$0xff] %v6131_v3  ;;  %v19512_v61 = vmax.f32 %v19510_v13, %v19511_v38  ;;  %v6469_v55 = vadd.f32 %v6468_v49, %v15928_v28  ;;  %v5659_v51 = vadd.f32 %v16316_v50, %v11127_v4 }
 0x491   : > { %19504 = vst [vmem:[#allocation82_spill] sm:$0xff] %v16617_v7  ;;  %19509 = vst [vmem:[#allocation84_spill] sm:$0xff] %v16632_v19  ;;  %v6471_v46 = vadd.f32 %v6470_v24, %v15936_v6  ;;  %v16644_v0 = vmax.f32 %v5656_v57, %v5832_v20  ;;  %9035 = vmatprep.mubr.bf16.mxu0 %v16632_v19  ;;  %v5830_v45 = vmul.f32 0.2, %v5648_v63 }
 0x492   : > { %19508 = vst [vmem:[#allocation90_spill] sm:$0xff] %v16628_v11  ;;  %v16639_v17 = vmax.f32 %v19512_v61, %v7524_v29  ;;  %v5651_v5 = vadd.f32 %v16316_v50, %v5650_v35  ;;  %v6475_v48 = vadd.f32 %v6474_v42, %v15928_v28  ;;  %v7205_v13 = vmul.f32 0.2, %v6469_v55  ;;  %v19514_v61 = vld [vmem:[#allocation58_spill] sm:$0xff]  ;;  %v6480_v35 = vpop.f32.mrb[191].mxu1  ;;  %v19515_v11 = vld [vmem:[#allocation68_spill] sm:$0xff] }
 0x493   : > { %v5833_v29 = vmul.f32 0.2, %v5659_v51  ;;  %v7206_v38 = vmul.f32 0.2, %v6471_v46  ;;  %v6477_v49 = vadd.f32 %v6476_v34, %v15936_v6  ;;  %v16652_v24 = vmax.f32 %v16368_v44, %v16644_v0  ;;  %9036 = vmatmul.mubr.bf16.gmra.mrb[84].mxu0 %v19514_v61  ;;  %v19516_v34 = vld [vmem:[#allocation63_spill] sm:$0xff] }
 0x494   : > { %19513 = vst [vmem:[#allocation91_spill] sm:$0xff] %v16639_v17  ;;  %v16654_v20 = vmax.f32 %v5648_v63, %v5830_v45  ;;  %v5831_v57 = vmul.f32 0.2, %v5651_v5  ;;  %v7207_v4 = vmul.f32 0.2, %v6475_v48  ;;  %v7525_v19 = vmax.f32 %v6469_v55, %v7205_v13 }
 0x495   : > { %v16657_v42 = vmax.f32 %v5659_v51, %v5833_v29  ;;  %v7526_v33 = vmax.f32 %v6471_v46, %v7206_v38  ;;  %v7208_v17 = vmul.f32 0.2, %v6477_v49  ;;  %v19517_v7 = vpack.c.bf16 %v19515_v11, %v19516_v34  ;;  %9679 = vst [vmem:[%s16517_s11 + $0x50] sm:$0xff] %v16652_v24  ;;  %v5663_v51 = vpop.f32.mrb[77].mxu0 }
 0x496   : > { %v16666_v44 = vmax.f32 %v16381_v27, %v16654_v20  ;;  %v16668_v63 = vmax.f32 %v5651_v5, %v5831_v57  ;;  %v7527_v45 = vmax.f32 %v6475_v48, %v7207_v4  ;;  %v5672_v55 = vadd.f32 %v16316_v50, %v11130_v31  ;;  %v19519_v5 = vld [vmem:[#allocation99_spill] sm:$0xff]  ;;  %v19520_v48 = vld [vmem:[#allocation102_spill] sm:$0xff]  ;;  %v11131_v29 = vpop.f32.mrb[78].mxu0  ;;  %v6484_v4 = vpop.f32.mrb[192].mxu1 }
 0x497   : > { %6743 = vmatmul.mubr.bf16.gmra.mrb[40].mxu1 %v19517_v7  ;;  %v19518_v46 = vmax.f32 %v16116_v18, %v16155_v54  ;;  %v16679_v7 = vmax.f32 %v16400_v47, %v16657_v42  ;;  %v19521_v13 = vmax.f32 %v19519_v5, %v19520_v48  ;;  %v19522_v47 = vmax.f32 %v16135_v53, %v16179_v59  ;;  %v5666_v57 = vpop.f32.mrb[79].mxu0  ;;  %v6486_v5 = vpop.f32.mrb[193].mxu1 }
 0x498   : > { %6752 = vmatprep.mubr.bf16.mxu1 %v19128_v41  ;;  %9677 = vst [vmem:[%s16517_s11 + $0x40] sm:$0xff] %v16666_v44  ;;  %v6135_v18 = vmax.f32 %v16417_v23, %v16668_v63  ;;  %v5836_v38 = vmul.f32 0.2, %v5672_v55  ;;  %v16702_v34 = vpack.c.bf16 %v6131_v3, %v16595_v60  ;;  %v6479_v23 = vadd.f32 %v6478_v10, %v15928_v28 }
 0x499   : > { %v16675_v11 = vmax.f32 %v19518_v46, %v7525_v19  ;;  %v16686_v31 = vmax.f32 %v19521_v13, %v7526_v33  ;;  %v16697_v19 = vmax.f32 %v19522_v47, %v7527_v45  ;;  %9680 = vst [vmem:[%s16517_s11 + $0x58] sm:$0xff] %v16679_v7  ;;  %v7528_v33 = vmax.f32 %v6477_v49, %v7208_v17  ;;  %v6488_v13 = vpop.f32.mrb[194].mxu1  ;;  %v19525_v47 = vld [vmem:[#allocation16_spill] sm:$0xff] }
 0x49a   : > { %19523 = vst [vmem:[#allocation62_spill] sm:$0xff] %v16702_v34  ;;  %v5664_v46 = vadd.f32 %v16316_v50, %v5663_v51  ;;  %9678 = vst [vmem:[%s16517_s11 + $0x48] sm:$0xff] %v6135_v18  ;;  %v16707_v48 = vmax.f32 %v5672_v55, %v5836_v38  ;;  %v5675_v53 = vadd.f32 %v16316_v50, %v11131_v29  ;;  %9045 = vmatprep.mubr.bf16.mxu0 %v16702_v34  ;;  %v6490_v55 = vpop.f32.mrb[195].mxu1 }
 0x49b   : > { %v6481_v59 = vadd.f32 %v6480_v35, %v15936_v6  ;;  %v5667_v45 = vadd.f32 %v16316_v50, %v5666_v57  ;;  %v19524_v17 = vmax.f32 %v16139_v43, %v16182_v32  ;;  %v7209_v3 = vmul.f32 0.2, %v6479_v23  ;;  %9046 = vmatmul.mubr.bf16.gmra.mrb[88].mxu0 %v19525_v47 }
 0x49c   : > { %v5834_v10 = vmul.f32 0.2, %v5664_v46  ;;  %v6485_v49 = vadd.f32 %v6484_v4, %v15928_v28  ;;  %v6140_v51 = vmax.f32 %v16454_v8, %v16707_v48  ;;  %v5837_v35 = vmul.f32 0.2, %v5675_v53 }
 0x49d   : > { %v16715_v60 = vmax.f32 %v19524_v17, %v7528_v33  ;;  %v7210_v29 = vmul.f32 0.2, %v6481_v59  ;;  %v5835_v50 = vmul.f32 0.2, %v5667_v45  ;;  %v7529_v43 = vmax.f32 %v6479_v23, %v7209_v3  ;;  %v19526_v33 = vld [vmem:[#allocation66_spill] sm:$0xff]  ;;  %v19527_v17 = vld [vmem:[#allocation61_spill] sm:$0xff] }
 0x49e   : > { %v16722_v38 = vmax.f32 %v5664_v46, %v5834_v10  ;;  %v7211_v32 = vmul.f32 0.2, %v6485_v49  ;;  %v6487_v57 = vadd.f32 %v6486_v5, %v15936_v6  ;;  %v19528_v27 = vpack.c.bf16 %v19526_v33, %v19527_v17  ;;  %9683 = vst [vmem:[%s16517_s11 + $0x70] sm:$0xff] %v6140_v51 }
 0x49f   : > { %v16729_v4 = vmax.f32 %v5675_v53, %v5837_v35  ;;  %v7530_v8 = vmax.f32 %v6481_v59, %v7210_v29  ;;  %v16731_v54 = vmax.f32 %v5667_v45, %v5835_v50  ;;  %v16735_v47 = vpack.c.bf16 %v16606_v39, %v16583_v52  ;;  %v19546_v52 = vld [vmem:[#allocation57_spill] sm:$0xff] }
 0x4a0   : > { %6753 = vmatmul.mubr.bf16.gmra.mrb[44].mxu1 %v19528_v27  ;;  %v6138_v46 = vmax.f32 %v16463_v2, %v16722_v38  ;;  %v19530_v23 = vmax.f32 %v16148_v62, %v16196_v9  ;;  %v7531_v5 = vmax.f32 %v6485_v49, %v7211_v32  ;;  %v7212_v53 = vmul.f32 0.2, %v6487_v57  ;;  %v6494_v9 = vpop.f32.mrb[196].mxu1 }
 0x4a1   : > { %19529 = vst [vmem:[#allocation53_spill] sm:$0xff] %v16735_v47  ;;  %6762 = vmatprep.mubr.bf16.mxu1 %v19128_v41  ;;  %v6141_v59 = vmax.f32 %v16477_v16, %v16729_v4  ;;  %v19531_v39 = vmax.f32 %v16159_v15, %v16209_v21  ;;  %v6139_v62 = vmax.f32 %v16487_v58, %v16731_v54  ;;  %v6496_v21 = vpop.f32.mrb[197].mxu1 }
 0x4a2   : > { %v16743_v27 = vmax.f32 %v19530_v23, %v7529_v43  ;;  %9055 = vmatprep.mubr.bf16.mxu0 %v16735_v47  ;;  %9681 = vst [vmem:[%s16517_s11 + $0x60] sm:$0xff] %v6138_v46  ;;  %v19532_v16 = vmax.f32 %v16224_v14, %v16255_v30  ;;  %v7532_v3 = vmax.f32 %v6487_v57, %v7212_v53  ;;  %v6498_v50 = vpop.f32.mrb[198].mxu1  ;;  %v19534_v43 = vld [vmem:[#allocation34_spill] sm:$0xff]  ;;  %v19538_v23 = vld [vmem:[#allocation11_spill] sm:$0xff] }
 0x4a3   : > { %v16752_v45 = vmax.f32 %v19531_v39, %v7530_v8  ;;  %v6489_v15 = vadd.f32 %v6488_v13, %v15928_v28  ;;  %9684 = vst [vmem:[%s16517_s11 + $0x78] sm:$0xff] %v6141_v59  ;;  %9682 = vst [vmem:[%s16517_s11 + $0x68] sm:$0xff] %v6139_v62  ;;  %v6491_v58 = vadd.f32 %v6490_v55, %v15936_v6  ;;  %v19535_v14 = vld [vmem:[#allocation110_spill] sm:$0xff]  ;;  %v6500_v33 = vpop.f32.mrb[199].mxu1  ;;  %9056 = vmatmul.mubr.bf16.gmra.mrb[92].mxu0 %v19538_v23  ;;  %v19539_v39 = vld [vmem:[#allocation35_spill] sm:$0xff]  ;;  %s9898_s11 = sshll.u32 %s19720_s23, 2 }
 0x4a4   : > { %v16763_v10 = vmax.f32 %v19532_v16, %v7531_v5  ;;  %v6495_v49 = vadd.f32 %v6494_v9, %v15928_v28  ;;  %v6497_v35 = vadd.f32 %v6496_v21, %v15936_v6  ;;  %v16772_v29 = vpack.c.bf16 %v6135_v18, %v16666_v44  ;;  %v19540_v9 = vld [vmem:[#allocation39_spill] sm:$0xff]  ;;  %s1173_s15 = sadd.s32 %s9899_s12, %s9898_s11 }
 0x4a5   : > { %v19536_v30 = vmax.f32 %v19534_v43, %v19535_v14  ;;  %v7213_v57 = vmul.f32 0.2, %v6489_v15  ;;  %v6499_v13 = vadd.f32 %v6498_v50, %v15928_v28  ;;  %v16782_v55 = vpack.c.bf16 %v16679_v7, %v16652_v24  ;;  %v19543_v14 = vld [vmem:[#allocation105_spill] sm:$0xff]  ;;  %s9900_s16 = sshll.u32 %s1173_s15, 3 }
 0x4a6   : > { %19533 = vst [vmem:[#allocation87_spill] sm:$0xff] %v16772_v29  ;;  %v7214_v17 = vmul.f32 0.2, %v6491_v58  ;;  %v7215_v8 = vmul.f32 0.2, %v6495_v49  ;;  %v6501_v18 = vadd.f32 %v6500_v33, %v15936_v6  ;;  %9065 = vmatprep.mubr.bf16.mxu0 %v16772_v29  ;;  %v19541_v16 = vpack.c.bf16 %v19539_v39, %v19540_v9  ;;  %v19545_v33 = vld [vmem:[#allocation108_spill] sm:$0xff]  ;;  %s18417_s20 = scalar_lea.vmem %s19702_s19, %s9900_s16 }
 0x4a7   : > { %v16777_v32 = vmax.f32 %v19536_v30, %v7532_v3  ;;  %19537 = vst [vmem:[#allocation92_spill] sm:$0xff] %v16782_v55  ;;  %v7216_v44 = vmul.f32 0.2, %v6497_v35  ;;  %v7533_v5 = vmax.f32 %v6489_v15, %v7213_v57  ;;  %v7217_v53 = vmul.f32 0.2, %v6499_v13  ;;  %v19544_v30 = vld [vmem:[#allocation107_spill] sm:$0xff] }
 0x4a8   : > { %6763 = vmatmul.mubr.bf16.gmra.mrb[48].mxu1 %v19541_v16  ;;  %v16790_v3 = vpack.c.bf16 %v6139_v62, %v6138_v46  ;;  %v16792_v21 = vpack.c.bf16 %v6141_v59, %v6140_v51  ;;  %v7534_v24 = vmax.f32 %v6491_v58, %v7214_v17  ;;  %v7535_v7 = vmax.f32 %v6495_v49, %v7215_v8  ;;  %v19550_v49 = vld [vmem:[#allocation117_spill] sm:$0xff] }
 0x4a9   : > { %v7536_v50 = vmax.f32 %v6497_v35, %v7216_v44  ;;  %v7218_v43 = vmul.f32 0.2, %v6501_v18  ;;  %6772 = vmatprep.mubr.bf16.mxu1 %v19128_v41  ;;  %v6429_v15 = vadd.f32 %v19543_v14, %v15928_v28  ;;  %v6431_v57 = vadd.f32 %v19544_v30, %v15936_v6  ;;  %v19552_v44 = vld [vmem:[#allocation55_spill] sm:$0xff]  ;;  %v19558_v14 = vld [vmem:[#allocation122_spill] sm:$0xff] }
 0x4aa   : > { %19542 = vst [vmem:[#allocation93_spill] sm:$0xff] %v16792_v21  ;;  %v19547_v39 = vmax.f32 %v19545_v33, %v19546_v52  ;;  %v7537_v46 = vmax.f32 %v6499_v13, %v7217_v53  ;;  %v19548_v51 = vmax.f32 %v16274_v40, %v16330_v12  ;;  %v19549_v62 = vmax.f32 %v16289_v26, %v16343_v56  ;;  %v6504_v52 = vpop.f32.mrb[200].mxu1  ;;  %v19553_v13 = vld [vmem:[#allocation27_spill] sm:$0xff]  ;;  %v19554_v53 = vld [vmem:[#allocation120_spill] sm:$0xff] }
 0x4ab   : > { %v19551_v35 = vmax.f32 %v16303_v1, %v19550_v49  ;;  %v7538_v8 = vmax.f32 %v6501_v18, %v7218_v43  ;;  %v19555_v16 = vmax.f32 %v19553_v13, %v19554_v53  ;;  %v6505_v12 = vadd.f32 %v6504_v52, %v15928_v28  ;;  %v19556_v26 = vld [vmem:[#allocation36_spill] sm:$0xff] }
 0x4ac   : > { %v16802_v9 = vmax.f32 %v19547_v39, %v7533_v5  ;;  %v16807_v59 = vmax.f32 %v19548_v51, %v7534_v24  ;;  %v16812_v58 = vmax.f32 %v19549_v62, %v7535_v7  ;;  %v7187_v5 = vmul.f32 0.2, %v19552_v44  ;;  %v6506_v24 = vpop.f32.mrb[201].mxu1  ;;  %v19557_v7 = vld [vmem:[#allocation113_spill] sm:$0xff]  ;;  %v19560_v62 = vld [vmem:[#allocation20_spill] sm:$0xff] }
 0x4ad   : > { %v16817_v17 = vmax.f32 %v19551_v35, %v7536_v50  ;;  %v16823_v40 = vmax.f32 %v19555_v16, %v7537_v46  ;;  %v7188_v56 = vmul.f32 0.2, %v19556_v26  ;;  %v19559_v30 = vmax.f32 %v19557_v7, %v19558_v14  ;;  %v6508_v50 = vpop.f32.mrb[202].mxu1  ;;  %9066 = vmatmul.mubr.bf16.gmra.mrb[96].mxu0 %v19560_v62  ;;  %v19561_v13 = vld [vmem:[#allocation112_spill] sm:$0xff]  ;;  %v19563_v7 = vld [vmem:[#allocation10_spill] sm:$0xff] }
 0x4ae   : > { %v6507_v18 = vadd.f32 %v6506_v24, %v15936_v6  ;;  %v7189_v43 = vmul.f32 0.2, %v6429_v15  ;;  %v7219_v33 = vmul.f32 0.2, %v6505_v12  ;;  %v6509_v39 = vadd.f32 %v6508_v50, %v15928_v28  ;;  %v6510_v51 = vpop.f32.mrb[203].mxu1  ;;  %9075 = vmatprep.mubr.bf16.mxu0 %v16782_v55  ;;  %v19562_v24 = vld [vmem:[#allocation7_spill] sm:$0xff] }
 0x4af   : > { %v16830_v1 = vmax.f32 %v19559_v30, %v7538_v8  ;;  %v7190_v46 = vmul.f32 0.2, %v6431_v57  ;;  %v6511_v35 = vadd.f32 %v6510_v51, %v15936_v6  ;;  %v7507_v52 = vmax.f32 %v19552_v44, %v7187_v5  ;;  %v19565_v50 = vld [vmem:[#allocation114_spill] sm:$0xff]  ;;  %v19566_v5 = vld [vmem:[#allocation116_spill] sm:$0xff] }
 0x4b0   : > { %v7220_v49 = vmul.f32 0.2, %v6507_v18  ;;  %v6435_v8 = vadd.f32 %v19561_v13, %v15928_v28  ;;  %v7539_v53 = vmax.f32 %v6505_v12, %v7219_v33  ;;  %v7221_v16 = vmul.f32 0.2, %v6509_v39 }
 0x4b1   : > { %v19564_v14 = vpack.c.bf16 %v19562_v24, %v19563_v7  ;;  %v7508_v30 = vmax.f32 %v19556_v26, %v7188_v56  ;;  %v6437_v2 = vadd.f32 %v19565_v50, %v15936_v6  ;;  %v7222_v51 = vmul.f32 0.2, %v6511_v35  ;;  %v19567_v24 = vld [vmem:[#allocation119_spill] sm:$0xff]  ;;  %v6514_v56 = vpop.f32.mrb[204].mxu1 }
 0x4b2   : > { %v7540_v62 = vmax.f32 %v6507_v18, %v7220_v49  ;;  %v7509_v44 = vmax.f32 %v6429_v15, %v7189_v43  ;;  %v6439_v12 = vadd.f32 %v19566_v5, %v15928_v28  ;;  %v16849_v33 = vmax.f32 %v7507_v52, %v7539_v53  ;;  %v6516_v15 = vpop.f32.mrb[205].mxu1 }
 0x4b3   : > { %6773 = vmatmul.mubr.bf16.gmra.mrb[52].mxu1 %v19564_v14  ;;  %v7541_v13 = vmax.f32 %v6509_v39, %v7221_v16  ;;  %v7510_v55 = vmax.f32 %v6431_v57, %v7190_v46  ;;  %v6441_v7 = vadd.f32 %v19567_v24, %v15936_v6  ;;  %v7542_v26 = vmax.f32 %v6511_v35, %v7222_v51  ;;  %v6518_v39 = vpop.f32.mrb[206].mxu1  ;;  %v19568_v35 = vld [vmem:[#allocation22_spill] sm:$0xff]  ;;  %v19570_v24 = vld [vmem:[#allocation37_spill] sm:$0xff] }
 0x4b4   : > { %6782 = vmatprep.mubr.bf16.mxu1 %v19128_v41  ;;  %v16853_v14 = vmax.f32 %v7508_v30, %v7540_v62  ;;  %v7191_v50 = vmul.f32 0.2, %v6435_v8  ;;  %v6515_v49 = vadd.f32 %v6514_v56, %v15928_v28  ;;  %v7192_v43 = vmul.f32 0.2, %v6437_v2  ;;  %v6520_v62 = vpop.f32.mrb[207].mxu1 }
 0x4b5   : > { %v16855_v18 = vmax.f32 %v7509_v44, %v7541_v13  ;;  %v16858_v29 = vmax.f32 %v7510_v55, %v7542_v26  ;;  %v6517_v52 = vadd.f32 %v6516_v15, %v15936_v6  ;;  %v7193_v57 = vmul.f32 0.2, %v6439_v12  ;;  %9076 = vmatmul.mubr.bf16.gmra.mrb[100].mxu0 %v19568_v35  ;;  %v19569_v13 = vld [vmem:[#allocation33_spill] sm:$0xff] }
 0x4b6   : > { %v7223_v46 = vmul.f32 0.2, %v6515_v49  ;;  %v6519_v53 = vadd.f32 %v6518_v39, %v15928_v28  ;;  %v7194_v16 = vmul.f32 0.2, %v6441_v7  ;;  %v6521_v51 = vadd.f32 %v6520_v62, %v15936_v6  ;;  %9085 = vmatprep.mubr.bf16.mxu0 %v16790_v3 }
 0x4b7   : > { %v7224_v30 = vmul.f32 0.2, %v6517_v52  ;;  %v7511_v44 = vmax.f32 %v6435_v8, %v7191_v50  ;;  %v19571_v26 = vpack.c.bf16 %v19569_v13, %v19570_v24  ;;  %v7512_v56 = vmax.f32 %v6437_v2, %v7192_v43  ;;  %v6524_v50 = vpop.f32.mrb[208].mxu1 }
 0x4b8   : > { %v7543_v5 = vmax.f32 %v6515_v49, %v7223_v46  ;;  %v7225_v55 = vmul.f32 0.2, %v6519_v53  ;;  %v7226_v23 = vmul.f32 0.2, %v6521_v51  ;;  %v7513_v39 = vmax.f32 %v6439_v12, %v7193_v57  ;;  %v6526_v13 = vpop.f32.mrb[209].mxu1 }
 0x4b9   : > { %v7544_v15 = vmax.f32 %v6517_v52, %v7224_v30  ;;  %v7514_v34 = vmax.f32 %v6441_v7, %v7194_v16  ;;  %v6525_v46 = vadd.f32 %v6524_v50, %v15928_v28  ;;  %v6527_v2 = vadd.f32 %v6526_v13, %v15936_v6  ;;  %v6528_v43 = vpop.f32.mrb[210].mxu1  ;;  %v19573_v30 = vld [vmem:[#allocation5_spill] sm:$0xff]  ;;  %v19576_v13 = vld [vmem:[#allocation78_spill] sm:$0xff] }
 0x4ba   : > { %v16869_v47 = vmax.f32 %v7511_v44, %v7543_v5  ;;  %v7545_v35 = vmax.f32 %v6519_v53, %v7225_v55  ;;  %v7546_v8 = vmax.f32 %v6521_v51, %v7226_v23  ;;  %v6529_v12 = vadd.f32 %v6528_v43, %v15928_v28  ;;  %v6530_v57 = vpop.f32.mrb[211].mxu1  ;;  %v19572_v53 = vld [vmem:[#allocation24_spill] sm:$0xff]  ;;  %v19574_v51 = vld [vmem:[#allocation9_spill] sm:$0xff] }
 0x4bb   : > { %6783 = vmatmul.mubr.bf16.gmra.mrb[56].mxu1 %v19571_v26  ;;  %v16871_v62 = vmax.f32 %v7512_v56, %v7544_v15  ;;  %v7227_v52 = vmul.f32 0.2, %v6525_v46  ;;  %v7228_v7 = vmul.f32 0.2, %v6527_v2  ;;  %v6531_v23 = vadd.f32 %v6530_v57, %v15936_v6 }
 0x4bc   : > { %6792 = vmatprep.mubr.bf16.mxu1 %v19128_v41  ;;  %v16873_v49 = vmax.f32 %v7513_v39, %v7545_v35  ;;  %v16876_v24 = vmax.f32 %v7514_v34, %v7546_v8  ;;  %v7229_v35 = vmul.f32 0.2, %v6529_v12  ;;  %v19575_v34 = vpack.c.bf16 %v19573_v30, %v19574_v51  ;;  %v19579_v30 = vld [vmem:[#allocation44_spill] sm:$0xff] }
 0x4bd   : > { %9086 = vmatmul.mubr.bf16.gmra.mrb[104].mxu0 %v19572_v53  ;;  %v7547_v16 = vmax.f32 %v6525_v46, %v7227_v52  ;;  %v7548_v44 = vmax.f32 %v6527_v2, %v7228_v7  ;;  %v7230_v5 = vmul.f32 0.2, %v6531_v23  ;;  %v6534_v39 = vpop.f32.mrb[212].mxu1 }
 0x4be   : > { %9095 = vmatprep.mubr.bf16.mxu0 %v16792_v21  ;;  %v7549_v26 = vmax.f32 %v6529_v12, %v7229_v35  ;;  %v6535_v50 = vadd.f32 %v6534_v39, %v15928_v28  ;;  %v6536_v46 = vpop.f32.mrb[213].mxu1  ;;  %v19578_v35 = vld [vmem:[#allocation42_spill] sm:$0xff]  ;;  %v19582_v39 = vld [vmem:[#allocation77_spill] sm:$0xff] }
 0x4bf   : > { %v16888_v55 = vmax.f32 %v16494_v25, %v7547_v16  ;;  %v16891_v56 = vmax.f32 %v16501_v22, %v7548_v44  ;;  %v7550_v15 = vmax.f32 %v6531_v23, %v7230_v5  ;;  %v6537_v43 = vadd.f32 %v6536_v46, %v15936_v6  ;;  %v6538_v52 = vpop.f32.mrb[214].mxu1  ;;  %v19577_v22 = vld [vmem:[#allocation60_spill] sm:$0xff]  ;;  %v19581_v5 = vld [vmem:[#allocation81_spill] sm:$0xff] }
 0x4c0   : > { %v16894_v8 = vmax.f32 %v16511_v36, %v7549_v26  ;;  %v7231_v25 = vmul.f32 0.2, %v6535_v50  ;;  %v6539_v12 = vadd.f32 %v6538_v52, %v15928_v28  ;;  %v6540_v57 = vpop.f32.mrb[215].mxu1  ;;  %v19580_v51 = vpack.c.bf16 %v19578_v35, %v19579_v30  ;;  %v19583_v35 = vld [vmem:[#allocation82_spill] sm:$0xff] }
 0x4c1   : > { %v16898_v2 = vmax.f32 %v19576_v13, %v7550_v15  ;;  %v7232_v7 = vmul.f32 0.2, %v6537_v43  ;;  %v6541_v23 = vadd.f32 %v6540_v57, %v15936_v6 }
 0x4c2   : > { %v7551_v36 = vmax.f32 %v6535_v50, %v7231_v25  ;;  %v7233_v16 = vmul.f32 0.2, %v6539_v12 }
 0x4c3   : > { %6793 = vmatmul.mubr.bf16.gmra.mrb[60].mxu1 %v19575_v34  ;;  %v7552_v34 = vmax.f32 %v6537_v43, %v7232_v7  ;;  %v7234_v44 = vmul.f32 0.2, %v6541_v23 }
 0x4c4   : > { %6802 = vmatprep.mubr.bf16.mxu1 %v19128_v41  ;;  %v16909_v26 = vmax.f32 %v19581_v5, %v7551_v36  ;;  %v7553_v15 = vmax.f32 %v6539_v12, %v7233_v16  ;;  %v19585_v5 = vld [vmem:[#allocation18_spill] sm:$0xff] }
 0x4c5   : > { %9096 = vmatmul.mubr.bf16.gmra.mrb[108].mxu0 %v19577_v22  ;;  %v16912_v46 = vmax.f32 %v19582_v39, %v7552_v34  ;;  %v7554_v13 = vmax.f32 %v6541_v23, %v7234_v44  ;;  %v6544_v52 = vpop.f32.mrb[216].mxu1  ;;  %v19588_v22 = vld [vmem:[#allocation91_spill] sm:$0xff] }
 0x4c6   : > { %v16915_v50 = vmax.f32 %v16588_v37, %v7553_v15  ;;  %v6545_v25 = vadd.f32 %v6544_v52, %v15928_v28  ;;  %v6546_v57 = vpop.f32.mrb[217].mxu1  ;;  %v19584_v37 = vld [vmem:[#allocation15_spill] sm:$0xff] }
 0x4c7   : > { %v16919_v43 = vmax.f32 %v19583_v35, %v7554_v13  ;;  %v6547_v7 = vadd.f32 %v6546_v57, %v15936_v6  ;;  %v6548_v30 = vpop.f32.mrb[218].mxu1  ;;  %v19586_v15 = vpack.c.bf16 %v19584_v37, %v19585_v5  ;;  %v19587_v13 = vld [vmem:[#allocation90_spill] sm:$0xff] }
 0x4c8   : > { %v7235_v36 = vmul.f32 0.2, %v6545_v25  ;;  %v6549_v12 = vadd.f32 %v6548_v30, %v15928_v28  ;;  %v6550_v16 = vpop.f32.mrb[219].mxu1 }
 0x4c9   : > { %v6551_v23 = vadd.f32 %v6550_v16, %v15936_v6 }
 0x4ca   : > { %v7555_v34 = vmax.f32 %v6545_v25, %v7235_v36  ;;  %v7237_v44 = vmul.f32 0.2, %v6549_v12 }
 0x4cb   : > { %6803 = vmatmul.mubr.bf16.gmra.mrb[64].mxu1 %v19580_v51  ;;  %v7236_v51 = vmul.f32 0.2, %v6547_v7  ;;  %v7238_v52 = vmul.f32 0.2, %v6551_v23 }
 0x4cc   : > { %6812 = vmatprep.mubr.bf16.mxu1 %v19128_v41  ;;  %v16929_v57 = vmax.f32 %v19587_v13, %v7555_v34  ;;  %v7557_v35 = vmax.f32 %v6549_v12, %v7237_v44 }
 0x4cd   : > { %v7556_v39 = vmax.f32 %v6547_v7, %v7236_v51  ;;  %v7558_v21 = vmax.f32 %v6551_v23, %v7238_v52  ;;  %v6554_v53 = vpop.f32.mrb[220].mxu1 }
 0x4ce   : > { %v16935_v25 = vmax.f32 %v16675_v11, %v7557_v35  ;;  %v6555_v36 = vadd.f32 %v6554_v53, %v15928_v28  ;;  %v6556_v16 = vpop.f32.mrb[221].mxu1  ;;  %v19589_v11 = vld [vmem:[#allocation41_spill] sm:$0xff] }
 0x4cf   : > { %v16932_v30 = vmax.f32 %v19588_v22, %v7556_v39  ;;  %v16939_v7 = vmax.f32 %v16686_v31, %v7558_v21  ;;  %v6557_v51 = vadd.f32 %v6556_v16, %v15936_v6  ;;  %v6558_v37 = vpop.f32.mrb[222].mxu1  ;;  %v19590_v39 = vld [vmem:[#allocation43_spill] sm:$0xff] }
 0x4d0   : > { %v7239_v34 = vmul.f32 0.2, %v6555_v36  ;;  %v6559_v12 = vadd.f32 %v6558_v37, %v15928_v28  ;;  %v6560_v44 = vpop.f32.mrb[223].mxu1  ;;  %v19591_v52 = vpack.c.bf16 %v19589_v11, %v19590_v39 }
 0x4d1   : > { %v7240_v22 = vmul.f32 0.2, %v6557_v51  ;;  %v6561_v23 = vadd.f32 %v6560_v44, %v15936_v6 }
 0x4d2   : > { %v7559_v5 = vmax.f32 %v6555_v36, %v7239_v34 }
 0x4d3   : > { %6813 = vmatmul.mubr.bf16.gmra.mrb[68].mxu1 %v19586_v15  ;;  %v7241_v15 = vmul.f32 0.2, %v6559_v12  ;;  %v7560_v53 = vmax.f32 %v6557_v51, %v7240_v22  ;;  %v7242_v13 = vmul.f32 0.2, %v6561_v23 }
 0x4d4   : > { %6822 = vmatprep.mubr.bf16.mxu1 %v19128_v41  ;;  %v16949_v31 = vmax.f32 %v16697_v19, %v7559_v5 }
 0x4d5   : > { %v7561_v21 = vmax.f32 %v6559_v12, %v7241_v15  ;;  %v16952_v35 = vmax.f32 %v16715_v60, %v7560_v53  ;;  %v7562_v16 = vmax.f32 %v6561_v23, %v7242_v13  ;;  %v6564_v37 = vpop.f32.mrb[224].mxu1 }
 0x4d6   : > { %v6565_v34 = vadd.f32 %v6564_v37, %v15928_v28  ;;  %v6566_v44 = vpop.f32.mrb[225].mxu1 }
 0x4d7   : > { %v16955_v36 = vmax.f32 %v16743_v27, %v7561_v21  ;;  %v16959_v51 = vmax.f32 %v16752_v45, %v7562_v16  ;;  %v6567_v22 = vadd.f32 %v6566_v44, %v15936_v6  ;;  %v6568_v11 = vpop.f32.mrb[226].mxu1  ;;  %v19592_v27 = vld [vmem:[#allocation13_spill] sm:$0xff] }
 0x4d8   : > { %v7243_v19 = vmul.f32 0.2, %v6565_v34  ;;  %v6569_v12 = vadd.f32 %v6568_v11, %v15928_v28  ;;  %v6570_v5 = vpop.f32.mrb[227].mxu1 }
 0x4d9   : > { %v7244_v60 = vmul.f32 0.2, %v6567_v22  ;;  %v6571_v23 = vadd.f32 %v6570_v5, %v15936_v6 }
 0x4da   : > { %v7563_v15 = vmax.f32 %v6565_v34, %v7243_v19  ;;  %v7245_v39 = vmul.f32 0.2, %v6569_v12 }
 0x4db   : > { %6823 = vmatmul.mubr.bf16.gmra.mrb[72].mxu1 %v19591_v52  ;;  %v19593_v52 = vld [vmem:[#allocation17_spill] sm:$0xff]  ;;  %v7564_v13 = vmax.f32 %v6567_v22, %v7244_v60  ;;  %v7246_v21 = vmul.f32 0.2, %v6571_v23 }
 0x4dc   : > { %6832 = vmatprep.mubr.bf16.mxu1 %v19128_v41  ;;  %v19594_v53 = vpack.c.bf16 %v19592_v27, %v19593_v52  ;;  %v16969_v45 = vmax.f32 %v16763_v10, %v7563_v15  ;;  %v7565_v16 = vmax.f32 %v6569_v12, %v7245_v39 }
 0x4dd   : > { %v16972_v37 = vmax.f32 %v16777_v32, %v7564_v13  ;;  %v7566_v44 = vmax.f32 %v6571_v23, %v7246_v21  ;;  %v6574_v11 = vpop.f32.mrb[228].mxu1 }
 0x4de   : > { %v16975_v34 = vmax.f32 %v16802_v9, %v7565_v16  ;;  %v6575_v19 = vadd.f32 %v6574_v11, %v15928_v28  ;;  %v6576_v5 = vpop.f32.mrb[229].mxu1  ;;  %v19595_v9 = vld [vmem:[#allocation45_spill] sm:$0xff] }
 0x4df   : > { %v16979_v22 = vmax.f32 %v16807_v59, %v7566_v44  ;;  %v6577_v60 = vadd.f32 %v6576_v5, %v15936_v6  ;;  %v6578_v27 = vpop.f32.mrb[230].mxu1 }
 0x4e0   : > { %v7247_v10 = vmul.f32 0.2, %v6575_v19  ;;  %v6579_v12 = vadd.f32 %v6578_v27, %v15928_v28  ;;  %v6580_v15 = vpop.f32.mrb[231].mxu1 }
 0x4e1   : > { %v7248_v32 = vmul.f32 0.2, %v6577_v60  ;;  %v6581_v23 = vadd.f32 %v6580_v15, %v15936_v6 }
 0x4e2   : > { %v7567_v39 = vmax.f32 %v6575_v19, %v7247_v10  ;;  %v7249_v52 = vmul.f32 0.2, %v6579_v12 }
 0x4e3   : > { %6833 = vmatmul.mubr.bf16.gmra.mrb[76].mxu1 %v19594_v53  ;;  %v19596_v53 = vld [vmem:[#allocation47_spill] sm:$0xff]  ;;  %v7568_v21 = vmax.f32 %v6577_v60, %v7248_v32  ;;  %v7250_v16 = vmul.f32 0.2, %v6581_v23 }
 0x4e4   : > { %6842 = vmatprep.mubr.bf16.mxu1 %v19128_v41  ;;  %v19597_v13 = vpack.c.bf16 %v19595_v9, %v19596_v53  ;;  %v16989_v59 = vmax.f32 %v16812_v58, %v7567_v39  ;;  %v7569_v44 = vmax.f32 %v6579_v12, %v7249_v52 }
 0x4e5   : > { %v16992_v11 = vmax.f32 %v16817_v17, %v7568_v21  ;;  %v7570_v5 = vmax.f32 %v6581_v23, %v7250_v16  ;;  %v6584_v27 = vpop.f32.mrb[232].mxu1 }
 0x4e6   : > { %v16995_v19 = vmax.f32 %v16823_v40, %v7569_v44  ;;  %v6585_v10 = vadd.f32 %v6584_v27, %v15928_v28  ;;  %v6586_v15 = vpop.f32.mrb[233].mxu1  ;;  %v19598_v40 = vld [vmem:[#allocation21_spill] sm:$0xff] }
 0x4e7   : > { %v16999_v60 = vmax.f32 %v16830_v1, %v7570_v5  ;;  %v6587_v32 = vadd.f32 %v6586_v15, %v15936_v6  ;;  %v6588_v9 = vpop.f32.mrb[234].mxu1 }
 0x4e8   : > { %v7251_v58 = vmul.f32 0.2, %v6585_v10  ;;  %v6589_v12 = vadd.f32 %v6588_v9, %v15928_v28  ;;  %v6590_v39 = vpop.f32.mrb[235].mxu1 }
 0x4e9   : > { %v7252_v17 = vmul.f32 0.2, %v6587_v32  ;;  %v6591_v23 = vadd.f32 %v6590_v39, %v15936_v6 }
 0x4ea   : > { %v7571_v52 = vmax.f32 %v6585_v10, %v7251_v58  ;;  %v7253_v53 = vmul.f32 0.2, %v6589_v12 }
 0x4eb   : > { %6843 = vmatmul.mubr.bf16.gmra.mrb[80].mxu1 %v19597_v13  ;;  %v19599_v13 = vld [vmem:[#allocation25_spill] sm:$0xff]  ;;  %v7572_v16 = vmax.f32 %v6587_v32, %v7252_v17  ;;  %v7254_v44 = vmul.f32 0.2, %v6591_v23 }
 0x4ec   : > { %6852 = vmatprep.mubr.bf16.mxu1 %v19128_v41  ;;  %v19600_v21 = vpack.c.bf16 %v19598_v40, %v19599_v13  ;;  %v17009_v1 = vmax.f32 %v16849_v33, %v7571_v52  ;;  %v7573_v5 = vmax.f32 %v6589_v12, %v7253_v53 }
 0x4ed   : > { %v17012_v27 = vmax.f32 %v16853_v14, %v7572_v16  ;;  %v7574_v15 = vmax.f32 %v6591_v23, %v7254_v44  ;;  %v6594_v9 = vpop.f32.mrb[236].mxu1 }
 0x4ee   : > { %v17015_v10 = vmax.f32 %v16855_v18, %v7573_v5  ;;  %v6595_v58 = vadd.f32 %v6594_v9, %v15928_v28  ;;  %v6596_v39 = vpop.f32.mrb[237].mxu1  ;;  %v19601_v18 = vld [vmem:[#allocation46_spill] sm:$0xff] }
 0x4ef   : > { %v17019_v32 = vmax.f32 %v16858_v29, %v7574_v15  ;;  %v6597_v17 = vadd.f32 %v6596_v39, %v15936_v6  ;;  %v6598_v40 = vpop.f32.mrb[238].mxu1 }
 0x4f0   : > { %v7255_v33 = vmul.f32 0.2, %v6595_v58  ;;  %v6599_v12 = vadd.f32 %v6598_v40, %v15928_v28  ;;  %v6600_v52 = vpop.f32.mrb[239].mxu1 }
 0x4f1   : > { %v7256_v14 = vmul.f32 0.2, %v6597_v17  ;;  %v6601_v23 = vadd.f32 %v6600_v52, %v15936_v6 }
 0x4f2   : > { %v7575_v53 = vmax.f32 %v6595_v58, %v7255_v33  ;;  %v7257_v13 = vmul.f32 0.2, %v6599_v12 }
 0x4f3   : > { %6853 = vmatmul.mubr.bf16.gmra.mrb[84].mxu1 %v19600_v21  ;;  %v19602_v21 = vld [vmem:[#allocation48_spill] sm:$0xff]  ;;  %v7576_v44 = vmax.f32 %v6597_v17, %v7256_v14  ;;  %v7258_v5 = vmul.f32 0.2, %v6601_v23 }
 0x4f4   : > { %6862 = vmatprep.mubr.bf16.mxu1 %v19128_v41  ;;  %v19603_v16 = vpack.c.bf16 %v19601_v18, %v19602_v21  ;;  %v17029_v29 = vmax.f32 %v16869_v47, %v7575_v53  ;;  %v7577_v15 = vmax.f32 %v6599_v12, %v7257_v13 }
 0x4f5   : > { %v17032_v9 = vmax.f32 %v16871_v62, %v7576_v44  ;;  %v7578_v39 = vmax.f32 %v6601_v23, %v7258_v5  ;;  %v6604_v40 = vpop.f32.mrb[240].mxu1 }
 0x4f6   : > { %v17035_v58 = vmax.f32 %v16873_v49, %v7577_v15  ;;  %v6605_v33 = vadd.f32 %v6604_v40, %v15928_v28  ;;  %v6606_v52 = vpop.f32.mrb[241].mxu1  ;;  %v19604_v49 = vld [vmem:[#allocation23_spill] sm:$0xff] }
 0x4f7   : > { %v17039_v17 = vmax.f32 %v16876_v24, %v7578_v39  ;;  %v6607_v14 = vadd.f32 %v6606_v52, %v15936_v6  ;;  %v6608_v18 = vpop.f32.mrb[242].mxu1 }
 0x4f8   : > { %v7259_v47 = vmul.f32 0.2, %v6605_v33  ;;  %v6609_v12 = vadd.f32 %v6608_v18, %v15928_v28  ;;  %v6610_v53 = vpop.f32.mrb[243].mxu1 }
 0x4f9   : > { %v7260_v62 = vmul.f32 0.2, %v6607_v14  ;;  %v6611_v23 = vadd.f32 %v6610_v53, %v15936_v6 }
 0x4fa   : > { %v7579_v13 = vmax.f32 %v6605_v33, %v7259_v47  ;;  %v7261_v21 = vmul.f32 0.2, %v6609_v12 }
 0x4fb   : > { %6863 = vmatmul.mubr.bf16.gmra.mrb[88].mxu1 %v19603_v16  ;;  %v19605_v16 = vld [vmem:[#allocation26_spill] sm:$0xff]  ;;  %v7580_v5 = vmax.f32 %v6607_v14, %v7260_v62  ;;  %v7262_v15 = vmul.f32 0.2, %v6611_v23 }
 0x4fc   : > { %6872 = vmatprep.mubr.bf16.mxu1 %v19128_v41  ;;  %v19606_v44 = vpack.c.bf16 %v19604_v49, %v19605_v16  ;;  %v17049_v24 = vmax.f32 %v16888_v55, %v7579_v13  ;;  %v7581_v39 = vmax.f32 %v6609_v12, %v7261_v21 }
 0x4fd   : > { %v17052_v40 = vmax.f32 %v16891_v56, %v7580_v5  ;;  %v7582_v52 = vmax.f32 %v6611_v23, %v7262_v15  ;;  %v6614_v18 = vpop.f32.mrb[244].mxu1 }
 0x4fe   : > { %v17055_v33 = vmax.f32 %v16894_v8, %v7581_v39  ;;  %v6615_v47 = vadd.f32 %v6614_v18, %v15928_v28  ;;  %v6616_v53 = vpop.f32.mrb[245].mxu1  ;;  %v19607_v8 = vld [vmem:[#allocation32_spill] sm:$0xff] }
 0x4ff   : > { %v17059_v14 = vmax.f32 %v16898_v2, %v7582_v52  ;;  %v6617_v62 = vadd.f32 %v6616_v53, %v15936_v6  ;;  %v6618_v49 = vpop.f32.mrb[246].mxu1 }
 0x500   : > { %v7263_v55 = vmul.f32 0.2, %v6615_v47  ;;  %v6619_v12 = vadd.f32 %v6618_v49, %v15928_v28  ;;  %v6620_v13 = vpop.f32.mrb[247].mxu1 }
 0x501   : > { %v7264_v56 = vmul.f32 0.2, %v6617_v62  ;;  %v6621_v23 = vadd.f32 %v6620_v13, %v15936_v6 }
 0x502   : > { %v7583_v21 = vmax.f32 %v6615_v47, %v7263_v55  ;;  %v7265_v16 = vmul.f32 0.2, %v6619_v12 }
 0x503   : > { %6873 = vmatmul.mubr.bf16.gmra.mrb[92].mxu1 %v19606_v44  ;;  %v19608_v44 = vld [vmem:[#allocation51_spill] sm:$0xff]  ;;  %v7584_v15 = vmax.f32 %v6617_v62, %v7264_v56  ;;  %v7266_v39 = vmul.f32 0.2, %v6621_v23 }
 0x504   : > { %6882 = vmatprep.mubr.bf16.mxu1 %v19128_v41  ;;  %v19609_v5 = vpack.c.bf16 %v19607_v8, %v19608_v44  ;;  %v17069_v2 = vmax.f32 %v16909_v26, %v7583_v21  ;;  %v7585_v52 = vmax.f32 %v6619_v12, %v7265_v16 }
 0x505   : > { %v17072_v18 = vmax.f32 %v16912_v46, %v7584_v15  ;;  %v7586_v53 = vmax.f32 %v6621_v23, %v7266_v39  ;;  %v6624_v49 = vpop.f32.mrb[248].mxu1 }
 0x506   : > { %v17075_v47 = vmax.f32 %v16915_v50, %v7585_v52  ;;  %v6625_v55 = vadd.f32 %v6624_v49, %v15928_v28  ;;  %v6626_v13 = vpop.f32.mrb[249].mxu1  ;;  %v19610_v50 = vld [vmem:[#allocation29_spill] sm:$0xff] }
 0x507   : > { %v17079_v62 = vmax.f32 %v16919_v43, %v7586_v53  ;;  %v6627_v56 = vadd.f32 %v6626_v13, %v15936_v6  ;;  %v6628_v8 = vpop.f32.mrb[250].mxu1 }
 0x508   : > { %v7267_v26 = vmul.f32 0.2, %v6625_v55  ;;  %v6629_v12 = vadd.f32 %v6628_v8, %v15928_v28  ;;  %v6630_v21 = vpop.f32.mrb[251].mxu1 }
 0x509   : > { %v7268_v46 = vmul.f32 0.2, %v6627_v56  ;;  %v6631_v23 = vadd.f32 %v6630_v21, %v15936_v6 }
 0x50a   : > { %v7587_v16 = vmax.f32 %v6625_v55, %v7267_v26  ;;  %v7269_v44 = vmul.f32 0.2, %v6629_v12 }
 0x50b   : > { %6883 = vmatmul.mubr.bf16.gmra.mrb[96].mxu1 %v19609_v5  ;;  %v19611_v5 = vld [vmem:[#allocation31_spill] sm:$0xff]  ;;  %v7588_v39 = vmax.f32 %v6627_v56, %v7268_v46  ;;  %v7270_v52 = vmul.f32 0.2, %v6631_v23 }
 0x50c   : > { %6892 = vmatprep.mubr.bf16.mxu1 %v19128_v41  ;;  %v19612_v15 = vpack.c.bf16 %v19610_v50, %v19611_v5  ;;  %v17089_v43 = vmax.f32 %v16929_v57, %v7587_v16  ;;  %v7589_v53 = vmax.f32 %v6629_v12, %v7269_v44 }
 0x50d   : > { %v17092_v49 = vmax.f32 %v16932_v30, %v7588_v39  ;;  %v7590_v13 = vmax.f32 %v6631_v23, %v7270_v52  ;;  %v6634_v8 = vpop.f32.mrb[252].mxu1 }
 0x50e   : > { %v17095_v55 = vmax.f32 %v16935_v25, %v7589_v53  ;;  %v6635_v26 = vadd.f32 %v6634_v8, %v15928_v28  ;;  %v6636_v21 = vpop.f32.mrb[253].mxu1  ;;  %v19613_v25 = vld [vmem:[#allocation67_spill] sm:$0xff] }
 0x50f   : > { %v17099_v56 = vmax.f32 %v16939_v7, %v7590_v13  ;;  %v6637_v46 = vadd.f32 %v6636_v21, %v15936_v6  ;;  %v6638_v50 = vpop.f32.mrb[254].mxu1 }
 0x510   : > { %v7271_v57 = vmul.f32 0.2, %v6635_v26  ;;  %v6639_v12 = vadd.f32 %v6638_v50, %v15928_v28  ;;  %v6640_v16 = vpop.f32.mrb[255].mxu1 }
 0x511   : > { %v7272_v30 = vmul.f32 0.2, %v6637_v46  ;;  %v6641_v23 = vadd.f32 %v6640_v16, %v15936_v6 }
 0x512   : > { %v7591_v44 = vmax.f32 %v6635_v26, %v7271_v57  ;;  %v7273_v5 = vmul.f32 0.2, %v6639_v12 }
 0x513   : > { %6893 = vmatmul.mubr.bf16.gmra.mrb[100].mxu1 %v19612_v15  ;;  %v19614_v15 = vld [vmem:[#allocation65_spill] sm:$0xff]  ;;  %v7592_v52 = vmax.f32 %v6637_v46, %v7272_v30  ;;  %v7274_v53 = vmul.f32 0.2, %v6641_v23 }
 0x514   : > { %6902 = vmatprep.mubr.bf16.mxu1 %v19128_v41  ;;  %v19615_v39 = vpack.c.bf16 %v19613_v25, %v19614_v15  ;;  %v17109_v7 = vmax.f32 %v16949_v31, %v7591_v44  ;;  %v7593_v13 = vmax.f32 %v6639_v12, %v7273_v5 }
 0x515   : > { %v17112_v8 = vmax.f32 %v16952_v35, %v7592_v52  ;;  %v7594_v21 = vmax.f32 %v6641_v23, %v7274_v53  ;;  %v6644_v50 = vpop.f32.mrb[0].mxu1 }
 0x516   : > { %v17115_v26 = vmax.f32 %v16955_v36, %v7593_v13  ;;  %v6645_v57 = vadd.f32 %v6644_v50, %v15928_v28  ;;  %v6646_v16 = vpop.f32.mrb[1].mxu1  ;;  %v19616_v36 = vld [vmem:[#allocation6_spill] sm:$0xff] }
 0x517   : > { %v17119_v46 = vmax.f32 %v16959_v51, %v7594_v21  ;;  %v6647_v30 = vadd.f32 %v6646_v16, %v15936_v6  ;;  %v6648_v25 = vpop.f32.mrb[2].mxu1 }
 0x518   : > { %v7275_v31 = vmul.f32 0.2, %v6645_v57  ;;  %v6649_v12 = vadd.f32 %v6648_v25, %v15928_v28  ;;  %v6650_v44 = vpop.f32.mrb[3].mxu1 }
 0x519   : > { %v7276_v35 = vmul.f32 0.2, %v6647_v30  ;;  %v6651_v23 = vadd.f32 %v6650_v44, %v15936_v6 }
 0x51a   : > { %v7595_v5 = vmax.f32 %v6645_v57, %v7275_v31  ;;  %v7277_v15 = vmul.f32 0.2, %v6649_v12 }
 0x51b   : > { %6903 = vmatmul.mubr.bf16.gmra.mrb[104].mxu1 %v19615_v39  ;;  %v19617_v39 = vld [vmem:[#allocation50_spill] sm:$0xff]  ;;  %v7596_v53 = vmax.f32 %v6647_v30, %v7276_v35  ;;  %v7278_v13 = vmul.f32 0.2, %v6651_v23 }
 0x51c   : > { %6912 = vmatprep.mubr.bf16.mxu1 %v19128_v41  ;;  %v19618_v52 = vpack.c.bf16 %v19616_v36, %v19617_v39  ;;  %v17129_v51 = vmax.f32 %v16969_v45, %v7595_v5  ;;  %v7597_v21 = vmax.f32 %v6649_v12, %v7277_v15 }
 0x51d   : > { %v17132_v50 = vmax.f32 %v16972_v37, %v7596_v53  ;;  %v7598_v16 = vmax.f32 %v6651_v23, %v7278_v13  ;;  %v6654_v25 = vpop.f32.mrb[4].mxu1 }
 0x51e   : > { %v17135_v57 = vmax.f32 %v16975_v34, %v7597_v21  ;;  %v6655_v31 = vadd.f32 %v6654_v25, %v15928_v28  ;;  %v6656_v44 = vpop.f32.mrb[5].mxu1  ;;  %v19619_v34 = vld [vmem:[#allocation70_spill] sm:$0xff] }
 0x51f   : > { %v17139_v30 = vmax.f32 %v16979_v22, %v7598_v16  ;;  %v6657_v35 = vadd.f32 %v6656_v44, %v15936_v6  ;;  %v6658_v36 = vpop.f32.mrb[6].mxu1 }
 0x520   : > { %v7279_v45 = vmul.f32 0.2, %v6655_v31  ;;  %v6659_v12 = vadd.f32 %v6658_v36, %v15928_v28  ;;  %v6660_v5 = vpop.f32.mrb[7].mxu1 }
 0x521   : > { %v7280_v37 = vmul.f32 0.2, %v6657_v35  ;;  %v6661_v23 = vadd.f32 %v6660_v5, %v15936_v6 }
 0x522   : > { %v7599_v15 = vmax.f32 %v6655_v31, %v7279_v45  ;;  %v7281_v39 = vmul.f32 0.2, %v6659_v12 }
 0x523   : > { %6913 = vmatmul.mubr.bf16.gmra.mrb[108].mxu1 %v19618_v52  ;;  %v19620_v52 = vld [vmem:[#allocation56_spill] sm:$0xff]  ;;  %v7600_v13 = vmax.f32 %v6657_v35, %v7280_v37  ;;  %v7282_v21 = vmul.f32 0.2, %v6661_v23 }
 0x524   : > { %6922 = vmatprep.mubr.bf16.mxu1 %v19128_v41  ;;  %v19621_v53 = vpack.c.bf16 %v19619_v34, %v19620_v52  ;;  %v17149_v22 = vmax.f32 %v16989_v59, %v7599_v15  ;;  %v7601_v16 = vmax.f32 %v6659_v12, %v7281_v39 }
 0x525   : > { %v17152_v25 = vmax.f32 %v16992_v11, %v7600_v13  ;;  %v7602_v44 = vmax.f32 %v6661_v23, %v7282_v21  ;;  %v6664_v36 = vpop.f32.mrb[8].mxu1 }
 0x526   : > { %v17155_v31 = vmax.f32 %v16995_v19, %v7601_v16  ;;  %v6665_v45 = vadd.f32 %v6664_v36, %v15928_v28  ;;  %v6666_v5 = vpop.f32.mrb[9].mxu1  ;;  %v19622_v19 = vld [vmem:[#allocation59_spill] sm:$0xff] }
 0x527   : > { %v17159_v35 = vmax.f32 %v16999_v60, %v7602_v44  ;;  %v6667_v37 = vadd.f32 %v6666_v5, %v15936_v6  ;;  %v6668_v34 = vpop.f32.mrb[10].mxu1 }
 0x528   : > { %v7283_v59 = vmul.f32 0.2, %v6665_v45  ;;  %v6669_v12 = vadd.f32 %v6668_v34, %v15928_v28  ;;  %v6670_v15 = vpop.f32.mrb[11].mxu1 }
 0x529   : > { %v7284_v11 = vmul.f32 0.2, %v6667_v37  ;;  %v6671_v23 = vadd.f32 %v6670_v15, %v15936_v6 }
 0x52a   : > { %v7603_v39 = vmax.f32 %v6665_v45, %v7283_v59  ;;  %v7285_v52 = vmul.f32 0.2, %v6669_v12 }
 0x52b   : > { %6923 = vmatmul.mubr.bf16.gmra.mrb[112].mxu1 %v19621_v53  ;;  %v19623_v53 = vld [vmem:[#allocation8_spill] sm:$0xff]  ;;  %v7604_v21 = vmax.f32 %v6667_v37, %v7284_v11  ;;  %v7286_v16 = vmul.f32 0.2, %v6671_v23 }
 0x52c   : > { %6932 = vmatprep.mubr.bf16.mxu1 %v19128_v41  ;;  %v19624_v13 = vpack.c.bf16 %v19622_v19, %v19623_v53  ;;  %v17169_v60 = vmax.f32 %v17009_v1, %v7603_v39  ;;  %v7605_v44 = vmax.f32 %v6669_v12, %v7285_v52 }
 0x52d   : > { %v17172_v36 = vmax.f32 %v17012_v27, %v7604_v21  ;;  %v7606_v5 = vmax.f32 %v6671_v23, %v7286_v16  ;;  %v6674_v34 = vpop.f32.mrb[12].mxu1 }
 0x52e   : > { %v17175_v45 = vmax.f32 %v17015_v10, %v7605_v44  ;;  %v6675_v59 = vadd.f32 %v6674_v34, %v15928_v28  ;;  %v6676_v15 = vpop.f32.mrb[13].mxu1  ;;  %v19625_v10 = vld [vmem:[#allocation74_spill] sm:$0xff] }
 0x52f   : > { %v17179_v37 = vmax.f32 %v17019_v32, %v7606_v5  ;;  %v6677_v11 = vadd.f32 %v6676_v15, %v15936_v6  ;;  %v6678_v19 = vpop.f32.mrb[14].mxu1 }
 0x530   : > { %v7287_v1 = vmul.f32 0.2, %v6675_v59  ;;  %v6679_v12 = vadd.f32 %v6678_v19, %v15928_v28  ;;  %v6680_v39 = vpop.f32.mrb[15].mxu1 }
 0x531   : > { %v7288_v27 = vmul.f32 0.2, %v6677_v11  ;;  %v6681_v23 = vadd.f32 %v6680_v39, %v15936_v6 }
 0x532   : > { %v7607_v52 = vmax.f32 %v6675_v59, %v7287_v1  ;;  %v7289_v53 = vmul.f32 0.2, %v6679_v12 }
 0x533   : > { %6933 = vmatmul.mubr.bf16.gmra.mrb[116].mxu1 %v19624_v13  ;;  %v19626_v13 = vld [vmem:[#allocation72_spill] sm:$0xff]  ;;  %v7608_v16 = vmax.f32 %v6677_v11, %v7288_v27  ;;  %v7290_v44 = vmul.f32 0.2, %v6681_v23 }
 0x534   : > { %6942 = vmatprep.mubr.bf16.mxu1 %v19128_v41  ;;  %v19627_v21 = vpack.c.bf16 %v19625_v10, %v19626_v13  ;;  %v17189_v32 = vmax.f32 %v17029_v29, %v7607_v52  ;;  %v7609_v5 = vmax.f32 %v6679_v12, %v7289_v53 }
 0x535   : > { %v17192_v34 = vmax.f32 %v17032_v9, %v7608_v16  ;;  %v7610_v15 = vmax.f32 %v6681_v23, %v7290_v44  ;;  %v6684_v19 = vpop.f32.mrb[16].mxu1 }
 0x536   : > { %v17195_v59 = vmax.f32 %v17035_v58, %v7609_v5  ;;  %v6685_v1 = vadd.f32 %v6684_v19, %v15928_v28  ;;  %v6686_v39 = vpop.f32.mrb[17].mxu1  ;;  %v19628_v58 = vld [vmem:[#allocation73_spill] sm:$0xff] }
 0x537   : > { %v17199_v11 = vmax.f32 %v17039_v17, %v7610_v15  ;;  %v6687_v27 = vadd.f32 %v6686_v39, %v15936_v6  ;;  %v6688_v10 = vpop.f32.mrb[18].mxu1 }
 0x538   : > { %v7291_v29 = vmul.f32 0.2, %v6685_v1  ;;  %v6689_v12 = vadd.f32 %v6688_v10, %v15928_v28  ;;  %v6690_v52 = vpop.f32.mrb[19].mxu1 }
 0x539   : > { %v7292_v9 = vmul.f32 0.2, %v6687_v27  ;;  %v6691_v23 = vadd.f32 %v6690_v52, %v15936_v6 }
 0x53a   : > { %v7611_v53 = vmax.f32 %v6685_v1, %v7291_v29  ;;  %v7293_v13 = vmul.f32 0.2, %v6689_v12 }
 0x53b   : > { %6943 = vmatmul.mubr.bf16.gmra.mrb[120].mxu1 %v19627_v21  ;;  %v19629_v21 = vld [vmem:[#allocation71_spill] sm:$0xff]  ;;  %v7612_v44 = vmax.f32 %v6687_v27, %v7292_v9  ;;  %v7294_v5 = vmul.f32 0.2, %v6691_v23 }
 0x53c   : > { %6952 = vmatprep.mubr.bf16.mxu1 %v19128_v41  ;;  %v19630_v16 = vpack.c.bf16 %v19628_v58, %v19629_v21  ;;  %v17209_v17 = vmax.f32 %v17049_v24, %v7611_v53  ;;  %v7613_v15 = vmax.f32 %v6689_v12, %v7293_v13 }
 0x53d   : > { %v17212_v19 = vmax.f32 %v17052_v40, %v7612_v44  ;;  %v7614_v39 = vmax.f32 %v6691_v23, %v7294_v5  ;;  %v6694_v10 = vpop.f32.mrb[20].mxu1 }
 0x53e   : > { %v17215_v1 = vmax.f32 %v17055_v33, %v7613_v15  ;;  %v6695_v29 = vadd.f32 %v6694_v10, %v15928_v28  ;;  %v6696_v52 = vpop.f32.mrb[21].mxu1  ;;  %v19631_v33 = vld [vmem:[#allocation88_spill] sm:$0xff] }
 0x53f   : > { %v17219_v27 = vmax.f32 %v17059_v14, %v7614_v39  ;;  %v6697_v9 = vadd.f32 %v6696_v52, %v15936_v6  ;;  %v6698_v58 = vpop.f32.mrb[22].mxu1 }
 0x540   : > { %v7295_v24 = vmul.f32 0.2, %v6695_v29  ;;  %v6699_v12 = vadd.f32 %v6698_v58, %v15928_v28  ;;  %v6700_v53 = vpop.f32.mrb[23].mxu1 }
 0x541   : > { %v7296_v40 = vmul.f32 0.2, %v6697_v9  ;;  %v6701_v23 = vadd.f32 %v6700_v53, %v15936_v6 }
 0x542   : > { %v7615_v13 = vmax.f32 %v6695_v29, %v7295_v24  ;;  %v7297_v21 = vmul.f32 0.2, %v6699_v12 }
 0x543   : > { %6953 = vmatmul.mubr.bf16.gmra.mrb[124].mxu1 %v19630_v16  ;;  %v19632_v16 = vld [vmem:[#allocation83_spill] sm:$0xff]  ;;  %v7616_v5 = vmax.f32 %v6697_v9, %v7296_v40  ;;  %v7298_v15 = vmul.f32 0.2, %v6701_v23 }
 0x544   : > { %6962 = vmatprep.mubr.bf16.mxu1 %v19128_v41  ;;  %v19633_v44 = vpack.c.bf16 %v19631_v33, %v19632_v16  ;;  %v17229_v14 = vmax.f32 %v17069_v2, %v7615_v13  ;;  %v7617_v39 = vmax.f32 %v6699_v12, %v7297_v21 }
 0x545   : > { %v17232_v10 = vmax.f32 %v17072_v18, %v7616_v5  ;;  %v7618_v52 = vmax.f32 %v6701_v23, %v7298_v15  ;;  %v6704_v58 = vpop.f32.mrb[24].mxu1 }
 0x546   : > { %v17235_v29 = vmax.f32 %v17075_v47, %v7617_v39  ;;  %v6705_v24 = vadd.f32 %v6704_v58, %v15928_v28  ;;  %v6706_v53 = vpop.f32.mrb[25].mxu1  ;;  %v19634_v47 = vld [vmem:[#allocation85_spill] sm:$0xff] }
 0x547   : > { %v17239_v9 = vmax.f32 %v17079_v62, %v7618_v52  ;;  %v6707_v40 = vadd.f32 %v6706_v53, %v15936_v6  ;;  %v6708_v33 = vpop.f32.mrb[26].mxu1 }
 0x548   : > { %v7299_v2 = vmul.f32 0.2, %v6705_v24  ;;  %v6709_v12 = vadd.f32 %v6708_v33, %v15928_v28  ;;  %v6710_v13 = vpop.f32.mrb[27].mxu1 }
 0x549   : > { %v7300_v18 = vmul.f32 0.2, %v6707_v40  ;;  %v6711_v23 = vadd.f32 %v6710_v13, %v15936_v6 }
 0x54a   : > { %v7619_v21 = vmax.f32 %v6705_v24, %v7299_v2  ;;  %v7301_v16 = vmul.f32 0.2, %v6709_v12 }
 0x54b   : > { %6963 = vmatmul.mubr.bf16.gmra.mrb[128].mxu1 %v19633_v44  ;;  %v19635_v44 = vld [vmem:[#allocation80_spill] sm:$0xff]  ;;  %v7620_v15 = vmax.f32 %v6707_v40, %v7300_v18  ;;  %v7302_v39 = vmul.f32 0.2, %v6711_v23 }
 0x54c   : > { %6972 = vmatprep.mubr.bf16.mxu1 %v19128_v41  ;;  %v19636_v5 = vpack.c.bf16 %v19634_v47, %v19635_v44  ;;  %v17249_v62 = vmax.f32 %v17089_v43, %v7619_v21  ;;  %v7621_v52 = vmax.f32 %v6709_v12, %v7301_v16 }
 0x54d   : > { %v17252_v58 = vmax.f32 %v17092_v49, %v7620_v15  ;;  %v7622_v53 = vmax.f32 %v6711_v23, %v7302_v39 }
 0x54e   : > { %v17255_v24 = vmax.f32 %v17095_v55, %v7621_v52  ;;  %v19637_v55 = vld [vmem:[#allocation98_spill] sm:$0xff] }
 0x54f   : > { %v6714_v33 = vpop.f32.mrb[28].mxu1  ;;  %v17259_v40 = vmax.f32 %v17099_v56, %v7622_v53 }
 0x550   : > { %v6715_v2 = vadd.f32 %v6714_v33, %v15928_v28  ;;  %v6716_v13 = vpop.f32.mrb[29].mxu1 }
 0x551   : > { %v6717_v18 = vadd.f32 %v6716_v13, %v15936_v6  ;;  %v6718_v47 = vpop.f32.mrb[30].mxu1 }
 0x552   : > { %v7303_v43 = vmul.f32 0.2, %v6715_v2  ;;  %v6719_v12 = vadd.f32 %v6718_v47, %v15928_v28  ;;  %v6720_v21 = vpop.f32.mrb[31].mxu1 }
 0x553   : > { %6973 = vmatmul.mubr.bf16.gmra.mrb[132].mxu1 %v19636_v5  ;;  %v7304_v49 = vmul.f32 0.2, %v6717_v18  ;;  %v6721_v23 = vadd.f32 %v6720_v21, %v15936_v6  ;;  %v19638_v5 = vld [vmem:[#allocation95_spill] sm:$0xff] }
 0x554   : > { %6982 = vmatprep.mubr.bf16.mxu1 %v19128_v41  ;;  %v7623_v16 = vmax.f32 %v6715_v2, %v7303_v43  ;;  %v7305_v44 = vmul.f32 0.2, %v6719_v12  ;;  %v19639_v15 = vpack.c.bf16 %v19637_v55, %v19638_v5 }
 0x555   : > { %v7624_v39 = vmax.f32 %v6717_v18, %v7304_v49  ;;  %v7306_v52 = vmul.f32 0.2, %v6721_v23 }
 0x556   : > { %v17269_v56 = vmax.f32 %v17109_v7, %v7623_v16  ;;  %v7625_v53 = vmax.f32 %v6719_v12, %v7305_v44 }
 0x557   : > { %v17272_v33 = vmax.f32 %v17112_v8, %v7624_v39  ;;  %v7626_v13 = vmax.f32 %v6721_v23, %v7306_v52  ;;  %v6724_v47 = vpop.f32.mrb[32].mxu1 }
 0x558   : > { %v17275_v2 = vmax.f32 %v17115_v26, %v7625_v53  ;;  %v6725_v43 = vadd.f32 %v6724_v47, %v15928_v28  ;;  %v6726_v21 = vpop.f32.mrb[33].mxu1  ;;  %v19640_v26 = vld [vmem:[#allocation97_spill] sm:$0xff] }
 0x559   : > { %v17279_v18 = vmax.f32 %v17119_v46, %v7626_v13  ;;  %v6727_v49 = vadd.f32 %v6726_v21, %v15936_v6  ;;  %v6728_v55 = vpop.f32.mrb[34].mxu1 }
 0x55a   : > { %v7307_v7 = vmul.f32 0.2, %v6725_v43  ;;  %v6729_v12 = vadd.f32 %v6728_v55, %v15928_v28  ;;  %v6730_v16 = vpop.f32.mrb[35].mxu1 }
 0x55b   : > { %6983 = vmatmul.mubr.bf16.gmra.mrb[136].mxu1 %v19639_v15  ;;  %v7308_v8 = vmul.f32 0.2, %v6727_v49  ;;  %v6731_v23 = vadd.f32 %v6730_v16, %v15936_v6  ;;  %v19641_v15 = vld [vmem:[#allocation94_spill] sm:$0xff] }
 0x55c   : > { %6992 = vmatprep.mubr.bf16.mxu1 %v19128_v41  ;;  %v7627_v44 = vmax.f32 %v6725_v43, %v7307_v7  ;;  %v7309_v5 = vmul.f32 0.2, %v6729_v12  ;;  %v19642_v39 = vpack.c.bf16 %v19640_v26, %v19641_v15 }
 0x55d   : > { %v7628_v52 = vmax.f32 %v6727_v49, %v7308_v8  ;;  %v7310_v53 = vmul.f32 0.2, %v6731_v23 }
 0x55e   : > { %v17289_v46 = vmax.f32 %v17129_v51, %v7627_v44  ;;  %v7629_v13 = vmax.f32 %v6729_v12, %v7309_v5 }
 0x55f   : > { %v17292_v47 = vmax.f32 %v17132_v50, %v7628_v52  ;;  %v7630_v21 = vmax.f32 %v6731_v23, %v7310_v53 }
 0x560   : > { %v17295_v43 = vmax.f32 %v17135_v57, %v7629_v13  ;;  %v19643_v57 = vld [vmem:[#allocation104_spill] sm:$0xff] }
 0x561   : > { %v6734_v55 = vpop.f32.mrb[36].mxu1  ;;  %v17299_v49 = vmax.f32 %v17139_v30, %v7630_v21 }
 0x562   : > { %v6735_v7 = vadd.f32 %v6734_v55, %v15928_v28  ;;  %v6736_v16 = vpop.f32.mrb[37].mxu1 }
 0x563   : > { %6993 = vmatmul.mubr.bf16.gmra.mrb[140].mxu1 %v19642_v39  ;;  %v6737_v8 = vadd.f32 %v6736_v16, %v15936_v6  ;;  %v6738_v26 = vpop.f32.mrb[38].mxu1  ;;  %v19644_v39 = vld [vmem:[#allocation101_spill] sm:$0xff] }
 0x564   : > { %7002 = vmatprep.mubr.bf16.mxu1 %v19128_v41  ;;  %v7311_v51 = vmul.f32 0.2, %v6735_v7  ;;  %v6739_v12 = vadd.f32 %v6738_v26, %v15928_v28  ;;  %v6740_v44 = vpop.f32.mrb[39].mxu1  ;;  %v19645_v52 = vpack.c.bf16 %v19643_v57, %v19644_v39 }
 0x565   : > { %v7312_v50 = vmul.f32 0.2, %v6737_v8  ;;  %v6741_v23 = vadd.f32 %v6740_v44, %v15936_v6 }
 0x566   : > { %v7631_v5 = vmax.f32 %v6735_v7, %v7311_v51  ;;  %v7313_v15 = vmul.f32 0.2, %v6739_v12 }
 0x567   : > { %v7632_v53 = vmax.f32 %v6737_v8, %v7312_v50  ;;  %v7314_v13 = vmul.f32 0.2, %v6741_v23 }
 0x568   : > { %v17309_v30 = vmax.f32 %v17149_v22, %v7631_v5  ;;  %v7633_v21 = vmax.f32 %v6739_v12, %v7313_v15 }
 0x569   : > { %v17312_v55 = vmax.f32 %v17152_v25, %v7632_v53  ;;  %v7634_v16 = vmax.f32 %v6741_v23, %v7314_v13 }
 0x56a   : > { %v6744_v26 = vpop.f32.mrb[40].mxu1  ;;  %v17315_v7 = vmax.f32 %v17155_v31, %v7633_v21  ;;  %v19646_v31 = vld [vmem:[#allocation103_spill] sm:$0xff] }
 0x56b   : > { %7003 = vmatmul.mubr.bf16.gmra.mrb[144].mxu1 %v19645_v52  ;;  %v6745_v51 = vadd.f32 %v6744_v26, %v15928_v28  ;;  %v6746_v44 = vpop.f32.mrb[41].mxu1  ;;  %v17319_v8 = vmax.f32 %v17159_v35, %v7634_v16  ;;  %v19647_v52 = vld [vmem:[#allocation100_spill] sm:$0xff] }
 0x56c   : > { %7012 = vmatprep.mubr.bf16.mxu1 %v19128_v41  ;;  %v6747_v50 = vadd.f32 %v6746_v44, %v15936_v6  ;;  %v6748_v57 = vpop.f32.mrb[42].mxu1  ;;  %v19648_v53 = vpack.c.bf16 %v19646_v31, %v19647_v52 }
 0x56d   : > { %v7315_v22 = vmul.f32 0.2, %v6745_v51  ;;  %v6749_v12 = vadd.f32 %v6748_v57, %v15928_v28  ;;  %v6750_v5 = vpop.f32.mrb[43].mxu1 }
 0x56e   : > { %v7316_v25 = vmul.f32 0.2, %v6747_v50  ;;  %v6751_v23 = vadd.f32 %v6750_v5, %v15936_v6 }
 0x56f   : > { %v7635_v15 = vmax.f32 %v6745_v51, %v7315_v22  ;;  %v7317_v39 = vmul.f32 0.2, %v6749_v12 }
 0x570   : > { %v7636_v13 = vmax.f32 %v6747_v50, %v7316_v25  ;;  %v7318_v21 = vmul.f32 0.2, %v6751_v23 }
 0x571   : > { %v17329_v35 = vmax.f32 %v17169_v60, %v7635_v15  ;;  %v7637_v16 = vmax.f32 %v6749_v12, %v7317_v39 }
 0x572   : > { %v17332_v26 = vmax.f32 %v17172_v36, %v7636_v13  ;;  %v7638_v44 = vmax.f32 %v6751_v23, %v7318_v21 }
 0x573   : > { %7013 = vmatmul.mubr.bf16.gmra.mrb[148].mxu1 %v19648_v53  ;;  %v6754_v57 = vpop.f32.mrb[44].mxu1  ;;  %v17335_v51 = vmax.f32 %v17175_v45, %v7637_v16  ;;  %v19649_v45 = vld [vmem:[#allocation111_spill] sm:$0xff]  ;;  %v19650_v53 = vld [vmem:[#allocation106_spill] sm:$0xff] }
 0x574   : > { %7022 = vmatprep.mubr.bf16.mxu1 %v19128_v41  ;;  %v6755_v22 = vadd.f32 %v6754_v57, %v15928_v28  ;;  %v6756_v5 = vpop.f32.mrb[45].mxu1  ;;  %v17339_v50 = vmax.f32 %v17179_v37, %v7638_v44  ;;  %v19651_v13 = vpack.c.bf16 %v19649_v45, %v19650_v53 }
 0x575   : > { %v6757_v25 = vadd.f32 %v6756_v5, %v15936_v6  ;;  %v6758_v31 = vpop.f32.mrb[46].mxu1 }
 0x576   : > { %v7319_v60 = vmul.f32 0.2, %v6755_v22  ;;  %v6759_v12 = vadd.f32 %v6758_v31, %v15928_v28  ;;  %v6760_v15 = vpop.f32.mrb[47].mxu1 }
 0x577   : > { %v7320_v36 = vmul.f32 0.2, %v6757_v25  ;;  %v6761_v23 = vadd.f32 %v6760_v15, %v15936_v6 }
 0x578   : > { %v7639_v39 = vmax.f32 %v6755_v22, %v7319_v60  ;;  %v7321_v52 = vmul.f32 0.2, %v6759_v12 }
 0x579   : > { %v7640_v21 = vmax.f32 %v6757_v25, %v7320_v36  ;;  %v7322_v16 = vmul.f32 0.2, %v6761_v23 }
 0x57a   : > { %v17349_v37 = vmax.f32 %v17189_v32, %v7639_v39  ;;  %v7641_v44 = vmax.f32 %v6759_v12, %v7321_v52 }
 0x57b   : > { %7023 = vmatmul.mubr.bf16.gmra.mrb[152].mxu1 %v19651_v13  ;;  %v17352_v57 = vmax.f32 %v17192_v34, %v7640_v21  ;;  %v7642_v5 = vmax.f32 %v6761_v23, %v7322_v16  ;;  %v6764_v31 = vpop.f32.mrb[48].mxu1  ;;  %v19653_v13 = vld [vmem:[#allocation19_spill] sm:$0xff] }
 0x57c   : > { %7032 = vmatprep.mubr.bf16.mxu1 %v19128_v41  ;;  %v17355_v22 = vmax.f32 %v17195_v59, %v7641_v44  ;;  %v6765_v60 = vadd.f32 %v6764_v31, %v15928_v28  ;;  %v6766_v15 = vpop.f32.mrb[49].mxu1  ;;  %v19652_v59 = vld [vmem:[#allocation109_spill] sm:$0xff] }
 0x57d   : > { %v17359_v25 = vmax.f32 %v17199_v11, %v7642_v5  ;;  %v6767_v36 = vadd.f32 %v6766_v15, %v15936_v6  ;;  %v6768_v45 = vpop.f32.mrb[50].mxu1  ;;  %v19654_v21 = vpack.c.bf16 %v19652_v59, %v19653_v13 }
 0x57e   : > { %v7323_v32 = vmul.f32 0.2, %v6765_v60  ;;  %v6769_v12 = vadd.f32 %v6768_v45, %v15928_v28  ;;  %v6770_v39 = vpop.f32.mrb[51].mxu1 }
 0x57f   : > { %v7324_v34 = vmul.f32 0.2, %v6767_v36  ;;  %v6771_v23 = vadd.f32 %v6770_v39, %v15936_v6 }
 0x580   : > { %v7643_v52 = vmax.f32 %v6765_v60, %v7323_v32  ;;  %v7325_v53 = vmul.f32 0.2, %v6769_v12 }
 0x581   : > { %v7644_v16 = vmax.f32 %v6767_v36, %v7324_v34  ;;  %v7326_v44 = vmul.f32 0.2, %v6771_v23 }
 0x582   : > { %v17369_v11 = vmax.f32 %v17209_v17, %v7643_v52  ;;  %v7645_v5 = vmax.f32 %v6769_v12, %v7325_v53 }
 0x583   : > { %7033 = vmatmul.mubr.bf16.gmra.mrb[156].mxu1 %v19654_v21  ;;  %v17372_v31 = vmax.f32 %v17212_v19, %v7644_v16  ;;  %v7646_v15 = vmax.f32 %v6771_v23, %v7326_v44  ;;  %v19656_v21 = vld [vmem:[#allocation118_spill] sm:$0xff] }
 0x584   : > { %7042 = vmatprep.mubr.bf16.mxu1 %v19128_v41  ;;  %v17375_v60 = vmax.f32 %v17215_v1, %v7645_v5  ;;  %v19655_v1 = vld [vmem:[#allocation49_spill] sm:$0xff] }
 0x585   : > { %v17379_v36 = vmax.f32 %v17219_v27, %v7646_v15  ;;  %v19657_v16 = vpack.c.bf16 %v19655_v1, %v19656_v21 }
 0x586   : > { %v6774_v45 = vpop.f32.mrb[52].mxu1 }
 0x587   : > { %v6775_v32 = vadd.f32 %v6774_v45, %v15928_v28  ;;  %v6776_v39 = vpop.f32.mrb[53].mxu1 }
 0x588   : > { %v6777_v34 = vadd.f32 %v6776_v39, %v15936_v6  ;;  %v6778_v59 = vpop.f32.mrb[54].mxu1 }
 0x589   : > { %v7327_v17 = vmul.f32 0.2, %v6775_v32  ;;  %v6779_v12 = vadd.f32 %v6778_v59, %v15928_v28  ;;  %v6780_v52 = vpop.f32.mrb[55].mxu1 }
 0x58a   : > { %v7328_v19 = vmul.f32 0.2, %v6777_v34  ;;  %v6781_v23 = vadd.f32 %v6780_v52, %v15936_v6 }
 0x58b   : > { %v7647_v53 = vmax.f32 %v6775_v32, %v7327_v17  ;;  %v7329_v13 = vmul.f32 0.2, %v6779_v12  ;;  %7043 = vmatmul.mubr.bf16.gmra.mrb[160].mxu1 %v19657_v16  ;;  %v19659_v16 = vld [vmem:[#allocation115_spill] sm:$0xff] }
 0x58c   : > { %v7648_v44 = vmax.f32 %v6777_v34, %v7328_v19  ;;  %v7330_v5 = vmul.f32 0.2, %v6781_v23  ;;  %7052 = vmatprep.mubr.bf16.mxu1 %v19128_v41 }
 0x58d   : > { %v17389_v27 = vmax.f32 %v17229_v14, %v7647_v53  ;;  %v7649_v15 = vmax.f32 %v6779_v12, %v7329_v13 }
 0x58e   : > { %v17392_v45 = vmax.f32 %v17232_v10, %v7648_v44  ;;  %v7650_v39 = vmax.f32 %v6781_v23, %v7330_v5  ;;  %v6784_v59 = vpop.f32.mrb[56].mxu1 }
 0x58f   : > { %v17395_v32 = vmax.f32 %v17235_v29, %v7649_v15  ;;  %v6785_v17 = vadd.f32 %v6784_v59, %v15928_v28  ;;  %v6786_v52 = vpop.f32.mrb[57].mxu1  ;;  %v19658_v29 = vld [vmem:[#allocation121_spill] sm:$0xff] }
 0x590   : > { %v17399_v34 = vmax.f32 %v17239_v9, %v7650_v39  ;;  %v6787_v19 = vadd.f32 %v6786_v52, %v15936_v6  ;;  %v6788_v1 = vpop.f32.mrb[58].mxu1  ;;  %v19660_v44 = vpack.c.bf16 %v19658_v29, %v19659_v16 }
 0x591   : > { %v7331_v14 = vmul.f32 0.2, %v6785_v17  ;;  %v6789_v12 = vadd.f32 %v6788_v1, %v15928_v28  ;;  %v6790_v53 = vpop.f32.mrb[59].mxu1 }
 0x592   : > { %v7332_v10 = vmul.f32 0.2, %v6787_v19  ;;  %v6791_v23 = vadd.f32 %v6790_v53, %v15936_v6 }
 0x593   : > { %v7651_v13 = vmax.f32 %v6785_v17, %v7331_v14  ;;  %v7333_v21 = vmul.f32 0.2, %v6789_v12  ;;  %7053 = vmatmul.mubr.bf16.gmra.mrb[164].mxu1 %v19660_v44  ;;  %v19662_v44 = vld [vmem:[#allocation30_spill] sm:$0xff] }
 0x594   : > { %v7652_v5 = vmax.f32 %v6787_v19, %v7332_v10  ;;  %v7334_v15 = vmul.f32 0.2, %v6791_v23  ;;  %7062 = vmatprep.mubr.bf16.mxu1 %v19128_v41 }
 0x595   : > { %v17409_v9 = vmax.f32 %v17249_v62, %v7651_v13  ;;  %v7653_v39 = vmax.f32 %v6789_v12, %v7333_v21 }
 0x596   : > { %v17412_v59 = vmax.f32 %v17252_v58, %v7652_v5  ;;  %v7654_v52 = vmax.f32 %v6791_v23, %v7334_v15  ;;  %v6794_v1 = vpop.f32.mrb[60].mxu1 }
 0x597   : > { %v17415_v17 = vmax.f32 %v17255_v24, %v7653_v39  ;;  %v6795_v14 = vadd.f32 %v6794_v1, %v15928_v28  ;;  %v6796_v53 = vpop.f32.mrb[61].mxu1  ;;  %v19661_v24 = vld [vmem:[#allocation124_spill] sm:$0xff] }
 0x598   : > { %v17419_v19 = vmax.f32 %v17259_v40, %v7654_v52  ;;  %v6797_v10 = vadd.f32 %v6796_v53, %v15936_v6  ;;  %v6798_v29 = vpop.f32.mrb[62].mxu1  ;;  %v19663_v5 = vpack.c.bf16 %v19661_v24, %v19662_v44 }
 0x599   : > { %v7335_v62 = vmul.f32 0.2, %v6795_v14  ;;  %v6799_v12 = vadd.f32 %v6798_v29, %v15928_v28  ;;  %v6800_v13 = vpop.f32.mrb[63].mxu1 }
 0x59a   : > { %v7336_v58 = vmul.f32 0.2, %v6797_v10  ;;  %v6801_v23 = vadd.f32 %v6800_v13, %v15936_v6 }
 0x59b   : > { %v7655_v21 = vmax.f32 %v6795_v14, %v7335_v62  ;;  %v7337_v16 = vmul.f32 0.2, %v6799_v12  ;;  %7063 = vmatmul.mubr.bf16.gmra.mrb[168].mxu1 %v19663_v5  ;;  %v19665_v5 = vld [vmem:[#allocation52_spill] sm:$0xff] }
 0x59c   : > { %v7656_v15 = vmax.f32 %v6797_v10, %v7336_v58  ;;  %v7338_v39 = vmul.f32 0.2, %v6801_v23  ;;  %7072 = vmatprep.mubr.bf16.mxu1 %v19128_v41 }
 0x59d   : > { %v17429_v40 = vmax.f32 %v17269_v56, %v7655_v21  ;;  %v7657_v52 = vmax.f32 %v6799_v12, %v7337_v16 }
 0x59e   : > { %v17432_v1 = vmax.f32 %v17272_v33, %v7656_v15  ;;  %v7658_v53 = vmax.f32 %v6801_v23, %v7338_v39  ;;  %v6804_v29 = vpop.f32.mrb[64].mxu1 }
 0x59f   : > { %v17435_v14 = vmax.f32 %v17275_v2, %v7657_v52  ;;  %v6805_v62 = vadd.f32 %v6804_v29, %v15928_v28  ;;  %v6806_v13 = vpop.f32.mrb[65].mxu1  ;;  %v19664_v2 = vld [vmem:[#allocation123_spill] sm:$0xff] }
 0x5a0   : > { %v17439_v10 = vmax.f32 %v17279_v18, %v7658_v53  ;;  %v6807_v58 = vadd.f32 %v6806_v13, %v15936_v6  ;;  %v6808_v24 = vpop.f32.mrb[66].mxu1  ;;  %v19666_v15 = vpack.c.bf16 %v19664_v2, %v19665_v5 }
 0x5a1   : > { %v7339_v56 = vmul.f32 0.2, %v6805_v62  ;;  %v6809_v12 = vadd.f32 %v6808_v24, %v15928_v28  ;;  %v6810_v21 = vpop.f32.mrb[67].mxu1 }
 0x5a2   : > { %v7340_v33 = vmul.f32 0.2, %v6807_v58  ;;  %v6811_v23 = vadd.f32 %v6810_v21, %v15936_v6 }
 0x5a3   : > { %v7659_v16 = vmax.f32 %v6805_v62, %v7339_v56  ;;  %v7341_v44 = vmul.f32 0.2, %v6809_v12  ;;  %7073 = vmatmul.mubr.bf16.gmra.mrb[172].mxu1 %v19666_v15  ;;  %v19668_v15 = vld [vmem:[#allocation38_spill] sm:$0xff] }
 0x5a4   : > { %v7660_v39 = vmax.f32 %v6807_v58, %v7340_v33  ;;  %v7342_v52 = vmul.f32 0.2, %v6811_v23  ;;  %7082 = vmatprep.mubr.bf16.mxu1 %v19128_v41 }
 0x5a5   : > { %v17449_v18 = vmax.f32 %v17289_v46, %v7659_v16  ;;  %v7661_v53 = vmax.f32 %v6809_v12, %v7341_v44 }
 0x5a6   : > { %v17452_v29 = vmax.f32 %v17292_v47, %v7660_v39  ;;  %v7662_v13 = vmax.f32 %v6811_v23, %v7342_v52  ;;  %v6814_v24 = vpop.f32.mrb[68].mxu1 }
 0x5a7   : > { %v17455_v62 = vmax.f32 %v17295_v43, %v7661_v53  ;;  %v6815_v56 = vadd.f32 %v6814_v24, %v15928_v28  ;;  %v6816_v21 = vpop.f32.mrb[69].mxu1  ;;  %v19667_v43 = vld [vmem:[#allocation76_spill] sm:$0xff] }
 0x5a8   : > { %v17459_v58 = vmax.f32 %v17299_v49, %v7662_v13  ;;  %v6817_v33 = vadd.f32 %v6816_v21, %v15936_v6  ;;  %v6818_v2 = vpop.f32.mrb[70].mxu1  ;;  %v19669_v39 = vpack.c.bf16 %v19667_v43, %v19668_v15 }
 0x5a9   : > { %v7343_v46 = vmul.f32 0.2, %v6815_v56  ;;  %v6819_v12 = vadd.f32 %v6818_v2, %v15928_v28  ;;  %v6820_v16 = vpop.f32.mrb[71].mxu1 }
 0x5aa   : > { %v7344_v47 = vmul.f32 0.2, %v6817_v33  ;;  %v6821_v23 = vadd.f32 %v6820_v16, %v15936_v6 }
 0x5ab   : > { %v7663_v44 = vmax.f32 %v6815_v56, %v7343_v46  ;;  %v7345_v5 = vmul.f32 0.2, %v6819_v12  ;;  %7083 = vmatmul.mubr.bf16.gmra.mrb[176].mxu1 %v19669_v39  ;;  %v19671_v39 = vld [vmem:[#allocation69_spill] sm:$0xff] }
 0x5ac   : > { %v7664_v52 = vmax.f32 %v6817_v33, %v7344_v47  ;;  %v7346_v53 = vmul.f32 0.2, %v6821_v23  ;;  %7092 = vmatprep.mubr.bf16.mxu1 %v19128_v41 }
 0x5ad   : > { %v17469_v49 = vmax.f32 %v17309_v30, %v7663_v44  ;;  %v7665_v13 = vmax.f32 %v6819_v12, %v7345_v5 }
 0x5ae   : > { %v17472_v24 = vmax.f32 %v17312_v55, %v7664_v52  ;;  %v7666_v21 = vmax.f32 %v6821_v23, %v7346_v53  ;;  %v6824_v2 = vpop.f32.mrb[72].mxu1 }
 0x5af   : > { %v17475_v56 = vmax.f32 %v17315_v7, %v7665_v13  ;;  %v6825_v46 = vadd.f32 %v6824_v2, %v15928_v28  ;;  %v6826_v16 = vpop.f32.mrb[73].mxu1  ;;  %v19670_v7 = vld [vmem:[#allocation75_spill] sm:$0xff] }
 0x5b0   : > { %v17479_v33 = vmax.f32 %v17319_v8, %v7666_v21  ;;  %v6827_v47 = vadd.f32 %v6826_v16, %v15936_v6  ;;  %v6828_v43 = vpop.f32.mrb[74].mxu1  ;;  %v19672_v52 = vpack.c.bf16 %v19670_v7, %v19671_v39 }
 0x5b1   : > { %v7347_v30 = vmul.f32 0.2, %v6825_v46  ;;  %v6829_v12 = vadd.f32 %v6828_v43, %v15928_v28  ;;  %v6830_v44 = vpop.f32.mrb[75].mxu1 }
 0x5b2   : > { %v7348_v55 = vmul.f32 0.2, %v6827_v47  ;;  %v6831_v23 = vadd.f32 %v6830_v44, %v15936_v6 }
 0x5b3   : > { %v7667_v5 = vmax.f32 %v6825_v46, %v7347_v30  ;;  %v7349_v15 = vmul.f32 0.2, %v6829_v12  ;;  %7093 = vmatmul.mubr.bf16.gmra.mrb[180].mxu1 %v19672_v52  ;;  %v19674_v52 = vld [vmem:[#allocation54_spill] sm:$0xff] }
 0x5b4   : > { %v7668_v53 = vmax.f32 %v6827_v47, %v7348_v55  ;;  %v7350_v13 = vmul.f32 0.2, %v6831_v23  ;;  %7102 = vmatprep.mubr.bf16.mxu1 %v19128_v41 }
 0x5b5   : > { %v17489_v8 = vmax.f32 %v17329_v35, %v7667_v5  ;;  %v7669_v21 = vmax.f32 %v6829_v12, %v7349_v15 }
 0x5b6   : > { %v17492_v2 = vmax.f32 %v17332_v26, %v7668_v53  ;;  %v7670_v16 = vmax.f32 %v6831_v23, %v7350_v13  ;;  %v6834_v43 = vpop.f32.mrb[76].mxu1 }
 0x5b7   : > { %v17495_v46 = vmax.f32 %v17335_v51, %v7669_v21  ;;  %v6835_v30 = vadd.f32 %v6834_v43, %v15928_v28  ;;  %v6836_v44 = vpop.f32.mrb[77].mxu1  ;;  %v19673_v51 = vld [vmem:[#allocation89_spill] sm:$0xff] }
 0x5b8   : > { %v17499_v47 = vmax.f32 %v17339_v50, %v7670_v16  ;;  %v6837_v55 = vadd.f32 %v6836_v44, %v15936_v6  ;;  %v6838_v7 = vpop.f32.mrb[78].mxu1  ;;  %v19675_v53 = vpack.c.bf16 %v19673_v51, %v19674_v52 }
 0x5b9   : > { %v7351_v35 = vmul.f32 0.2, %v6835_v30  ;;  %v6839_v12 = vadd.f32 %v6838_v7, %v15928_v28  ;;  %v6840_v5 = vpop.f32.mrb[79].mxu1 }
 0x5ba   : > { %v7352_v26 = vmul.f32 0.2, %v6837_v55  ;;  %v6841_v23 = vadd.f32 %v6840_v5, %v15936_v6 }
 0x5bb   : > { %v7671_v15 = vmax.f32 %v6835_v30, %v7351_v35  ;;  %v7353_v39 = vmul.f32 0.2, %v6839_v12  ;;  %7103 = vmatmul.mubr.bf16.gmra.mrb[184].mxu1 %v19675_v53  ;;  %v19677_v53 = vld [vmem:[#allocation64_spill] sm:$0xff] }
 0x5bc   : > { %v7672_v13 = vmax.f32 %v6837_v55, %v7352_v26  ;;  %v7354_v21 = vmul.f32 0.2, %v6841_v23  ;;  %7112 = vmatprep.mubr.bf16.mxu1 %v19128_v41 }
 0x5bd   : > { %v17509_v50 = vmax.f32 %v17349_v37, %v7671_v15  ;;  %v7673_v16 = vmax.f32 %v6839_v12, %v7353_v39 }
 0x5be   : > { %v17512_v43 = vmax.f32 %v17352_v57, %v7672_v13  ;;  %v7674_v44 = vmax.f32 %v6841_v23, %v7354_v21  ;;  %v6844_v7 = vpop.f32.mrb[80].mxu1 }
 0x5bf   : > { %v17515_v30 = vmax.f32 %v17355_v22, %v7673_v16  ;;  %v6845_v35 = vadd.f32 %v6844_v7, %v15928_v28  ;;  %v6846_v5 = vpop.f32.mrb[81].mxu1  ;;  %v19676_v22 = vld [vmem:[#allocation79_spill] sm:$0xff] }
 0x5c0   : > { %v17519_v55 = vmax.f32 %v17359_v25, %v7674_v44  ;;  %v6847_v26 = vadd.f32 %v6846_v5, %v15936_v6  ;;  %v6848_v51 = vpop.f32.mrb[82].mxu1  ;;  %v19678_v13 = vpack.c.bf16 %v19676_v22, %v19677_v53 }
 0x5c1   : > { %v7355_v37 = vmul.f32 0.2, %v6845_v35  ;;  %v6849_v12 = vadd.f32 %v6848_v51, %v15928_v28  ;;  %v6850_v15 = vpop.f32.mrb[83].mxu1 }
 0x5c2   : > { %v7356_v57 = vmul.f32 0.2, %v6847_v26  ;;  %v6851_v23 = vadd.f32 %v6850_v15, %v15936_v6 }
 0x5c3   : > { %v7675_v39 = vmax.f32 %v6845_v35, %v7355_v37  ;;  %v7357_v52 = vmul.f32 0.2, %v6849_v12  ;;  %7113 = vmatmul.mubr.bf16.gmra.mrb[188].mxu1 %v19678_v13 }
 0x5c4   : > { %v7676_v21 = vmax.f32 %v6847_v26, %v7356_v57  ;;  %v7358_v16 = vmul.f32 0.2, %v6851_v23  ;;  %7122 = vmatprep.mubr.bf16.mxu1 %v19128_v41 }
 0x5c5   : > { %v17529_v25 = vmax.f32 %v17369_v11, %v7675_v39  ;;  %v7677_v44 = vmax.f32 %v6849_v12, %v7357_v52 }
 0x5c6   : > { %v17532_v7 = vmax.f32 %v17372_v31, %v7676_v21  ;;  %v7678_v5 = vmax.f32 %v6851_v23, %v7358_v16  ;;  %v6854_v51 = vpop.f32.mrb[84].mxu1 }
 0x5c7   : > { %v17535_v35 = vmax.f32 %v17375_v60, %v7677_v44  ;;  %v6855_v37 = vadd.f32 %v6854_v51, %v15928_v28  ;;  %v6856_v15 = vpop.f32.mrb[85].mxu1  ;;  %v19679_v60 = vpack.c.bf16 %v16668_v63, %v16654_v20 }
 0x5c8   : > { %v17539_v26 = vmax.f32 %v17379_v36, %v7678_v5  ;;  %v6857_v57 = vadd.f32 %v6856_v15, %v15936_v6  ;;  %v6858_v22 = vpop.f32.mrb[86].mxu1 }
 0x5c9   : > { %v7359_v11 = vmul.f32 0.2, %v6855_v37  ;;  %v6859_v12 = vadd.f32 %v6858_v22, %v15928_v28  ;;  %v6860_v39 = vpop.f32.mrb[87].mxu1 }
 0x5ca   : > { %v7360_v31 = vmul.f32 0.2, %v6857_v57  ;;  %v6861_v23 = vadd.f32 %v6860_v39, %v15936_v6 }
 0x5cb   : > { %v7679_v52 = vmax.f32 %v6855_v37, %v7359_v11  ;;  %v7361_v53 = vmul.f32 0.2, %v6859_v12  ;;  %7123 = vmatmul.mubr.bf16.gmra.mrb[192].mxu1 %v19679_v60 }
 0x5cc   : > { %v7680_v13 = vmax.f32 %v6857_v57, %v7360_v31  ;;  %v7362_v21 = vmul.f32 0.2, %v6861_v23  ;;  %7132 = vmatprep.mubr.bf16.mxu1 %v19128_v41 }
 0x5cd   : > { %v17549_v36 = vmax.f32 %v17389_v27, %v7679_v52  ;;  %v7681_v16 = vmax.f32 %v6859_v12, %v7361_v53  ;;  %v11530_v27 = vld [vmem:[%s18582_s9 + $0x200] ss:$16 sps:$4 sm:$0xff]   ;;  %v19680_v52 = vpack.c.bf16 %v16657_v42, %v16644_v0 }
 0x5ce   : > { %v17552_v44 = vmax.f32 %v17392_v45, %v7680_v13  ;;  %v7682_v5 = vmax.f32 %v6861_v23, %v7362_v21  ;;  %v6864_v51 = vpop.f32.mrb[88].mxu1  ;;  %v11532_v45 = vld [vmem:[%s18582_s9 + $0x204] ss:$16 sps:$4 sm:$0xff]  }
 0x5cf   : > { %v17555_v37 = vmax.f32 %v17395_v32, %v7681_v16  ;;  %v6865_v15 = vadd.f32 %v6864_v51, %v15928_v28  ;;  %v6866_v20 = vpop.f32.mrb[89].mxu1  ;;  %9106 = vmatprep.subr.bf16.mxu0 %v11532_v45 }
 0x5d0   : > { %v17559_v63 = vmax.f32 %v17399_v34, %v7682_v5  ;;  %v6867_v57 = vadd.f32 %v6866_v20, %v15936_v6  ;;  %v6868_v22 = vpop.f32.mrb[90].mxu1  ;;  %9107 = vmatpush1.bf16.msra.mxu0 %v11530_v27  ;;  %v11533_v20 = vld [vmem:[%s18582_s9 + $0x220] ss:$16 sps:$4 sm:$0xff]  }
 0x5d1   : > { %v7363_v11 = vmul.f32 0.2, %v6865_v15  ;;  %v6869_v32 = vadd.f32 %v6868_v22, %v15928_v28  ;;  %v6870_v12 = vpop.f32.mrb[91].mxu1 }
 0x5d2   : > { %v7364_v39 = vmul.f32 0.2, %v6867_v57  ;;  %v6871_v31 = vadd.f32 %v6870_v12, %v15936_v6 }
 0x5d3   : > { %v7683_v34 = vmax.f32 %v6865_v15, %v7363_v11  ;;  %v7365_v23 = vmul.f32 0.2, %v6869_v32  ;;  %7133 = vmatmul.mubr.bf16.gmra.mrb[196].mxu1 %v19680_v52 }
 0x5d4   : > { %v7684_v53 = vmax.f32 %v6867_v57, %v7364_v39  ;;  %v7366_v60 = vmul.f32 0.2, %v6871_v31  ;;  %7142 = vmatprep.mubr.bf16.mxu1 %v19128_v41 }
 0x5d5   : > { %v17575_v13 = vmax.f32 %v17409_v9, %v7683_v34  ;;  %v7685_v21 = vmax.f32 %v6869_v32, %v7365_v23  ;;  %v11535_v9 = vld [vmem:[%s18582_s9 + $0x224] ss:$16 sps:$4 sm:$0xff]   ;;  %v19681_v34 = vpack.c.bf16 %v16731_v54, %v16722_v38 }
 0x5d6   : > { %v17578_v16 = vmax.f32 %v17412_v59, %v7684_v53  ;;  %v7686_v5 = vmax.f32 %v6871_v31, %v7366_v60  ;;  %v6874_v51 = vpop.f32.mrb[92].mxu1  ;;  %9108 = vmatprep.subr.bf16.mxu0 %v11535_v9 }
 0x5d7   : > { %v17581_v15 = vmax.f32 %v17415_v17, %v7685_v21  ;;  %v6875_v0 = vadd.f32 %v6874_v51, %v15928_v28  ;;  %v6876_v42 = vpop.f32.mrb[93].mxu1  ;;  %v11538_v17 = vld [vmem:[%s18582_s9 + $0x244] ss:$16 sps:$4 sm:$0xff]   ;;  %9109 = vmatpush1.bf16.msra.mxu0 %v11533_v20 }
 0x5d8   : > { %v17591_v57 = vmax.f32 %v17419_v19, %v7686_v5  ;;  %v6877_v59 = vadd.f32 %v6876_v42, %v15936_v6  ;;  %v6878_v22 = vpop.f32.mrb[94].mxu1  ;;  %v11536_v19 = vld [vmem:[%s18582_s9 + $0x240] ss:$16 sps:$4 sm:$0xff]   ;;  %9110 = vmatprep.subr.bf16.mxu0 %v11538_v17 }
 0x5d9   : > { %v7367_v27 = vmul.f32 0.2, %v6875_v0  ;;  %v6879_v45 = vadd.f32 %v6878_v22, %v15928_v28  ;;  %v6880_v11 = vpop.f32.mrb[95].mxu1 }
 0x5da   : > { %v7368_v32 = vmul.f32 0.2, %v6877_v59  ;;  %v6881_v12 = vadd.f32 %v6880_v11, %v15936_v6 }
 0x5db   : > { %v7687_v39 = vmax.f32 %v6875_v0, %v7367_v27  ;;  %v7369_v31 = vmul.f32 0.2, %v6879_v45  ;;  %7143 = vmatmul.mubr.bf16.gmra.mrb[200].mxu1 %v19681_v34  ;;  %9111 = vmatpush1.bf16.msra.mxu0 %v11536_v19 }
 0x5dc   : > { %v7688_v23 = vmax.f32 %v6877_v59, %v7368_v32  ;;  %v7370_v52 = vmul.f32 0.2, %v6881_v12  ;;  %7152 = vmatprep.mubr.bf16.mxu1 %v19128_v41  ;;  %v11539_v41 = vld [vmem:[%s18582_s9 + $0x260] ss:$16 sps:$4 sm:$0xff]   ;;  %v19682_v32 = vpack.c.bf16 %v16729_v4, %v16707_v48 }
 0x5dd   : > { %v17607_v53 = vmax.f32 %v17429_v40, %v7687_v39  ;;  %v7689_v60 = vmax.f32 %v6879_v45, %v7369_v31  ;;  %v11541_v40 = vld [vmem:[%s18582_s9 + $0x264] ss:$16 sps:$4 sm:$0xff]   ;;  %v11545_v4 = vld [vmem:[%s18582_s9 + $0x2a0] ss:$16 sps:$4 sm:$0xff]  }
 0x5de   : > { %v17610_v21 = vmax.f32 %v17432_v1, %v7688_v23  ;;  %v7690_v5 = vmax.f32 %v6881_v12, %v7370_v52  ;;  %v6884_v51 = vpop.f32.mrb[96].mxu1  ;;  %9112 = vmatprep.subr.bf16.mxu0 %v11541_v40 }
 0x5df   : > { %v17613_v0 = vmax.f32 %v17435_v14, %v7689_v60  ;;  %v6885_v54 = vadd.f32 %v6884_v51, %v15928_v28  ;;  %v6886_v38 = vpop.f32.mrb[97].mxu1  ;;  %v11544_v14 = vld [vmem:[%s18582_s9 + $0x284] ss:$16 sps:$4 sm:$0xff]   ;;  %9113 = vmatpush1.bf16.msra.mxu0 %v11539_v41 }
 0x5e0   : > { %v17623_v1 = vmax.f32 %v17439_v10, %v7690_v5  ;;  %v6887_v42 = vadd.f32 %v6886_v38, %v15936_v6  ;;  %v6888_v20 = vpop.f32.mrb[98].mxu1  ;;  %v11542_v10 = vld [vmem:[%s18582_s9 + $0x280] ss:$16 sps:$4 sm:$0xff]   ;;  %9114 = vmatprep.subr.bf16.mxu0 %v11544_v14 }
 0x5e1   : > { %v7371_v9 = vmul.f32 0.2, %v6885_v54  ;;  %v6889_v59 = vadd.f32 %v6888_v20, %v15928_v28  ;;  %v6890_v22 = vpop.f32.mrb[99].mxu1 }
 0x5e2   : > { %v7372_v17 = vmul.f32 0.2, %v6887_v42  ;;  %v6891_v27 = vadd.f32 %v6890_v22, %v15936_v6 }
 0x5e3   : > { %v7691_v45 = vmax.f32 %v6885_v54, %v7371_v9  ;;  %v7373_v11 = vmul.f32 0.2, %v6889_v59  ;;  %7153 = vmatmul.mubr.bf16.gmra.mrb[204].mxu1 %v19682_v32  ;;  %9115 = vmatpush1.bf16.msra.mxu0 %v11542_v10 }
 0x5e4   : > { %v7692_v12 = vmax.f32 %v6887_v42, %v7372_v17  ;;  %v7374_v19 = vmul.f32 0.2, %v6891_v27 }
 0x5e5   : > { %v17638_v39 = vmax.f32 %v17449_v18, %v7691_v45  ;;  %v7693_v31 = vmax.f32 %v6889_v59, %v7373_v11  ;;  %v11547_v18 = vld [vmem:[%s18582_s9 + $0x2a4] ss:$16 sps:$4 sm:$0xff]  }
 0x5e6   : > { %v17641_v34 = vmax.f32 %v17452_v29, %v7692_v12  ;;  %v7694_v23 = vmax.f32 %v6891_v27, %v7374_v19  ;;  %v6894_v52 = vpop.f32.mrb[100].mxu1  ;;  %9116 = vmatprep.subr.bf16.mxu0 %v11547_v18 }
 0x5e7   : > { %v17644_v60 = vmax.f32 %v17455_v62, %v7693_v31  ;;  %v6895_v5 = vadd.f32 %v6894_v52, %v15928_v28  ;;  %v6896_v48 = vpop.f32.mrb[101].mxu1  ;;  %v11550_v62 = vld [vmem:[%s18582_s9 + $0x2c4] ss:$16 sps:$4 sm:$0xff]   ;;  %9117 = vmatpush1.bf16.msra.mxu0 %v11545_v4  ;;  %v11551_v31 = vld [vmem:[%s18582_s9 + $0x2e0] ss:$16 sps:$4 sm:$0xff]  }
 0x5e8   : > { %v17654_v29 = vmax.f32 %v17459_v58, %v7694_v23  ;;  %v6897_v51 = vadd.f32 %v6896_v48, %v15936_v6  ;;  %v6898_v54 = vpop.f32.mrb[102].mxu1  ;;  %v11548_v58 = vld [vmem:[%s18582_s9 + $0x2c0] ss:$16 sps:$4 sm:$0xff]   ;;  %9118 = vmatprep.subr.bf16.mxu0 %v11550_v62 }
 0x5e9   : > { %v7375_v38 = vmul.f32 0.2, %v6895_v5  ;;  %v6899_v41 = vadd.f32 %v6898_v54, %v15928_v28  ;;  %v6900_v40 = vpop.f32.mrb[103].mxu1 }
 0x5ea   : > { %v7376_v42 = vmul.f32 0.2, %v6897_v51  ;;  %v6901_v20 = vadd.f32 %v6900_v40, %v15936_v6 }
 0x5eb   : > { %v7695_v14 = vmax.f32 %v6895_v5, %v7375_v38  ;;  %v7377_v9 = vmul.f32 0.2, %v6899_v41  ;;  %9119 = vmatpush1.bf16.msra.mxu0 %v11548_v58 }
 0x5ec   : > { %v7696_v59 = vmax.f32 %v6897_v51, %v7376_v42  ;;  %v7378_v22 = vmul.f32 0.2, %v6901_v20 }
 0x5ed   : > { %v17666_v17 = vmax.f32 %v17469_v49, %v7695_v14  ;;  %v7697_v27 = vmax.f32 %v6899_v41, %v7377_v9  ;;  %v11553_v49 = vld [vmem:[%s18582_s9 + $0x2e4] ss:$16 sps:$4 sm:$0xff]  }
 0x5ee   : > { %v17669_v10 = vmax.f32 %v17472_v24, %v7696_v59  ;;  %v7698_v45 = vmax.f32 %v6901_v20, %v7378_v22  ;;  %v6904_v11 = vpop.f32.mrb[104].mxu1  ;;  %9120 = vmatprep.subr.bf16.mxu0 %v11553_v49 }
 0x5ef   : > { %v17672_v32 = vmax.f32 %v17475_v56, %v7697_v27  ;;  %v6905_v12 = vadd.f32 %v6904_v11, %v15928_v28  ;;  %v6906_v19 = vpop.f32.mrb[105].mxu1  ;;  %v11556_v56 = vld [vmem:[%s18582_s9 + $0x304] ss:$16 sps:$4 sm:$0xff]   ;;  %9121 = vmatpush1.bf16.msra.mxu0 %v11551_v31  ;;  %v11557_v27 = vld [vmem:[%s18582_s9 + $0x320] ss:$16 sps:$4 sm:$0xff]  }
 0x5f0   : > { %v17682_v24 = vmax.f32 %v17479_v33, %v7698_v45  ;;  %v6907_v23 = vadd.f32 %v6906_v19, %v15936_v6  ;;  %v6908_v52 = vpop.f32.mrb[106].mxu1  ;;  %v11554_v33 = vld [vmem:[%s18582_s9 + $0x300] ss:$16 sps:$4 sm:$0xff]   ;;  %9122 = vmatprep.subr.bf16.mxu0 %v11556_v56 }
 0x5f1   : > { %v7379_v5 = vmul.f32 0.2, %v6905_v12  ;;  %v6909_v48 = vadd.f32 %v6908_v52, %v15928_v28  ;;  %v6910_v4 = vpop.f32.mrb[107].mxu1 }
 0x5f2   : > { %v7380_v18 = vmul.f32 0.2, %v6907_v23  ;;  %v6911_v51 = vadd.f32 %v6910_v4, %v15936_v6 }
 0x5f3   : > { %v7699_v54 = vmax.f32 %v6905_v12, %v7379_v5  ;;  %v7381_v62 = vmul.f32 0.2, %v6909_v48  ;;  %9123 = vmatpush1.bf16.msra.mxu0 %v11554_v33 }
 0x5f4   : > { %v7700_v38 = vmax.f32 %v6907_v23, %v7380_v18  ;;  %v7382_v41 = vmul.f32 0.2, %v6911_v51 }
 0x5f5   : > { %v17694_v40 = vmax.f32 %v17489_v8, %v7699_v54  ;;  %v7701_v42 = vmax.f32 %v6909_v48, %v7381_v62  ;;  %v11559_v8 = vld [vmem:[%s18582_s9 + $0x324] ss:$16 sps:$4 sm:$0xff]  }
 0x5f6   : > { %v17697_v20 = vmax.f32 %v17492_v2, %v7700_v38  ;;  %v7702_v58 = vmax.f32 %v6911_v51, %v7382_v41  ;;  %v6914_v14 = vpop.f32.mrb[108].mxu1  ;;  %9124 = vmatprep.subr.bf16.mxu0 %v11559_v8 }
 0x5f7   : > { %v17700_v9 = vmax.f32 %v17495_v46, %v7701_v42  ;;  %v6915_v59 = vadd.f32 %v6914_v14, %v15928_v28  ;;  %v6916_v22 = vpop.f32.mrb[109].mxu1  ;;  %v11562_v46 = vld [vmem:[%s18582_s9 + $0x344] ss:$16 sps:$4 sm:$0xff]   ;;  %9125 = vmatpush1.bf16.msra.mxu0 %v11557_v27  ;;  %v11563_v42 = vld [vmem:[%s18582_s9 + $0x360] ss:$16 sps:$4 sm:$0xff]  }
 0x5f8   : > { %v17710_v2 = vmax.f32 %v17499_v47, %v7702_v58  ;;  %v6917_v45 = vadd.f32 %v6916_v22, %v15936_v6  ;;  %v6918_v11 = vpop.f32.mrb[110].mxu1  ;;  %v11560_v47 = vld [vmem:[%s18582_s9 + $0x340] ss:$16 sps:$4 sm:$0xff]   ;;  %9126 = vmatprep.subr.bf16.mxu0 %v11562_v46 }
 0x5f9   : > { %v7383_v12 = vmul.f32 0.2, %v6915_v59  ;;  %v6919_v19 = vadd.f32 %v6918_v11, %v15928_v28  ;;  %v6920_v31 = vpop.f32.mrb[111].mxu1 }
 0x5fa   : > { %v7384_v49 = vmul.f32 0.2, %v6917_v45  ;;  %v6921_v23 = vadd.f32 %v6920_v31, %v15936_v6 }
 0x5fb   : > { %v7703_v52 = vmax.f32 %v6915_v59, %v7383_v12  ;;  %v7385_v56 = vmul.f32 0.2, %v6919_v19  ;;  %9127 = vmatpush1.bf16.msra.mxu0 %v11560_v47 }
 0x5fc   : > { %v7704_v5 = vmax.f32 %v6917_v45, %v7384_v49  ;;  %v7386_v48 = vmul.f32 0.2, %v6921_v23 }
 0x5fd   : > { %v17722_v4 = vmax.f32 %v17509_v50, %v7703_v52  ;;  %v7705_v18 = vmax.f32 %v6919_v19, %v7385_v56  ;;  %v11565_v50 = vld [vmem:[%s18582_s9 + $0x364] ss:$16 sps:$4 sm:$0xff]  }
 0x5fe   : > { %v17725_v51 = vmax.f32 %v17512_v43, %v7704_v5  ;;  %v7706_v33 = vmax.f32 %v6921_v23, %v7386_v48  ;;  %v6924_v54 = vpop.f32.mrb[112].mxu1  ;;  %9128 = vmatprep.subr.bf16.mxu0 %v11565_v50  ;;  %v11571_v50 = vld [vmem:[%s18582_s9 + $0x3a4] ss:$16 sps:$4 sm:$0xff]  }
 0x5ff   : > { %v17728_v62 = vmax.f32 %v17515_v30, %v7705_v18  ;;  %v6925_v38 = vadd.f32 %v6924_v54, %v15928_v28  ;;  %v6926_v41 = vpop.f32.mrb[113].mxu1  ;;  %v11568_v30 = vld [vmem:[%s18582_s9 + $0x384] ss:$16 sps:$4 sm:$0xff]   ;;  %9129 = vmatpush1.bf16.msra.mxu0 %v11563_v42 }
 0x600   : > { %v17738_v43 = vmax.f32 %v17519_v55, %v7706_v33  ;;  %v6927_v58 = vadd.f32 %v6926_v41, %v15936_v6  ;;  %v6928_v14 = vpop.f32.mrb[114].mxu1  ;;  %v11566_v55 = vld [vmem:[%s18582_s9 + $0x380] ss:$16 sps:$4 sm:$0xff]   ;;  %9130 = vmatprep.subr.bf16.mxu0 %v11568_v30 }
 0x601   : > { %v7387_v59 = vmul.f32 0.2, %v6925_v38  ;;  %v6929_v22 = vadd.f32 %v6928_v14, %v15928_v28  ;;  %v6930_v27 = vpop.f32.mrb[115].mxu1  ;;  %v11569_v41 = vld [vmem:[%s18582_s9 + $0x3a0] ss:$16 sps:$4 sm:$0xff]  }
 0x602   : > { %v7388_v8 = vmul.f32 0.2, %v6927_v58  ;;  %v6931_v45 = vadd.f32 %v6930_v27, %v15936_v6  ;;  %v11574_v14 = vld [vmem:[%s18582_s9 + $0x3c4] ss:$16 sps:$4 sm:$0xff]  }
 0x603   : > { %v7707_v11 = vmax.f32 %v6925_v38, %v7387_v59  ;;  %v7389_v46 = vmul.f32 0.2, %v6929_v22  ;;  %9131 = vmatpush1.bf16.msra.mxu0 %v11566_v55 }
 0x604   : > { %v7708_v12 = vmax.f32 %v6927_v58, %v7388_v8  ;;  %v7390_v19 = vmul.f32 0.2, %v6931_v45  ;;  %9132 = vmatprep.subr.bf16.mxu0 %v11571_v50  ;;  %v11572_v8 = vld [vmem:[%s18582_s9 + $0x3c0] ss:$16 sps:$4 sm:$0xff]  }
 0x605   : > { %v17750_v31 = vmax.f32 %v17529_v25, %v7707_v11  ;;  %v7709_v49 = vmax.f32 %v6929_v22, %v7389_v46 }
 0x606   : > { %v17753_v23 = vmax.f32 %v17532_v7, %v7708_v12  ;;  %v7710_v47 = vmax.f32 %v6931_v45, %v7390_v19  ;;  %v6934_v52 = vpop.f32.mrb[116].mxu1 }
 0x607   : > { %v17756_v56 = vmax.f32 %v17535_v35, %v7709_v49  ;;  %v6935_v5 = vadd.f32 %v6934_v52, %v15928_v28  ;;  %v6936_v48 = vpop.f32.mrb[117].mxu1  ;;  %9133 = vmatpush1.bf16.msra.mxu0 %v11569_v41 }
 0x608   : > { %v17760_v18 = vmax.f32 %v17539_v26, %v7710_v47  ;;  %v6937_v33 = vadd.f32 %v6936_v48, %v15936_v6  ;;  %v6938_v25 = vpop.f32.mrb[118].mxu1  ;;  %9134 = vmatprep.subr.bf16.mxu0 %v11574_v14  ;;  %v11575_v48 = vld [vmem:[%s18582_s9 + $0x3e0] ss:$16 sps:$4 sm:$0xff]  }
 0x609   : > { %v7391_v54 = vmul.f32 0.2, %v6935_v5  ;;  %v6939_v38 = vadd.f32 %v6938_v25, %v15928_v28  ;;  %v6940_v7 = vpop.f32.mrb[119].mxu1 }
 0x60a   : > { %v7392_v42 = vmul.f32 0.2, %v6937_v33  ;;  %v6941_v35 = vadd.f32 %v6940_v7, %v15936_v6 }
 0x60b   : > { %v7711_v26 = vmax.f32 %v6935_v5, %v7391_v54  ;;  %v7393_v58 = vmul.f32 0.2, %v6939_v38  ;;  %9135 = vmatpush1.bf16.msra.mxu0 %v11572_v8 }
 0x60c   : > { %v7712_v30 = vmax.f32 %v6937_v33, %v7392_v42  ;;  %v7394_v59 = vmul.f32 0.2, %v6941_v35 }
 0x60d   : > { %v17775_v22 = vmax.f32 %v17549_v36, %v7711_v26  ;;  %v7713_v27 = vmax.f32 %v6939_v38, %v7393_v58  ;;  %v11580_v38 = vld [vmem:[%s18582_s9 + $0xc] ss:$16 sps:$4 sm:$0xff]  }
 0x60e   : > { %v17781_v45 = vmax.f32 %v17552_v44, %v7712_v30  ;;  %v7714_v55 = vmax.f32 %v6941_v35, %v7394_v59  ;;  %v6944_v11 = vpop.f32.mrb[120].mxu1 }
 0x60f   : > { %v17784_v46 = vmax.f32 %v17555_v37, %v7713_v27  ;;  %v6945_v12 = vadd.f32 %v6944_v11, %v15928_v28  ;;  %v6946_v19 = vpop.f32.mrb[121].mxu1 }
 0x610   : > { %v17788_v36 = vmax.f32 %v17559_v63, %v7714_v55  ;;  %v6947_v49 = vadd.f32 %v6946_v19, %v15936_v6  ;;  %v6948_v47 = vpop.f32.mrb[122].mxu1  ;;  %v11577_v63 = vld [vmem:[%s18582_s9 + $0x3e4] ss:$16 sps:$4 sm:$0xff]  }
 0x611   : > { %v7395_v52 = vmul.f32 0.2, %v6945_v12  ;;  %v6949_v5 = vadd.f32 %v6948_v47, %v15928_v28  ;;  %v6950_v44 = vpop.f32.mrb[123].mxu1  ;;  %9136 = vmatprep.subr.bf16.mxu0 %v11577_v63 }
 0x612   : > { %v7396_v37 = vmul.f32 0.2, %v6947_v49  ;;  %v6951_v33 = vadd.f32 %v6950_v44, %v15936_v6  ;;  %9137 = vmatpush1.bf16.msra.mxu0 %v11575_v48 }
 0x613   : > { %v7715_v25 = vmax.f32 %v6945_v12, %v7395_v52  ;;  %v7397_v54 = vmul.f32 0.2, %v6949_v5  ;;  %9219 = vmatprep.subr.bf16.mxu0 %v11580_v38 }
 0x614   : > { %v7716_v7 = vmax.f32 %v6947_v49, %v7396_v37  ;;  %v7398_v41 = vmul.f32 0.2, %v6951_v33 }
 0x615   : > { %v17803_v42 = vmax.f32 %v17575_v13, %v7715_v25  ;;  %v7717_v35 = vmax.f32 %v6949_v5, %v7397_v54 }
 0x616   : > { %v17806_v50 = vmax.f32 %v17578_v16, %v7716_v7  ;;  %v7718_v26 = vmax.f32 %v6951_v33, %v7398_v41  ;;  %v6954_v58 = vpop.f32.mrb[124].mxu1 }
 0x617   : > { %v17809_v14 = vmax.f32 %v17581_v15, %v7717_v35  ;;  %v6955_v30 = vadd.f32 %v6954_v58, %v15928_v28  ;;  %v6956_v59 = vpop.f32.mrb[125].mxu1 }
 0x618   : > { %v17813_v27 = vmax.f32 %v17591_v57, %v7718_v26  ;;  %v6957_v13 = vadd.f32 %v6956_v59, %v15936_v6  ;;  %v6958_v8 = vpop.f32.mrb[126].mxu1 }
 0x619   : > { %v7399_v55 = vmul.f32 0.2, %v6955_v30  ;;  %v6959_v11 = vadd.f32 %v6958_v8, %v15928_v28  ;;  %v6960_v16 = vpop.f32.mrb[127].mxu1 }
 0x61a   : > { %v7400_v12 = vmul.f32 0.2, %v6957_v13  ;;  %v6961_v19 = vadd.f32 %v6960_v16, %v15936_v6 }
 0x61b   : > { %v7719_v49 = vmax.f32 %v6955_v30, %v7399_v55  ;;  %v7401_v47 = vmul.f32 0.2, %v6959_v11 }
 0x61c   : > { %v7720_v15 = vmax.f32 %v6957_v13, %v7400_v12  ;;  %v7402_v52 = vmul.f32 0.2, %v6961_v19 }
 0x61d   : > { %v17819_v5 = vmax.f32 %v17607_v53, %v7719_v49  ;;  %v7721_v44 = vmax.f32 %v6959_v11, %v7401_v47 }
 0x61e   : > { %v17822_v57 = vmax.f32 %v17610_v21, %v7720_v15  ;;  %v7722_v48 = vmax.f32 %v6961_v19, %v7402_v52  ;;  %v6964_v37 = vpop.f32.mrb[128].mxu1 }
 0x61f   : > { %v17825_v33 = vmax.f32 %v17613_v0, %v7721_v44  ;;  %v6965_v63 = vadd.f32 %v6964_v37, %v15928_v28  ;;  %v6966_v25 = vpop.f32.mrb[129].mxu1 }
 0x620   : > { %v17829_v54 = vmax.f32 %v17623_v1, %v7722_v48  ;;  %v6967_v38 = vadd.f32 %v6966_v25, %v15936_v6  ;;  %v6968_v7 = vpop.f32.mrb[130].mxu1 }
 0x621   : > { %v7403_v53 = vmul.f32 0.2, %v6965_v63  ;;  %v6969_v41 = vadd.f32 %v6968_v7, %v15928_v28  ;;  %v6970_v35 = vpop.f32.mrb[131].mxu1 }
 0x622   : > { %v7404_v21 = vmul.f32 0.2, %v6967_v38  ;;  %v6971_v26 = vadd.f32 %v6970_v35, %v15936_v6 }
 0x623   : > { %v7723_v58 = vmax.f32 %v6965_v63, %v7403_v53  ;;  %v7405_v30 = vmul.f32 0.2, %v6969_v41 }
 0x624   : > { %v7724_v0 = vmax.f32 %v6967_v38, %v7404_v21  ;;  %v7406_v59 = vmul.f32 0.2, %v6971_v26 }
 0x625   : > { %v17835_v13 = vmax.f32 %v17638_v39, %v7723_v58  ;;  %v7725_v8 = vmax.f32 %v6969_v41, %v7405_v30 }
 0x626   : > { %v17838_v1 = vmax.f32 %v17641_v34, %v7724_v0  ;;  %v7726_v55 = vmax.f32 %v6971_v26, %v7406_v59  ;;  %v6974_v11 = vpop.f32.mrb[132].mxu1 }
 0x627   : > { %v17841_v16 = vmax.f32 %v17644_v60, %v7725_v8  ;;  %v6975_v12 = vadd.f32 %v6974_v11, %v15928_v28  ;;  %v6976_v19 = vpop.f32.mrb[133].mxu1 }
 0x628   : > { %v17845_v49 = vmax.f32 %v17654_v29, %v7726_v55  ;;  %v6977_v47 = vadd.f32 %v6976_v19, %v15936_v6  ;;  %v6978_v15 = vpop.f32.mrb[134].mxu1 }
 0x629   : > { %v7407_v39 = vmul.f32 0.2, %v6975_v12  ;;  %v6979_v52 = vadd.f32 %v6978_v15, %v15928_v28  ;;  %v6980_v44 = vpop.f32.mrb[135].mxu1 }
 0x62a   : > { %v7408_v34 = vmul.f32 0.2, %v6977_v47  ;;  %v6981_v48 = vadd.f32 %v6980_v44, %v15936_v6 }
 0x62b   : > { %v7727_v37 = vmax.f32 %v6975_v12, %v7407_v39  ;;  %v7409_v63 = vmul.f32 0.2, %v6979_v52 }
 0x62c   : > { %v7728_v60 = vmax.f32 %v6977_v47, %v7408_v34  ;;  %v7410_v25 = vmul.f32 0.2, %v6981_v48 }
 0x62d   : > { %v17851_v38 = vmax.f32 %v17666_v17, %v7727_v37  ;;  %v7729_v7 = vmax.f32 %v6979_v52, %v7409_v63 }
 0x62e   : > { %v17854_v29 = vmax.f32 %v17669_v10, %v7728_v60  ;;  %v7730_v53 = vmax.f32 %v6981_v48, %v7410_v25  ;;  %v6984_v41 = vpop.f32.mrb[136].mxu1 }
 0x62f   : > { %v17857_v35 = vmax.f32 %v17672_v32, %v7729_v7  ;;  %v6985_v21 = vadd.f32 %v6984_v41, %v15928_v28  ;;  %v6986_v26 = vpop.f32.mrb[137].mxu1 }
 0x630   : > { %v17861_v58 = vmax.f32 %v17682_v24, %v7730_v53  ;;  %v6987_v30 = vadd.f32 %v6986_v26, %v15936_v6  ;;  %v6988_v0 = vpop.f32.mrb[138].mxu1 }
 0x631   : > { %v7411_v17 = vmul.f32 0.2, %v6985_v21  ;;  %v6989_v59 = vadd.f32 %v6988_v0, %v15928_v28  ;;  %v6990_v8 = vpop.f32.mrb[139].mxu1 }
 0x632   : > { %v7412_v10 = vmul.f32 0.2, %v6987_v30  ;;  %v6991_v55 = vadd.f32 %v6990_v8, %v15936_v6 }
 0x633   : > { %v7731_v11 = vmax.f32 %v6985_v21, %v7411_v17  ;;  %v7413_v12 = vmul.f32 0.2, %v6989_v59 }
 0x634   : > { %v7732_v32 = vmax.f32 %v6987_v30, %v7412_v10  ;;  %v7414_v19 = vmul.f32 0.2, %v6991_v55 }
 0x635   : > { %v17867_v47 = vmax.f32 %v17694_v40, %v7731_v11  ;;  %v7733_v15 = vmax.f32 %v6989_v59, %v7413_v12 }
 0x636   : > { %v17870_v24 = vmax.f32 %v17697_v20, %v7732_v32  ;;  %v7734_v39 = vmax.f32 %v6991_v55, %v7414_v19  ;;  %v6994_v52 = vpop.f32.mrb[140].mxu1 }
 0x637   : > { %v17873_v44 = vmax.f32 %v17700_v9, %v7733_v15  ;;  %v6995_v34 = vadd.f32 %v6994_v52, %v15928_v28  ;;  %v6996_v48 = vpop.f32.mrb[141].mxu1 }
 0x638   : > { %v17877_v37 = vmax.f32 %v17710_v2, %v7734_v39  ;;  %v6997_v63 = vadd.f32 %v6996_v48, %v15936_v6  ;;  %v6998_v60 = vpop.f32.mrb[142].mxu1 }
 0x639   : > { %v7415_v40 = vmul.f32 0.2, %v6995_v34  ;;  %v6999_v25 = vadd.f32 %v6998_v60, %v15928_v28  ;;  %v7000_v7 = vpop.f32.mrb[143].mxu1 }
 0x63a   : > { %v7416_v20 = vmul.f32 0.2, %v6997_v63  ;;  %v7001_v53 = vadd.f32 %v7000_v7, %v15936_v6 }
 0x63b   : > { %v7735_v41 = vmax.f32 %v6995_v34, %v7415_v40  ;;  %v7417_v21 = vmul.f32 0.2, %v6999_v25 }
 0x63c   : > { %v7736_v9 = vmax.f32 %v6997_v63, %v7416_v20  ;;  %v7418_v26 = vmul.f32 0.2, %v7001_v53 }
 0x63d   : > { %v17883_v30 = vmax.f32 %v17722_v4, %v7735_v41  ;;  %v7737_v0 = vmax.f32 %v6999_v25, %v7417_v21 }
 0x63e   : > { %v17886_v2 = vmax.f32 %v17725_v51, %v7736_v9  ;;  %v7738_v17 = vmax.f32 %v7001_v53, %v7418_v26  ;;  %v7004_v59 = vpop.f32.mrb[144].mxu1 }
 0x63f   : > { %v17889_v8 = vmax.f32 %v17728_v62, %v7737_v0  ;;  %v7005_v10 = vadd.f32 %v7004_v59, %v15928_v28  ;;  %v7006_v55 = vpop.f32.mrb[145].mxu1 }
 0x640   : > { %v17893_v11 = vmax.f32 %v17738_v43, %v7738_v17  ;;  %v7007_v12 = vadd.f32 %v7006_v55, %v15936_v6  ;;  %v7008_v32 = vpop.f32.mrb[146].mxu1 }
 0x641   : > { %v7419_v4 = vmul.f32 0.2, %v7005_v10  ;;  %v7009_v19 = vadd.f32 %v7008_v32, %v15928_v28  ;;  %v7010_v15 = vpop.f32.mrb[147].mxu1 }
 0x642   : > { %v7420_v51 = vmul.f32 0.2, %v7007_v12  ;;  %v7011_v39 = vadd.f32 %v7010_v15, %v15936_v6 }
 0x643   : > { %v7739_v52 = vmax.f32 %v7005_v10, %v7419_v4  ;;  %v7421_v34 = vmul.f32 0.2, %v7009_v19 }
 0x644   : > { %v7740_v62 = vmax.f32 %v7007_v12, %v7420_v51  ;;  %v7422_v48 = vmul.f32 0.2, %v7011_v39 }
 0x645   : > { %v17899_v63 = vmax.f32 %v17750_v31, %v7739_v52  ;;  %v7741_v60 = vmax.f32 %v7009_v19, %v7421_v34 }
 0x646   : > { %v17902_v43 = vmax.f32 %v17753_v23, %v7740_v62  ;;  %v7742_v40 = vmax.f32 %v7011_v39, %v7422_v48  ;;  %v7014_v25 = vpop.f32.mrb[148].mxu1 }
 0x647   : > { %v17905_v7 = vmax.f32 %v17756_v56, %v7741_v60  ;;  %v7015_v20 = vadd.f32 %v7014_v25, %v15928_v28  ;;  %v7016_v53 = vpop.f32.mrb[149].mxu1 }
 0x648   : > { %v17909_v41 = vmax.f32 %v17760_v18, %v7742_v40  ;;  %v7017_v21 = vadd.f32 %v7016_v53, %v15936_v6  ;;  %v7018_v9 = vpop.f32.mrb[150].mxu1 }
 0x649   : > { %v7423_v31 = vmul.f32 0.2, %v7015_v20  ;;  %v7019_v26 = vadd.f32 %v7018_v9, %v15928_v28  ;;  %v7020_v0 = vpop.f32.mrb[151].mxu1 }
 0x64a   : > { %v7424_v23 = vmul.f32 0.2, %v7017_v21  ;;  %v7021_v17 = vadd.f32 %v7020_v0, %v15936_v6 }
 0x64b   : > { %v7743_v59 = vmax.f32 %v7015_v20, %v7423_v31  ;;  %v7425_v10 = vmul.f32 0.2, %v7019_v26 }
 0x64c   : > { %v7744_v56 = vmax.f32 %v7017_v21, %v7424_v23  ;;  %v7426_v55 = vmul.f32 0.2, %v7021_v17 }
 0x64d   : > { %v17915_v12 = vmax.f32 %v17775_v22, %v7743_v59  ;;  %v7745_v32 = vmax.f32 %v7019_v26, %v7425_v10 }
 0x64e   : > { %v17918_v18 = vmax.f32 %v17781_v45, %v7744_v56  ;;  %v7746_v4 = vmax.f32 %v7021_v17, %v7426_v55  ;;  %v7024_v19 = vpop.f32.mrb[152].mxu1 }
 0x64f   : > { %v17921_v15 = vmax.f32 %v17784_v46, %v7745_v32  ;;  %v7025_v51 = vadd.f32 %v7024_v19, %v15928_v28  ;;  %v7026_v39 = vpop.f32.mrb[153].mxu1 }
 0x650   : > { %v17925_v52 = vmax.f32 %v17788_v36, %v7746_v4  ;;  %v7027_v34 = vadd.f32 %v7026_v39, %v15936_v6  ;;  %v7028_v62 = vpop.f32.mrb[154].mxu1 }
 0x651   : > { %v7427_v22 = vmul.f32 0.2, %v7025_v51  ;;  %v7029_v48 = vadd.f32 %v7028_v62, %v15928_v28  ;;  %v7030_v60 = vpop.f32.mrb[155].mxu1 }
 0x652   : > { %v7428_v45 = vmul.f32 0.2, %v7027_v34  ;;  %v7031_v40 = vadd.f32 %v7030_v60, %v15936_v6 }
 0x653   : > { %v7747_v25 = vmax.f32 %v7025_v51, %v7427_v22  ;;  %v7429_v20 = vmul.f32 0.2, %v7029_v48 }
 0x654   : > { %v7748_v46 = vmax.f32 %v7027_v34, %v7428_v45  ;;  %v7430_v53 = vmul.f32 0.2, %v7031_v40 }
 0x655   : > { %v17931_v21 = vmax.f32 %v17803_v42, %v7747_v25  ;;  %v7749_v9 = vmax.f32 %v7029_v48, %v7429_v20 }
 0x656   : > { %v17934_v36 = vmax.f32 %v17806_v50, %v7748_v46  ;;  %v7750_v31 = vmax.f32 %v7031_v40, %v7430_v53  ;;  %v7034_v26 = vpop.f32.mrb[156].mxu1 }
 0x657   : > { %v17937_v0 = vmax.f32 %v17809_v14, %v7749_v9  ;;  %v7035_v23 = vadd.f32 %v7034_v26, %v15928_v28  ;;  %v7036_v17 = vpop.f32.mrb[157].mxu1 }
 0x658   : > { %v17941_v59 = vmax.f32 %v17813_v27, %v7750_v31  ;;  %v7037_v10 = vadd.f32 %v7036_v17, %v15936_v6  ;;  %v7038_v56 = vpop.f32.mrb[158].mxu1 }
 0x659   : > { %v7431_v42 = vmul.f32 0.2, %v7035_v23  ;;  %v7039_v55 = vadd.f32 %v7038_v56, %v15928_v28  ;;  %v7040_v32 = vpop.f32.mrb[159].mxu1 }
 0x65a   : > { %v7432_v50 = vmul.f32 0.2, %v7037_v10  ;;  %v7041_v4 = vadd.f32 %v7040_v32, %v15936_v6 }
 0x65b   : > { %v7751_v19 = vmax.f32 %v7035_v23, %v7431_v42  ;;  %v7433_v51 = vmul.f32 0.2, %v7039_v55 }
 0x65c   : > { %v7752_v14 = vmax.f32 %v7037_v10, %v7432_v50  ;;  %v7434_v39 = vmul.f32 0.2, %v7041_v4 }
 0x65d   : > { %v17947_v34 = vmax.f32 %v17819_v5, %v7751_v19  ;;  %v7753_v62 = vmax.f32 %v7039_v55, %v7433_v51 }
 0x65e   : > { %v17950_v27 = vmax.f32 %v17822_v57, %v7752_v14  ;;  %v7754_v22 = vmax.f32 %v7041_v4, %v7434_v39  ;;  %v7044_v48 = vpop.f32.mrb[160].mxu1 }
 0x65f   : > { %v17953_v60 = vmax.f32 %v17825_v33, %v7753_v62  ;;  %v7045_v45 = vadd.f32 %v7044_v48, %v15928_v28  ;;  %v7046_v40 = vpop.f32.mrb[161].mxu1 }
 0x660   : > { %v17957_v25 = vmax.f32 %v17829_v54, %v7754_v22  ;;  %v7047_v20 = vadd.f32 %v7046_v40, %v15936_v6  ;;  %v7048_v46 = vpop.f32.mrb[162].mxu1 }
 0x661   : > { %v7435_v5 = vmul.f32 0.2, %v7045_v45  ;;  %v7049_v53 = vadd.f32 %v7048_v46, %v15928_v28  ;;  %v7050_v9 = vpop.f32.mrb[163].mxu1 }
 0x662   : > { %v7436_v57 = vmul.f32 0.2, %v7047_v20  ;;  %v7051_v31 = vadd.f32 %v7050_v9, %v15936_v6 }
 0x663   : > { %v7755_v26 = vmax.f32 %v7045_v45, %v7435_v5  ;;  %v7437_v23 = vmul.f32 0.2, %v7049_v53 }
 0x664   : > { %v7756_v33 = vmax.f32 %v7047_v20, %v7436_v57  ;;  %v7438_v17 = vmul.f32 0.2, %v7051_v31 }
 0x665   : > { %v17963_v10 = vmax.f32 %v17835_v13, %v7755_v26  ;;  %v7757_v56 = vmax.f32 %v7049_v53, %v7437_v23 }
 0x666   : > { %v17966_v54 = vmax.f32 %v17838_v1, %v7756_v33  ;;  %v7758_v42 = vmax.f32 %v7051_v31, %v7438_v17  ;;  %v7054_v55 = vpop.f32.mrb[164].mxu1 }
 0x667   : > { %v17969_v32 = vmax.f32 %v17841_v16, %v7757_v56  ;;  %v7055_v50 = vadd.f32 %v7054_v55, %v15928_v28  ;;  %v7056_v4 = vpop.f32.mrb[165].mxu1 }
 0x668   : > { %v17973_v19 = vmax.f32 %v17845_v49, %v7758_v42  ;;  %v7057_v51 = vadd.f32 %v7056_v4, %v15936_v6  ;;  %v7058_v14 = vpop.f32.mrb[166].mxu1 }
 0x669   : > { %v7439_v13 = vmul.f32 0.2, %v7055_v50  ;;  %v7059_v39 = vadd.f32 %v7058_v14, %v15928_v28  ;;  %v7060_v62 = vpop.f32.mrb[167].mxu1 }
 0x66a   : > { %v7440_v1 = vmul.f32 0.2, %v7057_v51  ;;  %v7061_v22 = vadd.f32 %v7060_v62, %v15936_v6 }
 0x66b   : > { %v7759_v48 = vmax.f32 %v7055_v50, %v7439_v13  ;;  %v7441_v45 = vmul.f32 0.2, %v7059_v39 }
 0x66c   : > { %v7760_v16 = vmax.f32 %v7057_v51, %v7440_v1  ;;  %v7442_v40 = vmul.f32 0.2, %v7061_v22 }
 0x66d   : > { %v17979_v20 = vmax.f32 %v17851_v38, %v7759_v48  ;;  %v7761_v46 = vmax.f32 %v7059_v39, %v7441_v45 }
 0x66e   : > { %v17982_v49 = vmax.f32 %v17854_v29, %v7760_v16  ;;  %v7762_v5 = vmax.f32 %v7061_v22, %v7442_v40  ;;  %v7064_v53 = vpop.f32.mrb[168].mxu1 }
 0x66f   : > { %v17985_v9 = vmax.f32 %v17857_v35, %v7761_v46  ;;  %v7065_v57 = vadd.f32 %v7064_v53, %v15928_v28  ;;  %v7066_v31 = vpop.f32.mrb[169].mxu1 }
 0x670   : > { %v17989_v26 = vmax.f32 %v17861_v58, %v7762_v5  ;;  %v7067_v23 = vadd.f32 %v7066_v31, %v15936_v6  ;;  %v7068_v33 = vpop.f32.mrb[170].mxu1 }
 0x671   : > { %v7443_v38 = vmul.f32 0.2, %v7065_v57  ;;  %v7069_v17 = vadd.f32 %v7068_v33, %v15928_v28  ;;  %v7070_v56 = vpop.f32.mrb[171].mxu1 }
 0x672   : > { %v7444_v29 = vmul.f32 0.2, %v7067_v23  ;;  %v7071_v42 = vadd.f32 %v7070_v56, %v15936_v6 }
 0x673   : > { %v7763_v55 = vmax.f32 %v7065_v57, %v7443_v38  ;;  %v7445_v50 = vmul.f32 0.2, %v7069_v17 }
 0x674   : > { %v7764_v35 = vmax.f32 %v7067_v23, %v7444_v29  ;;  %v7446_v4 = vmul.f32 0.2, %v7071_v42 }
 0x675   : > { %v17995_v51 = vmax.f32 %v17867_v47, %v7763_v55  ;;  %v7765_v14 = vmax.f32 %v7069_v17, %v7445_v50 }
 0x676   : > { %v17998_v58 = vmax.f32 %v17870_v24, %v7764_v35  ;;  %v7766_v13 = vmax.f32 %v7071_v42, %v7446_v4  ;;  %v7074_v39 = vpop.f32.mrb[172].mxu1 }
 0x677   : > { %v18001_v62 = vmax.f32 %v17873_v44, %v7765_v14  ;;  %v7075_v1 = vadd.f32 %v7074_v39, %v15928_v28  ;;  %v7076_v22 = vpop.f32.mrb[173].mxu1 }
 0x678   : > { %v18005_v48 = vmax.f32 %v17877_v37, %v7766_v13  ;;  %v7077_v47 = vadd.f32 %v7076_v22, %v15936_v6  ;;  %v7078_v45 = vpop.f32.mrb[174].mxu1 }
 0x679   : > { %v7447_v16 = vmul.f32 0.2, %v7075_v1  ;;  %v7079_v24 = vadd.f32 %v7078_v45, %v15928_v28  ;;  %v7080_v40 = vpop.f32.mrb[175].mxu1 }
 0x67a   : > { %v7448_v46 = vmul.f32 0.2, %v7077_v47  ;;  %v7081_v5 = vadd.f32 %v7080_v40, %v15936_v6 }
 0x67b   : > { %v7767_v53 = vmax.f32 %v7075_v1, %v7447_v16  ;;  %v7449_v57 = vmul.f32 0.2, %v7079_v24 }
 0x67c   : > { %v7768_v44 = vmax.f32 %v7077_v47, %v7448_v46  ;;  %v7450_v31 = vmul.f32 0.2, %v7081_v5 }
 0x67d   : > { %v18013_v23 = vmax.f32 %v17883_v30, %v7767_v53  ;;  %v7769_v37 = vmax.f32 %v7079_v24, %v7449_v57 }
 0x67e   : > { %v18016_v33 = vmax.f32 %v17886_v2, %v7768_v44  ;;  %v7770_v38 = vmax.f32 %v7081_v5, %v7450_v31  ;;  %v7084_v17 = vpop.f32.mrb[176].mxu1 }
 0x67f   : > { %v18019_v56 = vmax.f32 %v17889_v8, %v7769_v37  ;;  %v7085_v29 = vadd.f32 %v7084_v17, %v15928_v28  ;;  %v7086_v42 = vpop.f32.mrb[177].mxu1 }
 0x680   : > { %v18023_v55 = vmax.f32 %v17893_v11, %v7770_v38  ;;  %v7087_v50 = vadd.f32 %v7086_v42, %v15936_v6  ;;  %v7088_v30 = vpop.f32.mrb[178].mxu1 }
 0x681   : > { %v7451_v35 = vmul.f32 0.2, %v7085_v29  ;;  %v7089_v2 = vadd.f32 %v7088_v30, %v15928_v28  ;;  %v7090_v4 = vpop.f32.mrb[179].mxu1 }
 0x682   : > { %v7452_v14 = vmul.f32 0.2, %v7087_v50  ;;  %v7091_v13 = vadd.f32 %v7090_v4, %v15936_v6 }
 0x683   : > { %v7771_v39 = vmax.f32 %v7085_v29, %v7451_v35  ;;  %v7453_v8 = vmul.f32 0.2, %v7089_v2 }
 0x684   : > { %v7772_v11 = vmax.f32 %v7087_v50, %v7452_v14  ;;  %v7454_v1 = vmul.f32 0.2, %v7091_v13  ;;  %v11583_v50 = vld [vmem:[%s18582_s9 + $0x2c] ss:$16 sps:$4 sm:$0xff]  }
 0x685   : > { %v8059_v22 = vmax.f32 %v17899_v63, %v7771_v39  ;;  %v7773_v47 = vmax.f32 %v7089_v2, %v7453_v8  ;;  %v11581_v8 = vld [vmem:[%s18582_s9 + $0x28] ss:$16 sps:$4 sm:$0xff]  }
 0x686   : > { %v8060_v45 = vmax.f32 %v17902_v43, %v7772_v11  ;;  %v7774_v16 = vmax.f32 %v7091_v13, %v7454_v1  ;;  %v7094_v24 = vpop.f32.mrb[180].mxu1 }
 0x687   : > { %9637 = vst [vmem:[%s18031_s27] sm:$0xff] %v8059_v22  ;;  %v8061_v40 = vmax.f32 %v17905_v7, %v7773_v47  ;;  %v7095_v46 = vadd.f32 %v7094_v24, %v15928_v28  ;;  %v7096_v5 = vpop.f32.mrb[181].mxu1 }
 0x688   : > { %9638 = vst [vmem:[%s18031_s27 + $0x8] sm:$0xff] %v8060_v45  ;;  %v8062_v53 = vmax.f32 %v17909_v41, %v7774_v16  ;;  %v7097_v57 = vadd.f32 %v7096_v5, %v15936_v6  ;;  %v7098_v44 = vpop.f32.mrb[182].mxu1  ;;  %v11578_v41 = vld [vmem:[%s18582_s9 + $0x8] ss:$16 sps:$4 sm:$0xff]  }
 0x689   : > { %v18041_v31 = vpack.c.bf16 %v8061_v40, %v8059_v22  ;;  %9639 = vst [vmem:[%s18031_s27 + $0x10] sm:$0xff] %v8061_v40  ;;  %v7455_v63 = vmul.f32 0.2, %v7095_v46  ;;  %v7099_v43 = vadd.f32 %v7098_v44, %v15928_v28  ;;  %v7100_v37 = vpop.f32.mrb[183].mxu1 }
 0x68a   : > { %9640 = vst [vmem:[%s18031_s27 + $0x18] sm:$0xff] %v8062_v53  ;;  %v7456_v38 = vmul.f32 0.2, %v7097_v57  ;;  %v7101_v7 = vadd.f32 %v7100_v37, %v15936_v6  ;;  %v18047_v17 = vpack.c.bf16 %v8062_v53, %v8060_v45 }
 0x68b   : > { %v7775_v29 = vmax.f32 %v7095_v46, %v7455_v63  ;;  %v7457_v42 = vmul.f32 0.2, %v7099_v43  ;;  %v11589_v63 = vld [vmem:[%s18582_s9 + $0x6c] ss:$16 sps:$4 sm:$0xff]  }
 0x68c   : > { %v7776_v30 = vmax.f32 %v7097_v57, %v7456_v38  ;;  %v7458_v35 = vmul.f32 0.2, %v7101_v7  ;;  %9138 = vmatprep.mubr.bf16.mxu0 %v18047_v17 }
 0x68d   : > { %v8063_v2 = vmax.f32 %v17915_v12, %v7775_v29  ;;  %v7777_v4 = vmax.f32 %v7099_v43, %v7457_v42  ;;  %9139 = vmatmul.mubr.bf16.vlgmr.msra.gmra.mrb[80].mxu0 %v18041_v31 }
 0x68e   : > { %v8064_v14 = vmax.f32 %v17918_v18, %v7776_v30  ;;  %v7778_v13 = vmax.f32 %v7101_v7, %v7458_v35  ;;  %9220 = vmatpush1.bf16.msra.mxu0 %v11578_v41  ;;  %v7104_v39 = vpop.f32.mrb[184].mxu1  ;;  %v11586_v18 = vld [vmem:[%s18582_s9 + $0x4c] ss:$16 sps:$4 sm:$0xff]  }
 0x68f   : > { %9641 = vst [vmem:[%s18031_s27 + $0x20] sm:$0xff] %v8063_v2  ;;  %v8065_v11 = vmax.f32 %v17921_v15, %v7777_v4  ;;  %v7105_v1 = vadd.f32 %v7104_v39, %v15928_v28  ;;  %v7106_v12 = vpop.f32.mrb[185].mxu1  ;;  %9221 = vmatprep.subr.bf16.mxu0 %v11583_v50  ;;  %v11587_v50 = vld [vmem:[%s18582_s9 + $0x68] ss:$16 sps:$4 sm:$0xff]  }
 0x690   : > { %9642 = vst [vmem:[%s18031_s27 + $0x28] sm:$0xff] %v8064_v14  ;;  %v8066_v22 = vmax.f32 %v17925_v52, %v7778_v13  ;;  %v7107_v47 = vadd.f32 %v7106_v12, %v15936_v6  ;;  %v7108_v45 = vpop.f32.mrb[186].mxu1  ;;  %v11584_v52 = vld [vmem:[%s18582_s9 + $0x48] ss:$16 sps:$4 sm:$0xff]  }
 0x691   : > { %v18071_v16 = vpack.c.bf16 %v8065_v11, %v8063_v2  ;;  %9643 = vst [vmem:[%s18031_s27 + $0x30] sm:$0xff] %v8065_v11  ;;  %v7459_v24 = vmul.f32 0.2, %v7105_v1  ;;  %v7109_v15 = vadd.f32 %v7108_v45, %v15928_v28  ;;  %v7110_v40 = vpop.f32.mrb[187].mxu1 }
 0x692   : > { %9644 = vst [vmem:[%s18031_s27 + $0x38] sm:$0xff] %v8066_v22  ;;  %v7460_v46 = vmul.f32 0.2, %v7107_v47  ;;  %v7111_v5 = vadd.f32 %v7110_v40, %v15936_v6  ;;  %9222 = vmatpush1.bf16.msra.mxu0 %v11581_v8  ;;  %v18077_v53 = vpack.c.bf16 %v8066_v22, %v8064_v14 }
 0x693   : > { %v7779_v57 = vmax.f32 %v7105_v1, %v7459_v24  ;;  %v7461_v44 = vmul.f32 0.2, %v7109_v15  ;;  %9223 = vmatprep.subr.bf16.mxu0 %v11586_v18 }
 0x694   : > { %v7780_v43 = vmax.f32 %v7107_v47, %v7460_v46  ;;  %v7462_v37 = vmul.f32 0.2, %v7111_v5  ;;  %9148 = vmatprep.mubr.bf16.mxu0 %v18077_v53  ;;  %v11595_v47 = vld [vmem:[%s18582_s9 + $0xac] ss:$16 sps:$4 sm:$0xff]  }
 0x695   : > { %v8067_v38 = vmax.f32 %v17931_v21, %v7779_v57  ;;  %v7781_v7 = vmax.f32 %v7109_v15, %v7461_v44  ;;  %9149 = vmatmul.mubr.bf16.gmra.mrb[84].mxu0 %v18071_v16  ;;  %v11593_v57 = vld [vmem:[%s18582_s9 + $0xa8] ss:$16 sps:$4 sm:$0xff]  }
 0x696   : > { %v8068_v41 = vmax.f32 %v17934_v36, %v7780_v43  ;;  %v7782_v29 = vmax.f32 %v7111_v5, %v7462_v37  ;;  %9224 = vmatpush1.bf16.msra.mxu0 %v11584_v52  ;;  %v7114_v42 = vpop.f32.mrb[188].mxu1  ;;  %v11592_v36 = vld [vmem:[%s18582_s9 + $0x8c] ss:$16 sps:$4 sm:$0xff]  }
 0x697   : > { %9645 = vst [vmem:[%s18031_s27 + $0x40] sm:$0xff] %v8067_v38  ;;  %v8069_v30 = vmax.f32 %v17937_v0, %v7781_v7  ;;  %v7115_v35 = vadd.f32 %v7114_v42, %v15928_v28  ;;  %v7116_v21 = vpop.f32.mrb[189].mxu1  ;;  %9225 = vmatprep.subr.bf16.mxu0 %v11589_v63 }
 0x698   : > { %9646 = vst [vmem:[%s18031_s27 + $0x48] sm:$0xff] %v8068_v41  ;;  %v8070_v2 = vmax.f32 %v17941_v59, %v7782_v29  ;;  %v7117_v4 = vadd.f32 %v7116_v21, %v15936_v6  ;;  %v7118_v14 = vpop.f32.mrb[190].mxu1  ;;  %v11590_v59 = vld [vmem:[%s18582_s9 + $0x88] ss:$16 sps:$4 sm:$0xff]  }
 0x699   : > { %v18101_v13 = vpack.c.bf16 %v8069_v30, %v8067_v38  ;;  %9647 = vst [vmem:[%s18031_s27 + $0x50] sm:$0xff] %v8069_v30  ;;  %v7463_v39 = vmul.f32 0.2, %v7115_v35  ;;  %v7119_v0 = vadd.f32 %v7118_v14, %v15928_v28  ;;  %v7120_v8 = vpop.f32.mrb[191].mxu1 }
 0x69a   : > { %9648 = vst [vmem:[%s18031_s27 + $0x58] sm:$0xff] %v8070_v2  ;;  %v7464_v11 = vmul.f32 0.2, %v7117_v4  ;;  %v7121_v1 = vadd.f32 %v7120_v8, %v15936_v6  ;;  %9226 = vmatpush1.bf16.msra.mxu0 %v11587_v50  ;;  %v18107_v12 = vpack.c.bf16 %v8070_v2, %v8068_v41 }
 0x69b   : > { %v7783_v18 = vmax.f32 %v7115_v35, %v7463_v39  ;;  %v7465_v22 = vmul.f32 0.2, %v7119_v0  ;;  %9227 = vmatprep.subr.bf16.mxu0 %v11592_v36  ;;  %v11601_v36 = vld [vmem:[%s18582_s9 + $0xec] ss:$16 sps:$4 sm:$0xff]  }
 0x69c   : > { %v7784_v45 = vmax.f32 %v7117_v4, %v7464_v11  ;;  %v7466_v24 = vmul.f32 0.2, %v7121_v1  ;;  %9158 = vmatprep.mubr.bf16.mxu0 %v18107_v12 }
 0x69d   : > { %v8071_v15 = vmax.f32 %v17947_v34, %v7783_v18  ;;  %v7785_v40 = vmax.f32 %v7119_v0, %v7465_v22  ;;  %9159 = vmatmul.mubr.bf16.gmra.mrb[88].mxu0 %v18101_v13 }
 0x69e   : > { %v8072_v46 = vmax.f32 %v17950_v27, %v7784_v45  ;;  %v7786_v5 = vmax.f32 %v7121_v1, %v7466_v24  ;;  %9228 = vmatpush1.bf16.msra.mxu0 %v11590_v59  ;;  %v7124_v52 = vpop.f32.mrb[192].mxu1  ;;  %v11598_v27 = vld [vmem:[%s18582_s9 + $0xcc] ss:$16 sps:$4 sm:$0xff]   ;;  %v11599_v1 = vld [vmem:[%s18582_s9 + $0xe8] ss:$16 sps:$4 sm:$0xff]  }
 0x69f   : > { %9649 = vst [vmem:[%s18031_s27 + $0x60] sm:$0xff] %v8071_v15  ;;  %v8073_v44 = vmax.f32 %v17953_v60, %v7785_v40  ;;  %v7125_v63 = vadd.f32 %v7124_v52, %v15928_v28  ;;  %v7126_v34 = vpop.f32.mrb[193].mxu1  ;;  %9229 = vmatprep.subr.bf16.mxu0 %v11595_v47 }
 0x6a0   : > { %9650 = vst [vmem:[%s18031_s27 + $0x68] sm:$0xff] %v8072_v46  ;;  %v8074_v43 = vmax.f32 %v17957_v25, %v7786_v5  ;;  %v7127_v37 = vadd.f32 %v7126_v34, %v15936_v6  ;;  %v7128_v38 = vpop.f32.mrb[194].mxu1  ;;  %v11596_v25 = vld [vmem:[%s18582_s9 + $0xc8] ss:$16 sps:$4 sm:$0xff]  }
 0x6a1   : > { %v18131_v7 = vpack.c.bf16 %v8073_v44, %v8071_v15  ;;  %9651 = vst [vmem:[%s18031_s27 + $0x70] sm:$0xff] %v8073_v44  ;;  %v7467_v41 = vmul.f32 0.2, %v7125_v63  ;;  %v7129_v60 = vadd.f32 %v7128_v38, %v15928_v28  ;;  %v7130_v29 = vpop.f32.mrb[195].mxu1 }
 0x6a2   : > { %9652 = vst [vmem:[%s18031_s27 + $0x78] sm:$0xff] %v8074_v43  ;;  %v7468_v42 = vmul.f32 0.2, %v7127_v37  ;;  %v7131_v50 = vadd.f32 %v7130_v29, %v15936_v6  ;;  %9230 = vmatpush1.bf16.msra.mxu0 %v11593_v57  ;;  %v18137_v30 = vpack.c.bf16 %v8074_v43, %v8072_v46  ;;  %v11605_v29 = vld [vmem:[%s18582_s9 + $0x128] ss:$16 sps:$4 sm:$0xff]  }
 0x6a3   : > { %v7787_v35 = vmax.f32 %v7125_v63, %v7467_v41  ;;  %v7469_v21 = vmul.f32 0.2, %v7129_v60  ;;  %9231 = vmatprep.subr.bf16.mxu0 %v11598_v27  ;;  %v11607_v63 = vld [vmem:[%s18582_s9 + $0x12c] ss:$16 sps:$4 sm:$0xff]  }
 0x6a4   : > { %v7788_v2 = vmax.f32 %v7127_v37, %v7468_v42  ;;  %v7470_v4 = vmul.f32 0.2, %v7131_v50  ;;  %9168 = vmatprep.mubr.bf16.mxu0 %v18137_v30 }
 0x6a5   : > { %v8075_v14 = vmax.f32 %v17963_v10, %v7787_v35  ;;  %v7789_v39 = vmax.f32 %v7129_v60, %v7469_v21  ;;  %9169 = vmatmul.mubr.bf16.gmra.mrb[92].mxu0 %v18131_v7 }
 0x6a6   : > { %v8076_v0 = vmax.f32 %v17966_v54, %v7788_v2  ;;  %v7790_v8 = vmax.f32 %v7131_v50, %v7470_v4  ;;  %9232 = vmatpush1.bf16.msra.mxu0 %v11596_v25  ;;  %v7134_v11 = vpop.f32.mrb[196].mxu1  ;;  %v11604_v54 = vld [vmem:[%s18582_s9 + $0x10c] ss:$16 sps:$4 sm:$0xff]  }
 0x6a7   : > { %9653 = vst [vmem:[%s18031_s27 + $0x80] sm:$0xff] %v8075_v14  ;;  %v8077_v59 = vmax.f32 %v17969_v32, %v7789_v39  ;;  %v7135_v18 = vadd.f32 %v7134_v11, %v15928_v28  ;;  %v7136_v10 = vpop.f32.mrb[197].mxu1  ;;  %9233 = vmatprep.subr.bf16.mxu0 %v11601_v36 }
 0x6a8   : > { %9654 = vst [vmem:[%s18031_s27 + $0x88] sm:$0xff] %v8076_v0  ;;  %v8078_v22 = vmax.f32 %v17973_v19, %v7790_v8  ;;  %v7137_v47 = vadd.f32 %v7136_v10, %v15936_v6  ;;  %v7138_v45 = vpop.f32.mrb[198].mxu1  ;;  %v11602_v19 = vld [vmem:[%s18582_s9 + $0x108] ss:$16 sps:$4 sm:$0xff]  }
 0x6a9   : > { %v18161_v24 = vpack.c.bf16 %v8077_v59, %v8075_v14  ;;  %9655 = vst [vmem:[%s18031_s27 + $0x90] sm:$0xff] %v8077_v59  ;;  %v7471_v15 = vmul.f32 0.2, %v7135_v18  ;;  %v7139_v32 = vadd.f32 %v7138_v45, %v15928_v28  ;;  %v7140_v40 = vpop.f32.mrb[199].mxu1 }
 0x6aa   : > { %9656 = vst [vmem:[%s18031_s27 + $0x98] sm:$0xff] %v8078_v22  ;;  %v7472_v46 = vmul.f32 0.2, %v7137_v47  ;;  %v7141_v5 = vadd.f32 %v7140_v40, %v15936_v6  ;;  %9234 = vmatpush1.bf16.msra.mxu0 %v11599_v1  ;;  %v18167_v52 = vpack.c.bf16 %v8078_v22, %v8076_v0  ;;  %v11613_v1 = vld [vmem:[%s18582_s9 + $0x16c] ss:$16 sps:$4 sm:$0xff]  }
 0x6ab   : > { %v7791_v57 = vmax.f32 %v7135_v18, %v7471_v15  ;;  %v7473_v44 = vmul.f32 0.2, %v7139_v32  ;;  %9235 = vmatprep.subr.bf16.mxu0 %v11604_v54  ;;  %v11611_v15 = vld [vmem:[%s18582_s9 + $0x168] ss:$16 sps:$4 sm:$0xff]  }
 0x6ac   : > { %v7792_v34 = vmax.f32 %v7137_v47, %v7472_v46  ;;  %v7474_v27 = vmul.f32 0.2, %v7141_v5  ;;  %9178 = vmatprep.mubr.bf16.mxu0 %v18167_v52 }
 0x6ad   : > { %v8079_v43 = vmax.f32 %v17979_v20, %v7791_v57  ;;  %v7793_v37 = vmax.f32 %v7139_v32, %v7473_v44  ;;  %9179 = vmatmul.mubr.bf16.gmra.mrb[96].mxu0 %v18161_v24 }
 0x6ae   : > { %v8080_v38 = vmax.f32 %v17982_v49, %v7792_v34  ;;  %v7794_v41 = vmax.f32 %v7141_v5, %v7474_v27  ;;  %9236 = vmatpush1.bf16.msra.mxu0 %v11602_v19  ;;  %v7144_v60 = vpop.f32.mrb[200].mxu1  ;;  %v11610_v49 = vld [vmem:[%s18582_s9 + $0x14c] ss:$16 sps:$4 sm:$0xff]  }
 0x6af   : > { %9657 = vst [vmem:[%s18031_s27 + $0xa0] sm:$0xff] %v8079_v43  ;;  %v8081_v42 = vmax.f32 %v17985_v9, %v7793_v37  ;;  %v7145_v50 = vadd.f32 %v7144_v60, %v15928_v28  ;;  %v7146_v20 = vpop.f32.mrb[201].mxu1  ;;  %9237 = vmatprep.subr.bf16.mxu0 %v11607_v63 }
 0x6b0   : > { %9658 = vst [vmem:[%s18031_s27 + $0xa8] sm:$0xff] %v8080_v38  ;;  %v8082_v25 = vmax.f32 %v17989_v26, %v7794_v41  ;;  %v7147_v35 = vadd.f32 %v7146_v20, %v15936_v6  ;;  %v7148_v21 = vpop.f32.mrb[202].mxu1  ;;  %v11608_v26 = vld [vmem:[%s18582_s9 + $0x148] ss:$16 sps:$4 sm:$0xff]  }
 0x6b1   : > { %v18191_v36 = vpack.c.bf16 %v8081_v42, %v8079_v43  ;;  %9659 = vst [vmem:[%s18031_s27 + $0xb0] sm:$0xff] %v8081_v42  ;;  %v7475_v2 = vmul.f32 0.2, %v7145_v50  ;;  %v7149_v9 = vadd.f32 %v7148_v21, %v15928_v28  ;;  %v7150_v4 = vpop.f32.mrb[203].mxu1  ;;  %v11617_v20 = vld [vmem:[%s18582_s9 + $0x1a8] ss:$16 sps:$4 sm:$0xff]  }
 0x6b2   : > { %9660 = vst [vmem:[%s18031_s27 + $0xb8] sm:$0xff] %v8082_v25  ;;  %v7476_v14 = vmul.f32 0.2, %v7147_v35  ;;  %v7151_v39 = vadd.f32 %v7150_v4, %v15936_v6  ;;  %9238 = vmatpush1.bf16.msra.mxu0 %v11605_v29  ;;  %v18197_v0 = vpack.c.bf16 %v8082_v25, %v8080_v38  ;;  %v11622_v25 = vld [vmem:[%s18582_s9 + $0x1cc] ss:$16 sps:$4 sm:$0xff]  }
 0x6b3   : > { %v7795_v8 = vmax.f32 %v7145_v50, %v7475_v2  ;;  %v7477_v11 = vmul.f32 0.2, %v7149_v9  ;;  %9239 = vmatprep.subr.bf16.mxu0 %v11610_v49  ;;  %v11620_v21 = vld [vmem:[%s18582_s9 + $0x1c8] ss:$16 sps:$4 sm:$0xff]  }
 0x6b4   : > { %v7796_v59 = vmax.f32 %v7147_v35, %v7476_v14  ;;  %v7478_v18 = vmul.f32 0.2, %v7151_v39  ;;  %9188 = vmatprep.mubr.bf16.mxu0 %v18197_v0  ;;  %v11623_v2 = vld [vmem:[%s18582_s9 + $0x1e8] ss:$16 sps:$4 sm:$0xff]   ;;  %v11631_v14 = vld [vmem:[%s18582_s9 + $0x22c] ss:$16 sps:$4 sm:$0xff]  }
 0x6b5   : > { %v8083_v10 = vmax.f32 %v17995_v51, %v7795_v8  ;;  %v7797_v54 = vmax.f32 %v7149_v9, %v7477_v11  ;;  %9189 = vmatmul.mubr.bf16.gmra.mrb[100].mxu0 %v18191_v36  ;;  %v11628_v9 = vld [vmem:[%s18582_s9 + $0x20c] ss:$16 sps:$4 sm:$0xff]   ;;  %v11626_v4 = vld [vmem:[%s18582_s9 + $0x208] ss:$16 sps:$4 sm:$0xff]  }
 0x6b6   : > { %v8084_v22 = vmax.f32 %v17998_v58, %v7796_v59  ;;  %v7798_v47 = vmax.f32 %v7151_v39, %v7478_v18  ;;  %9240 = vmatpush1.bf16.msra.mxu0 %v11608_v26  ;;  %v7154_v45 = vpop.f32.mrb[204].mxu1  ;;  %v11616_v58 = vld [vmem:[%s18582_s9 + $0x18c] ss:$16 sps:$4 sm:$0xff]   ;;  %v11629_v8 = vld [vmem:[%s18582_s9 + $0x228] ss:$16 sps:$4 sm:$0xff]  }
 0x6b7   : > { %9661 = vst [vmem:[%s18031_s27 + $0xc0] sm:$0xff] %v8083_v10  ;;  %v8085_v32 = vmax.f32 %v18001_v62, %v7797_v54  ;;  %v7155_v40 = vadd.f32 %v7154_v45, %v15928_v28  ;;  %v7156_v51 = vpop.f32.mrb[205].mxu1  ;;  %9241 = vmatprep.subr.bf16.mxu0 %v11613_v1  ;;  %v19685_v39 = vld [vmem:[#allocation14_spill] sm:$0xff]  ;;  %v19686_v26 = vld [vmem:[#allocation84_spill] sm:$0xff]  ;;  %v19689_v45 = vld [vmem:[#allocation53_spill] sm:$0xff] }
 0x6b8   : > { %9662 = vst [vmem:[%s18031_s27 + $0xc8] sm:$0xff] %v8084_v22  ;;  %v8086_v46 = vmax.f32 %v18005_v48, %v7798_v47  ;;  %v7157_v5 = vadd.f32 %v7156_v51, %v15936_v6  ;;  %v7158_v19 = vpop.f32.mrb[206].mxu1  ;;  %v11614_v48 = vld [vmem:[%s18582_s9 + $0x188] ss:$16 sps:$4 sm:$0xff]   ;;  %v11634_v11 = vld [vmem:[%s18582_s9 + $0x24c] ss:$16 sps:$4 sm:$0xff]  }
 0x6b9   : > { %v18221_v57 = vpack.c.bf16 %v8085_v32, %v8083_v10  ;;  %9663 = vst [vmem:[%s18031_s27 + $0xd0] sm:$0xff] %v8085_v32  ;;  %v7479_v44 = vmul.f32 0.2, %v7155_v40  ;;  %v7159_v62 = vadd.f32 %v7158_v19, %v15928_v28  ;;  %v7160_v63 = vpop.f32.mrb[207].mxu1  ;;  %v11619_v28 = vld [vmem:[%s18582_s9 + $0x1ac] ss:$16 sps:$4 sm:$0xff]  }
 0x6ba   : > { %9664 = vst [vmem:[%s18031_s27 + $0xd8] sm:$0xff] %v8086_v46  ;;  %v7480_v34 = vmul.f32 0.2, %v7157_v5  ;;  %v7161_v27 = vadd.f32 %v7160_v63, %v15936_v6  ;;  %9242 = vmatpush1.bf16.msra.mxu0 %v11611_v15  ;;  %v18227_v43 = vpack.c.bf16 %v8086_v46, %v8084_v22  ;;  %v11632_v1 = vld [vmem:[%s18582_s9 + $0x248] ss:$16 sps:$4 sm:$0xff]   ;;  %v19691_v46 = vld [vmem:[#allocation87_spill] sm:$0xff] }
 0x6bb   : > { %v7799_v37 = vmax.f32 %v7155_v40, %v7479_v44  ;;  %v7481_v38 = vmul.f32 0.2, %v7159_v62  ;;  %9243 = vmatprep.subr.bf16.mxu0 %v11616_v58  ;;  %v11637_v59 = vld [vmem:[%s18582_s9 + $0x26c] ss:$16 sps:$4 sm:$0xff]   ;;  %v11635_v10 = vld [vmem:[%s18582_s9 + $0x268] ss:$16 sps:$4 sm:$0xff]  }
 0x6bc   : > { %v7800_v41 = vmax.f32 %v7157_v5, %v7480_v34  ;;  %v7482_v60 = vmul.f32 0.2, %v7161_v27  ;;  %9198 = vmatprep.mubr.bf16.mxu0 %v18227_v43  ;;  %v19687_v18 = vld [vmem:[#allocation62_spill] sm:$0xff]  ;;  %v19688_v47 = vld [vmem:[#allocation16_spill] sm:$0xff]  ;;  %v19690_v58 = vld [vmem:[#allocation11_spill] sm:$0xff] }
 0x6bd   : > { %v8087_v6 = vmax.f32 %v18013_v23, %v7799_v37  ;;  %v7801_v29 = vmax.f32 %v7159_v62, %v7481_v38  ;;  %9199 = vmatmul.mubr.bf16.gmra.mrb[104].mxu0 %v18221_v57  ;;  %v11640_v54 = vld [vmem:[%s18582_s9 + $0x28c] ss:$16 sps:$4 sm:$0xff]   ;;  %v11638_v22 = vld [vmem:[%s18582_s9 + $0x288] ss:$16 sps:$4 sm:$0xff]  }
 0x6be   : > { %v8088_v42 = vmax.f32 %v18016_v33, %v7800_v41  ;;  %v7802_v50 = vmax.f32 %v7161_v27, %v7482_v60  ;;  %9244 = vmatpush1.bf16.msra.mxu0 %v11614_v48  ;;  %v11641_v15 = vld [vmem:[%s18582_s9 + $0x2a8] ss:$16 sps:$4 sm:$0xff]   ;;  %v11646_v32 = vld [vmem:[%s18582_s9 + $0x2cc] ss:$16 sps:$4 sm:$0xff]  }
 0x6bf   : > { %9665 = vst [vmem:[%s18031_s27 + $0xe0] sm:$0xff] %v8087_v6  ;;  %v8089_v49 = vmax.f32 %v18019_v56, %v7801_v29  ;;  %9245 = vmatprep.subr.bf16.mxu0 %v11619_v28  ;;  %v11625_v56 = vld [vmem:[%s18582_s9 + $0x1ec] ss:$16 sps:$4 sm:$0xff]   ;;  %v11644_v40 = vld [vmem:[%s18582_s9 + $0x2c8] ss:$16 sps:$4 sm:$0xff]  }
 0x6c0   : > { %9666 = vst [vmem:[%s18031_s27 + $0xe8] sm:$0xff] %v8088_v42  ;;  %v8090_v23 = vmax.f32 %v18023_v55, %v7802_v50  ;;  %v19684_v55 = vld [vmem:[#allocation86_spill] sm:$0xff]  ;;  %v19692_v63 = vld [vmem:[#allocation20_spill] sm:$0xff] }
 0x6c1   : > { %v18249_v35 = vpack.c.bf16 %v8089_v49, %v8087_v6  ;;  %9667 = vst [vmem:[%s18031_s27 + $0xf0] sm:$0xff] %v8089_v49  ;;  %v11649_v51 = vld [vmem:[%s18582_s9 + $0x2ec] ss:$16 sps:$4 sm:$0xff]   ;;  %v11647_v5 = vld [vmem:[%s18582_s9 + $0x2e8] ss:$16 sps:$4 sm:$0xff]  }
 0x6c2   : > { %9668 = vst [vmem:[%s18031_s27 + $0xf8] sm:$0xff] %v8090_v23  ;;  %9246 = vmatpush1.bf16.msra.mxu0 %v11617_v20  ;;  %v18253_v33 = vpack.c.bf16 %v8090_v23, %v8088_v42  ;;  %v11652_v19 = vld [vmem:[%s18582_s9 + $0x30c] ss:$16 sps:$4 sm:$0xff]   ;;  %v11650_v44 = vld [vmem:[%s18582_s9 + $0x308] ss:$16 sps:$4 sm:$0xff]   ;;  %v19696_v42 = vld [vmem:[#allocation93_spill] sm:$0xff] }
 0x6c3   : > { %9247 = vmatprep.subr.bf16.mxu0 %v11622_v25  ;;  %v11655_v62 = vld [vmem:[%s18582_s9 + $0x32c] ss:$16 sps:$4 sm:$0xff]   ;;  %v11653_v27 = vld [vmem:[%s18582_s9 + $0x328] ss:$16 sps:$4 sm:$0xff]  }
 0x6c4   : > { %9208 = vmatprep.mubr.bf16.mxu0 %v18253_v33  ;;  %v19693_v34 = vld [vmem:[#allocation92_spill] sm:$0xff]  ;;  %v19694_v28 = vld [vmem:[#allocation22_spill] sm:$0xff] }
 0x6c5   : > { %9209 = vmatmul.mubr.bf16.gmra.mrb[108].mxu0 %v18249_v35  ;;  %v11658_v48 = vld [vmem:[%s18582_s9 + $0x34c] ss:$16 sps:$4 sm:$0xff]   ;;  %v11656_v37 = vld [vmem:[%s18582_s9 + $0x348] ss:$16 sps:$4 sm:$0xff]  }
 0x6c6   : > { %9248 = vmatpush1.bf16.msra.mxu0 %v11620_v21  ;;  %9251 = vmatprep.mubr.bf16.mxu0 %v19684_v55  ;;  %v11661_v38 = vld [vmem:[%s18582_s9 + $0x36c] ss:$16 sps:$4 sm:$0xff]   ;;  %v11659_v41 = vld [vmem:[%s18582_s9 + $0x368] ss:$16 sps:$4 sm:$0xff]  }
 0x6c7   : > { %9249 = vmatprep.subr.bf16.mxu0 %v11625_v56  ;;  %v11664_v60 = vld [vmem:[%s18582_s9 + $0x38c] ss:$16 sps:$4 sm:$0xff]   ;;  %v11662_v6 = vld [vmem:[%s18582_s9 + $0x388] ss:$16 sps:$4 sm:$0xff]  }
 0x6c8   : > { %v11667_v29 = vld [vmem:[%s18582_s9 + $0x3ac] ss:$16 sps:$4 sm:$0xff]   ;;  %v11665_v50 = vld [vmem:[%s18582_s9 + $0x3a8] ss:$16 sps:$4 sm:$0xff]  }
 0x6c9   : > { %v11670_v20 = vld [vmem:[%s18582_s9 + $0x3cc] ss:$16 sps:$4 sm:$0xff]   ;;  %v11668_v49 = vld [vmem:[%s18582_s9 + $0x3c8] ss:$16 sps:$4 sm:$0xff]  }
 0x6ca   : > { %9250 = vmatpush1.bf16.msra.mxu0 %v11623_v2  ;;  %v11673_v25 = vld [vmem:[%s18582_s9 + $0x3ec] ss:$16 sps:$4 sm:$0xff]   ;;  %v11671_v21 = vld [vmem:[%s18582_s9 + $0x3e8] ss:$16 sps:$4 sm:$0xff]  }
 0x6cb   : > { %9332 = vmatprep.subr.bf16.mxu0 %v11628_v9  ;;  %v19697_v23 = vld [vmem:[#allocation60_spill] sm:$0xff] }
 0x6cd   : > { %9252 = vmatmul.mubr.bf16.vlgmr.msra.gmra.mrb[112].mxu0 %v19685_v39 }
 0x6ce   : > { %9333 = vmatpush1.bf16.msra.mxu0 %v11626_v4  ;;  %9261 = vmatprep.mubr.bf16.mxu0 %v19686_v26 }
 0x6cf   : > { %9334 = vmatprep.subr.bf16.mxu0 %v11631_v14 }
 0x6d2   : > { %9335 = vmatpush1.bf16.msra.mxu0 %v11629_v8 }
 0x6d3   : > { %9336 = vmatprep.subr.bf16.mxu0 %v11634_v11 }
 0x6d5   : > { %9262 = vmatmul.mubr.bf16.gmra.mrb[116].mxu0 %v19514_v61  ;;  %v11643_v61 = vld [vmem:[%s18582_s9 + $0x2ac] ss:$16 sps:$4 sm:$0xff]  }
 0x6d6   : > { %9337 = vmatpush1.bf16.msra.mxu0 %v11632_v1  ;;  %9271 = vmatprep.mubr.bf16.mxu0 %v19687_v18 }
 0x6d7   : > { %9338 = vmatprep.subr.bf16.mxu0 %v11637_v59 }
 0x6da   : > { %9339 = vmatpush1.bf16.msra.mxu0 %v11635_v10 }
 0x6db   : > { %9340 = vmatprep.subr.bf16.mxu0 %v11640_v54 }
 0x6dd   : > { %9272 = vmatmul.mubr.bf16.gmra.mrb[120].mxu0 %v19688_v47 }
 0x6de   : > { %9341 = vmatpush1.bf16.msra.mxu0 %v11638_v22  ;;  %9281 = vmatprep.mubr.bf16.mxu0 %v19689_v45 }
 0x6df   : > { %9342 = vmatprep.subr.bf16.mxu0 %v11643_v61 }
 0x6e2   : > { %9343 = vmatpush1.bf16.msra.mxu0 %v11641_v15 }
 0x6e3   : > { %9344 = vmatprep.subr.bf16.mxu0 %v11646_v32 }
 0x6e5   : > { %9282 = vmatmul.mubr.bf16.gmra.mrb[124].mxu0 %v19690_v58 }
 0x6e6   : > { %9345 = vmatpush1.bf16.msra.mxu0 %v11644_v40  ;;  %9291 = vmatprep.mubr.bf16.mxu0 %v19691_v46 }
 0x6e7   : > { %9346 = vmatprep.subr.bf16.mxu0 %v11649_v51 }
 0x6ea   : > { %9347 = vmatpush1.bf16.msra.mxu0 %v11647_v5 }
 0x6eb   : > { %9348 = vmatprep.subr.bf16.mxu0 %v11652_v19 }
 0x6ed   : > { %9292 = vmatmul.mubr.bf16.gmra.mrb[128].mxu0 %v19692_v63 }
 0x6ee   : > { %9349 = vmatpush1.bf16.msra.mxu0 %v11650_v44  ;;  %9301 = vmatprep.mubr.bf16.mxu0 %v19693_v34 }
 0x6ef   : > { %9350 = vmatprep.subr.bf16.mxu0 %v11655_v62 }
 0x6f2   : > { %9351 = vmatpush1.bf16.msra.mxu0 %v11653_v27 }
 0x6f3   : > { %9352 = vmatprep.subr.bf16.mxu0 %v11658_v48 }
 0x6f5   : > { %9302 = vmatmul.mubr.bf16.gmra.mrb[132].mxu0 %v19694_v28 }
 0x6f6   : > { %9353 = vmatpush1.bf16.msra.mxu0 %v11656_v37  ;;  %9311 = vmatprep.mubr.bf16.mxu0 %v16790_v3  ;;  %v19695_v3 = vld [vmem:[#allocation24_spill] sm:$0xff] }
 0x6f7   : > { %9354 = vmatprep.subr.bf16.mxu0 %v11661_v38 }
 0x6fa   : > { %9355 = vmatpush1.bf16.msra.mxu0 %v11659_v41 }
 0x6fb   : > { %9356 = vmatprep.subr.bf16.mxu0 %v11664_v60 }
 0x6fd   : > { %9312 = vmatmul.mubr.bf16.gmra.mrb[136].mxu0 %v19695_v3 }
 0x6fe   : > { %9357 = vmatpush1.bf16.msra.mxu0 %v11662_v6  ;;  %9321 = vmatprep.mubr.bf16.mxu0 %v19696_v42 }
 0x6ff   : > { %9358 = vmatprep.subr.bf16.mxu0 %v11667_v29 }
 0x702   : > { %9359 = vmatpush1.bf16.msra.mxu0 %v11665_v50 }
 0x703   : > { %9360 = vmatprep.subr.bf16.mxu0 %v11670_v20 }
 0x705   : > { %9322 = vmatmul.mubr.bf16.gmra.mrb[140].mxu0 %v19697_v23 }
 0x706   : > { %9361 = vmatpush1.bf16.msra.mxu0 %v11668_v49  ;;  %9364 = vmatprep.mubr.bf16.mxu0 %v18047_v17  ;;  %v19699_v17 = vld [vmem:[#allocation12_spill] sm:$0xff] }
 0x707   : > { %9362 = vmatprep.subr.bf16.mxu0 %v11673_v25 }
 0x70a   : > { %9363 = vmatpush1.bf16.msra.mxu0 %v11671_v21 }
 0x70d   : > { %9365 = vmatmul.mubr.bf16.vlgmr.msra.gmra.mrb[112].mxu0 %v18041_v31  ;;  %v18397_v31 = vld [vmem:[%s19698_s10] sm:$0xf] }
 0x70e   : > { %9374 = vmatprep.mubr.bf16.mxu0 %v18077_v53 }
 0x715   : > { %9375 = vmatmul.mubr.bf16.gmra.mrb[116].mxu0 %v18071_v16  ;;  %v19700_v16 = vsub.s32 0, %v19699_v17 }
 0x716   : > { %9384 = vmatprep.mubr.bf16.mxu0 %v18107_v12 }
 0x717   : > { %v18404_v53 = vrot.slane %v18397_v31, %v19700_v16 }
 0x71d   : > { %9385 = vmatmul.mubr.bf16.gmra.mrb[120].mxu0 %v18101_v13  ;;  %v19701_v13 = vsub.s32 1, %v19699_v17 }
 0x71e   : > { %9394 = vmatprep.mubr.bf16.mxu0 %v18137_v30 }
 0x71f   : > { %v18409_v12 = vrot.slane %v18397_v31, %v19701_v13 }
 0x725   : > { %9395 = vmatmul.mubr.bf16.gmra.mrb[124].mxu0 %v18131_v7 }
 0x726   : > { %9404 = vmatprep.mubr.bf16.mxu0 %v18167_v52 }
 0x72d   : > { %9405 = vmatmul.mubr.bf16.gmra.mrb[128].mxu0 %v18161_v24 }
 0x72e   : > { %9414 = vmatprep.mubr.bf16.mxu0 %v18197_v0 }
 0x735   : > { %9415 = vmatmul.mubr.bf16.gmra.mrb[132].mxu0 %v18191_v36 }
 0x736   : > { %9424 = vmatprep.mubr.bf16.mxu0 %v18227_v43 }
 0x73d   : > { %9425 = vmatmul.mubr.bf16.gmra.mrb[136].mxu0 %v18221_v57 }
 0x73e   : > { %9434 = vmatprep.mubr.bf16.mxu0 %v18253_v33 }
 0x745   : > { %9435 = vmatmul.mubr.bf16.gmra.mrb[140].mxu0 %v18249_v35 }
 0x760   : > { %v9140_v7 = vpop.f32.mrb[80].mxu0 }
 0x761   : > { %v11140_v30 = vadd.f32 %v9140_v7, %v18404_v53  ;;  %v9142_v24 = vpop.f32.mrb[81].mxu0 }
 0x762   : > { %v11141_v52 = vadd.f32 %v9142_v24, %v18409_v12  ;;  %v9144_v36 = vpop.f32.mrb[82].mxu0 }
 0x763   : > { %v9445_v0 = vmul.f32 0.01, %v11140_v30  ;;  %v11142_v57 = vadd.f32 %v9144_v36, %v18404_v53  ;;  %v9146_v43 = vpop.f32.mrb[83].mxu0 }
 0x764   : > { %v9446_v35 = vmul.f32 0.01, %v11141_v52  ;;  %v11143_v33 = vadd.f32 %v9146_v43, %v18409_v12 }
 0x765   : > { %v9509_v56 = vmax.f32 %v11140_v30, %v9445_v0  ;;  %v9449_v55 = vmul.f32 0.01, %v11142_v57 }
 0x766   : > { %v9510_v2 = vmax.f32 %v11141_v52, %v9446_v35  ;;  %v9450_v9 = vmul.f32 0.01, %v11143_v33 }
 0x767   : > { %9573 = vst [vmem:[%s18417_s20] sm:$0xff] %v9509_v56  ;;  %v9513_v4 = vmax.f32 %v11142_v57, %v9449_v55 }
 0x768   : > { %9574 = vst [vmem:[%s18417_s20 + $0x8] sm:$0xff] %v9510_v2  ;;  %v9514_v14 = vmax.f32 %v11143_v33, %v9450_v9  ;;  %v9150_v39 = vpop.f32.mrb[84].mxu0 }
 0x769   : > { %9577 = vst [vmem:[%s18417_s20 + $0x20] sm:$0xff] %v9513_v4  ;;  %v11144_v26 = vadd.f32 %v9150_v39, %v18404_v53  ;;  %v9152_v8 = vpop.f32.mrb[85].mxu0 }
 0x76a   : > { %9578 = vst [vmem:[%s18417_s20 + $0x28] sm:$0xff] %v9514_v14  ;;  %v11145_v11 = vadd.f32 %v9152_v8, %v18409_v12  ;;  %v9154_v1 = vpop.f32.mrb[86].mxu0 }
 0x76b   : > { %v9453_v59 = vmul.f32 0.01, %v11144_v26  ;;  %v11146_v18 = vadd.f32 %v9154_v1, %v18404_v53  ;;  %v9156_v10 = vpop.f32.mrb[87].mxu0 }
 0x76c   : > { %v9454_v54 = vmul.f32 0.01, %v11145_v11  ;;  %v11147_v22 = vadd.f32 %v9156_v10, %v18409_v12 }
 0x76d   : > { %v9517_v61 = vmax.f32 %v11144_v26, %v9453_v59  ;;  %v9457_v47 = vmul.f32 0.01, %v11146_v18 }
 0x76e   : > { %v9518_v45 = vmax.f32 %v11145_v11, %v9454_v54  ;;  %v9458_v15 = vmul.f32 0.01, %v11147_v22 }
 0x76f   : > { %9581 = vst [vmem:[%s18417_s20 + $0x40] sm:$0xff] %v9517_v61  ;;  %v9521_v32 = vmax.f32 %v11146_v18, %v9457_v47 }
 0x770   : > { %9582 = vst [vmem:[%s18417_s20 + $0x48] sm:$0xff] %v9518_v45  ;;  %v9522_v40 = vmax.f32 %v11147_v22, %v9458_v15  ;;  %v9160_v51 = vpop.f32.mrb[88].mxu0 }
 0x771   : > { %9585 = vst [vmem:[%s18417_s20 + $0x60] sm:$0xff] %v9521_v32  ;;  %v11148_v58 = vadd.f32 %v9160_v51, %v18404_v53  ;;  %v9162_v46 = vpop.f32.mrb[89].mxu0 }
 0x772   : > { %9586 = vst [vmem:[%s18417_s20 + $0x68] sm:$0xff] %v9522_v40  ;;  %v11149_v5 = vadd.f32 %v9162_v46, %v18409_v12  ;;  %v9164_v19 = vpop.f32.mrb[90].mxu0 }
 0x773   : > { %v9461_v44 = vmul.f32 0.01, %v11148_v58  ;;  %v11150_v62 = vadd.f32 %v9164_v19, %v18404_v53  ;;  %v9166_v63 = vpop.f32.mrb[91].mxu0 }
 0x774   : > { %v9462_v34 = vmul.f32 0.01, %v11149_v5  ;;  %v11151_v27 = vadd.f32 %v9166_v63, %v18409_v12 }
 0x775   : > { %v9525_v48 = vmax.f32 %v11148_v58, %v9461_v44  ;;  %v9465_v37 = vmul.f32 0.01, %v11150_v62 }
 0x776   : > { %v9526_v38 = vmax.f32 %v11149_v5, %v9462_v34  ;;  %v9466_v28 = vmul.f32 0.01, %v11151_v27 }
 0x777   : > { %9589 = vst [vmem:[%s18417_s20 + $0x80] sm:$0xff] %v9525_v48  ;;  %v9529_v41 = vmax.f32 %v11150_v62, %v9465_v37 }
 0x778   : > { %9590 = vst [vmem:[%s18417_s20 + $0x88] sm:$0xff] %v9526_v38  ;;  %v9530_v60 = vmax.f32 %v11151_v27, %v9466_v28  ;;  %v9170_v6 = vpop.f32.mrb[92].mxu0 }
 0x779   : > { %9593 = vst [vmem:[%s18417_s20 + $0xa0] sm:$0xff] %v9529_v41  ;;  %v11152_v29 = vadd.f32 %v9170_v6, %v18404_v53  ;;  %v9172_v3 = vpop.f32.mrb[93].mxu0 }
 0x77a   : > { %9594 = vst [vmem:[%s18417_s20 + $0xa8] sm:$0xff] %v9530_v60  ;;  %v11153_v42 = vadd.f32 %v9172_v3, %v18409_v12  ;;  %v9174_v50 = vpop.f32.mrb[94].mxu0 }
 0x77b   : > { %v9469_v20 = vmul.f32 0.01, %v11152_v29  ;;  %v11154_v49 = vadd.f32 %v9174_v50, %v18404_v53  ;;  %v9176_v25 = vpop.f32.mrb[95].mxu0 }
 0x77c   : > { %v9470_v23 = vmul.f32 0.01, %v11153_v42  ;;  %v11155_v21 = vadd.f32 %v9176_v25, %v18409_v12 }
 0x77d   : > { %v9533_v16 = vmax.f32 %v11152_v29, %v9469_v20  ;;  %v9473_v13 = vmul.f32 0.01, %v11154_v49 }
 0x77e   : > { %v9534_v7 = vmax.f32 %v11153_v42, %v9470_v23  ;;  %v9474_v30 = vmul.f32 0.01, %v11155_v21 }
 0x77f   : > { %9597 = vst [vmem:[%s18417_s20 + $0xc0] sm:$0xff] %v9533_v16  ;;  %v9537_v24 = vmax.f32 %v11154_v49, %v9473_v13 }
 0x780   : > { %9598 = vst [vmem:[%s18417_s20 + $0xc8] sm:$0xff] %v9534_v7  ;;  %v9538_v52 = vmax.f32 %v11155_v21, %v9474_v30  ;;  %v9180_v36 = vpop.f32.mrb[96].mxu0 }
 0x781   : > { %9601 = vst [vmem:[%s18417_s20 + $0xe0] sm:$0xff] %v9537_v24  ;;  %v11156_v0 = vadd.f32 %v9180_v36, %v18404_v53  ;;  %v9182_v57 = vpop.f32.mrb[97].mxu0 }
 0x782   : > { %9602 = vst [vmem:[%s18417_s20 + $0xe8] sm:$0xff] %v9538_v52  ;;  %v11157_v43 = vadd.f32 %v9182_v57, %v18409_v12  ;;  %v9184_v35 = vpop.f32.mrb[98].mxu0 }
 0x783   : > { %v9477_v33 = vmul.f32 0.01, %v11156_v0  ;;  %v11158_v56 = vadd.f32 %v9184_v35, %v18404_v53  ;;  %v9186_v55 = vpop.f32.mrb[99].mxu0  ;;  %v8343_v35 = vsub.s32 2, %v19699_v17 }
 0x784   : > { %v9478_v2 = vmul.f32 0.01, %v11157_v43  ;;  %v11159_v9 = vadd.f32 %v9186_v55, %v18409_v12 }
 0x785   : > { %v9541_v4 = vmax.f32 %v11156_v0, %v9477_v33  ;;  %v9481_v14 = vmul.f32 0.01, %v11158_v56  ;;  %v8347_v33 = vsub.s32 3, %v19699_v17 }
 0x786   : > { %v9542_v39 = vmax.f32 %v11157_v43, %v9478_v2  ;;  %v9482_v26 = vmul.f32 0.01, %v11159_v9 }
 0x787   : > { %9605 = vst [vmem:[%s18417_s20 + $0x100] sm:$0xff] %v9541_v4  ;;  %v9545_v8 = vmax.f32 %v11158_v56, %v9481_v14 }
 0x788   : > { %9606 = vst [vmem:[%s18417_s20 + $0x108] sm:$0xff] %v9542_v39  ;;  %v9546_v11 = vmax.f32 %v11159_v9, %v9482_v26  ;;  %v9190_v1 = vpop.f32.mrb[100].mxu0 }
 0x789   : > { %9609 = vst [vmem:[%s18417_s20 + $0x120] sm:$0xff] %v9545_v8  ;;  %v11160_v59 = vadd.f32 %v9190_v1, %v18404_v53  ;;  %v9192_v18 = vpop.f32.mrb[101].mxu0 }
 0x78a   : > { %9610 = vst [vmem:[%s18417_s20 + $0x128] sm:$0xff] %v9546_v11  ;;  %v11161_v10 = vadd.f32 %v9192_v18, %v18409_v12  ;;  %v9194_v54 = vpop.f32.mrb[102].mxu0 }
 0x78b   : > { %v9485_v22 = vmul.f32 0.01, %v11160_v59  ;;  %v11162_v61 = vadd.f32 %v9194_v54, %v18404_v53  ;;  %v9196_v47 = vpop.f32.mrb[103].mxu0 }
 0x78c   : > { %v9486_v45 = vmul.f32 0.01, %v11161_v10  ;;  %v11163_v15 = vadd.f32 %v9196_v47, %v18409_v12 }
 0x78d   : > { %v9549_v32 = vmax.f32 %v11160_v59, %v9485_v22  ;;  %v9489_v40 = vmul.f32 0.01, %v11162_v61 }
 0x78e   : > { %v9550_v51 = vmax.f32 %v11161_v10, %v9486_v45  ;;  %v9490_v58 = vmul.f32 0.01, %v11163_v15 }
 0x78f   : > { %9613 = vst [vmem:[%s18417_s20 + $0x140] sm:$0xff] %v9549_v32  ;;  %v9553_v46 = vmax.f32 %v11162_v61, %v9489_v40 }
 0x790   : > { %9614 = vst [vmem:[%s18417_s20 + $0x148] sm:$0xff] %v9550_v51  ;;  %v9554_v5 = vmax.f32 %v11163_v15, %v9490_v58  ;;  %v9200_v19 = vpop.f32.mrb[104].mxu0 }
 0x791   : > { %9617 = vst [vmem:[%s18417_s20 + $0x160] sm:$0xff] %v9553_v46  ;;  %v11164_v44 = vadd.f32 %v9200_v19, %v18404_v53  ;;  %v9202_v62 = vpop.f32.mrb[105].mxu0 }
 0x792   : > { %9618 = vst [vmem:[%s18417_s20 + $0x168] sm:$0xff] %v9554_v5  ;;  %v11165_v63 = vadd.f32 %v9202_v62, %v18409_v12  ;;  %v9204_v34 = vpop.f32.mrb[106].mxu0 }
 0x793   : > { %v9493_v27 = vmul.f32 0.01, %v11164_v44  ;;  %v11166_v48 = vadd.f32 %v9204_v34, %v18404_v53  ;;  %v9206_v37 = vpop.f32.mrb[107].mxu0 }
 0x794   : > { %v9494_v38 = vmul.f32 0.01, %v11165_v63  ;;  %v11167_v28 = vadd.f32 %v9206_v37, %v18409_v12 }
 0x795   : > { %v9557_v41 = vmax.f32 %v11164_v44, %v9493_v27  ;;  %v9497_v60 = vmul.f32 0.01, %v11166_v48 }
 0x796   : > { %v9558_v6 = vmax.f32 %v11165_v63, %v9494_v38  ;;  %v9498_v29 = vmul.f32 0.01, %v11167_v28 }
 0x797   : > { %9621 = vst [vmem:[%s18417_s20 + $0x180] sm:$0xff] %v9557_v41  ;;  %v9561_v3 = vmax.f32 %v11166_v48, %v9497_v60 }
 0x798   : > { %9622 = vst [vmem:[%s18417_s20 + $0x188] sm:$0xff] %v9558_v6  ;;  %v9562_v42 = vmax.f32 %v11167_v28, %v9498_v29  ;;  %v9210_v50 = vpop.f32.mrb[108].mxu0 }
 0x799   : > { %9625 = vst [vmem:[%s18417_s20 + $0x1a0] sm:$0xff] %v9561_v3  ;;  %v11168_v20 = vadd.f32 %v9210_v50, %v18404_v53  ;;  %v9212_v49 = vpop.f32.mrb[109].mxu0 }
 0x79a   : > { %9626 = vst [vmem:[%s18417_s20 + $0x1a8] sm:$0xff] %v9562_v42  ;;  %v11169_v25 = vadd.f32 %v9212_v49, %v18409_v12  ;;  %v9214_v23 = vpop.f32.mrb[110].mxu0 }
 0x79b   : > { %v9501_v21 = vmul.f32 0.01, %v11168_v20  ;;  %v11170_v16 = vadd.f32 %v9214_v23, %v18404_v53  ;;  %v9216_v13 = vpop.f32.mrb[111].mxu0  ;;  %v18483_v53 = vrot.slane %v18397_v31, %v8343_v35 }
 0x79c   : > { %v9502_v7 = vmul.f32 0.01, %v11169_v25  ;;  %v11171_v30 = vadd.f32 %v9216_v13, %v18409_v12  ;;  %v18486_v12 = vrot.slane %v18397_v31, %v8347_v33 }
 0x79d   : > { %v9565_v24 = vmax.f32 %v11168_v20, %v9501_v21  ;;  %v9505_v52 = vmul.f32 0.01, %v11170_v16 }
 0x79e   : > { %v9566_v36 = vmax.f32 %v11169_v25, %v9502_v7  ;;  %v9506_v0 = vmul.f32 0.01, %v11171_v30 }
 0x79f   : > { %9629 = vst [vmem:[%s18417_s20 + $0x1c0] sm:$0xff] %v9565_v24  ;;  %v9569_v57 = vmax.f32 %v11170_v16, %v9505_v52 }
 0x7a0   : > { %9630 = vst [vmem:[%s18417_s20 + $0x1c8] sm:$0xff] %v9566_v36  ;;  %v9570_v43 = vmax.f32 %v11171_v30, %v9506_v0 }
 0x7a1   : > { %9633 = vst [vmem:[%s18417_s20 + $0x1e0] sm:$0xff] %v9569_v57 }
 0x7a2   : > { %9634 = vst [vmem:[%s18417_s20 + $0x1e8] sm:$0xff] %v9570_v43 }
 0x7e0   : > { %v9366_v56 = vpop.f32.mrb[112].mxu0 }
 0x7e1   : > { %v11172_v55 = vadd.f32 %v9366_v56, %v18483_v53  ;;  %v9368_v2 = vpop.f32.mrb[113].mxu0 }
 0x7e2   : > { %v11173_v9 = vadd.f32 %v9368_v2, %v18486_v12  ;;  %v9370_v4 = vpop.f32.mrb[114].mxu0 }
 0x7e3   : > { %v9447_v14 = vmul.f32 0.01, %v11172_v55  ;;  %v11174_v39 = vadd.f32 %v9370_v4, %v18483_v53  ;;  %v9372_v17 = vpop.f32.mrb[115].mxu0 }
 0x7e4   : > { %v9448_v26 = vmul.f32 0.01, %v11173_v9  ;;  %v11175_v8 = vadd.f32 %v9372_v17, %v18486_v12 }
 0x7e5   : > { %v9511_v11 = vmax.f32 %v11172_v55, %v9447_v14  ;;  %v9451_v31 = vmul.f32 0.01, %v11174_v39 }
 0x7e6   : > { %v9512_v1 = vmax.f32 %v11173_v9, %v9448_v26  ;;  %v9452_v59 = vmul.f32 0.01, %v11175_v8 }
 0x7e7   : > { %9575 = vst [vmem:[%s18417_s20 + $0x10] sm:$0xff] %v9511_v11  ;;  %v9515_v18 = vmax.f32 %v11174_v39, %v9451_v31 }
 0x7e8   : > { %9576 = vst [vmem:[%s18417_s20 + $0x18] sm:$0xff] %v9512_v1  ;;  %v9516_v10 = vmax.f32 %v11175_v8, %v9452_v59  ;;  %v9376_v54 = vpop.f32.mrb[116].mxu0 }
 0x7e9   : > { %9579 = vst [vmem:[%s18417_s20 + $0x30] sm:$0xff] %v9515_v18  ;;  %v11176_v22 = vadd.f32 %v9376_v54, %v18483_v53  ;;  %v9378_v61 = vpop.f32.mrb[117].mxu0 }
 0x7ea   : > { %9580 = vst [vmem:[%s18417_s20 + $0x38] sm:$0xff] %v9516_v10  ;;  %v11177_v47 = vadd.f32 %v9378_v61, %v18486_v12  ;;  %v9380_v45 = vpop.f32.mrb[118].mxu0 }
 0x7eb   : > { %v9455_v15 = vmul.f32 0.01, %v11176_v22  ;;  %v11178_v32 = vadd.f32 %v9380_v45, %v18483_v53  ;;  %v9382_v40 = vpop.f32.mrb[119].mxu0 }
 0x7ec   : > { %v9456_v51 = vmul.f32 0.01, %v11177_v47  ;;  %v11179_v58 = vadd.f32 %v9382_v40, %v18486_v12 }
 0x7ed   : > { %v9519_v46 = vmax.f32 %v11176_v22, %v9455_v15  ;;  %v9459_v5 = vmul.f32 0.01, %v11178_v32 }
 0x7ee   : > { %v9520_v19 = vmax.f32 %v11177_v47, %v9456_v51  ;;  %v9460_v44 = vmul.f32 0.01, %v11179_v58 }
 0x7ef   : > { %9583 = vst [vmem:[%s18417_s20 + $0x50] sm:$0xff] %v9519_v46  ;;  %v9523_v62 = vmax.f32 %v11178_v32, %v9459_v5 }
 0x7f0   : > { %9584 = vst [vmem:[%s18417_s20 + $0x58] sm:$0xff] %v9520_v19  ;;  %v9524_v63 = vmax.f32 %v11179_v58, %v9460_v44  ;;  %v9386_v34 = vpop.f32.mrb[120].mxu0 }
 0x7f1   : > { %9587 = vst [vmem:[%s18417_s20 + $0x70] sm:$0xff] %v9523_v62  ;;  %v11180_v27 = vadd.f32 %v9386_v34, %v18483_v53  ;;  %v9388_v48 = vpop.f32.mrb[121].mxu0 }
 0x7f2   : > { %9588 = vst [vmem:[%s18417_s20 + $0x78] sm:$0xff] %v9524_v63  ;;  %v11181_v37 = vadd.f32 %v9388_v48, %v18486_v12  ;;  %v9390_v38 = vpop.f32.mrb[122].mxu0 }
 0x7f3   : > { %v9463_v28 = vmul.f32 0.01, %v11180_v27  ;;  %v11182_v41 = vadd.f32 %v9390_v38, %v18483_v53  ;;  %v9392_v60 = vpop.f32.mrb[123].mxu0 }
 0x7f4   : > { %v9464_v6 = vmul.f32 0.01, %v11181_v37  ;;  %v11183_v29 = vadd.f32 %v9392_v60, %v18486_v12 }
 0x7f5   : > { %v9527_v3 = vmax.f32 %v11180_v27, %v9463_v28  ;;  %v9467_v42 = vmul.f32 0.01, %v11182_v41 }
 0x7f6   : > { %v9528_v50 = vmax.f32 %v11181_v37, %v9464_v6  ;;  %v9468_v20 = vmul.f32 0.01, %v11183_v29 }
 0x7f7   : > { %9591 = vst [vmem:[%s18417_s20 + $0x90] sm:$0xff] %v9527_v3  ;;  %v9531_v49 = vmax.f32 %v11182_v41, %v9467_v42 }
 0x7f8   : > { %9592 = vst [vmem:[%s18417_s20 + $0x98] sm:$0xff] %v9528_v50  ;;  %v9532_v25 = vmax.f32 %v11183_v29, %v9468_v20  ;;  %v9396_v23 = vpop.f32.mrb[124].mxu0 }
 0x7f9   : > { %9595 = vst [vmem:[%s18417_s20 + $0xb0] sm:$0xff] %v9531_v49  ;;  %v11184_v21 = vadd.f32 %v9396_v23, %v18483_v53  ;;  %v9398_v16 = vpop.f32.mrb[125].mxu0 }
 0x7fa   : > { %9596 = vst [vmem:[%s18417_s20 + $0xb8] sm:$0xff] %v9532_v25  ;;  %v11185_v13 = vadd.f32 %v9398_v16, %v18486_v12  ;;  %v9400_v7 = vpop.f32.mrb[126].mxu0 }
 0x7fb   : > { %v9471_v30 = vmul.f32 0.01, %v11184_v21  ;;  %v11186_v24 = vadd.f32 %v9400_v7, %v18483_v53  ;;  %v9402_v52 = vpop.f32.mrb[127].mxu0 }
 0x7fc   : > { %v9472_v36 = vmul.f32 0.01, %v11185_v13  ;;  %v11187_v0 = vadd.f32 %v9402_v52, %v18486_v12 }
 0x7fd   : > { %v9535_v57 = vmax.f32 %v11184_v21, %v9471_v30  ;;  %v9475_v43 = vmul.f32 0.01, %v11186_v24 }
 0x7fe   : > { %v9536_v35 = vmax.f32 %v11185_v13, %v9472_v36  ;;  %v9476_v33 = vmul.f32 0.01, %v11187_v0 }
 0x7ff   : > { %9599 = vst [vmem:[%s18417_s20 + $0xd0] sm:$0xff] %v9535_v57  ;;  %v9539_v56 = vmax.f32 %v11186_v24, %v9475_v43 }
 0x800   : > { %9600 = vst [vmem:[%s18417_s20 + $0xd8] sm:$0xff] %v9536_v35  ;;  %v9540_v55 = vmax.f32 %v11187_v0, %v9476_v33  ;;  %v9406_v2 = vpop.f32.mrb[128].mxu0 }
 0x801   : > { %9603 = vst [vmem:[%s18417_s20 + $0xf0] sm:$0xff] %v9539_v56  ;;  %v11188_v9 = vadd.f32 %v9406_v2, %v18483_v53  ;;  %v9408_v4 = vpop.f32.mrb[129].mxu0 }
 0x802   : > { %9604 = vst [vmem:[%s18417_s20 + $0xf8] sm:$0xff] %v9540_v55  ;;  %v11189_v14 = vadd.f32 %v9408_v4, %v18486_v12  ;;  %v9410_v39 = vpop.f32.mrb[130].mxu0 }
 0x803   : > { %v9479_v17 = vmul.f32 0.01, %v11188_v9  ;;  %v11190_v26 = vadd.f32 %v9410_v39, %v18483_v53  ;;  %v9412_v8 = vpop.f32.mrb[131].mxu0 }
 0x804   : > { %v9480_v11 = vmul.f32 0.01, %v11189_v14  ;;  %v11191_v31 = vadd.f32 %v9412_v8, %v18486_v12 }
 0x805   : > { %v9543_v1 = vmax.f32 %v11188_v9, %v9479_v17  ;;  %v9483_v59 = vmul.f32 0.01, %v11190_v26 }
 0x806   : > { %v9544_v18 = vmax.f32 %v11189_v14, %v9480_v11  ;;  %v9484_v10 = vmul.f32 0.01, %v11191_v31 }
 0x807   : > { %9607 = vst [vmem:[%s18417_s20 + $0x110] sm:$0xff] %v9543_v1  ;;  %v9547_v54 = vmax.f32 %v11190_v26, %v9483_v59 }
 0x808   : > { %9608 = vst [vmem:[%s18417_s20 + $0x118] sm:$0xff] %v9544_v18  ;;  %v9548_v22 = vmax.f32 %v11191_v31, %v9484_v10  ;;  %v9416_v61 = vpop.f32.mrb[132].mxu0 }
 0x809   : > { %9611 = vst [vmem:[%s18417_s20 + $0x130] sm:$0xff] %v9547_v54  ;;  %v11192_v47 = vadd.f32 %v9416_v61, %v18483_v53  ;;  %v9418_v45 = vpop.f32.mrb[133].mxu0 }
 0x80a   : > { %9612 = vst [vmem:[%s18417_s20 + $0x138] sm:$0xff] %v9548_v22  ;;  %v11193_v15 = vadd.f32 %v9418_v45, %v18486_v12  ;;  %v9420_v32 = vpop.f32.mrb[134].mxu0 }
 0x80b   : > { %v9487_v40 = vmul.f32 0.01, %v11192_v47  ;;  %v11194_v51 = vadd.f32 %v9420_v32, %v18483_v53  ;;  %v9422_v58 = vpop.f32.mrb[135].mxu0 }
 0x80c   : > { %v9488_v46 = vmul.f32 0.01, %v11193_v15  ;;  %v11195_v5 = vadd.f32 %v9422_v58, %v18486_v12 }
 0x80d   : > { %v9551_v19 = vmax.f32 %v11192_v47, %v9487_v40  ;;  %v9491_v44 = vmul.f32 0.01, %v11194_v51 }
 0x80e   : > { %v9552_v62 = vmax.f32 %v11193_v15, %v9488_v46  ;;  %v9492_v63 = vmul.f32 0.01, %v11195_v5 }
 0x80f   : > { %9615 = vst [vmem:[%s18417_s20 + $0x150] sm:$0xff] %v9551_v19  ;;  %v9555_v34 = vmax.f32 %v11194_v51, %v9491_v44 }
 0x810   : > { %9616 = vst [vmem:[%s18417_s20 + $0x158] sm:$0xff] %v9552_v62  ;;  %v9556_v27 = vmax.f32 %v11195_v5, %v9492_v63  ;;  %v9426_v48 = vpop.f32.mrb[136].mxu0 }
 0x811   : > { %9619 = vst [vmem:[%s18417_s20 + $0x170] sm:$0xff] %v9555_v34  ;;  %v11196_v37 = vadd.f32 %v9426_v48, %v18483_v53  ;;  %v9428_v38 = vpop.f32.mrb[137].mxu0 }
 0x812   : > { %9620 = vst [vmem:[%s18417_s20 + $0x178] sm:$0xff] %v9556_v27  ;;  %v11197_v28 = vadd.f32 %v9428_v38, %v18486_v12  ;;  %v9430_v41 = vpop.f32.mrb[138].mxu0 }
 0x813   : > { %v9495_v60 = vmul.f32 0.01, %v11196_v37  ;;  %v11198_v6 = vadd.f32 %v9430_v41, %v18483_v53  ;;  %v9432_v29 = vpop.f32.mrb[139].mxu0 }
 0x814   : > { %v9496_v3 = vmul.f32 0.01, %v11197_v28  ;;  %v11199_v42 = vadd.f32 %v9432_v29, %v18486_v12 }
 0x815   : > { %v9559_v50 = vmax.f32 %v11196_v37, %v9495_v60  ;;  %v9499_v20 = vmul.f32 0.01, %v11198_v6 }
 0x816   : > { %v9560_v49 = vmax.f32 %v11197_v28, %v9496_v3  ;;  %v9500_v25 = vmul.f32 0.01, %v11199_v42 }
 0x817   : > { %9623 = vst [vmem:[%s18417_s20 + $0x190] sm:$0xff] %v9559_v50  ;;  %v9563_v23 = vmax.f32 %v11198_v6, %v9499_v20 }
 0x818   : > { %9624 = vst [vmem:[%s18417_s20 + $0x198] sm:$0xff] %v9560_v49  ;;  %v9564_v21 = vmax.f32 %v11199_v42, %v9500_v25  ;;  %v9436_v16 = vpop.f32.mrb[140].mxu0 }
 0x819   : > { %9627 = vst [vmem:[%s18417_s20 + $0x1b0] sm:$0xff] %v9563_v23  ;;  %v11200_v13 = vadd.f32 %v9436_v16, %v18483_v53  ;;  %v9438_v7 = vpop.f32.mrb[141].mxu0 }
 0x81a   : > { %9628 = vst [vmem:[%s18417_s20 + $0x1b8] sm:$0xff] %v9564_v21  ;;  %v11201_v30 = vadd.f32 %v9438_v7, %v18486_v12  ;;  %v9440_v24 = vpop.f32.mrb[142].mxu0 }
 0x81b   : > { %v9503_v52 = vmul.f32 0.01, %v11200_v13  ;;  %v11202_v36 = vadd.f32 %v9440_v24, %v18483_v53  ;;  %v9442_v0 = vpop.f32.mrb[143].mxu0 }
 0x81c   : > { %v9504_v57 = vmul.f32 0.01, %v11201_v30  ;;  %v11203_v43 = vadd.f32 %v9442_v0, %v18486_v12 }
 0x81d   : > { %v9567_v35 = vmax.f32 %v11200_v13, %v9503_v52  ;;  %v9507_v33 = vmul.f32 0.01, %v11202_v36 }
 0x81e   : > { %v9568_v56 = vmax.f32 %v11201_v30, %v9504_v57  ;;  %v9508_v55 = vmul.f32 0.01, %v11203_v43 }
 0x81f   : > { %9631 = vst [vmem:[%s18417_s20 + $0x1d0] sm:$0xff] %v9567_v35  ;;  %v9571_v2 = vmax.f32 %v11202_v36, %v9507_v33 }
 0x820   : > { %9632 = vst [vmem:[%s18417_s20 + $0x1d8] sm:$0xff] %v9568_v56  ;;  %v9572_v9 = vmax.f32 %v11203_v43, %v9508_v55 }
 0x821   : > { %9635 = vst [vmem:[%s18417_s20 + $0x1f0] sm:$0xff] %v9571_v2 }
 0x822   : > { %9636 = vst [vmem:[%s18417_s20 + $0x1f8] sm:$0xff] %v9572_v9 }
 0x823 PF: > { %s24_s14 = sadd.s32 1, %s11734_s14   ;;  %s19703_s22 = sld [smem:[#allocation3_spill]] }
 0x824   : > { %p21_p12 = scmp.ge.s32.totalorder %s24_s14, 6   ;;  %s19704_s24 = sld [smem:[#allocation4_spill]] }
 0x825   : > { %s19705_s25 = smov %s11714_s26  ;;  %s19706_s26 = smov %s11859_s21 }
 0x826   : > { %s19707_s27 = smov %s11726_s29  ;;  %s19708_s28 = smov %s11730_s30 }
 0x827   :  { %23 = sbr.rel (!%p21_p12) target bundleno = 8 (0x8), region = 164 }
 0x829   : > { %s19709_s29 = smov %s19703_s22 }
 0x82a   : > { %s19710_s30 = smov %s19704_s24 }

</bundles_post_ra>
